<compile_context>
chip_gen: v7x
topology: tpu7x:2x2x1
jax: 0.10.0
libtpu: 0.0.40
codegen_flags: <defaults>
</compile_context>

<pallas_src>
import functools

import jax
import jax.numpy as jnp
from jax.experimental import pallas as pl
from jax.experimental.pallas import tpu as pltpu

SLOPE = 0.2
SMALL_SLOPE = 0.02
BN_EPS = 1e-5

# fixed architecture constants from the module
PRICE_DIM = 3
PRICE_HIDDEN = 128
PRICE_EMBED_DIM = 32
OTHER_DIM = 5          # missing (3) + season (2)
IMG_DIM = 2048
REDUCED_IMG_DIM = 128
RES_HIDDEN = 3200


def _round_up(n, m):
    return ((n + m - 1) // m) * m


def _chip_tuning():
    """(max batch-tile rows, scoped VMEM limit bytes) per TPU generation."""
    try:
        cap = int(pltpu.get_tpu_info().vmem_capacity_bytes)
    except Exception:
        cap = 128 * 1024 * 1024
    if cap <= 64 * 1024 * 1024:          # v7x-class: 64 MiB physical VMEM per core
        return 256, 32 * 1024 * 1024
    return 512, 96 * 1024 * 1024         # v5e / v6e: 128 MiB physical VMEM


def _leaky(x, slope):
    return jnp.where(x >= 0, x, slope * x)


def _layout(embed_dim, b_dim, m_dim, s_dim, d_dim):
    """Lane-aligned latent layout (a permutation of the PyTorch latent order).

    lanes [0,32)                 : BN1(price branch)
    lanes [32,32+E)              : embedded text
    lanes [.., +3), [.., +2)     : missing, season
    lane  bias_lane              : constant 1  (folds rb1 / pb1 / head biases)
    lanes rawp_off..+3           : raw price inputs (ride along; zero weights)
    lanes [pe_pad, pe_pad+128)   : img branch
    """
    lat_real = embed_dim + PRICE_EMBED_DIM + OTHER_DIM + REDUCED_IMG_DIM
    emb_off = PRICE_EMBED_DIM
    miss_off = emb_off + embed_dim
    season_off = miss_off + 3
    bias_lane = season_off + 2
    rawp_off = bias_lane + 1
    pe_pad = _round_up(rawp_off + PRICE_DIM, 128)
    lat_pad = pe_pad + REDUCED_IMG_DIM
    hid2_pad = _round_up(2 * lat_real, 128)
    heads = (b_dim, m_dim, s_dim, d_dim)
    head_pad = _round_up(sum(heads), 128)
    return dict(lat_real=lat_real, embed_dim=embed_dim, emb_off=emb_off,
                miss_off=miss_off, season_off=season_off, bias_lane=bias_lane,
                rawp_off=rawp_off, pe_pad=pe_pad, lat_pad=lat_pad, img_off=pe_pad,
                hid2_pad=hid2_pad, heads=heads, head_pad=head_pad)


# --------------------------------------------------------------------------- kernels

def _tile_stats(x, batch, tb):
    """Per-tile masked (sum, sum_sq) of x over valid rows, packed as an (8, W) block."""
    row = pl.program_id(0) * tb + jax.lax.broadcasted_iota(jnp.int32, (tb, 1), 0)
    valid = (row < batch).astype(x.dtype)
    xm = x * valid
    s = jnp.sum(xm, axis=0, keepdims=True)
    sq = jnp.sum(xm * x, axis=0, keepdims=True)
    sub = jax.lax.broadcasted_iota(jnp.int32, (8, 1), 0)
    return jnp.where(sub == 0, s, jnp.where(sub == 1, sq, 0.0))


def _make_kernel_a(batch, tb):
    """Price branch up to pre-BN + img branch + partial BN1 statistics."""
    f32, bf16 = jnp.float32, jnp.bfloat16

    def kernel(pe_ref, img_ref, pw1_ref, pw2_ref, iw_ref, vec_ref,
               h2_ref, imgact_ref, stats_ref):
        # Linear(3,128)+pb1 folded into a lane-dense (pe_pad,128) matmul
        # (raw price + constant-1 lane live inside the pe block).
        h1 = _leaky(jnp.dot(pe_ref[...].astype(bf16), pw1_ref[...],
                            preferred_element_type=f32), SLOPE)
        h2 = _leaky(jnp.dot(h1.astype(bf16), pw2_ref[...],
                            preferred_element_type=f32) + vec_ref[0:1, :], SLOPE)
        h2_ref[...] = h2
        # img branch: Linear(2048,128) -> LeakyReLU
        imgact_ref[...] = _leaky(
            jnp.dot(img_ref[...], iw_ref[...], preferred_element_type=f32)
            + vec_ref[1:2, :], SLOPE)
        # per-tile BN1 partial stats (keeps the row grid "parallel")
        stats_ref[0] = _tile_stats(h2, batch, tb)

    return kernel


def _make_kernel_b(batch, tb, pe_pad, lat_pad, hid2_pad):
    """BN1 affine + lane-aligned latent + residual MLP (pre-BN2) + partial BN2 stats."""
    f32, bf16 = jnp.float32, jnp.bfloat16

    def kernel(h2_ref, imgact_ref, pe_ref, bn1_ref,
               rw1_ref, rw2_ref, rw3_ref, vec_ref,
               lat_ref, r3_ref, stats_ref):
        # BN1 folded to a per-lane affine (scale/shift computed in the wrapper).
        price = h2_ref[...] * bn1_ref[0:1, :] + bn1_ref[1:2, :]
        pe = pe_ref[...]
        if pe_pad == 128:
            block1 = price + pe              # disjoint lanes; a single VPU add
        else:
            block1 = jnp.concatenate([price + pe[:, :128], pe[:, 128:]], axis=1)
        latent = jnp.concatenate([block1, imgact_ref[...]], axis=1)   # 128-aligned
        lat_ref[...] = latent

        # residual MLP (rb1 folded into rw1 via the constant-1 latent lane);
        # r1/r2 cast to bf16 right after LeakyReLU (they only feed bf16 matmuls).
        r = _leaky(jnp.dot(latent.astype(bf16), rw1_ref[...],
                           preferred_element_type=f32), SLOPE).astype(bf16)
        r = _leaky(jnp.dot(r, rw2_ref[...], preferred_element_type=f32)
                   + vec_ref[0:1, :hid2_pad], SLOPE).astype(bf16)
        r3 = _leaky(jnp.dot(r, rw3_ref[...], preferred_element_type=f32)
                    + vec_ref[1:2, :lat_pad], SMALL_SLOPE)
        r3_ref[...] = r3
        stats_ref[0] = _tile_stats(r3, batch, tb)

    return kernel


def _make_kernel_c(head_slices, head_pad):
    """Skip connection + fused head matmul + masked per-head log-softmax."""
    f32, bf16 = jnp.float32, jnp.bfloat16
    NEG = -1e30

    def kernel(lat_ref, r3_ref, bn2_ref, hw_ref, out_ref):
        lat2 = lat_ref[...] + r3_ref[...] * bn2_ref[0:1, :] + bn2_ref[1:2, :]
        logits = jnp.dot(lat2.astype(bf16), hw_ref[...],
                         preferred_element_type=f32)     # head biases folded in hw
        lane = jax.lax.broadcasted_iota(jnp.int32, (1, head_pad), 1)
        out = jnp.zeros_like(logits)
        for off, hd in head_slices:                      # static lane-mask segments
            m = (lane >= off) & (lane < off + hd)
            mx = jnp.max(jnp.where(m, logits, NEG), axis=1, keepdims=True)
            lse = mx + jnp.log(jnp.sum(jnp.where(m, jnp.exp(logits - mx), 0.0),
                                       axis=1, keepdims=True))
            out = out + jnp.where(m, logits - lse, 0.0)
        out_ref[...] = out                               # dense, lane-aligned store

    return kernel


# ------------------------------------------------------------------- parameter packing

def make_params(key, vocab_dim, embed_dim, b_dim, m_dim, s_dim, d_dim):
    """Deterministic synthetic init, PyTorch-shaped (in_features, out_features)."""
    latent_dim = embed_dim + PRICE_EMBED_DIM + OTHER_DIM + REDUCED_IMG_DIM
    lrelu_gain = (2.0 / (1.0 + SLOPE ** 2)) ** 0.5

    def nxt():
        nonlocal key
        key, sub = jax.random.split(key)
        return sub

    def xavier(fan_in, fan_out, gain):
        std = gain * (2.0 / (fan_in + fan_out)) ** 0.5
        return (std * jax.random.normal(nxt(), (fan_in, fan_out))).astype(jnp.float32)

    def lin_w(fan_in, fan_out):
        bound = (1.0 / fan_in) ** 0.5
        return jax.random.uniform(nxt(), (fan_in, fan_out), jnp.float32, -bound, bound)

    def lin_b(fan_in, n):
        bound = (1.0 / fan_in) ** 0.5
        return jax.random.uniform(nxt(), (n,), jnp.float32, -bound, bound)

    p = {}
    p["emb_tab"] = jax.random.normal(nxt(), (vocab_dim, embed_dim), jnp.float32)
    p["pw1"] = xavier(PRICE_DIM, PRICE_HIDDEN, lrelu_gain)
    p["pb1"] = lin_b(PRICE_DIM, PRICE_HIDDEN)
    p["pw2"] = xavier(PRICE_HIDDEN, PRICE_EMBED_DIM, lrelu_gain)
    p["pb2"] = lin_b(PRICE_HIDDEN, PRICE_EMBED_DIM)
    p["bn1_g"] = jnp.ones((PRICE_EMBED_DIM,), jnp.float32)
    p["bn1_b"] = jnp.zeros((PRICE_EMBED_DIM,), jnp.float32)
    p["iw"] = xavier(IMG_DIM, REDUCED_IMG_DIM, lrelu_gain)
    p["ib"] = lin_b(IMG_DIM, REDUCED_IMG_DIM)
    p["rw1"] = xavier(latent_dim, RES_HIDDEN, lrelu_gain)
    p["rb1"] = lin_b(latent_dim, RES_HIDDEN)
    p["rw2"] = xavier(RES_HIDDEN, 2 * latent_dim, lrelu_gain)
    p["rb2"] = lin_b(RES_HIDDEN, 2 * latent_dim)
    p["rw3"] = xavier(2 * latent_dim, latent_dim, SMALL_SLOPE)
    p["rb3"] = lin_b(2 * latent_dim, latent_dim)
    p["bn2_g"] = jnp.ones((latent_dim,), jnp.float32)
    p["bn2_b"] = jnp.zeros((latent_dim,), jnp.float32)
    for name, dim in (("b", b_dim), ("m", m_dim), ("s", s_dim), ("d", d_dim)):
        p[name + "w"] = lin_w(latent_dim, dim)
        p[name + "b"] = lin_b(latent_dim, dim)
    return p


def pack_params(p, embed_dim, b_dim, m_dim, s_dim, d_dim):
    """One-time padding / lane-layout permutation / bf16 cast of the weights."""
    L = _layout(embed_dim, b_dim, m_dim, s_dim, d_dim)
    E = embed_dim
    f32, bf16 = jnp.float32, jnp.bfloat16
    lat_real = L["lat_real"]

    def permute_rows(w):
        """(lat_real, N) in torch [price|emb|img|missing|season] order
           -> (lat_pad, N) in the kernel's lane-aligned layout (zero pad rows)."""
        n = w.shape[1]
        out = jnp.zeros((L["lat_pad"], n), f32)
        out = out.at[0:PRICE_EMBED_DIM].set(w[0:32])
        out = out.at[L["emb_off"]:L["emb_off"] + E].set(w[32:32 + E])
        out = out.at[L["img_off"]:L["img_off"] + REDUCED_IMG_DIM].set(w[32 + E:160 + E])
        out = out.at[L["miss_off"]:L["miss_off"] + 3].set(w[160 + E:163 + E])
        out = out.at[L["season_off"]:L["season_off"] + 2].set(w[163 + E:165 + E])
        return out

    def permute_vec(v):
        return permute_rows(jnp.asarray(v, f32).reshape(-1, 1)).reshape(-1)

    def padv(v, width):
        v = jnp.asarray(v, f32).reshape(-1)
        return jnp.pad(v, (0, width - v.shape[0]))

    # price Linear(3,128): folded into the lane-dense pe-block matmul.
    pw1p = jnp.zeros((L["pe_pad"], PRICE_HIDDEN), f32)
    pw1p = pw1p.at[L["rawp_off"]:L["rawp_off"] + PRICE_DIM].set(p["pw1"])
    pw1p = pw1p.at[L["bias_lane"]].set(p["pb1"])                  # pb1 fold

    pw2p = jnp.zeros((PRICE_HIDDEN, 128), f32).at[:, :PRICE_EMBED_DIM].set(p["pw2"])

    rw1p = permute_rows(p["rw1"]).at[L["bias_lane"]].set(p["rb1"])   # rb1 fold
    rw2p = jnp.pad(p["rw2"], ((0, 0), (0, L["hid2_pad"] - 2 * lat_real)))
    rw3p = permute_rows(p["rw3"].T).T
    rw3p = jnp.pad(rw3p, ((0, L["hid2_pad"] - 2 * lat_real), (0, 0)))

    hw = jnp.concatenate([p["bw"], p["mw"], p["sw"], p["dw"]], axis=1)
    hb = jnp.concatenate([p["bb"], p["mb"], p["sb"], p["db"]], axis=0)
    hwp = permute_rows(hw)
    hwp = jnp.pad(hwp, ((0, 0), (0, L["head_pad"] - hw.shape[1])))
    hwp = hwp.at[L["bias_lane"]].set(padv(hb, L["head_pad"]))        # head-bias fold

    vec_w = max(L["hid2_pad"], L["lat_pad"])
    packed = {
        "emb_tab": jnp.asarray(p["emb_tab"], f32),
        "pw1": pw1p.astype(bf16),
        "pw2": pw2p.astype(bf16),
        "iw": jnp.asarray(p["iw"], f32).astype(bf16),
        "rw1": rw1p.astype(bf16),
        "rw2": rw2p.astype(bf16),
        "rw3": rw3p.astype(bf16),
        "hw": hwp.astype(bf16),
        "vecA": jnp.stack([padv(p["pb2"], 128), padv(p["ib"], 128)], axis=0),
        "vecB": jnp.stack([padv(p["rb2"], vec_w),
                           padv(permute_vec(p["rb3"]), vec_w)], axis=0),
        "bn1_g": padv(p["bn1_g"], 128),
        "bn1_b": padv(p["bn1_b"], 128),
        "bn2_g": permute_vec(p["bn2_g"]),
        "bn2_b": permute_vec(p["bn2_b"]),
    }
    tb_max, vmem_limit = _chip_tuning()
    dims = dict(L, tb_max=tb_max, vmem_limit=vmem_limit)
    return packed, dims


def _bn_affine(stats, gamma, beta, n):
    """Reduce per-tile (sum, sum_sq) partials -> BN scale/shift as a (2, W) array."""
    s = jnp.sum(stats[:, 0, :], axis=0)
    sq = jnp.sum(stats[:, 1, :], axis=0)
    mean = s / n
    var = jnp.maximum(sq / n - mean * mean, 0.0)
    scale = gamma * jax.lax.rsqrt(var + BN_EPS)
    shift = beta - mean * scale
    return jnp.stack([scale, shift], axis=0)


# --------------------------------------------------------------------------- forward

def net_forward(packed, text, price, img, missing, season, *, dims):
    L = dims
    B = int(text.shape[0])
    f32 = jnp.float32

    # EmbeddingBag(mode='sum') as XLA gather + sum.
    # TODO(synk): move in-kernel with scalar-prefetched indices + per-row DMA.
    embedded = jnp.take(packed["emb_tab"], text, axis=0).sum(axis=1)

    tb = min(L["tb_max"], _round_up(max(B, 1), 8))      # per-generation row tile
    n_tiles = -(-B // tb)
    b_pad = n_tiles * tb

    # lane-aligned "pe" block: [0(32) | emb | missing | season | 1 | raw price | 0...]
    pe = jnp.concatenate([
        jnp.zeros((B, PRICE_EMBED_DIM), f32),
        embedded.astype(f32),
        missing.astype(f32),
        season.astype(f32),
        jnp.ones((B, 1), f32),
        price.astype(f32),
        jnp.zeros((B, L["pe_pad"] - L["rawp_off"] - PRICE_DIM), f32),
    ], axis=1)

    def pad_rows(x):
        if x.shape[0] == b_pad:
            return x
        return jnp.pad(x, ((0, b_pad - x.shape[0]), (0, 0)))

    pe = pad_rows(pe)
    img_in = pad_rows(img.astype(jnp.bfloat16))

    cparams = pltpu.CompilerParams(dimension_semantics=("parallel",),
                                   vmem_limit_bytes=L["vmem_limit"])

    def rspec(width):                       # row-tiled activations
        return pl.BlockSpec((tb, width), lambda i: (i, 0))

    def wspec(arr):                         # VMEM-resident weights (constant index map)
        nd = arr.ndim
        return pl.BlockSpec(arr.shape, lambda i: (0,) * nd)

    def sspec(width):                       # per-tile BN partial statistics
        return pl.BlockSpec((1, 8, width), lambda i: (i, 0, 0))

    # ---- stage A: price branch (pre-BN) + img branch + BN1 partial stats
    h2, imgact, bn1_stats = pl.pallas_call(
        _make_kernel_a(B, tb),
        grid=(n_tiles,),
        in_specs=[rspec(L["pe_pad"]), rspec(IMG_DIM),
                  wspec(packed["pw1"]), wspec(packed["pw2"]),
                  wspec(packed["iw"]), wspec(packed["vecA"])],
        out_shape=(jax.ShapeDtypeStruct((b_pad, 128), f32),
                   jax.ShapeDtypeStruct((b_pad, REDUCED_IMG_DIM), f32),
                   jax.ShapeDtypeStruct((n_tiles, 8, 128), f32)),
        out_specs=[rspec(128), rspec(REDUCED_IMG_DIM), sspec(128)],
        compiler_params=cparams,
    )(pe, img_in, packed["pw1"], packed["pw2"], packed["iw"], packed["vecA"])

    bn1_aff = _bn_affine(bn1_stats, packed["bn1_g"], packed["bn1_b"], B)

    # ---- stage B: latent + residual MLP (pre-BN2) + BN2 partial stats
    latent, r3, bn2_stats = pl.pallas_call(
        _make_kernel_b(B, tb, L["pe_pad"], L["lat_pad"], L["hid2_pad"]),
        grid=(n_tiles,),
        in_specs=[rspec(128), rspec(REDUCED_IMG_DIM), rspec(L["pe_pad"]),
                  wspec(bn1_aff), wspec(packed["rw1"]), wspec(packed["rw2"]),
                  wspec(packed["rw3"]), wspec(packed["vecB"])],
        out_shape=(jax.ShapeDtypeStruct((b_pad, L["lat_pad"]), f32),
                   jax.ShapeDtypeStruct((b_pad, L["lat_pad"]), f32),
                   jax.ShapeDtypeStruct((n_tiles, 8, L["lat_pad"]), f32)),
        out_specs=[rspec(L["lat_pad"]), rspec(L["lat_pad"]), sspec(L["lat_pad"])],
        compiler_params=cparams,
    )(h2, imgact, pe, bn1_aff, packed["rw1"], packed["rw2"], packed["rw3"],
      packed["vecB"])

    bn2_aff = _bn_affine(bn2_stats, packed["bn2_g"], packed["bn2_b"], B)

    # ---- stage C: skip-add + fused heads + masked per-head log-softmax
    head_slices = []
    off = 0
    for hd in L["heads"]:
        head_slices.append((off, hd))
        off += hd
    out = pl.pallas_call(
        _make_kernel_c(tuple(head_slices), L["head_pad"]),
        grid=(n_tiles,),
        in_specs=[rspec(L["lat_pad"]), rspec(L["lat_pad"]),
                  wspec(bn2_aff), wspec(packed["hw"])],
        out_shape=jax.ShapeDtypeStruct((b_pad, L["head_pad"]), f32),
        out_specs=rspec(L["head_pad"]),
        compiler_params=cparams,
    )(latent, r3, bn2_aff, packed["hw"])

    return tuple(out[:B, o:o + hd] for o, hd in head_slices)


# ---------------------------------------------------------------- pure-JAX reference

def reference_forward(p, text, price, img, missing, season):
    def bn(x, g, b):
        mu = jnp.mean(x, axis=0, keepdims=True)
        var = jnp.mean((x - mu) ** 2, axis=0, keepdims=True)
        return (x - mu) * jax.lax.rsqrt(var + BN_EPS) * g + b

    emb = jnp.take(p["emb_tab"], text, axis=0).sum(axis=1)
    h = _leaky(price @ p["pw1"] + p["pb1"], SLOPE)
    h = _leaky(h @ p["pw2"] + p["pb2"], SLOPE)
    pr = bn(h, p["bn1_g"], p["bn1_b"])
    im = _leaky(img @ p["iw"] + p["ib"], SLOPE)
    latent = jnp.concatenate([pr, emb, im, missing, season], axis=1)
    r = _leaky(latent @ p["rw1"] + p["rb1"], SLOPE)
    r = _leaky(r @ p["rw2"] + p["rb2"], SLOPE)
    r = _leaky(r @ p["rw3"] + p["rb3"], SMALL_SLOPE)
    latent = latent + bn(r, p["bn2_g"], p["bn2_b"])
    outs = []
    for name in ("b", "m", "s", "d"):
        outs.append(jax.nn.log_softmax(latent @ p[name + "w"] + p[name + "b"], axis=1))
    return tuple(outs)


if __name__ == "__main__":
    # small, module-consistent shapes
    VOCAB_DIM, EMBED_DIM = 50, 16
    B_DIM, M_DIM, S_DIM, D_DIM = 4, 6, 3, 5
    BATCH, SEQ = 8, 8

    key = jax.random.PRNGKey(0)
    k_param, k_text, k_price, k_img, k_miss, k_season = jax.random.split(key, 6)

    params = make_params(k_param, VOCAB_DIM, EMBED_DIM, B_DIM, M_DIM, S_DIM, D_DIM)

    text = jax.random.randint(k_text, (BATCH, SEQ), 0, VOCAB_DIM, dtype=jnp.int32)
    price = jax.random.normal(k_price, (BATCH, PRICE_DIM), jnp.float32)
    img = jax.random.normal(k_img, (BATCH, IMG_DIM), jnp.float32)
    missing = jax.random.bernoulli(k_miss, 0.2, (BATCH, 3)).astype(jnp.float32)
    season = jax.random.normal(k_season, (BATCH, 2), jnp.float32)

    # one-time weight packing (padding / permutation / bf16 cast), hoisted out of the forward
    packed, dims = pack_params(params, EMBED_DIM, B_DIM, M_DIM, S_DIM, D_DIM)
    fwd = jax.jit(functools.partial(net_forward, dims=dims))

    b, m, s, d = fwd(packed, text, price, img, missing, season)
    jax.block_until_ready((b, m, s, d))

    assert b.shape == (BATCH, B_DIM) and m.shape == (BATCH, M_DIM)
    assert s.shape == (BATCH, S_DIM) and d.shape == (BATCH, D_DIM)
    # each head is a valid log-softmax: exp(row) sums to 1
    for t in (b, m, s, d):
        assert bool(jnp.all(jnp.abs(jnp.exp(t).sum(axis=1) - 1.0) < 1e-3))
    # compare against the pure-JAX f32 reference (bf16 MXU operands => loose tol)
    refs = reference_forward(params, text, price, img, missing, season)
    for got, want in zip((b, m, s, d), refs):
        assert bool(jnp.max(jnp.abs(got - want)) < 0.2)
    print("KERNEL_OK")
</pallas_src>

<mosaic_0001>
module attributes {stable_mosaic.version = 11 : i64} {
  func.func @kernel(%arg0: i32, %arg1: memref<8x128xf32, #tpu.memory_space<vmem>>, %arg2: memref<8x2048xbf16, #tpu.memory_space<vmem>>, %arg3: memref<128x128xbf16, #tpu.memory_space<vmem>>, %arg4: memref<128x128xbf16, #tpu.memory_space<vmem>>, %arg5: memref<2048x128xbf16, #tpu.memory_space<vmem>>, %arg6: memref<2x128xf32, #tpu.memory_space<vmem>>, %arg7: memref<8x128xf32, #tpu.memory_space<vmem>>, %arg8: memref<8x128xf32, #tpu.memory_space<vmem>>, %arg9: memref<1x8x128xf32, #tpu.memory_space<vmem>>) attributes {dimension_semantics = [#tpu.dimension_semantics<parallel>], iteration_bounds = array<i64: 1>, scalar_prefetch = 0 : i64, scratch_operands = 0 : i64, tpu.core_type = #tpu.core_type<tc>, window_params = [{transform_indices = @transform_0, window_bounds = array<i64: 8, 128>}, {transform_indices = @transform_1, window_bounds = array<i64: 8, 2048>}, {pipeline_mode = #tpu.pipeline_mode<synchronous>, transform_indices = @transform_2, window_bounds = array<i64: 128, 128>}, {pipeline_mode = #tpu.pipeline_mode<synchronous>, transform_indices = @transform_3, window_bounds = array<i64: 128, 128>}, {pipeline_mode = #tpu.pipeline_mode<synchronous>, transform_indices = @transform_4, window_bounds = array<i64: 2048, 128>}, {pipeline_mode = #tpu.pipeline_mode<synchronous>, transform_indices = @transform_5, window_bounds = array<i64: 2, 128>}, {transform_indices = @transform_6, window_bounds = array<i64: 8, 128>}, {transform_indices = @transform_7, window_bounds = array<i64: 8, 128>}, {transform_indices = @transform_8, window_bounds = array<i64: 1, 8, 128>}]} {
    %c0 = arith.constant 0 : index
    %c0_0 = arith.constant 0 : index
    %0 = vector.load %arg1[%c0, %c0_0] : memref<8x128xf32, #tpu.memory_space<vmem>>, vector<8x128xf32>
    %1 = arith.truncf %0 : vector<8x128xf32> to vector<8x128xbf16>
    %c0_1 = arith.constant 0 : index
    %c0_2 = arith.constant 0 : index
    %2 = vector.load %arg3[%c0_1, %c0_2] : memref<128x128xbf16, #tpu.memory_space<vmem>>, vector<128x128xbf16>
    %cst = arith.constant dense<0.000000e+00> : vector<8x128xf32>
    %3 = tpu.matmul %1, %2, %cst {dimension_numbers = #tpu.dot_dimension_numbers<[1], [0], [0], [1], [0, 0, 1, 1], [], []>} : vector<8x128xbf16>, vector<128x128xbf16>, vector<8x128xf32> -> vector<8x128xf32>
    %cst_3 = arith.constant 0.000000e+00 : f32
    %4 = vector.broadcast %cst_3 : f32 to vector<8x128xf32>
    %5 = arith.cmpf oge, %3, %4 : vector<8x128xf32>
    %cst_4 = arith.constant 2.000000e-01 : f32
    %6 = vector.broadcast %cst_4 : f32 to vector<8x128xf32>
    %7 = arith.mulf %6, %3 : vector<8x128xf32>
    %8 = arith.select %5, %3, %7 : vector<8x128xi1>, vector<8x128xf32>
    %9 = arith.truncf %8 : vector<8x128xf32> to vector<8x128xbf16>
    %c0_5 = arith.constant 0 : index
    %c0_6 = arith.constant 0 : index
    %10 = vector.load %arg4[%c0_5, %c0_6] : memref<128x128xbf16, #tpu.memory_space<vmem>>, vector<128x128xbf16>
    %cst_7 = arith.constant dense<0.000000e+00> : vector<8x128xf32>
    %11 = tpu.matmul %9, %10, %cst_7 {dimension_numbers = #tpu.dot_dimension_numbers<[1], [0], [0], [1], [0, 0, 1, 1], [], []>} : vector<8x128xbf16>, vector<128x128xbf16>, vector<8x128xf32> -> vector<8x128xf32>
    %c0_8 = arith.constant 0 : index
    %c0_9 = arith.constant 0 : index
    %12 = vector.load %arg6[%c0_8, %c0_9] : memref<2x128xf32, #tpu.memory_space<vmem>>, vector<1x128xf32>
    %13 = vector.broadcast %12 : vector<1x128xf32> to vector<8x128xf32>
    %14 = arith.addf %11, %13 : vector<8x128xf32>
    %cst_10 = arith.constant 0.000000e+00 : f32
    %15 = vector.broadcast %cst_10 : f32 to vector<8x128xf32>
    %16 = arith.cmpf oge, %14, %15 : vector<8x128xf32>
    %cst_11 = arith.constant 2.000000e-01 : f32
    %17 = vector.broadcast %cst_11 : f32 to vector<8x128xf32>
    %18 = arith.mulf %17, %14 : vector<8x128xf32>
    %19 = arith.select %16, %14, %18 : vector<8x128xi1>, vector<8x128xf32>
    %c0_12 = arith.constant 0 : index
    %c0_13 = arith.constant 0 : index
    %20 = vector.load %arg7[%c0_12, %c0_13] : memref<8x128xf32, #tpu.memory_space<vmem>>, vector<8x128xf32>
    tpu.vector_store %arg7[%c0_12, %c0_13], %19 {strides = array<i32>} : memref<8x128xf32, #tpu.memory_space<vmem>>, vector<8x128xf32>,
    %c0_14 = arith.constant 0 : index
    %c0_15 = arith.constant 0 : index
    %21 = vector.load %arg2[%c0_14, %c0_15] : memref<8x2048xbf16, #tpu.memory_space<vmem>>, vector<8x2048xbf16>
    %c0_16 = arith.constant 0 : index
    %c0_17 = arith.constant 0 : index
    %22 = vector.load %arg5[%c0_16, %c0_17] : memref<2048x128xbf16, #tpu.memory_space<vmem>>, vector<2048x128xbf16>
    %cst_18 = arith.constant dense<0.000000e+00> : vector<8x128xf32>
    %23 = tpu.matmul %21, %22, %cst_18 {dimension_numbers = #tpu.dot_dimension_numbers<[1], [0], [0], [1], [0, 0, 1, 1], [], []>} : vector<8x2048xbf16>, vector<2048x128xbf16>, vector<8x128xf32> -> vector<8x128xf32>
    %c1 = arith.constant 1 : index
    %c0_19 = arith.constant 0 : index
    %24 = vector.load %arg6[%c1, %c0_19] : memref<2x128xf32, #tpu.memory_space<vmem>>, vector<1x128xf32>
    %25 = vector.broadcast %24 : vector<1x128xf32> to vector<8x128xf32>
    %26 = arith.addf %23, %25 : vector<8x128xf32>
    %cst_20 = arith.constant 0.000000e+00 : f32
    %27 = vector.broadcast %cst_20 : f32 to vector<8x128xf32>
    %28 = arith.cmpf oge, %26, %27 : vector<8x128xf32>
    %cst_21 = arith.constant 2.000000e-01 : f32
    %29 = vector.broadcast %cst_21 : f32 to vector<8x128xf32>
    %30 = arith.mulf %29, %26 : vector<8x128xf32>
    %31 = arith.select %28, %26, %30 : vector<8x128xi1>, vector<8x128xf32>
    %c0_22 = arith.constant 0 : index
    %c0_23 = arith.constant 0 : index
    %32 = vector.load %arg8[%c0_22, %c0_23] : memref<8x128xf32, #tpu.memory_space<vmem>>, vector<8x128xf32>
    tpu.vector_store %arg8[%c0_22, %c0_23], %31 {strides = array<i32>} : memref<8x128xf32, #tpu.memory_space<vmem>>, vector<8x128xf32>,
    %c8_i32 = arith.constant 8 : i32
    %33 = arith.muli %arg0, %c8_i32 : i32
    %34 = tpu.iota {dimensions = array<i32: 0>} : vector<8x1xi32>
    %35 = vector.broadcast %33 : i32 to vector<8x1xi32>
    %36 = arith.addi %35, %34 : vector<8x1xi32>
    %c8_i32_24 = arith.constant 8 : i32
    %37 = vector.broadcast %c8_i32_24 : i32 to vector<8x1xi32>
    %38 = arith.cmpi slt, %36, %37 : vector<8x1xi32>
    %39 = arith.extui %38 : vector<8x1xi1> to vector<8x1xi32>
    %40 = arith.sitofp %39 : vector<8x1xi32> to vector<8x1xf32>
    %41 = vector.broadcast %40 : vector<8x1xf32> to vector<8x128xf32>
    %42 = arith.mulf %19, %41 : vector<8x128xf32>
    %cst_25 = arith.constant dense<0.000000e+00> : vector<128xf32>
    %43 = vector.multi_reduction <add>, %42, %cst_25 [0] : vector<8x128xf32> to vector<128xf32>
    %44 = vector.shape_cast %43 : vector<128xf32> to vector<1x128xf32>
    %45 = arith.mulf %42, %19 : vector<8x128xf32>
    %cst_26 = arith.constant dense<0.000000e+00> : vector<128xf32>
    %46 = vector.multi_reduction <add>, %45, %cst_26 [0] : vector<8x128xf32> to vector<128xf32>
    %47 = vector.shape_cast %46 : vector<128xf32> to vector<1x128xf32>
    %48 = tpu.iota {dimensions = array<i32: 0>} : vector<8x1xi32>
    %c0_i32 = arith.constant 0 : i32
    %49 = vector.broadcast %c0_i32 : i32 to vector<8x1xi32>
    %50 = arith.cmpi eq, %48, %49 : vector<8x1xi32>
    %c1_i32 = arith.constant 1 : i32
    %51 = vector.broadcast %c1_i32 : i32 to vector<8x1xi32>
    %52 = arith.cmpi eq, %48, %51 : vector<8x1xi32>
    %cst_27 = arith.constant 0.000000e+00 : f32
    %53 = vector.shape_cast %52 : vector<8x1xi1> to vector<8x1xi1>
    %54 = vector.broadcast %53 : vector<8x1xi1> to vector<8x128xi1>
    %55 = vector.shape_cast %47 : vector<1x128xf32> to vector<1x128xf32>
    %56 = vector.broadcast %55 : vector<1x128xf32> to vector<8x128xf32>
    %57 = vector.broadcast %cst_27 : f32 to vector<8x128xf32>
    %58 = arith.select %54, %56, %57 : vector<8x128xi1>, vector<8x128xf32>
    %59 = vector.shape_cast %50 : vector<8x1xi1> to vector<8x1xi1>
    %60 = vector.broadcast %59 : vector<8x1xi1> to vector<8x128xi1>
    %61 = vector.shape_cast %44 : vector<1x128xf32> to vector<1x128xf32>
    %62 = vector.broadcast %61 : vector<1x128xf32> to vector<8x128xf32>
    %63 = arith.select %60, %62, %58 : vector<8x128xi1>, vector<8x128xf32>
    %c0_28 = arith.constant 0 : index
    %c0_29 = arith.constant 0 : index
    %c0_30 = arith.constant 0 : index
    %64 = vector.load %arg9[%c0_28, %c0_29, %c0_30] : memref<1x8x128xf32, #tpu.memory_space<vmem>>, vector<1x8x128xf32>
    %65 = vector.shape_cast %64 : vector<1x8x128xf32> to vector<8x128xf32>
    %66 = vector.shape_cast %63 : vector<8x128xf32> to vector<1x8x128xf32>
    tpu.vector_store %arg9[%c0_28, %c0_29, %c0_30], %66 {strides = array<i32>} : memref<1x8x128xf32, #tpu.memory_space<vmem>>, vector<1x8x128xf32>,
    return
  }
  func.func @transform_0(%arg0: i32) -> (i32, i32) {
    %c0_i32 = arith.constant 0 : i32
    %c0_i32_0 = arith.constant 0 : i32
    return %arg0, %c0_i32 : i32, i32
  }
  func.func @transform_1(%arg0: i32) -> (i32, i32) {
    %c0_i32 = arith.constant 0 : i32
    %c0_i32_0 = arith.constant 0 : i32
    return %arg0, %c0_i32 : i32, i32
  }
  func.func @transform_2(%arg0: i32) -> (i32, i32) {
    %c0_i32 = arith.constant 0 : i32
    %c0_i32_0 = arith.constant 0 : i32
    %c0_i32_1 = arith.constant 0 : i32
    return %c0_i32, %c0_i32_0 : i32, i32
  }
  func.func @transform_3(%arg0: i32) -> (i32, i32) {
    %c0_i32 = arith.constant 0 : i32
    %c0_i32_0 = arith.constant 0 : i32
    %c0_i32_1 = arith.constant 0 : i32
    return %c0_i32, %c0_i32_0 : i32, i32
  }
  func.func @transform_4(%arg0: i32) -> (i32, i32) {
    %c0_i32 = arith.constant 0 : i32
    %c0_i32_0 = arith.constant 0 : i32
    %c0_i32_1 = arith.constant 0 : i32
    return %c0_i32, %c0_i32_0 : i32, i32
  }
  func.func @transform_5(%arg0: i32) -> (i32, i32) {
    %c0_i32 = arith.constant 0 : i32
    %c0_i32_0 = arith.constant 0 : i32
    %c0_i32_1 = arith.constant 0 : i32
    return %c0_i32, %c0_i32_0 : i32, i32
  }
  func.func @transform_6(%arg0: i32) -> (i32, i32) {
    %c0_i32 = arith.constant 0 : i32
    %c0_i32_0 = arith.constant 0 : i32
    return %arg0, %c0_i32 : i32, i32
  }
  func.func @transform_7(%arg0: i32) -> (i32, i32) {
    %c0_i32 = arith.constant 0 : i32
    %c0_i32_0 = arith.constant 0 : i32
    return %arg0, %c0_i32 : i32, i32
  }
  func.func @transform_8(%arg0: i32) -> (i32, i32, i32) {
    %c0_i32 = arith.constant 0 : i32
    %c0_i32_0 = arith.constant 0 : i32
    %c0_i32_1 = arith.constant 0 : i32
    return %arg0, %c0_i32, %c0_i32_0 : i32, i32, i32
  }
}

module attributes {stable_mosaic.version = 11 : i64} {
  func.func @kernel(%arg0: i32, %arg1: memref<8x128xf32, #tpu.memory_space<vmem>>, %arg2: memref<8x128xf32, #tpu.memory_space<vmem>>, %arg3: memref<8x128xf32, #tpu.memory_space<vmem>>, %arg4: memref<2x128xf32, #tpu.memory_space<vmem>>, %arg5: memref<256x3200xbf16, #tpu.memory_space<vmem>>, %arg6: memref<3200x384xbf16, #tpu.memory_space<vmem>>, %arg7: memref<384x256xbf16, #tpu.memory_space<vmem>>, %arg8: memref<2x384xf32, #tpu.memory_space<vmem>>, %arg9: memref<8x256xf32, #tpu.memory_space<vmem>>, %arg10: memref<8x256xf32, #tpu.memory_space<vmem>>, %arg11: memref<1x8x256xf32, #tpu.memory_space<vmem>>) attributes {dimension_semantics = [#tpu.dimension_semantics<parallel>], iteration_bounds = array<i64: 1>, scalar_prefetch = 0 : i64, scratch_operands = 0 : i64, tpu.core_type = #tpu.core_type<tc>, window_params = [{transform_indices = @transform_0, window_bounds = array<i64: 8, 128>}, {transform_indices = @transform_1, window_bounds = array<i64: 8, 128>}, {transform_indices = @transform_2, window_bounds = array<i64: 8, 128>}, {pipeline_mode = #tpu.pipeline_mode<synchronous>, transform_indices = @transform_3, window_bounds = array<i64: 2, 128>}, {pipeline_mode = #tpu.pipeline_mode<synchronous>, transform_indices = @transform_4, window_bounds = array<i64: 256, 3200>}, {pipeline_mode = #tpu.pipeline_mode<synchronous>, transform_indices = @transform_5, window_bounds = array<i64: 3200, 384>}, {pipeline_mode = #tpu.pipeline_mode<synchronous>, transform_indices = @transform_6, window_bounds = array<i64: 384, 256>}, {pipeline_mode = #tpu.pipeline_mode<synchronous>, transform_indices = @transform_7, window_bounds = array<i64: 2, 384>}, {transform_indices = @transform_8, window_bounds = array<i64: 8, 256>}, {transform_indices = @transform_9, window_bounds = array<i64: 8, 256>}, {transform_indices = @transform_10, window_bounds = array<i64: 1, 8, 256>}]} {
    %c0 = arith.constant 0 : index
    %c0_0 = arith.constant 0 : index
    %0 = vector.load %arg1[%c0, %c0_0] : memref<8x128xf32, #tpu.memory_space<vmem>>, vector<8x128xf32>
    %c0_1 = arith.constant 0 : index
    %c0_2 = arith.constant 0 : index
    %1 = vector.load %arg4[%c0_1, %c0_2] : memref<2x128xf32, #tpu.memory_space<vmem>>, vector<1x128xf32>
    %2 = vector.broadcast %1 : vector<1x128xf32> to vector<8x128xf32>
    %3 = arith.mulf %0, %2 : vector<8x128xf32>
    %c1 = arith.constant 1 : index
    %c0_3 = arith.constant 0 : index
    %4 = vector.load %arg4[%c1, %c0_3] : memref<2x128xf32, #tpu.memory_space<vmem>>, vector<1x128xf32>
    %5 = vector.broadcast %4 : vector<1x128xf32> to vector<8x128xf32>
    %6 = arith.addf %3, %5 : vector<8x128xf32>
    %c0_4 = arith.constant 0 : index
    %c0_5 = arith.constant 0 : index
    %7 = vector.load %arg3[%c0_4, %c0_5] : memref<8x128xf32, #tpu.memory_space<vmem>>, vector<8x128xf32>
    %8 = arith.addf %6, %7 : vector<8x128xf32>
    %c0_6 = arith.constant 0 : index
    %c0_7 = arith.constant 0 : index
    %9 = vector.load %arg2[%c0_6, %c0_7] : memref<8x128xf32, #tpu.memory_space<vmem>>, vector<8x128xf32>
    %10 = tpu.concatenate %8, %9 in 1 : vector<8x128xf32>, vector<8x128xf32> -> vector<8x256xf32>
    %c0_8 = arith.constant 0 : index
    %c0_9 = arith.constant 0 : index
    %11 = vector.load %arg9[%c0_8, %c0_9] : memref<8x256xf32, #tpu.memory_space<vmem>>, vector<8x256xf32>
    tpu.vector_store %arg9[%c0_8, %c0_9], %10 {strides = array<i32>} : memref<8x256xf32, #tpu.memory_space<vmem>>, vector<8x256xf32>,
    %12 = arith.truncf %10 : vector<8x256xf32> to vector<8x256xbf16>
    %c0_10 = arith.constant 0 : index
    %c0_11 = arith.constant 0 : index
    %13 = vector.load %arg5[%c0_10, %c0_11] : memref<256x3200xbf16, #tpu.memory_space<vmem>>, vector<256x3200xbf16>
    %cst = arith.constant dense<0.000000e+00> : vector<8x3200xf32>
    %14 = tpu.matmul %12, %13, %cst {dimension_numbers = #tpu.dot_dimension_numbers<[1], [0], [0], [1], [0, 0, 1, 1], [], []>} : vector<8x256xbf16>, vector<256x3200xbf16>, vector<8x3200xf32> -> vector<8x3200xf32>
    %cst_12 = arith.constant 0.000000e+00 : f32
    %15 = vector.broadcast %cst_12 : f32 to vector<8x3200xf32>
    %16 = arith.cmpf oge, %14, %15 : vector<8x3200xf32>
    %cst_13 = arith.constant 2.000000e-01 : f32
    %17 = vector.broadcast %cst_13 : f32 to vector<8x3200xf32>
    %18 = arith.mulf %17, %14 : vector<8x3200xf32>
    %19 = arith.select %16, %14, %18 : vector<8x3200xi1>, vector<8x3200xf32>
    %20 = arith.truncf %19 : vector<8x3200xf32> to vector<8x3200xbf16>
    %c0_14 = arith.constant 0 : index
    %c0_15 = arith.constant 0 : index
    %21 = vector.load %arg6[%c0_14, %c0_15] : memref<3200x384xbf16, #tpu.memory_space<vmem>>, vector<3200x384xbf16>
    %cst_16 = arith.constant dense<0.000000e+00> : vector<8x384xf32>
    %22 = tpu.matmul %20, %21, %cst_16 {dimension_numbers = #tpu.dot_dimension_numbers<[1], [0], [0], [1], [0, 0, 1, 1], [], []>} : vector<8x3200xbf16>, vector<3200x384xbf16>, vector<8x384xf32> -> vector<8x384xf32>
    %c0_17 = arith.constant 0 : index
    %c0_18 = arith.constant 0 : index
    %23 = vector.load %arg8[%c0_17, %c0_18] : memref<2x384xf32, #tpu.memory_space<vmem>>, vector<1x384xf32>
    %24 = vector.broadcast %23 : vector<1x384xf32> to vector<8x384xf32>
    %25 = arith.addf %22, %24 : vector<8x384xf32>
    %cst_19 = arith.constant 0.000000e+00 : f32
    %26 = vector.broadcast %cst_19 : f32 to vector<8x384xf32>
    %27 = arith.cmpf oge, %25, %26 : vector<8x384xf32>
    %cst_20 = arith.constant 2.000000e-01 : f32
    %28 = vector.broadcast %cst_20 : f32 to vector<8x384xf32>
    %29 = arith.mulf %28, %25 : vector<8x384xf32>
    %30 = arith.select %27, %25, %29 : vector<8x384xi1>, vector<8x384xf32>
    %31 = arith.truncf %30 : vector<8x384xf32> to vector<8x384xbf16>
    %c0_21 = arith.constant 0 : index
    %c0_22 = arith.constant 0 : index
    %32 = vector.load %arg7[%c0_21, %c0_22] : memref<384x256xbf16, #tpu.memory_space<vmem>>, vector<384x256xbf16>
    %cst_23 = arith.constant dense<0.000000e+00> : vector<8x256xf32>
    %33 = tpu.matmul %31, %32, %cst_23 {dimension_numbers = #tpu.dot_dimension_numbers<[1], [0], [0], [1], [0, 0, 1, 1], [], []>} : vector<8x384xbf16>, vector<384x256xbf16>, vector<8x256xf32> -> vector<8x256xf32>
    %c1_24 = arith.constant 1 : index
    %c0_25 = arith.constant 0 : index
    %34 = vector.load %arg8[%c1_24, %c0_25] : memref<2x384xf32, #tpu.memory_space<vmem>>, vector<1x256xf32>
    %35 = vector.broadcast %34 : vector<1x256xf32> to vector<8x256xf32>
    %36 = arith.addf %33, %35 : vector<8x256xf32>
    %cst_26 = arith.constant 0.000000e+00 : f32
    %37 = vector.broadcast %cst_26 : f32 to vector<8x256xf32>
    %38 = arith.cmpf oge, %36, %37 : vector<8x256xf32>
    %cst_27 = arith.constant 2.000000e-02 : f32
    %39 = vector.broadcast %cst_27 : f32 to vector<8x256xf32>
    %40 = arith.mulf %39, %36 : vector<8x256xf32>
    %41 = arith.select %38, %36, %40 : vector<8x256xi1>, vector<8x256xf32>
    %c0_28 = arith.constant 0 : index
    %c0_29 = arith.constant 0 : index
    %42 = vector.load %arg10[%c0_28, %c0_29] : memref<8x256xf32, #tpu.memory_space<vmem>>, vector<8x256xf32>
    tpu.vector_store %arg10[%c0_28, %c0_29], %41 {strides = array<i32>} : memref<8x256xf32, #tpu.memory_space<vmem>>, vector<8x256xf32>,
    %c8_i32 = arith.constant 8 : i32
    %43 = arith.muli %arg0, %c8_i32 : i32
    %44 = tpu.iota {dimensions = array<i32: 0>} : vector<8x1xi32>
    %45 = vector.broadcast %43 : i32 to vector<8x1xi32>
    %46 = arith.addi %45, %44 : vector<8x1xi32>
    %c8_i32_30 = arith.constant 8 : i32
    %47 = vector.broadcast %c8_i32_30 : i32 to vector<8x1xi32>
    %48 = arith.cmpi slt, %46, %47 : vector<8x1xi32>
    %49 = arith.extui %48 : vector<8x1xi1> to vector<8x1xi32>
    %50 = arith.sitofp %49 : vector<8x1xi32> to vector<8x1xf32>
    %51 = vector.broadcast %50 : vector<8x1xf32> to vector<8x256xf32>
    %52 = arith.mulf %41, %51 : vector<8x256xf32>
    %cst_31 = arith.constant dense<0.000000e+00> : vector<256xf32>
    %53 = vector.multi_reduction <add>, %52, %cst_31 [0] : vector<8x256xf32> to vector<256xf32>
    %54 = vector.shape_cast %53 : vector<256xf32> to vector<1x256xf32>
    %55 = arith.mulf %52, %41 : vector<8x256xf32>
    %cst_32 = arith.constant dense<0.000000e+00> : vector<256xf32>
    %56 = vector.multi_reduction <add>, %55, %cst_32 [0] : vector<8x256xf32> to vector<256xf32>
    %57 = vector.shape_cast %56 : vector<256xf32> to vector<1x256xf32>
    %58 = tpu.iota {dimensions = array<i32: 0>} : vector<8x1xi32>
    %c0_i32 = arith.constant 0 : i32
    %59 = vector.broadcast %c0_i32 : i32 to vector<8x1xi32>
    %60 = arith.cmpi eq, %58, %59 : vector<8x1xi32>
    %c1_i32 = arith.constant 1 : i32
    %61 = vector.broadcast %c1_i32 : i32 to vector<8x1xi32>
    %62 = arith.cmpi eq, %58, %61 : vector<8x1xi32>
    %cst_33 = arith.constant 0.000000e+00 : f32
    %63 = vector.shape_cast %62 : vector<8x1xi1> to vector<8x1xi1>
    %64 = vector.broadcast %63 : vector<8x1xi1> to vector<8x256xi1>
    %65 = vector.shape_cast %57 : vector<1x256xf32> to vector<1x256xf32>
    %66 = vector.broadcast %65 : vector<1x256xf32> to vector<8x256xf32>
    %67 = vector.broadcast %cst_33 : f32 to vector<8x256xf32>
    %68 = arith.select %64, %66, %67 : vector<8x256xi1>, vector<8x256xf32>
    %69 = vector.shape_cast %60 : vector<8x1xi1> to vector<8x1xi1>
    %70 = vector.broadcast %69 : vector<8x1xi1> to vector<8x256xi1>
    %71 = vector.shape_cast %54 : vector<1x256xf32> to vector<1x256xf32>
    %72 = vector.broadcast %71 : vector<1x256xf32> to vector<8x256xf32>
    %73 = arith.select %70, %72, %68 : vector<8x256xi1>, vector<8x256xf32>
    %c0_34 = arith.constant 0 : index
    %c0_35 = arith.constant 0 : index
    %c0_36 = arith.constant 0 : index
    %74 = vector.load %arg11[%c0_34, %c0_35, %c0_36] : memref<1x8x256xf32, #tpu.memory_space<vmem>>, vector<1x8x256xf32>
    %75 = vector.shape_cast %74 : vector<1x8x256xf32> to vector<8x256xf32>
    %76 = vector.shape_cast %73 : vector<8x256xf32> to vector<1x8x256xf32>
    tpu.vector_store %arg11[%c0_34, %c0_35, %c0_36], %76 {strides = array<i32>} : memref<1x8x256xf32, #tpu.memory_space<vmem>>, vector<1x8x256xf32>,
    return
  }
  func.func @transform_0(%arg0: i32) -> (i32, i32) {
    %c0_i32 = arith.constant 0 : i32
    %c0_i32_0 = arith.constant 0 : i32
    return %arg0, %c0_i32 : i32, i32
  }
  func.func @transform_1(%arg0: i32) -> (i32, i32) {
    %c0_i32 = arith.constant 0 : i32
    %c0_i32_0 = arith.constant 0 : i32
    return %arg0, %c0_i32 : i32, i32
  }
  func.func @transform_2(%arg0: i32) -> (i32, i32) {
    %c0_i32 = arith.constant 0 : i32
    %c0_i32_0 = arith.constant 0 : i32
    return %arg0, %c0_i32 : i32, i32
  }
  func.func @transform_3(%arg0: i32) -> (i32, i32) {
    %c0_i32 = arith.constant 0 : i32
    %c0_i32_0 = arith.constant 0 : i32
    %c0_i32_1 = arith.constant 0 : i32
    return %c0_i32, %c0_i32_0 : i32, i32
  }
  func.func @transform_4(%arg0: i32) -> (i32, i32) {
    %c0_i32 = arith.constant 0 : i32
    %c0_i32_0 = arith.constant 0 : i32
    %c0_i32_1 = arith.constant 0 : i32
    return %c0_i32, %c0_i32_0 : i32, i32
  }
  func.func @transform_5(%arg0: i32) -> (i32, i32) {
    %c0_i32 = arith.constant 0 : i32
    %c0_i32_0 = arith.constant 0 : i32
    %c0_i32_1 = arith.constant 0 : i32
    return %c0_i32, %c0_i32_0 : i32, i32
  }
  func.func @transform_6(%arg0: i32) -> (i32, i32) {
    %c0_i32 = arith.constant 0 : i32
    %c0_i32_0 = arith.constant 0 : i32
    %c0_i32_1 = arith.constant 0 : i32
    return %c0_i32, %c0_i32_0 : i32, i32
  }
  func.func @transform_7(%arg0: i32) -> (i32, i32) {
    %c0_i32 = arith.constant 0 : i32
    %c0_i32_0 = arith.constant 0 : i32
    %c0_i32_1 = arith.constant 0 : i32
    return %c0_i32, %c0_i32_0 : i32, i32
  }
  func.func @transform_8(%arg0: i32) -> (i32, i32) {
    %c0_i32 = arith.constant 0 : i32
    %c0_i32_0 = arith.constant 0 : i32
    return %arg0, %c0_i32 : i32, i32
  }
  func.func @transform_9(%arg0: i32) -> (i32, i32) {
    %c0_i32 = arith.constant 0 : i32
    %c0_i32_0 = arith.constant 0 : i32
    return %arg0, %c0_i32 : i32, i32
  }
  func.func @transform_10(%arg0: i32) -> (i32, i32, i32) {
    %c0_i32 = arith.constant 0 : i32
    %c0_i32_0 = arith.constant 0 : i32
    %c0_i32_1 = arith.constant 0 : i32
    return %arg0, %c0_i32, %c0_i32_0 : i32, i32, i32
  }
}

module attributes {stable_mosaic.version = 11 : i64} {
  func.func @kernel(%arg0: i32, %arg1: memref<8x256xf32, #tpu.memory_space<vmem>>, %arg2: memref<8x256xf32, #tpu.memory_space<vmem>>, %arg3: memref<2x256xf32, #tpu.memory_space<vmem>>, %arg4: memref<256x128xbf16, #tpu.memory_space<vmem>>, %arg5: memref<8x128xf32, #tpu.memory_space<vmem>>) attributes {dimension_semantics = [#tpu.dimension_semantics<parallel>], iteration_bounds = array<i64: 1>, scalar_prefetch = 0 : i64, scratch_operands = 0 : i64, tpu.core_type = #tpu.core_type<tc>, window_params = [{transform_indices = @transform_0, window_bounds = array<i64: 8, 256>}, {transform_indices = @transform_1, window_bounds = array<i64: 8, 256>}, {pipeline_mode = #tpu.pipeline_mode<synchronous>, transform_indices = @transform_2, window_bounds = array<i64: 2, 256>}, {pipeline_mode = #tpu.pipeline_mode<synchronous>, transform_indices = @transform_3, window_bounds = array<i64: 256, 128>}, {transform_indices = @transform_4, window_bounds = array<i64: 8, 128>}]} {
    %c0 = arith.constant 0 : index
    %c0_0 = arith.constant 0 : index
    %0 = vector.load %arg1[%c0, %c0_0] : memref<8x256xf32, #tpu.memory_space<vmem>>, vector<8x256xf32>
    %c0_1 = arith.constant 0 : index
    %c0_2 = arith.constant 0 : index
    %1 = vector.load %arg2[%c0_1, %c0_2] : memref<8x256xf32, #tpu.memory_space<vmem>>, vector<8x256xf32>
    %c0_3 = arith.constant 0 : index
    %c0_4 = arith.constant 0 : index
    %2 = vector.load %arg3[%c0_3, %c0_4] : memref<2x256xf32, #tpu.memory_space<vmem>>, vector<1x256xf32>
    %3 = vector.broadcast %2 : vector<1x256xf32> to vector<8x256xf32>
    %4 = arith.mulf %1, %3 : vector<8x256xf32>
    %5 = arith.addf %0, %4 : vector<8x256xf32>
    %c1 = arith.constant 1 : index
    %c0_5 = arith.constant 0 : index
    %6 = vector.load %arg3[%c1, %c0_5] : memref<2x256xf32, #tpu.memory_space<vmem>>, vector<1x256xf32>
    %7 = vector.broadcast %6 : vector<1x256xf32> to vector<8x256xf32>
    %8 = arith.addf %5, %7 : vector<8x256xf32>
    %9 = arith.truncf %8 : vector<8x256xf32> to vector<8x256xbf16>
    %c0_6 = arith.constant 0 : index
    %c0_7 = arith.constant 0 : index
    %10 = vector.load %arg4[%c0_6, %c0_7] : memref<256x128xbf16, #tpu.memory_space<vmem>>, vector<256x128xbf16>
    %cst = arith.constant dense<0.000000e+00> : vector<8x128xf32>
    %11 = tpu.matmul %9, %10, %cst {dimension_numbers = #tpu.dot_dimension_numbers<[1], [0], [0], [1], [0, 0, 1, 1], [], []>} : vector<8x256xbf16>, vector<256x128xbf16>, vector<8x128xf32> -> vector<8x128xf32>
    %12 = tpu.iota {dimensions = array<i32: 1>} : vector<1x128xi32>
    %cst_8 = arith.constant 0.000000e+00 : f32
    %13 = vector.broadcast %cst_8 : f32 to vector<8x128xf32>
    %c0_i32 = arith.constant 0 : i32
    %14 = vector.broadcast %c0_i32 : i32 to vector<1x128xi32>
    %15 = arith.cmpi sge, %12, %14 : vector<1x128xi32>
    %c4_i32 = arith.constant 4 : i32
    %16 = vector.broadcast %c4_i32 : i32 to vector<1x128xi32>
    %17 = arith.cmpi slt, %12, %16 : vector<1x128xi32>
    %18 = arith.andi %15, %17 : vector<1x128xi1>
    %cst_9 = arith.constant -1.000000e+30 : f32
    %19 = vector.shape_cast %18 : vector<1x128xi1> to vector<1x128xi1>
    %20 = vector.broadcast %19 : vector<1x128xi1> to vector<8x128xi1>
    %21 = vector.broadcast %cst_9 : f32 to vector<8x128xf32>
    %22 = arith.select %20, %11, %21 : vector<8x128xi1>, vector<8x128xf32>
    %cst_10 = arith.constant dense<0xFF800000> : vector<8xf32>
    %23 = vector.multi_reduction <maximumf>, %22, %cst_10 [1] : vector<8x128xf32> to vector<8xf32>
    %24 = vector.shape_cast %23 : vector<8xf32> to vector<8x1xf32>
    %25 = vector.broadcast %24 : vector<8x1xf32> to vector<8x128xf32>
    %26 = arith.subf %11, %25 : vector<8x128xf32>
    %27 = math.exp %26 : vector<8x128xf32>
    %cst_11 = arith.constant 0.000000e+00 : f32
    %28 = vector.shape_cast %18 : vector<1x128xi1> to vector<1x128xi1>
    %29 = vector.broadcast %28 : vector<1x128xi1> to vector<8x128xi1>
    %30 = vector.broadcast %cst_11 : f32 to vector<8x128xf32>
    %31 = arith.select %29, %27, %30 : vector<8x128xi1>, vector<8x128xf32>
    %cst_12 = arith.constant dense<0.000000e+00> : vector<8xf32>
    %32 = vector.multi_reduction <add>, %31, %cst_12 [1] : vector<8x128xf32> to vector<8xf32>
    %33 = vector.shape_cast %32 : vector<8xf32> to vector<8x1xf32>
    %34 = math.log %33 : vector<8x1xf32>
    %35 = arith.addf %24, %34 : vector<8x1xf32>
    %36 = vector.broadcast %35 : vector<8x1xf32> to vector<8x128xf32>
    %37 = arith.subf %11, %36 : vector<8x128xf32>
    %cst_13 = arith.constant 0.000000e+00 : f32
    %38 = vector.shape_cast %18 : vector<1x128xi1> to vector<1x128xi1>
    %39 = vector.broadcast %38 : vector<1x128xi1> to vector<8x128xi1>
    %40 = vector.broadcast %cst_13 : f32 to vector<8x128xf32>
    %41 = arith.select %39, %37, %40 : vector<8x128xi1>, vector<8x128xf32>
    %42 = arith.addf %13, %41 : vector<8x128xf32>
    %c4_i32_14 = arith.constant 4 : i32
    %43 = vector.broadcast %c4_i32_14 : i32 to vector<1x128xi32>
    %44 = arith.cmpi sge, %12, %43 : vector<1x128xi32>
    %c10_i32 = arith.constant 10 : i32
    %45 = vector.broadcast %c10_i32 : i32 to vector<1x128xi32>
    %46 = arith.cmpi slt, %12, %45 : vector<1x128xi32>
    %47 = arith.andi %44, %46 : vector<1x128xi1>
    %cst_15 = arith.constant -1.000000e+30 : f32
    %48 = vector.shape_cast %47 : vector<1x128xi1> to vector<1x128xi1>
    %49 = vector.broadcast %48 : vector<1x128xi1> to vector<8x128xi1>
    %50 = vector.broadcast %cst_15 : f32 to vector<8x128xf32>
    %51 = arith.select %49, %11, %50 : vector<8x128xi1>, vector<8x128xf32>
    %cst_16 = arith.constant dense<0xFF800000> : vector<8xf32>
    %52 = vector.multi_reduction <maximumf>, %51, %cst_16 [1] : vector<8x128xf32> to vector<8xf32>
    %53 = vector.shape_cast %52 : vector<8xf32> to vector<8x1xf32>
    %54 = vector.broadcast %53 : vector<8x1xf32> to vector<8x128xf32>
    %55 = arith.subf %11, %54 : vector<8x128xf32>
    %56 = math.exp %55 : vector<8x128xf32>
    %cst_17 = arith.constant 0.000000e+00 : f32
    %57 = vector.shape_cast %47 : vector<1x128xi1> to vector<1x128xi1>
    %58 = vector.broadcast %57 : vector<1x128xi1> to vector<8x128xi1>
    %59 = vector.broadcast %cst_17 : f32 to vector<8x128xf32>
    %60 = arith.select %58, %56, %59 : vector<8x128xi1>, vector<8x128xf32>
    %cst_18 = arith.constant dense<0.000000e+00> : vector<8xf32>
    %61 = vector.multi_reduction <add>, %60, %cst_18 [1] : vector<8x128xf32> to vector<8xf32>
    %62 = vector.shape_cast %61 : vector<8xf32> to vector<8x1xf32>
    %63 = math.log %62 : vector<8x1xf32>
    %64 = arith.addf %53, %63 : vector<8x1xf32>
    %65 = vector.broadcast %64 : vector<8x1xf32> to vector<8x128xf32>
    %66 = arith.subf %11, %65 : vector<8x128xf32>
    %cst_19 = arith.constant 0.000000e+00 : f32
    %67 = vector.shape_cast %47 : vector<1x128xi1> to vector<1x128xi1>
    %68 = vector.broadcast %67 : vector<1x128xi1> to vector<8x128xi1>
    %69 = vector.broadcast %cst_19 : f32 to vector<8x128xf32>
    %70 = arith.select %68, %66, %69 : vector<8x128xi1>, vector<8x128xf32>
    %71 = arith.addf %42, %70 : vector<8x128xf32>
    %c10_i32_20 = arith.constant 10 : i32
    %72 = vector.broadcast %c10_i32_20 : i32 to vector<1x128xi32>
    %73 = arith.cmpi sge, %12, %72 : vector<1x128xi32>
    %c13_i32 = arith.constant 13 : i32
    %74 = vector.broadcast %c13_i32 : i32 to vector<1x128xi32>
    %75 = arith.cmpi slt, %12, %74 : vector<1x128xi32>
    %76 = arith.andi %73, %75 : vector<1x128xi1>
    %cst_21 = arith.constant -1.000000e+30 : f32
    %77 = vector.shape_cast %76 : vector<1x128xi1> to vector<1x128xi1>
    %78 = vector.broadcast %77 : vector<1x128xi1> to vector<8x128xi1>
    %79 = vector.broadcast %cst_21 : f32 to vector<8x128xf32>
    %80 = arith.select %78, %11, %79 : vector<8x128xi1>, vector<8x128xf32>
    %cst_22 = arith.constant dense<0xFF800000> : vector<8xf32>
    %81 = vector.multi_reduction <maximumf>, %80, %cst_22 [1] : vector<8x128xf32> to vector<8xf32>
    %82 = vector.shape_cast %81 : vector<8xf32> to vector<8x1xf32>
    %83 = vector.broadcast %82 : vector<8x1xf32> to vector<8x128xf32>
    %84 = arith.subf %11, %83 : vector<8x128xf32>
    %85 = math.exp %84 : vector<8x128xf32>
    %cst_23 = arith.constant 0.000000e+00 : f32
    %86 = vector.shape_cast %76 : vector<1x128xi1> to vector<1x128xi1>
    %87 = vector.broadcast %86 : vector<1x128xi1> to vector<8x128xi1>
    %88 = vector.broadcast %cst_23 : f32 to vector<8x128xf32>
    %89 = arith.select %87, %85, %88 : vector<8x128xi1>, vector<8x128xf32>
    %cst_24 = arith.constant dense<0.000000e+00> : vector<8xf32>
    %90 = vector.multi_reduction <add>, %89, %cst_24 [1] : vector<8x128xf32> to vector<8xf32>
    %91 = vector.shape_cast %90 : vector<8xf32> to vector<8x1xf32>
    %92 = math.log %91 : vector<8x1xf32>
    %93 = arith.addf %82, %92 : vector<8x1xf32>
    %94 = vector.broadcast %93 : vector<8x1xf32> to vector<8x128xf32>
    %95 = arith.subf %11, %94 : vector<8x128xf32>
    %cst_25 = arith.constant 0.000000e+00 : f32
    %96 = vector.shape_cast %76 : vector<1x128xi1> to vector<1x128xi1>
    %97 = vector.broadcast %96 : vector<1x128xi1> to vector<8x128xi1>
    %98 = vector.broadcast %cst_25 : f32 to vector<8x128xf32>
    %99 = arith.select %97, %95, %98 : vector<8x128xi1>, vector<8x128xf32>
    %100 = arith.addf %71, %99 : vector<8x128xf32>
    %c13_i32_26 = arith.constant 13 : i32
    %101 = vector.broadcast %c13_i32_26 : i32 to vector<1x128xi32>
    %102 = arith.cmpi sge, %12, %101 : vector<1x128xi32>
    %c18_i32 = arith.constant 18 : i32
    %103 = vector.broadcast %c18_i32 : i32 to vector<1x128xi32>
    %104 = arith.cmpi slt, %12, %103 : vector<1x128xi32>
    %105 = arith.andi %102, %104 : vector<1x128xi1>
    %cst_27 = arith.constant -1.000000e+30 : f32
    %106 = vector.shape_cast %105 : vector<1x128xi1> to vector<1x128xi1>
    %107 = vector.broadcast %106 : vector<1x128xi1> to vector<8x128xi1>
    %108 = vector.broadcast %cst_27 : f32 to vector<8x128xf32>
    %109 = arith.select %107, %11, %108 : vector<8x128xi1>, vector<8x128xf32>
    %cst_28 = arith.constant dense<0xFF800000> : vector<8xf32>
    %110 = vector.multi_reduction <maximumf>, %109, %cst_28 [1] : vector<8x128xf32> to vector<8xf32>
    %111 = vector.shape_cast %110 : vector<8xf32> to vector<8x1xf32>
    %112 = vector.broadcast %111 : vector<8x1xf32> to vector<8x128xf32>
    %113 = arith.subf %11, %112 : vector<8x128xf32>
    %114 = math.exp %113 : vector<8x128xf32>
    %cst_29 = arith.constant 0.000000e+00 : f32
    %115 = vector.shape_cast %105 : vector<1x128xi1> to vector<1x128xi1>
    %116 = vector.broadcast %115 : vector<1x128xi1> to vector<8x128xi1>
    %117 = vector.broadcast %cst_29 : f32 to vector<8x128xf32>
    %118 = arith.select %116, %114, %117 : vector<8x128xi1>, vector<8x128xf32>
    %cst_30 = arith.constant dense<0.000000e+00> : vector<8xf32>
    %119 = vector.multi_reduction <add>, %118, %cst_30 [1] : vector<8x128xf32> to vector<8xf32>
    %120 = vector.shape_cast %119 : vector<8xf32> to vector<8x1xf32>
    %121 = math.log %120 : vector<8x1xf32>
    %122 = arith.addf %111, %121 : vector<8x1xf32>
    %123 = vector.broadcast %122 : vector<8x1xf32> to vector<8x128xf32>
    %124 = arith.subf %11, %123 : vector<8x128xf32>
    %cst_31 = arith.constant 0.000000e+00 : f32
    %125 = vector.shape_cast %105 : vector<1x128xi1> to vector<1x128xi1>
    %126 = vector.broadcast %125 : vector<1x128xi1> to vector<8x128xi1>
    %127 = vector.broadcast %cst_31 : f32 to vector<8x128xf32>
    %128 = arith.select %126, %124, %127 : vector<8x128xi1>, vector<8x128xf32>
    %129 = arith.addf %100, %128 : vector<8x128xf32>
    %c0_32 = arith.constant 0 : index
    %c0_33 = arith.constant 0 : index
    %130 = vector.load %arg5[%c0_32, %c0_33] : memref<8x128xf32, #tpu.memory_space<vmem>>, vector<8x128xf32>
    tpu.vector_store %arg5[%c0_32, %c0_33], %129 {strides = array<i32>} : memref<8x128xf32, #tpu.memory_space<vmem>>, vector<8x128xf32>,
    return
  }
  func.func @transform_0(%arg0: i32) -> (i32, i32) {
    %c0_i32 = arith.constant 0 : i32
    %c0_i32_0 = arith.constant 0 : i32
    return %arg0, %c0_i32 : i32, i32
  }
  func.func @transform_1(%arg0: i32) -> (i32, i32) {
    %c0_i32 = arith.constant 0 : i32
    %c0_i32_0 = arith.constant 0 : i32
    return %arg0, %c0_i32 : i32, i32
  }
  func.func @transform_2(%arg0: i32) -> (i32, i32) {
    %c0_i32 = arith.constant 0 : i32
    %c0_i32_0 = arith.constant 0 : i32
    %c0_i32_1 = arith.constant 0 : i32
    return %c0_i32, %c0_i32_0 : i32, i32
  }
  func.func @transform_3(%arg0: i32) -> (i32, i32) {
    %c0_i32 = arith.constant 0 : i32
    %c0_i32_0 = arith.constant 0 : i32
    %c0_i32_1 = arith.constant 0 : i32
    return %c0_i32, %c0_i32_0 : i32, i32
  }
  func.func @transform_4(%arg0: i32) -> (i32, i32) {
    %c0_i32 = arith.constant 0 : i32
    %c0_i32_0 = arith.constant 0 : i32
    return %arg0, %c0_i32 : i32, i32
  }
}

</mosaic_0001>

<bundles_post_ra>
// kernel: net_forward.5
= control target key start
LH: loop header
LB: loop body
LE: loop exit
PB: predicated region body
PF: predicated region fallthrough
CT: control target
= control target key end

     0   :  { %9 = vsyncpa [#allocation3], 0  ;;  %s726_s0 = inlined_call_operand.hbm [shape: f32[8,256], index: 0, kind: input, shape index: {}]   ;;  %s727_s1 = inlined_call_operand.hbm [shape: f32[8,256], index: 1, kind: input, shape index: {}]   ;;  %s728_s2 = inlined_call_operand.hbm [shape: f32[2,256], index: 2, kind: input, shape index: {}]   ;;  %s729_s3 = inlined_call_operand.hbm [shape: bf16[256,128], index: 3, kind: input, shape index: {}]   ;;  %s730_s4 = inlined_call_operand.hbm [shape: f32[8,128], index: 4, kind: output, shape index: {}]  }
   0x1   :  { %10 = vsyncpa [#allocation6], 0 }
   0x2   :  { %11 = vsyncpa [#allocation9], 0 }
   0x3   :  { %12 = vsyncpa [#allocation4], 0  ;;  %s568_s15 = smov [#allocation5]   ;;  %s569_s17 = smov [#allocation2]  }
   0x4   :  { %s29_s16 = sshll.u32 %s568_s15, 4  ;;  %s19_s18 = sshll.u32 %s569_s17, 4  ;;  %s30_s16 = int_to_ptr.vmem [resolvable:$true] %s29_s16  ;;  %s20_s18 = int_to_ptr.vmem [resolvable:$true] %s19_s18 }
   0x5   :  { %s450_s21 = scalar_lea.hbm %s727_s1, 256 }
   0x6   :  { %p451_p0 = scmp.ne.s32.totalorder %s727_s1, %s450_s21  ;;  %p454_p1 = scmp.lt.u32.totalorder %s450_s21, %s727_s1 }
   0x8   :  { %p456_p2 = pnand %p454_p1, %p451_p0 }
   0xa   :  { %459 = shalt.err (!%p456_p2)
}
   0xb   :  { %s460_s26 = scalar_lea.vmem %s30_s16, 256  ;;  %p465_p4 = scmp.lt.s32.totalorder %s30_s16, %s30_s16 }
   0xc   :  { %p461_p3 = scmp.ne.s32.totalorder %s30_s16, %s460_s26  ;;  %p466_p5 = scmp.lt.s32.totalorder %s460_s26, %s460_s26 }
   0xe   :  { %p467_p6 = por %p466_p5, %p465_p4 }
  0x10   :  { %p468_p7 = pnand %p467_p6, %p461_p3 }
  0x12   :  { %471 = shalt.err (!%p468_p7)
}
  0x13   :  { %32 = dma.hbm_to_vmem [thread:$0]  %s727_s1, 256, %s30_s16, [#allocation6]  }
  0x14   :  { %s472_s5 = scalar_lea.hbm %s726_s0, 256 }
  0x15   :  { %p473_p8 = scmp.ne.s32.totalorder %s726_s0, %s472_s5  ;;  %p476_p9 = scmp.lt.u32.totalorder %s472_s5, %s726_s0 }
  0x17   :  { %p478_p10 = pnand %p476_p9, %p473_p8 }
  0x19   :  { %481 = shalt.err (!%p478_p10)
}
  0x1a   :  { %s482_s10 = scalar_lea.vmem %s20_s18, 256  ;;  %p487_p12 = scmp.lt.s32.totalorder %s20_s18, %s20_s18 }
  0x1b   :  { %p483_p11 = scmp.ne.s32.totalorder %s20_s18, %s482_s10  ;;  %p488_p13 = scmp.lt.s32.totalorder %s482_s10, %s482_s10 }
  0x1d   :  { %p489_p0 = por %p488_p13, %p487_p12 }
  0x1f   :  { %p490_p1 = pnand %p489_p0, %p483_p11 }
  0x21   :  { %493 = shalt.err (!%p490_p1)
}
  0x22   :  { %22 = dma.hbm_to_vmem [thread:$0]  %s726_s0, 256, %s20_s18, [#allocation3]  }
  0x23   :  { %s570_s12 = smov [#allocation7]   ;;  %s571_s14 = smov [#allocation8]  }
  0x24   :  { %s39_s13 = sshll.u32 %s570_s12, 4  ;;  %s48_s15 = sshll.u32 %s571_s14, 4  ;;  %s40_s13 = int_to_ptr.vmem [resolvable:$true] %s39_s13  ;;  %s624_s15 = int_to_ptr.vmem [resolvable:$true] %s48_s15 }
  0x25   :  { %s494_s19 = scalar_lea.hbm %s728_s2, 64 }
  0x26   :  { %p495_p2 = scmp.ne.s32.totalorder %s728_s2, %s494_s19  ;;  %p498_p3 = scmp.lt.u32.totalorder %s494_s19, %s728_s2 }
  0x28   :  { %p500_p4 = pnand %p498_p3, %p495_p2 }
  0x2a   :  { %503 = shalt.err (!%p500_p4)
}
  0x2b   :  { %s504_s0 = scalar_lea.vmem %s40_s13, 64  ;;  %p509_p6 = scmp.lt.s32.totalorder %s40_s13, %s40_s13 }
  0x2c   :  { %p505_p5 = scmp.ne.s32.totalorder %s40_s13, %s504_s0  ;;  %p510_p7 = scmp.lt.s32.totalorder %s504_s0, %s504_s0 }
  0x2e   :  { %p511_p8 = por %p510_p7, %p509_p6 }
  0x30   :  { %p512_p9 = pnand %p511_p8, %p505_p5 }
  0x32   :  { %515 = shalt.err (!%p512_p9)
}
  0x33   :  { %42 = dma.hbm_to_vmem [thread:$0]  %s728_s2, 64, %s40_s13, [#allocation6]  }
  0x34   :  { %s516_s27 = scalar_lea.hbm %s729_s3, 2048 }
  0x35   :  { %p517_p10 = scmp.ne.s32.totalorder %s729_s3, %s516_s27  ;;  %p520_p11 = scmp.lt.u32.totalorder %s516_s27, %s729_s3 }
  0x37   :  { %p522_p12 = pnand %p520_p11, %p517_p10 }
  0x39   :  { %525 = shalt.err (!%p522_p12)
}
  0x3a   :  { %s526_s6 = scalar_lea.vmem %s624_s15, 2048  ;;  %p531_p0 = scmp.lt.s32.totalorder %s624_s15, %s624_s15 }
  0x3b   :  { %p527_p13 = scmp.ne.s32.totalorder %s624_s15, %s526_s6  ;;  %p532_p1 = scmp.lt.s32.totalorder %s526_s6, %s526_s6 }
  0x3d   :  { %p533_p2 = por %p532_p1, %p531_p0 }
  0x3f   :  { %p534_p3 = pnand %p533_p2, %p527_p13 }
  0x41   :  { %537 = shalt.err (!%p534_p3)
}
  0x42   :  { %s572_s2 = smov 64   ;;  %s573_s7 = smov 4  }
  0x43   :  { %54 = dma.hbm_to_vmem [thread:$0]  %s729_s3, 2048, %s624_s15, [#allocation9], %s572_s2, %s572_s2, %s573_s7  }
  0x44   :  { %560 = dma.done.wait [#allocation3], 256  }
  0x45   :  { %561 = vsyncadd [#allocation3], 4294967040 }
  0x46   :  { %562 = dma.done.wait [#allocation6], 320  }
  0x47   :  { %563 = vsyncadd [#allocation6], 4294966976 }
  0x48   :  { %564 = dma.done.wait [#allocation9], 2048  }
  0x49   :  { %565 = vsyncadd [#allocation9], 4294965248  ;;  %v418_v0 = vld [vmem:[#allocation8 + $0x40] sm:$0xff]   ;;  %v420_v2 = vld [vmem:[#allocation8 + $0x48] sm:$0xff]   ;;  %v74_v5 = vlaneseq  ;;  %s574_s3 = smov [#allocation10]  }
  0x4a   :  { %v419_v1 = vld [vmem:[#allocation8] sm:$0xff]   ;;  %389 = vmatprep.subr.bf16.mxu0 %v418_v0  ;;  %v421_v3 = vld [vmem:[#allocation8 + $0x8] sm:$0xff]   ;;  %v422_v4 = vld [vmem:[#allocation8 + $0x50] sm:$0xff]   ;;  %s362_s10 = sshll.u32 %s574_s3, 4  ;;  %s363_s10 = int_to_ptr.vmem [resolvable:$true] %s362_s10 }
  0x4b   :  { %390 = vmatpush3.bf16.msra.mxu0 %v419_v1  ;;  %v423_v6 = vld [vmem:[#allocation8 + $0x10] sm:$0xff]   ;;  %v424_v7 = vld [vmem:[#allocation8 + $0x58] sm:$0xff]   ;;  %v75_v8 = vshrl.u32 %v74_v5, 7  ;;  %v426_v10 = vld [vmem:[#allocation8 + $0x60] sm:$0xff]   ;;  %v655_v38 = vand.u32 127, %v74_v5  ;;  %s538_s1 = scalar_lea.vmem %s363_s10, 128  ;;  %p543_p5 = scmp.lt.s32.totalorder %s363_s10, %s363_s10 }
  0x4c   :  { %391 = vmatprep.subr.bf16.mxu0 %v420_v2  ;;  %v425_v9 = vld [vmem:[#allocation8 + $0x18] sm:$0xff]   ;;  %v427_v13 = vld [vmem:[#allocation8 + $0x20] sm:$0xff]   ;;  %v428_v14 = vld [vmem:[#allocation8 + $0x68] sm:$0xff]   ;;  %p539_p4 = scmp.ne.s32.totalorder %s363_s10, %s538_s1  ;;  %p544_p6 = scmp.lt.s32.totalorder %s538_s1, %s538_s1 }
  0x4d   :  { %v76_v11 = vsub.s32 0, %v75_v8  ;;  %v80_v12 = vsub.s32 1, %v75_v8  ;;  %v71_v15 = vld [vmem:[#allocation5 + $0x8] sm:$0xff]  ;;  %v72_v16 = vld [vmem:[#allocation7] ss:$2 sm:$0x3] }
  0x4e   :  { %v89_v19 = vld [vmem:[#allocation7 + $0x1] ss:$2 sm:$0x3]  ;;  %v70_v20 = vld [vmem:[#allocation5] sm:$0xff]  ;;  %v69_v21 = vld [vmem:[#allocation2 + $0x8] sm:$0xff]  ;;  %vm315_vm0 = vcmp.ge.s32.totalorder %v655_v38, 10  ;;  %p545_p7 = por %p544_p6, %p543_p5 }
  0x4f   :  { %392 = vmatpush3.bf16.msra.mxu0 %v421_v3  ;;  %v77_v17 = vrot.slane %v72_v16, %v76_v11  ;;  %v81_v18 = vrot.slane %v72_v16, %v80_v12  ;;  %v429_v22 = vld [vmem:[#allocation8 + $0x28] sm:$0xff]   ;;  %v98_v24 = vrot.slane %v89_v19, %v80_v12  ;;  %v68_v25 = vld [vmem:[#allocation2] sm:$0xff]  ;;  %v430_v27 = vld [vmem:[#allocation8 + $0x70] sm:$0xff]   ;;  %v94_v29 = vrot.slane %v89_v19, %v76_v11 }
  0x50   :  { %393 = vmatprep.subr.bf16.mxu0 %v422_v4  ;;  %v431_v31 = vld [vmem:[#allocation8 + $0x30] sm:$0xff]   ;;  %v432_v33 = vld [vmem:[#allocation8 + $0x78] sm:$0xff]   ;;  %vm316_vm1 = vcmp.lt.s32.totalorder %v655_v38, 13  ;;  %vm276_vm3 = vcmp.lt.s32.totalorder %v655_v38, 4  ;;  %vm335_vm4 = vcmp.ge.s32.totalorder %v655_v38, 13  ;;  %vm336_vm5 = vcmp.lt.s32.totalorder %v655_v38, 18  ;;  %p546_p8 = pnand %p545_p7, %p539_p4 }
  0x51   :  { %v85_v23 = vmul.f32 %v81_v18, %v71_v15  ;;  %v84_v26 = vmul.f32 %v77_v17, %v70_v20  ;;  %v433_v36 = vld [vmem:[#allocation8 + $0x38] sm:$0xff]   ;;  %vm659_vm2 = vmand %vm315_vm0, %vm316_vm1  ;;  %vm295_vm6 = vcmp.ge.s32.totalorder %v655_v38, 4  ;;  %vm296_vm7 = vcmp.lt.s32.totalorder %v655_v38, 10 }
  0x52   :  { %vm676_vm8 = vmand %vm335_vm4, %vm336_vm5 }
  0x53   :  { %394 = vmatpush3.bf16.msra.mxu0 %v423_v6  ;;  %v87_v28 = vadd.f32 %v85_v23, %v69_v21  ;;  %v86_v30 = vadd.f32 %v84_v26, %v68_v25  ;;  %vm680_vm9 = vmand %vm295_vm6, %vm296_vm7 }
  0x54   :  { %395 = vmatprep.subr.bf16.mxu0 %v424_v7 }
  0x55   :  { %v102_v32 = vadd.f32 %v98_v24, %v87_v28  ;;  %v101_v35 = vadd.f32 %v94_v29, %v86_v30 }
  0x57   :  { %396 = vmatpush3.bf16.msra.mxu0 %v425_v9  ;;  %v104_v34 = vpack.c.bf16 %v102_v32, %v102_v32  ;;  %v103_v37 = vpack.c.bf16 %v101_v35, %v101_v35 }
  0x58   :  { %397 = vmatprep.subr.bf16.mxu0 %v426_v10 }
  0x59   :  { %265 = vmatprep.mubr.bf16.mxu0 %v104_v34 }
  0x5b   :  { %398 = vmatpush3.bf16.msra.mxu0 %v427_v13 }
  0x5c   :  { %399 = vmatprep.subr.bf16.mxu0 %v428_v14 }
  0x5f   :  { %400 = vmatpush3.bf16.msra.mxu0 %v429_v22 }
  0x60   :  { %401 = vmatprep.subr.bf16.mxu0 %v430_v27 }
  0x63   :  { %402 = vmatpush3.bf16.msra.mxu0 %v431_v31 }
  0x64   :  { %403 = vmatprep.subr.bf16.mxu0 %v432_v33 }
  0x67   :  { %404 = vmatpush3.bf16.msra.mxu0 %v433_v36 }
  0x6a   :  { %266 = vmatmul.mubr.bf16.vlgmr.msra.gmra.mrb[0].mxu0 %v103_v37 }
 0x13d   :  { %v405_v39 = vpop.f32.mrb[0].mxu0 }
 0x13e   :  { %v406_v40 = vpop.f32.mrb[1].mxu0 }
 0x13f   :  { %v666_v42 = vadd.f32 %v406_v40, %v405_v39  ;;  %v408_v43 = vpop.f32.mrb[2].mxu0 }
 0x140   :  { %v409_v44 = vpop.f32.mrb[3].mxu0 }
 0x141   :  { %v320_v45 = vsel %vm659_vm2, %v666_v42, -1e+30  ;;  %v280_v46 = vsel %vm276_vm3, %v666_v42, -1e+30  ;;  %v340_v49 = vsel %vm676_vm8, %v666_v42, -1e+30 }
 0x142   :  { %321 = vmax.xlane.f32.xlu1 %v320_v45  ;;  %281 = vmax.xlane.f32.xlu0 %v280_v46  ;;  %v300_v50 = vsel %vm680_vm9, %v666_v42, -1e+30 }
 0x146   :  { %341 = vmax.xlane.f32.xlu1 %v340_v49  ;;  %301 = vmax.xlane.f32.xlu0 %v300_v50 }
 0x1cf   :  { %v322_v51 = vpop.xlane.xlu1 %321  ;;  %v282_v52 = vpop.xlane.xlu0 %281 }
 0x1d0   :  { %v323_v53 = vsub.f32 %v666_v42, %v322_v51  ;;  %v283_v54 = vsub.f32 %v666_v42, %v282_v52 }
 0x1d2   :  { %v284_v55 = vmul.f32 1.442695, %v283_v54  ;;  %v324_v56 = vmul.f32 1.442695, %v323_v53 }
 0x1d3   :  { %v342_v57 = vpop.xlane.xlu1 %341  ;;  %v302_v58 = vpop.xlane.xlu0 %301 }
 0x1d4   :  { %v343_v59 = vsub.f32 %v666_v42, %v342_v57  ;;  %v303_v60 = vsub.f32 %v666_v42, %v302_v58  ;;  %434 = vpow2.f32 %v284_v55 }
 0x1d5   :  { %436 = vpow2.f32 %v324_v56 }
 0x1d6   :  { %v304_v61 = vmul.f32 1.442695, %v303_v60  ;;  %v344_v62 = vmul.f32 1.442695, %v343_v59 }
 0x1d8   :  { %438 = vpow2.f32 %v304_v61 }
 0x1d9   :  { %440 = vpow2.f32 %v344_v62 }
 0x1de   :  { %v435_v63 = vpop.eup %434 }
 0x1df   :  { %v286_v0 = vsel %vm276_vm3, %v435_v63, 0.0  ;;  %v437_v1 = vpop.eup %436 }
 0x1e0   :  { %287 = vadd.xlane.f32.xlu0 %v286_v0  ;;  %v326_v3 = vsel %vm659_vm2, %v437_v1, 0.0 }
 0x1e2   :  { %v439_v2 = vpop.eup %438 }
 0x1e3   :  { %v306_v4 = vsel %vm680_vm9, %v439_v2, 0.0  ;;  %v441_v5 = vpop.eup %440 }
 0x1e4   :  { %327 = vadd.xlane.f32.xlu0 %v326_v3  ;;  %307 = vadd.xlane.f32.xlu1 %v306_v4  ;;  %v346_v6 = vsel %vm676_vm8, %v441_v5, 0.0 }
 0x1e8   :  { %347 = vadd.xlane.f32.xlu1 %v346_v6 }
 0x26d   :  { %v288_v7 = vpop.xlane.xlu0 %287 }
 0x26e   :  { %442 = vlog2.f32 %v288_v7 }
 0x271   :  { %v308_v8 = vpop.xlane.xlu1 %307  ;;  %v328_v9 = vpop.xlane.xlu0 %327 }
 0x272   :  { %444 = vlog2.f32 %v308_v8 }
 0x273   :  { %446 = vlog2.f32 %v328_v9 }
 0x275   :  { %v348_v10 = vpop.xlane.xlu1 %347 }
 0x276   :  { %448 = vlog2.f32 %v348_v10 }
 0x278   :  { %v443_v11 = vpop.eup %442 }
 0x279   :  { %v290_v12 = vmul.f32 0.6931472, %v443_v11 }
 0x27b   :  { %v291_v13 = vadd.f32 %v290_v12, %v282_v52 }
 0x27c   :  { %v445_v14 = vpop.eup %444 }
 0x27d   :  { %v447_v15 = vpop.eup %446  ;;  %v310_v16 = vmul.f32 0.6931472, %v445_v14  ;;  %v292_v18 = vsub.f32 %v666_v42, %v291_v13 }
 0x27e   :  { %v330_v17 = vmul.f32 0.6931472, %v447_v15 }
 0x27f   :  { %v311_v19 = vadd.f32 %v310_v16, %v302_v58  ;;  %v293_v26 = vsel %vm276_vm3, %v292_v18, 0.0 }
 0x280   :  { %v449_v20 = vpop.eup %448  ;;  %v331_v21 = vadd.f32 %v330_v17, %v322_v51 }
 0x281   :  { %v312_v22 = vsub.f32 %v666_v42, %v311_v19  ;;  %v350_v23 = vmul.f32 0.6931472, %v449_v20 }
 0x282   :  { %v332_v24 = vsub.f32 %v666_v42, %v331_v21 }
 0x283   :  { %v351_v25 = vadd.f32 %v350_v23, %v342_v57  ;;  %v313_v27 = vsel %vm680_vm9, %v312_v22, 0.0 }
 0x284   :  { %v314_v28 = vadd.f32 %v313_v27, %v293_v26  ;;  %v333_v30 = vsel %vm659_vm2, %v332_v24, 0.0 }
 0x285   :  { %v352_v29 = vsub.f32 %v666_v42, %v351_v25 }
 0x286   :  { %v334_v31 = vadd.f32 %v333_v30, %v314_v28 }
 0x287   :  { %v353_v32 = vsel %vm676_vm8, %v352_v29, 0.0 }
 0x288   :  { %v354_v33 = vadd.f32 %v353_v32, %v334_v31 }
 0x28a   :  { %355 = vst [vmem:[#allocation10] sm:$0xff] %v354_v33 }
 0x28b   :  { %549 = shalt.err (!%p546_p8)
}
 0x28c   :  { %s550_s13 = scalar_lea.hbm %s730_s4, 128 }
 0x28d   :  { %p551_p9 = scmp.ne.s32.totalorder %s730_s4, %s550_s13  ;;  %p554_p10 = scmp.lt.u32.totalorder %s550_s13, %s730_s4 }
 0x28f   :  { %p556_p11 = pnand %p554_p10, %p551_p9 }
 0x291   :  { %559 = shalt.err (!%p556_p11)
}
 0x292   :  { %365 = dma.vmem_to_hbm [thread:$0]  %s363_s10, 128, %s730_s4, [#allocation4]  }
 0x293   :  { %566 = dma.done.wait [#allocation4], 128  }
 0x294   :  { %567 = vsyncadd [#allocation4], 4294967168 }
 0x295   :  { %369 = vsyncpa [#allocation3], 1 }
 0x296   :  { %370 = vsyncpa [#allocation6], 1 }
 0x297   :  { %371 = vsyncpa [#allocation9], 1 }
 0x298   :  { %372 = vsyncpa [#allocation4], 1 }

// kernel: net_forward.3
= control target key start
LH: loop header
LB: loop body
LE: loop exit
PB: predicated region body
PF: predicated region fallthrough
CT: control target
= control target key end

     0   :  { %14 = vsyncpa [#allocation3], 0  ;;  %s2787_s0 = inlined_call_operand.hbm [shape: f32[8,128], index: 0, kind: input, shape index: {}]   ;;  %s2788_s1 = inlined_call_operand.hbm [shape: bf16[8,2048], index: 1, kind: input, shape index: {}]   ;;  %s2789_s2 = inlined_call_operand.hbm [shape: bf16[128,128], index: 2, kind: input, shape index: {}]   ;;  %s2790_s3 = inlined_call_operand.hbm [shape: bf16[128,128], index: 3, kind: input, shape index: {}]   ;;  %s2791_s4 = inlined_call_operand.hbm [shape: bf16[2048,128], index: 4, kind: input, shape index: {}]   ;;  %s2792_s5 = inlined_call_operand.hbm [shape: f32[2,128], index: 5, kind: input, shape index: {}]   ;;  %s2793_s6 = inlined_call_operand.hbm [shape: f32[8,128], index: 6, kind: output, shape index: {0}]   ;;  %s2794_s7 = inlined_call_operand.hbm [shape: f32[8,128], index: 7, kind: output, shape index: {1}]   ;;  %s2795_s8 = inlined_call_operand.hbm [shape: f32[1,8,128], index: 8, kind: output, shape index: {2}]  }
   0x1   :  { %15 = vsyncpa [#allocation6], 0 }
   0x2   :  { %16 = vsyncpa [#allocation9], 0 }
   0x3   :  { %17 = vsyncpa [#allocation12], 0 }
   0x4   :  { %18 = vsyncpa [#allocation4], 0 }
   0x5   :  { %19 = vsyncpa [#allocation15], 0  ;;  %s2600_s27 = smov [#allocation5]   ;;  %s2390_s9 = scalar_lea.hbm %s2788_s1, 1024 }
   0x6   :  { %s36_s28 = sshll.u32 %s2600_s27, 4  ;;  %p2391_p0 = scmp.ne.s32.totalorder %s2788_s1, %s2390_s9  ;;  %s37_s28 = int_to_ptr.vmem [resolvable:$true] %s36_s28 }
   0x7   :  { %p2394_p1 = scmp.lt.u32.totalorder %s2390_s9, %s2788_s1 }
   0x9   :  { %p2396_p2 = pnand %p2394_p1, %p2391_p0 }
   0xb   :  { %2399 = shalt.err (!%p2396_p2)
}
   0xc   :  { %s2400_s14 = scalar_lea.vmem %s37_s28, 1024  ;;  %p2405_p4 = scmp.lt.s32.totalorder %s37_s28, %s37_s28 }
   0xd   :  { %p2401_p3 = scmp.ne.s32.totalorder %s37_s28, %s2400_s14  ;;  %p2406_p5 = scmp.lt.s32.totalorder %s2400_s14, %s2400_s14 }
   0xf   :  { %p2407_p6 = por %p2406_p5, %p2405_p4 }
  0x11   :  { %p2408_p7 = pnand %p2407_p6, %p2401_p3 }
  0x13   :  { %2411 = shalt.err (!%p2408_p7)
}
  0x14   :  { %39 = dma.hbm_to_vmem [thread:$0]  %s2788_s1, 1024, %s37_s28, [#allocation6]  }
  0x15   :  { %s2601_s17 = smov [#allocation8]   ;;  %s2602_s19 = smov [#allocation2]  }
  0x16   :  { %s57_s18 = sshll.u32 %s2601_s17, 4  ;;  %s26_s20 = sshll.u32 %s2602_s19, 4  ;;  %s58_s18 = int_to_ptr.vmem [resolvable:$true] %s57_s18  ;;  %s27_s20 = int_to_ptr.vmem [resolvable:$true] %s26_s20 }
  0x17   :  { %s2412_s23 = scalar_lea.hbm %s2790_s3, 1024 }
  0x18   :  { %p2413_p8 = scmp.ne.s32.totalorder %s2790_s3, %s2412_s23  ;;  %p2416_p9 = scmp.lt.u32.totalorder %s2412_s23, %s2790_s3 }
  0x1a   :  { %p2418_p10 = pnand %p2416_p9, %p2413_p8 }
  0x1c   :  { %2421 = shalt.err (!%p2418_p10)
}
  0x1d   :  { %s2422_s1 = scalar_lea.vmem %s58_s18, 1024  ;;  %p2427_p12 = scmp.lt.s32.totalorder %s58_s18, %s58_s18 }
  0x1e   :  { %p2423_p11 = scmp.ne.s32.totalorder %s58_s18, %s2422_s1  ;;  %p2428_p13 = scmp.lt.s32.totalorder %s2422_s1, %s2422_s1 }
  0x20   :  { %p2429_p0 = por %p2428_p13, %p2427_p12 }
  0x22   :  { %p2430_p1 = pnand %p2429_p0, %p2423_p11 }
  0x24   :  { %2433 = shalt.err (!%p2430_p1)
}
  0x25   :  { %s2603_s28 = smov 64   ;;  %s2604_s29 = smov 4  }
  0x26   :  { %63 = dma.hbm_to_vmem [thread:$0]  %s2790_s3, 1024, %s58_s18, [#allocation9], %s2603_s28, %s2603_s28, %s2604_s29  }
  0x27   :  { %s2434_s12 = scalar_lea.hbm %s2787_s0, 128 }
  0x28   :  { %p2435_p2 = scmp.ne.s32.totalorder %s2787_s0, %s2434_s12  ;;  %p2438_p3 = scmp.lt.u32.totalorder %s2434_s12, %s2787_s0 }
  0x2a   :  { %p2440_p4 = pnand %p2438_p3, %p2435_p2 }
  0x2c   :  { %2443 = shalt.err (!%p2440_p4)
}
  0x2d   :  { %s2444_s17 = scalar_lea.vmem %s27_s20, 128  ;;  %p2449_p6 = scmp.lt.s32.totalorder %s27_s20, %s27_s20 }
  0x2e   :  { %p2445_p5 = scmp.ne.s32.totalorder %s27_s20, %s2444_s17  ;;  %p2450_p7 = scmp.lt.s32.totalorder %s2444_s17, %s2444_s17 }
  0x30   :  { %p2451_p8 = por %p2450_p7, %p2449_p6 }
  0x32   :  { %p2452_p9 = pnand %p2451_p8, %p2445_p5 }
  0x34   :  { %2455 = shalt.err (!%p2452_p9)
}
  0x35   :  { %29 = dma.hbm_to_vmem [thread:$0]  %s2787_s0, 128, %s27_s20, [#allocation3]  }
  0x36   :  { %s2605_s19 = smov [#allocation7]   ;;  %s2606_s22 = smov [#allocation10]  }
  0x37   :  { %s45_s21 = sshll.u32 %s2605_s19, 4  ;;  %s69_s23 = sshll.u32 %s2606_s22, 4  ;;  %s46_s21 = int_to_ptr.vmem [resolvable:$true] %s45_s21  ;;  %s70_s23 = int_to_ptr.vmem [resolvable:$true] %s69_s23 }
  0x38   :  { %s2456_s26 = scalar_lea.hbm %s2789_s2, 1024 }
  0x39   :  { %p2457_p10 = scmp.ne.s32.totalorder %s2789_s2, %s2456_s26  ;;  %p2460_p11 = scmp.lt.u32.totalorder %s2456_s26, %s2789_s2 }
  0x3b   :  { %p2462_p12 = pnand %p2460_p11, %p2457_p10 }
  0x3d   :  { %2465 = shalt.err (!%p2462_p12)
}
  0x3e   :  { %s2466_s0 = scalar_lea.vmem %s46_s21, 1024  ;;  %p2471_p0 = scmp.lt.s32.totalorder %s46_s21, %s46_s21 }
  0x3f   :  { %p2467_p13 = scmp.ne.s32.totalorder %s46_s21, %s2466_s0  ;;  %p2472_p1 = scmp.lt.s32.totalorder %s2466_s0, %s2466_s0 }
  0x41   :  { %p2473_p2 = por %p2472_p1, %p2471_p0 }
  0x43   :  { %p2474_p3 = pnand %p2473_p2, %p2467_p13 }
  0x45   :  { %2477 = shalt.err (!%p2474_p3)
}
  0x46   :  { %51 = dma.hbm_to_vmem [thread:$0]  %s2789_s2, 1024, %s46_s21, [#allocation6], %s2603_s28, %s2603_s28, %s2604_s29  }
  0x47   :  { %s2478_s13 = scalar_lea.hbm %s2791_s4, 16384 }
  0x48   :  { %p2479_p4 = scmp.ne.s32.totalorder %s2791_s4, %s2478_s13  ;;  %p2482_p5 = scmp.lt.u32.totalorder %s2478_s13, %s2791_s4 }
  0x4a   :  { %p2484_p6 = pnand %p2482_p5, %p2479_p4 }
  0x4c   :  { %2487 = shalt.err (!%p2484_p6)
}
  0x4d   :  { %s2488_s3 = scalar_lea.vmem %s70_s23, 16384  ;;  %p2493_p8 = scmp.lt.s32.totalorder %s70_s23, %s70_s23 }
  0x4e   :  { %p2489_p7 = scmp.ne.s32.totalorder %s70_s23, %s2488_s3  ;;  %p2494_p9 = scmp.lt.s32.totalorder %s2488_s3, %s2488_s3 }
  0x50   :  { %p2495_p10 = por %p2494_p9, %p2493_p8 }
  0x52   :  { %p2496_p11 = pnand %p2495_p10, %p2489_p7 }
  0x54   :  { %2499 = shalt.err (!%p2496_p11)
}
  0x55   :  { %75 = dma.hbm_to_vmem [thread:$0]  %s2791_s4, 16384, %s70_s23, [#allocation9], %s2603_s28, %s2603_s28, %s2604_s29  }
  0x56   :  { %s2607_s19 = smov [#allocation11]   ;;  %s2500_s25 = scalar_lea.hbm %s2792_s5, 32 }
  0x57   :  { %s82_s21 = sshll.u32 %s2607_s19, 4  ;;  %p2501_p12 = scmp.ne.s32.totalorder %s2792_s5, %s2500_s25  ;;  %s83_s21 = int_to_ptr.vmem [resolvable:$true] %s82_s21 }
  0x58   :  { %p2504_p13 = scmp.lt.u32.totalorder %s2500_s25, %s2792_s5 }
  0x5a   :  { %p2506_p0 = pnand %p2504_p13, %p2501_p12 }
  0x5c   :  { %2509 = shalt.err (!%p2506_p0)
}
  0x5d   :  { %s2510_s9 = scalar_lea.vmem %s83_s21, 32  ;;  %p2515_p2 = scmp.lt.s32.totalorder %s83_s21, %s83_s21 }
  0x5e   :  { %p2511_p1 = scmp.ne.s32.totalorder %s83_s21, %s2510_s9  ;;  %p2516_p3 = scmp.lt.s32.totalorder %s2510_s9, %s2510_s9 }
  0x60   :  { %p2517_p4 = por %p2516_p3, %p2515_p2 }
  0x62   :  { %p2518_p5 = pnand %p2517_p4, %p2511_p1 }
  0x64   :  { %2521 = shalt.err (!%p2518_p5)
}
  0x65   :  { %85 = dma.hbm_to_vmem [thread:$0]  %s2792_s5, 32, %s83_s21, [#allocation12]  }
  0x66   :  { %2588 = dma.done.wait [#allocation3], 128  }
  0x67   :  { %2589 = vsyncadd [#allocation3], 4294967168 }
  0x68   :  { %2590 = dma.done.wait [#allocation6], 2048  }
  0x69   :  { %2591 = vsyncadd [#allocation6], 4294965248 }
  0x6a   :  { %2592 = dma.done.wait [#allocation9], 17408  }
  0x6b   :  { %2593 = vsyncadd [#allocation9], 4294949888 }
  0x6c   :  { %2594 = dma.done.wait [#allocation12], 32  }
  0x6d   :  { %2595 = vsyncadd [#allocation12], 4294967264  ;;  %v2608_v0 = vmov 0.0   ;;  %vm2609_vm0 = vmmov 0   ;;  %v2230_v1 = vld [vmem:[#allocation7] sm:$0xff]   ;;  %v2231_v2 = vld [vmem:[#allocation7 + $0x8] sm:$0xff]  }
  0x6e   :  { %2177 = vmatprep.subr.bf16.mxu0 %v2608_v0  ;;  %2193 = vmatprep.mubr.msk.bf16.mxu0 %vm2609_vm0, %v2608_v0  ;;  %v2232_v3 = vld [vmem:[#allocation7 + $0x10] sm:$0xff]   ;;  %v2238_v4 = vld [vmem:[#allocation8] sm:$0xff]   ;;  %v2233_v5 = vld [vmem:[#allocation7 + $0x18] sm:$0xff]   ;;  %s2610_s5 = smov [#allocation13]  }
  0x6f   :  { %2197 = vmatprep.subr.bf16.mxu1 %v2608_v0  ;;  %2213 = vmatprep.mubr.msk.bf16.mxu1 %vm2609_vm0, %v2608_v0  ;;  %v2241_v6 = vld [vmem:[#allocation8 + $0x8] sm:$0xff]   ;;  %v2234_v7 = vld [vmem:[#allocation7 + $0x20] sm:$0xff]   ;;  %v2244_v8 = vld [vmem:[#allocation8 + $0x10] sm:$0xff]   ;;  %s1782_s29 = sshll.u32 %s2610_s5, 4  ;;  %s1783_s29 = int_to_ptr.vmem [resolvable:$true] %s1782_s29 }
  0x70   :  { %2178 = vmatpush3.bf16.msra.mxu0 %v2230_v1  ;;  %2198 = vmatpush3.bf16.msra.mxu1 %v2238_v4  ;;  %v2235_v9 = vld [vmem:[#allocation7 + $0x28] sm:$0xff]   ;;  %v2247_v10 = vld [vmem:[#allocation8 + $0x18] sm:$0xff]   ;;  %v2236_v11 = vld [vmem:[#allocation7 + $0x30] sm:$0xff]   ;;  %s2522_s23 = scalar_lea.vmem %s1783_s29, 128  ;;  %p2527_p7 = scmp.lt.s32.totalorder %s1783_s29, %s1783_s29 }
  0x71   :  { %2179 = vmatprep.subr.bf16.mxu0 %v2608_v0  ;;  %2199 = vmatprep.subr.bf16.mxu1 %v2608_v0  ;;  %v2250_v12 = vld [vmem:[#allocation8 + $0x20] sm:$0xff]   ;;  %v2237_v13 = vld [vmem:[#allocation7 + $0x38] sm:$0xff]   ;;  %v2253_v16 = vld [vmem:[#allocation8 + $0x28] sm:$0xff]   ;;  %p2523_p6 = scmp.ne.s32.totalorder %s1783_s29, %s2522_s23  ;;  %p2528_p8 = scmp.lt.s32.totalorder %s2522_s23, %s2522_s23 }
  0x72   :  { %v105_v14 = vld [vmem:[#allocation2] sm:$0xff]  ;;  %v2239_v15 = vld [vmem:[#allocation10 + $0x40] sm:$0xff]   ;;  %v2242_v19 = vld [vmem:[#allocation10 + $0x48] sm:$0xff]  }
  0x73   :  { %v2240_v17 = vld [vmem:[#allocation10] sm:$0xff]   ;;  %v106_v18 = vpack.c.bf16 %v105_v14, %v105_v14  ;;  %v2256_v20 = vld [vmem:[#allocation8 + $0x30] sm:$0xff]   ;;  %v2243_v21 = vld [vmem:[#allocation10 + $0x8] sm:$0xff]   ;;  %p2529_p9 = por %p2528_p8, %p2527_p7 }
  0x74   :  { %2180 = vmatpush3.bf16.msra.mxu0 %v2231_v2  ;;  %2200 = vmatpush3.bf16.msra.mxu1 %v2241_v6  ;;  %v2245_v22 = vld [vmem:[#allocation10 + $0x50] sm:$0xff]   ;;  %v2248_v24 = vld [vmem:[#allocation10 + $0x58] sm:$0xff]   ;;  %v2251_v26 = vld [vmem:[#allocation10 + $0x60] sm:$0xff]  }
  0x75   :  { %2181 = vmatprep.subr.bf16.mxu0 %v2608_v0  ;;  %2201 = vmatprep.subr.bf16.mxu1 %v2608_v0  ;;  %v2246_v23 = vld [vmem:[#allocation10 + $0x10] sm:$0xff]   ;;  %v2249_v25 = vld [vmem:[#allocation10 + $0x18] sm:$0xff]   ;;  %v2252_v27 = vld [vmem:[#allocation10 + $0x20] sm:$0xff]   ;;  %p2530_p10 = pnand %p2529_p9, %p2523_p6 }
  0x76   :  { %v2254_v28 = vld [vmem:[#allocation10 + $0x68] sm:$0xff]   ;;  %v2257_v30 = vld [vmem:[#allocation10 + $0x70] sm:$0xff]   ;;  %v2259_v32 = vld [vmem:[#allocation8 + $0x38] sm:$0xff]  }
  0x77   :  { %v2255_v29 = vld [vmem:[#allocation10 + $0x28] sm:$0xff]   ;;  %v2258_v31 = vld [vmem:[#allocation10 + $0x30] sm:$0xff]   ;;  %v2260_v33 = vld [vmem:[#allocation10 + $0x78] sm:$0xff]  }
  0x78   :  { %2182 = vmatpush3.bf16.msra.mxu0 %v2232_v3  ;;  %2202 = vmatpush3.bf16.msra.mxu1 %v2244_v8  ;;  %v2261_v34 = vld [vmem:[#allocation10 + $0x38] sm:$0xff]   ;;  %v2262_v35 = vld [vmem:[#allocation10 + $0xc0] sm:$0xff]   ;;  %v2270_v41 = vld [vmem:[#allocation10 + $0x148] sm:$0xff]  }
  0x79   :  { %2183 = vmatprep.subr.bf16.mxu0 %v2608_v0  ;;  %2203 = vmatprep.subr.bf16.mxu1 %v2608_v0  ;;  %v328_v36 = vld [vmem:[#allocation5] sm:$0xff]  ;;  %v2271_v42 = vld [vmem:[#allocation10 + $0x108] sm:$0xff]   ;;  %v2274_v43 = vld [vmem:[#allocation10 + $0x150] sm:$0xff]  }
  0x7a   :  { %v1840_v37 = vcombine.high %v328_v36, %v328_v36  ;;  %v2266_v38 = vld [vmem:[#allocation10 + $0x140] sm:$0xff]   ;;  %v1839_v39 = vcombine.low %v328_v36, %v328_v36  ;;  %v2275_v44 = vld [vmem:[#allocation10 + $0x110] sm:$0xff]   ;;  %v2278_v45 = vld [vmem:[#allocation10 + $0x158] sm:$0xff]  }
  0x7b   :  { %v2267_v40 = vld [vmem:[#allocation10 + $0x100] sm:$0xff]   ;;  %v2279_v46 = vld [vmem:[#allocation10 + $0x118] sm:$0xff]   ;;  %v2286_v49 = vld [vmem:[#allocation10 + $0x168] sm:$0xff]  }
  0x7c   :  { %2184 = vmatpush3.bf16.msra.mxu0 %v2233_v5  ;;  %2204 = vmatpush3.bf16.msra.mxu1 %v2247_v10  ;;  %v2282_v47 = vld [vmem:[#allocation10 + $0x160] sm:$0xff]   ;;  %v2287_v50 = vld [vmem:[#allocation10 + $0x128] sm:$0xff]   ;;  %v2290_v51 = vld [vmem:[#allocation10 + $0x170] sm:$0xff]  }
  0x7d   :  { %2185 = vmatprep.subr.bf16.mxu0 %v2608_v0  ;;  %2205 = vmatprep.subr.bf16.mxu1 %v2608_v0  ;;  %v2283_v48 = vld [vmem:[#allocation10 + $0x120] sm:$0xff]   ;;  %v2291_v52 = vld [vmem:[#allocation10 + $0x130] sm:$0xff]   ;;  %v2294_v53 = vld [vmem:[#allocation10 + $0x178] sm:$0xff]  }
  0x7e   :  { %v2297_v54 = vld [vmem:[#allocation10 + $0x138] sm:$0xff]   ;;  %v330_v55 = vld [vmem:[#allocation5 + $0x10] sm:$0xff]  ;;  %v2302_v58 = vld [vmem:[#allocation10 + $0x240] sm:$0xff]  }
  0x7f   :  { %v1844_v56 = vcombine.high %v330_v55, %v330_v55  ;;  %v1843_v57 = vcombine.low %v330_v55, %v330_v55  ;;  %v2303_v59 = vld [vmem:[#allocation10 + $0x200] sm:$0xff]   ;;  %v2306_v60 = vld [vmem:[#allocation10 + $0x248] sm:$0xff]   ;;  %v2310_v62 = vld [vmem:[#allocation10 + $0x250] sm:$0xff]  }
  0x80   :  { %2186 = vmatpush3.bf16.msra.mxu0 %v2234_v7  ;;  %2206 = vmatpush3.bf16.msra.mxu1 %v2250_v12  ;;  %v2307_v61 = vld [vmem:[#allocation10 + $0x208] sm:$0xff]   ;;  %v2311_v63 = vld [vmem:[#allocation10 + $0x210] sm:$0xff]   ;;  %v2315_v1 = vld [vmem:[#allocation10 + $0x218] sm:$0xff]  }
  0x81   :  { %2187 = vmatprep.subr.bf16.mxu0 %v2608_v0  ;;  %2207 = vmatprep.subr.bf16.mxu1 %v2608_v0  ;;  %v2318_v2 = vld [vmem:[#allocation10 + $0x260] sm:$0xff]   ;;  %v2322_v4 = vld [vmem:[#allocation10 + $0x268] sm:$0xff]   ;;  %v2326_v6 = vld [vmem:[#allocation10 + $0x270] sm:$0xff]  }
  0x82   :  { %v2319_v3 = vld [vmem:[#allocation10 + $0x220] sm:$0xff]   ;;  %v2323_v5 = vld [vmem:[#allocation10 + $0x228] sm:$0xff]   ;;  %v2327_v7 = vld [vmem:[#allocation10 + $0x230] sm:$0xff]  }
  0x83   :  { %v2330_v8 = vld [vmem:[#allocation10 + $0x278] sm:$0xff]   ;;  %v332_v10 = vld [vmem:[#allocation5 + $0x20] sm:$0xff] }
  0x84   :  { %2188 = vmatpush3.bf16.msra.mxu0 %v2235_v9  ;;  %2208 = vmatpush3.bf16.msra.mxu1 %v2253_v16  ;;  %v2333_v9 = vld [vmem:[#allocation10 + $0x238] sm:$0xff]   ;;  %v1847_v12 = vcombine.low %v332_v10, %v332_v10  ;;  %v2339_v14 = vld [vmem:[#allocation10 + $0x300] sm:$0xff]   ;;  %v2343_v16 = vld [vmem:[#allocation10 + $0x308] sm:$0xff]  }
  0x85   :  { %2189 = vmatprep.subr.bf16.mxu0 %v2608_v0  ;;  %2209 = vmatprep.subr.bf16.mxu1 %v2608_v0  ;;  %v2293_v55 = vld [vmem:[#allocation10 + $0xb8] sm:$0xff]  }
  0x88   :  { %2190 = vmatpush3.bf16.msra.mxu0 %v2236_v11  ;;  %2210 = vmatpush3.bf16.msra.mxu1 %v2256_v20  ;;  %v1848_v11 = vcombine.high %v332_v10, %v332_v10  ;;  %v2351_v20 = vld [vmem:[#allocation10 + $0x318] sm:$0xff]  }
  0x89   :  { %2191 = vmatprep.subr.bf16.mxu0 %v2608_v0  ;;  %2211 = vmatprep.subr.bf16.mxu1 %v2608_v0  ;;  %v2314_v0 = vld [vmem:[#allocation10 + $0x258] sm:$0xff]  }
  0x8a   :  { %v2329_v10 = vld [vmem:[#allocation10 + $0x1b8] sm:$0xff]  }
  0x8c   :  { %2192 = vmatpush3.bf16.msra.mxu0 %v2237_v13  ;;  %2212 = vmatpush3.bf16.msra.mxu1 %v2259_v32  ;;  %v2338_v13 = vld [vmem:[#allocation10 + $0x340] sm:$0xff]  }
  0x8d   :  { %2001 = vmatprep.subr.bf16.mxu0 %v2239_v15  ;;  %2023 = vmatprep.subr.bf16.mxu1 %v2262_v35  ;;  %v2342_v15 = vld [vmem:[#allocation10 + $0x348] sm:$0xff]  }
  0x8f   :  { %2194 = vmatmul.mubr.bf16.vlgmr.msra.gmra.mrb[0].mxu0 %v106_v18  ;;  %v2347_v18 = vld [vmem:[#allocation10 + $0x310] sm:$0xff]  }
  0x90   :  { %2002 = vmatpush3.bf16.msra.mxu0 %v2240_v17  ;;  %1453 = vmatprep.mubr.bf16.mxu0 %v1840_v37  ;;  %v2346_v17 = vld [vmem:[#allocation10 + $0x350] sm:$0xff]  }
  0x91   :  { %2003 = vmatprep.subr.bf16.mxu0 %v2242_v19  ;;  %v2350_v19 = vld [vmem:[#allocation10 + $0x358] sm:$0xff]  }
  0x94   :  { %2004 = vmatpush3.bf16.msra.mxu0 %v2243_v21  ;;  %v2354_v21 = vld [vmem:[#allocation10 + $0x360] sm:$0xff]  }
  0x95   :  { %2005 = vmatprep.subr.bf16.mxu0 %v2245_v22  ;;  %v2355_v22 = vld [vmem:[#allocation10 + $0x320] sm:$0xff]  }
  0x98   :  { %2006 = vmatpush3.bf16.msra.mxu0 %v2246_v23  ;;  %v2358_v23 = vld [vmem:[#allocation10 + $0x368] sm:$0xff]  }
  0x99   :  { %2007 = vmatprep.subr.bf16.mxu0 %v2248_v24  ;;  %v2359_v24 = vld [vmem:[#allocation10 + $0x328] sm:$0xff]  }
  0x9c   :  { %2008 = vmatpush3.bf16.msra.mxu0 %v2249_v25  ;;  %v2362_v25 = vld [vmem:[#allocation10 + $0x370] sm:$0xff]  }
  0x9d   :  { %2009 = vmatprep.subr.bf16.mxu0 %v2251_v26  ;;  %v2363_v26 = vld [vmem:[#allocation10 + $0x330] sm:$0xff]  }
  0xa0   :  { %2010 = vmatpush3.bf16.msra.mxu0 %v2252_v27  ;;  %v2366_v27 = vld [vmem:[#allocation10 + $0x378] sm:$0xff]  }
  0xa1   :  { %2011 = vmatprep.subr.bf16.mxu0 %v2254_v28  ;;  %v2369_v28 = vld [vmem:[#allocation10 + $0x338] sm:$0xff]  }
  0xa4   :  { %2012 = vmatpush3.bf16.msra.mxu0 %v2255_v29  ;;  %v334_v29 = vld [vmem:[#allocation5 + $0x30] sm:$0xff] }
  0xa5   :  { %2013 = vmatprep.subr.bf16.mxu0 %v2257_v30  ;;  %v1852_v30 = vcombine.high %v334_v29, %v334_v29 }
  0xa8   :  { %2014 = vmatpush3.bf16.msra.mxu0 %v2258_v31  ;;  %v1851_v31 = vcombine.low %v334_v29, %v334_v29  ;;  %v2365_v29 = vld [vmem:[#allocation10 + $0x2b8] sm:$0xff]  }
  0xa9   :  { %2015 = vmatprep.subr.bf16.mxu0 %v2260_v33  ;;  %v329_v33 = vld [vmem:[#allocation5 + $0x8] sm:$0xff] }
  0xac   :  { %2016 = vmatpush3.bf16.msra.mxu0 %v2261_v34 }
  0xad   :  { %2045 = vmatprep.subr.bf16.mxu0 %v2266_v38 }
  0xaf   :  { %1454 = vmatmul.mubr.bf16.vlgmr.msra.gmra.mrb[4].mxu0 %v1839_v39  ;;  %v2263_v39 = vld [vmem:[#allocation10 + $0x80] sm:$0xff]  }
  0xb0   :  { %2046 = vmatpush3.bf16.msra.mxu0 %v2267_v40  ;;  %1533 = vmatprep.mubr.bf16.mxu0 %v1844_v56  ;;  %v1842_v40 = vcombine.high %v329_v33, %v329_v33  ;;  %v2298_v56 = vld [vmem:[#allocation10 + $0x1c0] sm:$0xff]  }
  0xb1   :  { %2047 = vmatprep.subr.bf16.mxu0 %v2270_v41 }
  0xb4   :  { %2048 = vmatpush3.bf16.msra.mxu0 %v2271_v42  ;;  %v2268_v42 = vld [vmem:[#allocation10 + $0xc8] sm:$0xff]  }
  0xb5   :  { %2049 = vmatprep.subr.bf16.mxu0 %v2274_v43  ;;  %v2269_v43 = vld [vmem:[#allocation10 + $0x88] sm:$0xff]  }
  0xb8   :  { %2050 = vmatpush3.bf16.msra.mxu0 %v2275_v44  ;;  %v2272_v44 = vld [vmem:[#allocation10 + $0xd0] sm:$0xff]  }
  0xb9   :  { %2051 = vmatprep.subr.bf16.mxu0 %v2278_v45  ;;  %v2273_v45 = vld [vmem:[#allocation10 + $0x90] sm:$0xff]  }
  0xbc   :  { %2052 = vmatpush3.bf16.msra.mxu0 %v2279_v46  ;;  %v2276_v46 = vld [vmem:[#allocation10 + $0xd8] sm:$0xff]  }
  0xbd   :  { %2053 = vmatprep.subr.bf16.mxu0 %v2282_v47  ;;  %v2277_v47 = vld [vmem:[#allocation10 + $0x98] sm:$0xff]  }
  0xc0   :  { %2054 = vmatpush3.bf16.msra.mxu0 %v2283_v48  ;;  %v2280_v48 = vld [vmem:[#allocation10 + $0xe0] sm:$0xff]  }
  0xc1   :  { %2055 = vmatprep.subr.bf16.mxu0 %v2286_v49  ;;  %v2281_v49 = vld [vmem:[#allocation10 + $0xa0] sm:$0xff]  }
  0xc4   :  { %2056 = vmatpush3.bf16.msra.mxu0 %v2287_v50  ;;  %v2284_v50 = vld [vmem:[#allocation10 + $0xe8] sm:$0xff]  }
  0xc5   :  { %2057 = vmatprep.subr.bf16.mxu0 %v2290_v51  ;;  %v2285_v51 = vld [vmem:[#allocation10 + $0xa8] sm:$0xff]  }
  0xc8   :  { %2058 = vmatpush3.bf16.msra.mxu0 %v2291_v52  ;;  %v2288_v52 = vld [vmem:[#allocation10 + $0xf0] sm:$0xff]  }
  0xc9   :  { %2059 = vmatprep.subr.bf16.mxu0 %v2294_v53  ;;  %v2289_v53 = vld [vmem:[#allocation10 + $0xb0] sm:$0xff]  }
  0xcc   :  { %2060 = vmatpush3.bf16.msra.mxu0 %v2297_v54  ;;  %v2292_v54 = vld [vmem:[#allocation10 + $0xf8] sm:$0xff]  }
  0xcd   :  { %2089 = vmatprep.subr.bf16.mxu0 %v2302_v58  ;;  %v1841_v58 = vcombine.low %v329_v33, %v329_v33  ;;  %v2373_v33 = vld [vmem:[#allocation10 + $0x380] sm:$0xff]  }
  0xcf   :  { %1534 = vmatmul.mubr.bf16.vlgmr.msra.gmra.mrb[8].mxu0 %v1843_v57  ;;  %v331_v57 = vld [vmem:[#allocation5 + $0x18] sm:$0xff] }
  0xd0   :  { %2090 = vmatpush3.bf16.msra.mxu0 %v2303_v59  ;;  %1613 = vmatprep.mubr.bf16.mxu0 %v1848_v11  ;;  %v2301_v59 = vld [vmem:[#allocation10 + $0x180] sm:$0xff]  }
  0xd1   :  { %2091 = vmatprep.subr.bf16.mxu0 %v2306_v60  ;;  %v1846_v60 = vcombine.high %v331_v57, %v331_v57  ;;  %v2334_v11 = vld [vmem:[#allocation10 + $0x2c0] sm:$0xff]  }
  0xd4   :  { %2092 = vmatpush3.bf16.msra.mxu0 %v2307_v61  ;;  %v2304_v61 = vld [vmem:[#allocation10 + $0x1c8] sm:$0xff]  }
  0xd5   :  { %2093 = vmatprep.subr.bf16.mxu0 %v2310_v62  ;;  %v2305_v62 = vld [vmem:[#allocation10 + $0x188] sm:$0xff]  }
  0xd8   :  { %2094 = vmatpush3.bf16.msra.mxu0 %v2311_v63  ;;  %v2308_v63 = vld [vmem:[#allocation10 + $0x1d0] sm:$0xff]  }
  0xd9   :  { %2095 = vmatprep.subr.bf16.mxu0 %v2314_v0  ;;  %v2309_v0 = vld [vmem:[#allocation10 + $0x190] sm:$0xff]  }
  0xdc   :  { %2096 = vmatpush3.bf16.msra.mxu0 %v2315_v1  ;;  %v2312_v1 = vld [vmem:[#allocation10 + $0x1d8] sm:$0xff]  }
  0xdd   :  { %2097 = vmatprep.subr.bf16.mxu0 %v2318_v2  ;;  %v2313_v2 = vld [vmem:[#allocation10 + $0x198] sm:$0xff]  }
  0xe0   :  { %2098 = vmatpush3.bf16.msra.mxu0 %v2319_v3  ;;  %v2316_v3 = vld [vmem:[#allocation10 + $0x1e0] sm:$0xff]  }
  0xe1   :  { %2099 = vmatprep.subr.bf16.mxu0 %v2322_v4  ;;  %v2317_v4 = vld [vmem:[#allocation10 + $0x1a0] sm:$0xff]  }
  0xe4   :  { %2100 = vmatpush3.bf16.msra.mxu0 %v2323_v5  ;;  %v2320_v5 = vld [vmem:[#allocation10 + $0x1e8] sm:$0xff]  }
  0xe5   :  { %2101 = vmatprep.subr.bf16.mxu0 %v2326_v6  ;;  %v2321_v6 = vld [vmem:[#allocation10 + $0x1a8] sm:$0xff]  }
  0xe8   :  { %2102 = vmatpush3.bf16.msra.mxu0 %v2327_v7  ;;  %v2324_v7 = vld [vmem:[#allocation10 + $0x1f0] sm:$0xff]  }
  0xe9   :  { %2103 = vmatprep.subr.bf16.mxu0 %v2330_v8  ;;  %v2325_v8 = vld [vmem:[#allocation10 + $0x1b0] sm:$0xff]  }
  0xec   :  { %2104 = vmatpush3.bf16.msra.mxu0 %v2333_v9  ;;  %v2328_v9 = vld [vmem:[#allocation10 + $0x1f8] sm:$0xff]  }
  0xed   :  { %2133 = vmatprep.subr.bf16.mxu0 %v2338_v13  ;;  %v1845_v13 = vcombine.low %v331_v57, %v331_v57  ;;  %v2387_v57 = vld [vmem:[#allocation10 + $0x3b8] sm:$0xff]  }
  0xef   :  { %1614 = vmatmul.mubr.bf16.vlgmr.msra.gmra.mrb[12].mxu0 %v1847_v12  ;;  %v333_v12 = vld [vmem:[#allocation5 + $0x28] sm:$0xff] }
  0xf0   :  { %2134 = vmatpush3.bf16.msra.mxu0 %v2339_v14  ;;  %1693 = vmatprep.mubr.bf16.mxu0 %v1852_v30  ;;  %v2337_v14 = vld [vmem:[#allocation10 + $0x280] sm:$0xff]  }
  0xf1   :  { %2135 = vmatprep.subr.bf16.mxu0 %v2342_v15  ;;  %v1850_v15 = vcombine.high %v333_v12, %v333_v12  ;;  %v2370_v30 = vld [vmem:[#allocation10 + $0x3c0] sm:$0xff]  }
  0xf4   :  { %2136 = vmatpush3.bf16.msra.mxu0 %v2343_v16  ;;  %v2340_v16 = vld [vmem:[#allocation10 + $0x2c8] sm:$0xff]  }
  0xf5   :  { %2137 = vmatprep.subr.bf16.mxu0 %v2346_v17  ;;  %v2341_v17 = vld [vmem:[#allocation10 + $0x288] sm:$0xff]  }
  0xf8   :  { %2138 = vmatpush3.bf16.msra.mxu0 %v2347_v18  ;;  %v2344_v18 = vld [vmem:[#allocation10 + $0x2d0] sm:$0xff]  }
  0xf9   :  { %2139 = vmatprep.subr.bf16.mxu0 %v2350_v19  ;;  %v2345_v19 = vld [vmem:[#allocation10 + $0x290] sm:$0xff]  }
  0xfc   :  { %2140 = vmatpush3.bf16.msra.mxu0 %v2351_v20  ;;  %v2348_v20 = vld [vmem:[#allocation10 + $0x2d8] sm:$0xff]  }
  0xfd   :  { %2141 = vmatprep.subr.bf16.mxu0 %v2354_v21  ;;  %v2349_v21 = vld [vmem:[#allocation10 + $0x298] sm:$0xff]  }
 0x100   :  { %2142 = vmatpush3.bf16.msra.mxu0 %v2355_v22  ;;  %v2352_v22 = vld [vmem:[#allocation10 + $0x2e0] sm:$0xff]  }
 0x101   :  { %2143 = vmatprep.subr.bf16.mxu0 %v2358_v23  ;;  %v2353_v23 = vld [vmem:[#allocation10 + $0x2a0] sm:$0xff]  }
 0x104   :  { %2144 = vmatpush3.bf16.msra.mxu0 %v2359_v24  ;;  %v2356_v24 = vld [vmem:[#allocation10 + $0x2e8] sm:$0xff]  }
 0x105   :  { %2145 = vmatprep.subr.bf16.mxu0 %v2362_v25  ;;  %v2357_v25 = vld [vmem:[#allocation10 + $0x2a8] sm:$0xff]  }
 0x108   :  { %2146 = vmatpush3.bf16.msra.mxu0 %v2363_v26  ;;  %v2360_v26 = vld [vmem:[#allocation10 + $0x2f0] sm:$0xff]  }
 0x109   :  { %2147 = vmatprep.subr.bf16.mxu0 %v2366_v27  ;;  %v2361_v27 = vld [vmem:[#allocation10 + $0x2b0] sm:$0xff]  }
 0x10c   :  { %2148 = vmatpush3.bf16.msra.mxu0 %v2369_v28  ;;  %v2364_v28 = vld [vmem:[#allocation10 + $0x2f8] sm:$0xff]  }
 0x10f   :  { %1694 = vmatmul.mubr.bf16.vlgmr.msra.gmra.mrb[16].mxu0 %v1851_v31  ;;  %v335_v31 = vld [vmem:[#allocation5 + $0x38] sm:$0xff] }
 0x162   :  { %v205_v32 = vpop.f32.mrb[0].mxu0 }
 0x163   :  { %vm211_vm1 = vcmp.ge.f32.partialorder %v205_v32, 0.0  ;;  %v212_v34 = vmul.f32 0.2, %v205_v32  ;;  %v2195_v35 = vpop.f32.mrb[1].mxu0 }
 0x164   :  { %v208_v36 = vpop.f32.mrb[2].mxu0 }
 0x165   :  { %v213_v37 = vsel %vm211_vm1, %v205_v32, %v212_v34  ;;  %v2196_v38 = vpop.f32.mrb[3].mxu0  ;;  %v1849_v32 = vcombine.low %v333_v12, %v333_v12  ;;  %v1854_v34 = vcombine.high %v335_v31, %v335_v31  ;;  %v2374_v36 = vld [vmem:[#allocation10 + $0x3c8] sm:$0xff]  }
 0x166   :  { %v214_v41 = vpack.c.bf16 %v213_v37, %v213_v37 }
 0x168   :  { %2214 = vmatmul.mubr.bf16.vlgmr.msra.gmra.mrb[0].mxu1 %v214_v41  ;;  %v2375_v41 = vld [vmem:[#allocation10 + $0x388] sm:$0xff]  }
 0x169   :  { %2024 = vmatpush3.bf16.msra.mxu1 %v2263_v39  ;;  %1493 = vmatprep.mubr.bf16.mxu1 %v1842_v40 }
 0x16a   :  { %2025 = vmatprep.subr.bf16.mxu1 %v2268_v42  ;;  %v2376_v42 = vld [vmem:[#allocation10 + $0x3d0] sm:$0xff]  }
 0x16d   :  { %2026 = vmatpush3.bf16.msra.mxu1 %v2269_v43  ;;  %v2377_v43 = vld [vmem:[#allocation10 + $0x390] sm:$0xff]  }
 0x16e   :  { %2027 = vmatprep.subr.bf16.mxu1 %v2272_v44  ;;  %v2378_v44 = vld [vmem:[#allocation10 + $0x3d8] sm:$0xff]  }
 0x171   :  { %2028 = vmatpush3.bf16.msra.mxu1 %v2273_v45  ;;  %v2379_v45 = vld [vmem:[#allocation10 + $0x398] sm:$0xff]  }
 0x172   :  { %2029 = vmatprep.subr.bf16.mxu1 %v2276_v46  ;;  %v2380_v46 = vld [vmem:[#allocation10 + $0x3e0] sm:$0xff]  }
 0x175   :  { %2030 = vmatpush3.bf16.msra.mxu1 %v2277_v47  ;;  %v2381_v47 = vld [vmem:[#allocation10 + $0x3a0] sm:$0xff]  }
 0x176   :  { %2031 = vmatprep.subr.bf16.mxu1 %v2280_v48  ;;  %v2382_v48 = vld [vmem:[#allocation10 + $0x3e8] sm:$0xff]  }
 0x179   :  { %2032 = vmatpush3.bf16.msra.mxu1 %v2281_v49  ;;  %v2383_v49 = vld [vmem:[#allocation10 + $0x3a8] sm:$0xff]  }
 0x17a   :  { %2033 = vmatprep.subr.bf16.mxu1 %v2284_v50  ;;  %v2384_v50 = vld [vmem:[#allocation10 + $0x3f0] sm:$0xff]  }
 0x17d   :  { %2034 = vmatpush3.bf16.msra.mxu1 %v2285_v51  ;;  %v2385_v51 = vld [vmem:[#allocation10 + $0x3b0] sm:$0xff]  }
 0x17e   :  { %2035 = vmatprep.subr.bf16.mxu1 %v2288_v52  ;;  %v2386_v52 = vld [vmem:[#allocation10 + $0x3f8] sm:$0xff]  }
 0x181   :  { %2036 = vmatpush3.bf16.msra.mxu1 %v2289_v53 }
 0x182   :  { %2037 = vmatprep.subr.bf16.mxu1 %v2292_v54  ;;  %v2017_v35 = vpop.f32.mrb[4].mxu0 }
 0x183   :  { %v2018_v37 = vpop.f32.mrb[5].mxu0 }
 0x184   :  { %v2739_v38 = vadd.f32 %v2018_v37, %v2017_v35  ;;  %v2020_v39 = vpop.f32.mrb[6].mxu0 }
 0x185   :  { %2038 = vmatpush3.bf16.msra.mxu1 %v2293_v55  ;;  %v2021_v40 = vpop.f32.mrb[7].mxu0 }
 0x186   :  { %2067 = vmatprep.subr.bf16.mxu1 %v2298_v56 }
 0x188   :  { %1494 = vmatmul.mubr.bf16.vlgmr.msra.gmra.mrb[4].mxu1 %v1841_v58 }
 0x189   :  { %2068 = vmatpush3.bf16.msra.mxu1 %v2301_v59  ;;  %1573 = vmatprep.mubr.bf16.mxu1 %v1846_v60  ;;  %v1853_v59 = vcombine.low %v335_v31, %v335_v31 }
 0x18a   :  { %2069 = vmatprep.subr.bf16.mxu1 %v2304_v61 }
 0x18d   :  { %2070 = vmatpush3.bf16.msra.mxu1 %v2305_v62 }
 0x18e   :  { %2071 = vmatprep.subr.bf16.mxu1 %v2308_v63 }
 0x191   :  { %2072 = vmatpush3.bf16.msra.mxu1 %v2309_v0 }
 0x192   :  { %2073 = vmatprep.subr.bf16.mxu1 %v2312_v1 }
 0x195   :  { %2074 = vmatpush3.bf16.msra.mxu1 %v2313_v2 }
 0x196   :  { %2075 = vmatprep.subr.bf16.mxu1 %v2316_v3 }
 0x199   :  { %2076 = vmatpush3.bf16.msra.mxu1 %v2317_v4 }
 0x19a   :  { %2077 = vmatprep.subr.bf16.mxu1 %v2320_v5 }
 0x19d   :  { %2078 = vmatpush3.bf16.msra.mxu1 %v2321_v6  ;;  %v1829_v6 = vld [vmem:[#allocation11] ss:$0 sm:$0xff] }
 0x19e   :  { %2079 = vmatprep.subr.bf16.mxu1 %v2324_v7 }
 0x1a1   :  { %2080 = vmatpush3.bf16.msra.mxu1 %v2325_v8 }
 0x1a2   :  { %2081 = vmatprep.subr.bf16.mxu1 %v2328_v9  ;;  %v2061_v53 = vpop.f32.mrb[8].mxu0 }
 0x1a3   :  { %v2062_v54 = vpop.f32.mrb[9].mxu0 }
 0x1a4   :  { %v2741_v55 = vadd.f32 %v2062_v54, %v2061_v53  ;;  %v2064_v56 = vpop.f32.mrb[10].mxu0 }
 0x1a5   :  { %2082 = vmatpush3.bf16.msra.mxu1 %v2329_v10  ;;  %v2065_v58 = vpop.f32.mrb[11].mxu0 }
 0x1a6   :  { %2111 = vmatprep.subr.bf16.mxu1 %v2334_v11 }
 0x1a8   :  { %1574 = vmatmul.mubr.bf16.vlgmr.msra.gmra.mrb[8].mxu1 %v1845_v13 }
 0x1a9   :  { %2112 = vmatpush3.bf16.msra.mxu1 %v2337_v14  ;;  %1653 = vmatprep.mubr.bf16.mxu1 %v1850_v15 }
 0x1aa   :  { %2113 = vmatprep.subr.bf16.mxu1 %v2340_v16 }
 0x1ad   :  { %2114 = vmatpush3.bf16.msra.mxu1 %v2341_v17 }
 0x1ae   :  { %2115 = vmatprep.subr.bf16.mxu1 %v2344_v18  ;;  %v1746_v18 = vlaneseq }
 0x1b1   :  { %2116 = vmatpush3.bf16.msra.mxu1 %v2345_v19 }
 0x1b2   :  { %2117 = vmatprep.subr.bf16.mxu1 %v2348_v20 }
 0x1b5   :  { %2118 = vmatpush3.bf16.msra.mxu1 %v2349_v21 }
 0x1b6   :  { %2119 = vmatprep.subr.bf16.mxu1 %v2352_v22 }
 0x1b9   :  { %2120 = vmatpush3.bf16.msra.mxu1 %v2353_v23 }
 0x1ba   :  { %2121 = vmatprep.subr.bf16.mxu1 %v2356_v24 }
 0x1bd   :  { %2122 = vmatpush3.bf16.msra.mxu1 %v2357_v25 }
 0x1be   :  { %2123 = vmatprep.subr.bf16.mxu1 %v2360_v26 }
 0x1c1   :  { %2124 = vmatpush3.bf16.msra.mxu1 %v2361_v27 }
 0x1c2   :  { %2125 = vmatprep.subr.bf16.mxu1 %v2364_v28  ;;  %v2105_v60 = vpop.f32.mrb[12].mxu0 }
 0x1c3   :  { %v2106_v61 = vpop.f32.mrb[13].mxu0 }
 0x1c4   :  { %v2743_v62 = vadd.f32 %v2106_v61, %v2105_v60  ;;  %v2108_v63 = vpop.f32.mrb[14].mxu0 }
 0x1c5   :  { %2126 = vmatpush3.bf16.msra.mxu1 %v2365_v29  ;;  %v2109_v0 = vpop.f32.mrb[15].mxu0 }
 0x1c6   :  { %2155 = vmatprep.subr.bf16.mxu1 %v2370_v30 }
 0x1c8   :  { %1654 = vmatmul.mubr.bf16.vlgmr.msra.gmra.mrb[12].mxu1 %v1849_v32 }
 0x1c9   :  { %2156 = vmatpush3.bf16.msra.mxu1 %v2373_v33  ;;  %1733 = vmatprep.mubr.bf16.mxu1 %v1854_v34 }
 0x1ca   :  { %2157 = vmatprep.subr.bf16.mxu1 %v2374_v36 }
 0x1cd   :  { %2158 = vmatpush3.bf16.msra.mxu1 %v2375_v41 }
 0x1ce   :  { %2159 = vmatprep.subr.bf16.mxu1 %v2376_v42 }
 0x1d1   :  { %2160 = vmatpush3.bf16.msra.mxu1 %v2377_v43 }
 0x1d2   :  { %2161 = vmatprep.subr.bf16.mxu1 %v2378_v44 }
 0x1d5   :  { %2162 = vmatpush3.bf16.msra.mxu1 %v2379_v45 }
 0x1d6   :  { %2163 = vmatprep.subr.bf16.mxu1 %v2380_v46 }
 0x1d9   :  { %2164 = vmatpush3.bf16.msra.mxu1 %v2381_v47 }
 0x1da   :  { %2165 = vmatprep.subr.bf16.mxu1 %v2382_v48 }
 0x1dd   :  { %2166 = vmatpush3.bf16.msra.mxu1 %v2383_v49 }
 0x1de   :  { %2167 = vmatprep.subr.bf16.mxu1 %v2384_v50 }
 0x1e1   :  { %2168 = vmatpush3.bf16.msra.mxu1 %v2385_v51 }
 0x1e2   :  { %2169 = vmatprep.subr.bf16.mxu1 %v2386_v52  ;;  %v2149_v1 = vpop.f32.mrb[16].mxu0 }
 0x1e3   :  { %v2150_v2 = vpop.f32.mrb[17].mxu0 }
 0x1e4   :  { %v2745_v3 = vadd.f32 %v2150_v2, %v2149_v1  ;;  %v2152_v4 = vpop.f32.mrb[18].mxu0 }
 0x1e5   :  { %2170 = vmatpush3.bf16.msra.mxu1 %v2387_v57  ;;  %v2153_v5 = vpop.f32.mrb[19].mxu0 }
 0x1e8   :  { %1734 = vmatmul.mubr.bf16.vlgmr.msra.gmra.mrb[16].mxu1 %v1853_v59 }
 0x23b   :  { %v318_v7 = vpop.f32.mrb[0].mxu1 }
 0x23c   :  { %v319_v8 = vadd.f32 %v1829_v6, %v318_v7  ;;  %v2215_v9 = vpop.f32.mrb[1].mxu1 }
 0x23d   :  { %v321_v10 = vpop.f32.mrb[2].mxu1 }
 0x23e   :  { %vm324_vm2 = vcmp.ge.f32.partialorder %v319_v8, 0.0  ;;  %v325_v11 = vmul.f32 0.2, %v319_v8  ;;  %v2216_v12 = vpop.f32.mrb[3].mxu1 }
 0x240   :  { %v326_v13 = vsel %vm324_vm2, %v319_v8, %v325_v11 }
 0x241   :  { %v1754_v14 = vrot.slane %v326_v13, 4  ;;  %v1760_v15 = vmul.f32 %v326_v13, %v326_v13  ;;  %327 = vst [vmem:[#allocation13] sm:$0xff] %v326_v13 }
 0x243   :  { %v1755_v16 = vadd.f32 %v1754_v14, %v326_v13  ;;  %v1761_v17 = vrot.slane %v1760_v15, 4 }
 0x245   :  { %v1756_v19 = vrot.slane %v1755_v16, 2  ;;  %v1762_v20 = vadd.f32 %v1761_v17, %v1760_v15 }
 0x246   :  { %2533 = shalt.err (!%p2530_p10)
}
 0x247   :  { %s2534_s10 = scalar_lea.hbm %s2793_s6, 128 }
 0x248   :  { %p2535_p11 = scmp.ne.s32.totalorder %s2793_s6, %s2534_s10  ;;  %p2538_p12 = scmp.lt.u32.totalorder %s2534_s10, %s2793_s6 }
 0x24a   :  { %p2540_p13 = pnand %p2538_p12, %p2535_p11 }
 0x24c   :  { %2543 = shalt.err (!%p2540_p13)
}
 0x24d   :  { %1785 = dma.vmem_to_hbm [thread:$0]  %s1783_s29, 128, %s2793_s6, [#allocation4]   ;;  %v1757_v21 = vadd.f32 %v1756_v19, %v1755_v16  ;;  %v1763_v22 = vrot.slane %v1762_v20, 2  ;;  %v1747_v23 = vshrl.u32 %v1746_v18, 7  ;;  %v1838_v31 = vld [vmem:[#allocation11 + $0x1] ss:$0 sm:$0xff] }
 0x24e   :  { %v1456_v32 = vadd.f32 %v2739_v38, %v1838_v31  ;;  %s2611_s6 = smov [#allocation14]   ;;  %s2612_s3 = smov [#allocation16]  }
 0x24f   :  { %v1764_v24 = vadd.f32 %v1763_v22, %v1762_v20  ;;  %v1758_v25 = vrot.slane %v1757_v21, 1  ;;  %vm1768_vm3 = vcmp.eq.s32.totalorder %v1747_v23, 1  ;;  %vm1767_vm4 = vcmp.eq.s32.totalorder %v1747_v23, 0  ;;  %s1792_s17 = sshll.u32 %s2611_s6, 4  ;;  %s1802_s2 = sshll.u32 %s2612_s3, 4  ;;  %s1793_s17 = int_to_ptr.vmem [resolvable:$true] %s1792_s17  ;;  %s1803_s2 = int_to_ptr.vmem [resolvable:$true] %s1802_s2 }
 0x250   :  { %s2544_s18 = scalar_lea.vmem %s1793_s17, 128  ;;  %p2549_p1 = scmp.lt.s32.totalorder %s1793_s17, %s1793_s17 }
 0x251   :  { %v1765_v26 = vrot.slane %v1764_v24, 1  ;;  %v1759_v28 = vadd.f32 %v1758_v25, %v1757_v21  ;;  %p2545_p0 = scmp.ne.s32.totalorder %s1793_s17, %s2544_s18  ;;  %p2550_p2 = scmp.lt.s32.totalorder %s2544_s18, %s2544_s18 }
 0x253   :  { %v1766_v27 = vadd.f32 %v1765_v26, %v1764_v24  ;;  %p2551_p3 = por %p2550_p2, %p2549_p1 }
 0x255   :  { %v1771_v29 = vsel %vm1768_vm3, %v1766_v27, 0.0  ;;  %p2552_p4 = pnand %p2551_p3, %p2545_p0 }
 0x256   :  { %v1774_v30 = vsel %vm1767_vm4, %v1759_v28, %v1771_v29 }
 0x257   :  { %1775 = vst [vmem:[#allocation16] sm:$0xff] %v1774_v30 }
 0x25b   :  { %v2039_v33 = vpop.f32.mrb[4].mxu1 }
 0x25c   :  { %v2040_v34 = vpop.f32.mrb[5].mxu1 }
 0x25d   :  { %v2041_v35 = vadd.f32 %v2040_v34, %v2039_v33  ;;  %v2042_v36 = vpop.f32.mrb[6].mxu1 }
 0x25e   :  { %v2043_v37 = vpop.f32.mrb[7].mxu1 }
 0x25f   :  { %v1496_v39 = vadd.f32 %v2041_v35, %v1456_v32 }
 0x261   :  { %v1536_v40 = vadd.f32 %v2741_v55, %v1496_v39 }
 0x27b   :  { %v2083_v41 = vpop.f32.mrb[8].mxu1 }
 0x27c   :  { %v2084_v42 = vpop.f32.mrb[9].mxu1 }
 0x27d   :  { %v2085_v43 = vadd.f32 %v2084_v42, %v2083_v41  ;;  %v2086_v44 = vpop.f32.mrb[10].mxu1 }
 0x27e   :  { %v2087_v45 = vpop.f32.mrb[11].mxu1 }
 0x27f   :  { %v1576_v46 = vadd.f32 %v2085_v43, %v1536_v40 }
 0x281   :  { %v1616_v47 = vadd.f32 %v2743_v62, %v1576_v46 }
 0x29b   :  { %v2127_v48 = vpop.f32.mrb[12].mxu1 }
 0x29c   :  { %v2128_v49 = vpop.f32.mrb[13].mxu1 }
 0x29d   :  { %v2129_v50 = vadd.f32 %v2128_v49, %v2127_v48  ;;  %v2130_v38 = vpop.f32.mrb[14].mxu1 }
 0x29e   :  { %v2131_v51 = vpop.f32.mrb[15].mxu1 }
 0x29f   :  { %v1656_v52 = vadd.f32 %v2129_v50, %v1616_v47 }
 0x2a1   :  { %v1696_v53 = vadd.f32 %v2745_v3, %v1656_v52 }
 0x2bb   :  { %v2171_v54 = vpop.f32.mrb[16].mxu1 }
 0x2bc   :  { %v2172_v56 = vpop.f32.mrb[17].mxu1 }
 0x2bd   :  { %v2173_v57 = vadd.f32 %v2172_v56, %v2171_v54  ;;  %v2174_v55 = vpop.f32.mrb[18].mxu1 }
 0x2be   :  { %v2175_v58 = vpop.f32.mrb[19].mxu1 }
 0x2bf   :  { %v1736_v59 = vadd.f32 %v2173_v57, %v1696_v53 }
 0x2c1   :  { %v1742_v60 = vmul.f32 0.2, %v1736_v59  ;;  %vm1741_vm5 = vcmp.ge.f32.partialorder %v1736_v59, 0.0 }
 0x2c3   :  { %v1743_v61 = vsel %vm1741_vm5, %v1736_v59, %v1742_v60 }
 0x2c4   :  { %1744 = vst [vmem:[#allocation14] sm:$0xff] %v1743_v61 }
 0x2c5   :  { %2555 = shalt.err (!%p2552_p4)
}
 0x2c6   :  { %s2556_s22 = scalar_lea.hbm %s2794_s7, 128 }
 0x2c7   :  { %p2557_p5 = scmp.ne.s32.totalorder %s2794_s7, %s2556_s22  ;;  %p2560_p6 = scmp.lt.u32.totalorder %s2556_s22, %s2794_s7 }
 0x2c9   :  { %p2562_p7 = pnand %p2560_p6, %p2557_p5 }
 0x2cb   :  { %2565 = shalt.err (!%p2562_p7)
}
 0x2cc   :  { %1795 = dma.vmem_to_hbm [thread:$0]  %s1793_s17, 128, %s2794_s7, [#allocation15]  }
 0x2cd   :  { %s2566_s9 = scalar_lea.vmem %s1803_s2, 128  ;;  %p2571_p9 = scmp.lt.s32.totalorder %s1803_s2, %s1803_s2 }
 0x2ce   :  { %p2567_p8 = scmp.ne.s32.totalorder %s1803_s2, %s2566_s9  ;;  %p2572_p10 = scmp.lt.s32.totalorder %s2566_s9, %s2566_s9 }
 0x2d0   :  { %p2573_p11 = por %p2572_p10, %p2571_p9 }
 0x2d2   :  { %p2574_p12 = pnand %p2573_p11, %p2567_p8 }
 0x2d4   :  { %2577 = shalt.err (!%p2574_p12)
}
 0x2d5   :  { %s2578_s5 = scalar_lea.hbm %s2795_s8, 128 }
 0x2d6   :  { %p2579_p13 = scmp.ne.s32.totalorder %s2795_s8, %s2578_s5  ;;  %p2582_p0 = scmp.lt.u32.totalorder %s2578_s5, %s2795_s8 }
 0x2d8   :  { %p2584_p1 = pnand %p2582_p0, %p2579_p13 }
 0x2da   :  { %2587 = shalt.err (!%p2584_p1)
}
 0x2db   :  { %1805 = dma.vmem_to_hbm [thread:$0]  %s1803_s2, 128, %s2795_s8, [#allocation15]  }
 0x2dc   :  { %2596 = dma.done.wait [#allocation4], 128  }
 0x2dd   :  { %2597 = vsyncadd [#allocation4], 4294967168 }
 0x2de   :  { %2598 = dma.done.wait [#allocation15], 256  }
 0x2df   :  { %2599 = vsyncadd [#allocation15], 4294967040 }
 0x2e0   :  { %1815 = vsyncpa [#allocation3], 1 }
 0x2e1   :  { %1816 = vsyncpa [#allocation6], 1 }
 0x2e2   :  { %1817 = vsyncpa [#allocation9], 1 }
 0x2e3   :  { %1818 = vsyncpa [#allocation12], 1 }
 0x2e4   :  { %1819 = vsyncpa [#allocation4], 1 }
 0x2e5   :  { %1820 = vsyncpa [#allocation15], 1 }

// kernel: net_forward.4
= control target key start
LH: loop header
LB: loop body
LE: loop exit
PB: predicated region body
PF: predicated region fallthrough
CT: control target
= control target key end

     0   :  { %16 = vsyncpa [#allocation3], 0  ;;  %s12408_s0 = inlined_call_operand.hbm [shape: f32[8,128], index: 0, kind: input, shape index: {}]   ;;  %s12409_s1 = inlined_call_operand.hbm [shape: f32[8,128], index: 1, kind: input, shape index: {}]   ;;  %s12410_s2 = inlined_call_operand.hbm [shape: f32[8,128], index: 2, kind: input, shape index: {}]   ;;  %s12411_s3 = inlined_call_operand.hbm [shape: f32[2,128], index: 3, kind: input, shape index: {}]   ;;  %s12412_s4 = inlined_call_operand.hbm [shape: bf16[256,3200], index: 4, kind: input, shape index: {}]   ;;  %s12413_s5 = inlined_call_operand.hbm [shape: bf16[3200,384], index: 5, kind: input, shape index: {}]   ;;  %s12414_s6 = inlined_call_operand.hbm [shape: bf16[384,256], index: 6, kind: input, shape index: {}]   ;;  %s12415_s7 = inlined_call_operand.hbm [shape: f32[2,384], index: 7, kind: input, shape index: {}]   ;;  %s12416_s8 = inlined_call_operand.hbm [shape: f32[8,256], index: 8, kind: output, shape index: {0}]   ;;  %s12417_s9 = inlined_call_operand.hbm [shape: f32[8,256], index: 9, kind: output, shape index: {1}]   ;;  %s12418_s10 = inlined_call_operand.hbm [shape: f32[1,8,256], index: 10, kind: output, shape index: {2}]  }
   0x1   :  { %17 = vsyncpa [#allocation6], 0 }
   0x2   :  { %18 = vsyncpa [#allocation9], 0 }
   0x3   :  { %19 = vsyncpa [#allocation12], 0 }
   0x4   :  { %20 = vsyncpa [#allocation15], 0 }
   0x5   :  { %21 = vsyncpa [#allocation4], 0 }
   0x6   :  { %22 = vsyncpa [#allocation18], 0  ;;  %s11947_s13 = smov [#allocation5]   ;;  %s11948_s15 = smov [#allocation8]  }
   0x7   :  { %s39_s14 = sshll.u32 %s11947_s13, 4  ;;  %s59_s16 = sshll.u32 %s11948_s15, 4  ;;  %s40_s14 = int_to_ptr.vmem [resolvable:$true] %s39_s14  ;;  %s60_s16 = int_to_ptr.vmem [resolvable:$true] %s59_s16 }
   0x8   :  { %s11691_s19 = scalar_lea.hbm %s12409_s1, 128 }
   0x9   :  { %p11692_p0 = scmp.ne.s32.totalorder %s12409_s1, %s11691_s19  ;;  %p11695_p1 = scmp.lt.u32.totalorder %s11691_s19, %s12409_s1 }
   0xb   :  { %p11697_p2 = pnand %p11695_p1, %p11692_p0 }
   0xd   :  { %11700 = shalt.err (!%p11697_p2)
}
   0xe   :  { %s11701_s24 = scalar_lea.vmem %s40_s14, 128  ;;  %p11706_p4 = scmp.lt.s32.totalorder %s40_s14, %s40_s14 }
   0xf   :  { %p11702_p3 = scmp.ne.s32.totalorder %s40_s14, %s11701_s24  ;;  %p11707_p5 = scmp.lt.s32.totalorder %s11701_s24, %s11701_s24 }
  0x11   :  { %p11708_p6 = por %p11707_p5, %p11706_p4 }
  0x13   :  { %p11709_p7 = pnand %p11708_p6, %p11702_p3 }
  0x15   :  { %11712 = shalt.err (!%p11709_p7)
}
  0x16   :  { %42 = dma.hbm_to_vmem [thread:$0]  %s12409_s1, 128, %s40_s14, [#allocation6]  }
  0x17   :  { %s11713_s29 = scalar_lea.hbm %s12411_s3, 32 }
  0x18   :  { %p11714_p8 = scmp.ne.s32.totalorder %s12411_s3, %s11713_s29  ;;  %p11717_p9 = scmp.lt.u32.totalorder %s11713_s29, %s12411_s3 }
  0x1a   :  { %p11719_p10 = pnand %p11717_p9, %p11714_p8 }
  0x1c   :  { %11722 = shalt.err (!%p11719_p10)
}
  0x1d   :  { %s11723_s15 = scalar_lea.vmem %s60_s16, 32  ;;  %p11728_p12 = scmp.lt.s32.totalorder %s60_s16, %s60_s16 }
  0x1e   :  { %p11724_p11 = scmp.ne.s32.totalorder %s60_s16, %s11723_s15  ;;  %p11729_p13 = scmp.lt.s32.totalorder %s11723_s15, %s11723_s15 }
  0x20   :  { %p11730_p0 = por %p11729_p13, %p11728_p12 }
  0x22   :  { %p11731_p1 = pnand %p11730_p0, %p11724_p11 }
  0x24   :  { %11734 = shalt.err (!%p11731_p1)
}
  0x25   :  { %62 = dma.hbm_to_vmem [thread:$0]  %s12411_s3, 32, %s60_s16, [#allocation9]  }
  0x26   :  { %s11949_s17 = smov [#allocation11]   ;;  %s11735_s21 = scalar_lea.hbm %s12413_s5, 76800 }
  0x27   :  { %s80_s18 = sshll.u32 %s11949_s17, 4  ;;  %p11736_p2 = scmp.ne.s32.totalorder %s12413_s5, %s11735_s21  ;;  %s81_s18 = int_to_ptr.vmem [resolvable:$true] %s80_s18 }
  0x28   :  { %p11739_p3 = scmp.lt.u32.totalorder %s11735_s21, %s12413_s5 }
  0x2a   :  { %p11741_p4 = pnand %p11739_p3, %p11736_p2 }
  0x2c   :  { %11744 = shalt.err (!%p11741_p4)
}
  0x2d   :  { %s11745_s26 = scalar_lea.vmem %s81_s18, 76800  ;;  %p11750_p6 = scmp.lt.s32.totalorder %s81_s18, %s81_s18 }
  0x2e   :  { %p11746_p5 = scmp.ne.s32.totalorder %s81_s18, %s11745_s26  ;;  %p11751_p7 = scmp.lt.s32.totalorder %s11745_s26, %s11745_s26 }
  0x30   :  { %p11752_p8 = por %p11751_p7, %p11750_p6 }
  0x32   :  { %p11753_p9 = pnand %p11752_p8, %p11746_p5 }
  0x34   :  { %11756 = shalt.err (!%p11753_p9)
}
  0x35   :  { %s11950_s3 = smov 192   ;;  %s11951_s16 = smov 12  }
  0x36   :  { %86 = dma.hbm_to_vmem [thread:$0]  %s12413_s5, 76800, %s81_s18, [#allocation12], %s11950_s3, %s11950_s3, %s11951_s16  }
  0x37   :  { %s11952_s29 = smov [#allocation2]   ;;  %s11953_s11 = smov [#allocation7]  }
  0x38   :  { %s29_s30 = sshll.u32 %s11952_s29, 4  ;;  %s49_s12 = sshll.u32 %s11953_s11, 4  ;;  %s30_s30 = int_to_ptr.vmem [resolvable:$true] %s29_s30  ;;  %s50_s12 = int_to_ptr.vmem [resolvable:$true] %s49_s12 }
  0x39   :  { %s11757_s1 = scalar_lea.hbm %s12408_s0, 128 }
  0x3a   :  { %p11758_p10 = scmp.ne.s32.totalorder %s12408_s0, %s11757_s1  ;;  %p11761_p11 = scmp.lt.u32.totalorder %s11757_s1, %s12408_s0 }
  0x3c   :  { %p11763_p12 = pnand %p11761_p11, %p11758_p10 }
  0x3e   :  { %11766 = shalt.err (!%p11763_p12)
}
  0x3f   :  { %s11767_s5 = scalar_lea.vmem %s30_s30, 128  ;;  %p11772_p0 = scmp.lt.s32.totalorder %s30_s30, %s30_s30 }
  0x40   :  { %p11768_p13 = scmp.ne.s32.totalorder %s30_s30, %s11767_s5  ;;  %p11773_p1 = scmp.lt.s32.totalorder %s11767_s5, %s11767_s5 }
  0x42   :  { %p11774_p2 = por %p11773_p1, %p11772_p0 }
  0x44   :  { %p11775_p3 = pnand %p11774_p2, %p11768_p13 }
  0x46   :  { %11778 = shalt.err (!%p11775_p3)
}
  0x47   :  { %32 = dma.hbm_to_vmem [thread:$0]  %s12408_s0, 128, %s30_s30, [#allocation3]  }
  0x48   :  { %s11779_s24 = scalar_lea.hbm %s12410_s2, 128 }
  0x49   :  { %p11780_p4 = scmp.ne.s32.totalorder %s12410_s2, %s11779_s24  ;;  %p11783_p5 = scmp.lt.u32.totalorder %s11779_s24, %s12410_s2 }
  0x4b   :  { %p11785_p6 = pnand %p11783_p5, %p11780_p4 }
  0x4d   :  { %11788 = shalt.err (!%p11785_p6)
}
  0x4e   :  { %s11789_s27 = scalar_lea.vmem %s50_s12, 128  ;;  %p11794_p8 = scmp.lt.s32.totalorder %s50_s12, %s50_s12 }
  0x4f   :  { %p11790_p7 = scmp.ne.s32.totalorder %s50_s12, %s11789_s27  ;;  %p11795_p9 = scmp.lt.s32.totalorder %s11789_s27, %s11789_s27 }
  0x51   :  { %p11796_p10 = por %p11795_p9, %p11794_p8 }
  0x53   :  { %p11797_p11 = pnand %p11796_p10, %p11790_p7 }
  0x55   :  { %11800 = shalt.err (!%p11797_p11)
}
  0x56   :  { %52 = dma.hbm_to_vmem [thread:$0]  %s12410_s2, 128, %s50_s12, [#allocation6]  }
  0x57   :  { %s11954_s29 = smov [#allocation10]   ;;  %s11801_s15 = scalar_lea.hbm %s12412_s4, 51200 }
  0x58   :  { %s68_s30 = sshll.u32 %s11954_s29, 4  ;;  %p11802_p12 = scmp.ne.s32.totalorder %s12412_s4, %s11801_s15  ;;  %s69_s30 = int_to_ptr.vmem [resolvable:$true] %s68_s30 }
  0x59   :  { %p11805_p13 = scmp.lt.u32.totalorder %s11801_s15, %s12412_s4 }
  0x5b   :  { %p11807_p0 = pnand %p11805_p13, %p11802_p12 }
  0x5d   :  { %11810 = shalt.err (!%p11807_p0)
}
  0x5e   :  { %s11811_s20 = scalar_lea.vmem %s69_s30, 51200  ;;  %p11816_p2 = scmp.lt.s32.totalorder %s69_s30, %s69_s30 }
  0x5f   :  { %p11812_p1 = scmp.ne.s32.totalorder %s69_s30, %s11811_s20  ;;  %p11817_p3 = scmp.lt.s32.totalorder %s11811_s20, %s11811_s20 }
  0x61   :  { %p11818_p4 = por %p11817_p3, %p11816_p2 }
  0x63   :  { %p11819_p5 = pnand %p11818_p4, %p11812_p1 }
  0x65   :  { %11822 = shalt.err (!%p11819_p5)
}
  0x66   :  { %s11955_s2 = smov 1600   ;;  %s11956_s12 = smov 100  }
  0x67   :  { %74 = dma.hbm_to_vmem [thread:$0]  %s12412_s4, 51200, %s69_s30, [#allocation9], %s11955_s2, %s11955_s2, %s11956_s12  }
  0x68   :  { %s11957_s21 = smov [#allocation13]   ;;  %s11823_s25 = scalar_lea.hbm %s12414_s6, 6144 }
  0x69   :  { %s92_s22 = sshll.u32 %s11957_s21, 4  ;;  %p11824_p6 = scmp.ne.s32.totalorder %s12414_s6, %s11823_s25  ;;  %s93_s22 = int_to_ptr.vmem [resolvable:$true] %s92_s22 }
  0x6a   :  { %p11827_p7 = scmp.lt.u32.totalorder %s11823_s25, %s12414_s6 }
  0x6c   :  { %p11829_p8 = pnand %p11827_p7, %p11824_p6 }
  0x6e   :  { %11832 = shalt.err (!%p11829_p8)
}
  0x6f   :  { %s11833_s0 = scalar_lea.vmem %s93_s22, 6144  ;;  %p11838_p10 = scmp.lt.s32.totalorder %s93_s22, %s93_s22 }
  0x70   :  { %p11834_p9 = scmp.ne.s32.totalorder %s93_s22, %s11833_s0  ;;  %p11839_p11 = scmp.lt.s32.totalorder %s11833_s0, %s11833_s0 }
  0x72   :  { %p11840_p12 = por %p11839_p11, %p11838_p10 }
  0x74   :  { %p11841_p13 = pnand %p11840_p12, %p11834_p9 }
  0x76   :  { %11844 = shalt.err (!%p11841_p13)
}
  0x77   :  { %s11958_s4 = smov 128   ;;  %s11959_s28 = smov 8  }
  0x78   :  { %98 = dma.hbm_to_vmem [thread:$0]  %s12414_s6, 6144, %s93_s22, [#allocation12], %s11958_s4, %s11958_s4, %s11959_s28  }
  0x79   :  { %s11960_s11 = smov [#allocation14]   ;;  %s11845_s14 = scalar_lea.hbm %s12415_s7, 96 }
  0x7a   :  { %s105_s13 = sshll.u32 %s11960_s11, 4  ;;  %p11846_p0 = scmp.ne.s32.totalorder %s12415_s7, %s11845_s14  ;;  %s106_s13 = int_to_ptr.vmem [resolvable:$true] %s105_s13 }
  0x7b   :  { %p11849_p1 = scmp.lt.u32.totalorder %s11845_s14, %s12415_s7 }
  0x7d   :  { %p11851_p2 = pnand %p11849_p1, %p11846_p0 }
  0x7f   :  { %11854 = shalt.err (!%p11851_p2)
}
  0x80   :  { %s11855_s12 = scalar_lea.vmem %s106_s13, 96  ;;  %p11860_p4 = scmp.lt.s32.totalorder %s106_s13, %s106_s13 }
  0x81   :  { %p11856_p3 = scmp.ne.s32.totalorder %s106_s13, %s11855_s12  ;;  %p11861_p5 = scmp.lt.s32.totalorder %s11855_s12, %s11855_s12 }
  0x83   :  { %p11862_p6 = por %p11861_p5, %p11860_p4 }
  0x85   :  { %p11863_p7 = pnand %p11862_p6, %p11856_p3 }
  0x87   :  { %11866 = shalt.err (!%p11863_p7)
}
  0x88   :  { %108 = dma.hbm_to_vmem [thread:$0]  %s12415_s7, 96, %s106_s13, [#allocation15]  }
  0x89   :  { %11933 = dma.done.wait [#allocation3], 128  }
  0x8a   :  { %11934 = vsyncadd [#allocation3], 4294967168 }
  0x8b   :  { %11935 = dma.done.wait [#allocation6], 256  }
  0x8c   :  { %11936 = vsyncadd [#allocation6], 4294967040 }
  0x8d   :  { %11937 = dma.done.wait [#allocation9], 51232  }
  0x8e   :  { %11938 = vsyncadd [#allocation9], 4294916064 }
  0x8f   :  { %11939 = dma.done.wait [#allocation12], 82944  }
  0x90   :  { %11940 = vsyncadd [#allocation12], 4294884352 }
  0x91   :  { %11941 = dma.done.wait [#allocation15], 96  }
  0x92   :  { %11942 = vsyncadd [#allocation15], 4294967200  ;;  %v10226_v0 = vld [vmem:[#allocation10 + $0x4] ss:$100 sps:$4 sm:$0xff]   ;;  %v10228_v1 = vld [vmem:[#allocation10 + $0x2c] ss:$100 sps:$4 sm:$0xff]  }
  0x93   :  { %2586 = vmatprep.subr.bf16.mxu0 %v10226_v0  ;;  %v10230_v2 = vld [vmem:[#allocation10] ss:$100 sps:$4 sm:$0xff]   ;;  %v10231_v3 = vld [vmem:[#allocation10 + $0x28] ss:$100 sps:$4 sm:$0xff]   ;;  %2791 = vmatprep.subr.bf16.mxu1 %v10228_v1  ;;  %v10234_v5 = vld [vmem:[#allocation10 + $0xf4] ss:$100 sps:$4 sm:$0xff]  }
  0x94   :  { %v10232_v4 = vld [vmem:[#allocation10 + $0xcc] ss:$100 sps:$4 sm:$0xff]   ;;  %2587 = vmatpush1.bf16.msra.mxu0 %v10230_v2  ;;  %2792 = vmatpush1.bf16.msra.mxu1 %v10231_v3  ;;  %v10238_v8 = vld [vmem:[#allocation10 + $0x194] ss:$100 sps:$4 sm:$0xff]   ;;  %v10240_v9 = vld [vmem:[#allocation10 + $0x1bc] ss:$100 sps:$4 sm:$0xff]  }
  0x95   :  { %v10236_v6 = vld [vmem:[#allocation10 + $0xc8] ss:$100 sps:$4 sm:$0xff]   ;;  %2588 = vmatprep.subr.bf16.mxu0 %v10232_v4  ;;  %v10237_v7 = vld [vmem:[#allocation10 + $0xf0] ss:$100 sps:$4 sm:$0xff]   ;;  %2793 = vmatprep.subr.bf16.mxu1 %v10234_v5  ;;  %v10243_v11 = vld [vmem:[#allocation10 + $0x1b8] ss:$100 sps:$4 sm:$0xff]  }
  0x96   :  { %v10242_v10 = vld [vmem:[#allocation10 + $0x190] ss:$100 sps:$4 sm:$0xff]   ;;  %v10244_v12 = vld [vmem:[#allocation10 + $0x25c] ss:$100 sps:$4 sm:$0xff]   ;;  %v10246_v13 = vld [vmem:[#allocation10 + $0x284] ss:$100 sps:$4 sm:$0xff]  }
  0x97   :  { %v10248_v14 = vld [vmem:[#allocation10 + $0x258] ss:$100 sps:$4 sm:$0xff]   ;;  %v10249_v15 = vld [vmem:[#allocation10 + $0x280] ss:$100 sps:$4 sm:$0xff]   ;;  %v10252_v17 = vld [vmem:[#allocation10 + $0x34c] ss:$100 sps:$4 sm:$0xff]  }
  0x98   :  { %2589 = vmatpush1.bf16.msra.mxu0 %v10236_v6  ;;  %2794 = vmatpush1.bf16.msra.mxu1 %v10237_v7  ;;  %v10250_v16 = vld [vmem:[#allocation10 + $0x324] ss:$100 sps:$4 sm:$0xff]   ;;  %v10256_v20 = vld [vmem:[#allocation10 + $0x3ec] ss:$100 sps:$4 sm:$0xff]   ;;  %v10258_v21 = vld [vmem:[#allocation10 + $0x414] ss:$100 sps:$4 sm:$0xff]  }
  0x99   :  { %2590 = vmatprep.subr.bf16.mxu0 %v10238_v8  ;;  %2795 = vmatprep.subr.bf16.mxu1 %v10240_v9  ;;  %v10254_v18 = vld [vmem:[#allocation10 + $0x320] ss:$100 sps:$4 sm:$0xff]   ;;  %v10255_v19 = vld [vmem:[#allocation10 + $0x348] ss:$100 sps:$4 sm:$0xff]   ;;  %v10261_v23 = vld [vmem:[#allocation10 + $0x410] ss:$100 sps:$4 sm:$0xff]  }
  0x9a   :  { %v10260_v22 = vld [vmem:[#allocation10 + $0x3e8] ss:$100 sps:$4 sm:$0xff]   ;;  %v10262_v24 = vld [vmem:[#allocation10 + $0x4b4] ss:$100 sps:$4 sm:$0xff]   ;;  %v10264_v25 = vld [vmem:[#allocation10 + $0x4dc] ss:$100 sps:$4 sm:$0xff]  }
  0x9b   :  { %v10266_v26 = vld [vmem:[#allocation10 + $0x4b0] ss:$100 sps:$4 sm:$0xff]   ;;  %v10267_v27 = vld [vmem:[#allocation10 + $0x4d8] ss:$100 sps:$4 sm:$0xff]   ;;  %v10270_v29 = vld [vmem:[#allocation10 + $0x5a4] ss:$100 sps:$4 sm:$0xff]  }
  0x9c   :  { %2591 = vmatpush1.bf16.msra.mxu0 %v10242_v10  ;;  %2796 = vmatpush1.bf16.msra.mxu1 %v10243_v11  ;;  %v10268_v28 = vld [vmem:[#allocation10 + $0x57c] ss:$100 sps:$4 sm:$0xff]   ;;  %v10274_v32 = vld [vmem:[#allocation10 + $0x644] ss:$100 sps:$4 sm:$0xff]   ;;  %v10276_v33 = vld [vmem:[#allocation10 + $0x66c] ss:$100 sps:$4 sm:$0xff]  }
  0x9d   :  { %2592 = vmatprep.subr.bf16.mxu0 %v10244_v12  ;;  %2797 = vmatprep.subr.bf16.mxu1 %v10246_v13  ;;  %v10272_v30 = vld [vmem:[#allocation10 + $0x578] ss:$100 sps:$4 sm:$0xff]   ;;  %v10273_v31 = vld [vmem:[#allocation10 + $0x5a0] ss:$100 sps:$4 sm:$0xff]   ;;  %v10279_v35 = vld [vmem:[#allocation10 + $0x668] ss:$100 sps:$4 sm:$0xff]  }
  0x9e   :  { %v10278_v34 = vld [vmem:[#allocation10 + $0x640] ss:$100 sps:$4 sm:$0xff]   ;;  %v10280_v36 = vld [vmem:[#allocation10 + $0x70c] ss:$100 sps:$4 sm:$0xff]   ;;  %v10282_v37 = vld [vmem:[#allocation10 + $0x734] ss:$100 sps:$4 sm:$0xff]  }
  0x9f   :  { %v10284_v38 = vld [vmem:[#allocation10 + $0x708] ss:$100 sps:$4 sm:$0xff]   ;;  %v10285_v39 = vld [vmem:[#allocation10 + $0x730] ss:$100 sps:$4 sm:$0xff]   ;;  %v10288_v41 = vld [vmem:[#allocation10 + $0x7fc] ss:$100 sps:$4 sm:$0xff]  }
  0xa0   :  { %2593 = vmatpush1.bf16.msra.mxu0 %v10248_v14  ;;  %2798 = vmatpush1.bf16.msra.mxu1 %v10249_v15  ;;  %v10286_v40 = vld [vmem:[#allocation10 + $0x7d4] ss:$100 sps:$4 sm:$0xff]   ;;  %v10292_v44 = vld [vmem:[#allocation10 + $0x89c] ss:$100 sps:$4 sm:$0xff]   ;;  %v10294_v45 = vld [vmem:[#allocation10 + $0x8c4] ss:$100 sps:$4 sm:$0xff]  }
  0xa1   :  { %2594 = vmatprep.subr.bf16.mxu0 %v10250_v16  ;;  %2799 = vmatprep.subr.bf16.mxu1 %v10252_v17  ;;  %v10290_v42 = vld [vmem:[#allocation10 + $0x7d0] ss:$100 sps:$4 sm:$0xff]   ;;  %v10291_v43 = vld [vmem:[#allocation10 + $0x7f8] ss:$100 sps:$4 sm:$0xff]   ;;  %v10297_v48 = vld [vmem:[#allocation10 + $0x8c0] ss:$100 sps:$4 sm:$0xff]  }
  0xa2   :  { %v10296_v46 = vld [vmem:[#allocation10 + $0x898] ss:$100 sps:$4 sm:$0xff]   ;;  %v149_v47 = vld [vmem:[#allocation5] sm:$0xff]  ;;  %v10298_v50 = vld [vmem:[#allocation10 + $0x964] ss:$100 sps:$4 sm:$0xff]   ;;  %s11964_s7 = smov [#allocation16]  }
  0xa3   :  { %v12118_v49 = vpack.c.bf16 %v149_v47, %v149_v47  ;;  %151 = vst [vmem:[#allocation16 + $0x8] sm:$0xff] %v149_v47  ;;  %v134_v51 = vld [vmem:[#allocation2] sm:$0xff]  ;;  %v8785_v52 = vld [vmem:[#allocation8] ss:$0 sm:$0xff]  ;;  %v8786_v55 = vld [vmem:[#allocation8 + $0x1] ss:$0 sm:$0xff] }
  0xa4   :  { %2595 = vmatpush1.bf16.msra.mxu0 %v10254_v18  ;;  %2800 = vmatpush1.bf16.msra.mxu1 %v10255_v19  ;;  %v10300_v53 = vld [vmem:[#allocation10 + $0x98c] ss:$100 sps:$4 sm:$0xff]   ;;  %v140_v54 = vmul.f32 %v8785_v52, %v134_v51  ;;  %v147_v56 = vld [vmem:[#allocation7] sm:$0xff]  ;;  %v10302_v57 = vld [vmem:[#allocation10 + $0x960] ss:$100 sps:$4 sm:$0xff]   ;;  %s8745_s18 = sshll.u32 %s11964_s7, 4  ;;  %s8746_s18 = int_to_ptr.vmem [resolvable:$true] %s8745_s18 }
  0xa5   :  { %2596 = vmatprep.subr.bf16.mxu0 %v10256_v20  ;;  %2801 = vmatprep.subr.bf16.mxu1 %v10258_v21  ;;  %v10303_v59 = vld [vmem:[#allocation10 + $0x988] ss:$100 sps:$4 sm:$0xff]   ;;  %v10306_v61 = vld [vmem:[#allocation10 + $0xa54] ss:$100 sps:$4 sm:$0xff]   ;;  %v10312_v2 = vld [vmem:[#allocation10 + $0xb1c] ss:$100 sps:$4 sm:$0xff]   ;;  %p11872_p9 = scmp.lt.s32.totalorder %s8746_s18, %s8746_s18 }
  0xa6   :  { %2823 = vmatprep.mubr.bf16.mxu1 %v12118_v49  ;;  %2618 = vmatprep.mubr.bf16.mxu0 %v12118_v49  ;;  %v146_v58 = vadd.f32 %v8786_v55, %v140_v54  ;;  %v10304_v60 = vld [vmem:[#allocation10 + $0xa2c] ss:$100 sps:$4 sm:$0xff]   ;;  %v10310_v1 = vld [vmem:[#allocation10 + $0xaf4] ss:$100 sps:$4 sm:$0xff]   ;;  %v10316_v5 = vld [vmem:[#allocation10 + $0xbbc] ss:$100 sps:$4 sm:$0xff]  }
  0xa7   :  { %v10308_v63 = vld [vmem:[#allocation10 + $0xa28] ss:$100 sps:$4 sm:$0xff]   ;;  %v10309_v0 = vld [vmem:[#allocation10 + $0xa50] ss:$100 sps:$4 sm:$0xff]   ;;  %v10315_v4 = vld [vmem:[#allocation10 + $0xb18] ss:$100 sps:$4 sm:$0xff]  }
  0xa8   :  { %2597 = vmatpush1.bf16.msra.mxu0 %v10260_v22  ;;  %2802 = vmatpush1.bf16.msra.mxu1 %v10261_v23  ;;  %v148_v62 = vadd.f32 %v147_v56, %v146_v58  ;;  %v10314_v3 = vld [vmem:[#allocation10 + $0xaf0] ss:$100 sps:$4 sm:$0xff]   ;;  %v10318_v6 = vld [vmem:[#allocation10 + $0xbe4] ss:$100 sps:$4 sm:$0xff]   ;;  %v10320_v7 = vld [vmem:[#allocation10 + $0xbb8] ss:$100 sps:$4 sm:$0xff]  }
  0xa9   :  { %2598 = vmatprep.subr.bf16.mxu0 %v10262_v24  ;;  %2803 = vmatprep.subr.bf16.mxu1 %v10264_v25  ;;  %v10321_v8 = vld [vmem:[#allocation10 + $0xbe0] ss:$100 sps:$4 sm:$0xff]   ;;  %v10324_v9 = vld [vmem:[#allocation10 + $0xc] ss:$100 sps:$4 sm:$0xff]   ;;  %v10325_v13 = vld [vmem:[#allocation10 + $0x38] ss:$100 sps:$4 sm:$0xff]  }
  0xaa   :  { %150 = vst [vmem:[#allocation16] sm:$0xff] %v148_v62  ;;  %v10327_v10 = vld [vmem:[#allocation10 + $0x3c] ss:$100 sps:$4 sm:$0xff]   ;;  %v10322_v11 = vld [vmem:[#allocation10 + $0x8] ss:$100 sps:$4 sm:$0xff]   ;;  %v12122_v12 = vpack.c.bf16 %v148_v62, %v148_v62  ;;  %s11867_s21 = scalar_lea.vmem %s8746_s18, 256 }
  0xab   :  { %v10330_v14 = vld [vmem:[#allocation10 + $0xd4] ss:$100 sps:$4 sm:$0xff]   ;;  %v10333_v15 = vld [vmem:[#allocation10 + $0x104] ss:$100 sps:$4 sm:$0xff]   ;;  %v10336_v18 = vld [vmem:[#allocation10 + $0x19c] ss:$100 sps:$4 sm:$0xff]   ;;  %p11868_p8 = scmp.ne.s32.totalorder %s8746_s18, %s11867_s21  ;;  %p11873_p10 = scmp.lt.s32.totalorder %s11867_s21, %s11867_s21 }
  0xac   :  { %2599 = vmatpush1.bf16.msra.mxu0 %v10266_v26  ;;  %2804 = vmatpush1.bf16.msra.mxu1 %v10267_v27  ;;  %v10328_v16 = vld [vmem:[#allocation10 + $0xd0] ss:$100 sps:$4 sm:$0xff]   ;;  %v10331_v17 = vld [vmem:[#allocation10 + $0x100] ss:$100 sps:$4 sm:$0xff]   ;;  %v10334_v20 = vld [vmem:[#allocation10 + $0x198] ss:$100 sps:$4 sm:$0xff]  }
  0xad   :  { %2600 = vmatprep.subr.bf16.mxu0 %v10268_v28  ;;  %2805 = vmatprep.subr.bf16.mxu1 %v10270_v29  ;;  %v10339_v19 = vld [vmem:[#allocation10 + $0x1cc] ss:$100 sps:$4 sm:$0xff]   ;;  %v10342_v22 = vld [vmem:[#allocation10 + $0x264] ss:$100 sps:$4 sm:$0xff]   ;;  %v10345_v23 = vld [vmem:[#allocation10 + $0x294] ss:$100 sps:$4 sm:$0xff]   ;;  %p11874_p11 = por %p11873_p10, %p11872_p9 }
  0xae   :  { %v10337_v21 = vld [vmem:[#allocation10 + $0x1c8] ss:$100 sps:$4 sm:$0xff]   ;;  %v10340_v24 = vld [vmem:[#allocation10 + $0x260] ss:$100 sps:$4 sm:$0xff]   ;;  %v10343_v25 = vld [vmem:[#allocation10 + $0x290] ss:$100 sps:$4 sm:$0xff]  }
  0xaf   :  { %v10348_v26 = vld [vmem:[#allocation10 + $0x32c] ss:$100 sps:$4 sm:$0xff]   ;;  %v10351_v27 = vld [vmem:[#allocation10 + $0x35c] ss:$100 sps:$4 sm:$0xff]   ;;  %v10381_v47 = vld [vmem:[#allocation10 + $0x744] ss:$100 sps:$4 sm:$0xff]   ;;  %p11875_p12 = pnand %p11874_p11, %p11868_p8 }
  0xb0   :  { %2601 = vmatpush1.bf16.msra.mxu0 %v10272_v30  ;;  %2806 = vmatpush1.bf16.msra.mxu1 %v10273_v31  ;;  %v10346_v28 = vld [vmem:[#allocation10 + $0x328] ss:$100 sps:$4 sm:$0xff]   ;;  %v10349_v29 = vld [vmem:[#allocation10 + $0x358] ss:$100 sps:$4 sm:$0xff]   ;;  %v10391_v58 = vld [vmem:[#allocation10 + $0x8d0] ss:$100 sps:$4 sm:$0xff]  }
  0xb1   :  { %2602 = vmatprep.subr.bf16.mxu0 %v10274_v32  ;;  %2807 = vmatprep.subr.bf16.mxu1 %v10276_v33  ;;  %v10354_v30 = vld [vmem:[#allocation10 + $0x3f4] ss:$100 sps:$4 sm:$0xff]   ;;  %v10357_v31 = vld [vmem:[#allocation10 + $0x424] ss:$100 sps:$4 sm:$0xff]   ;;  %v10384_v51 = vld [vmem:[#allocation10 + $0x7dc] ss:$100 sps:$4 sm:$0xff]  }
  0xb2   :  { %v10352_v32 = vld [vmem:[#allocation10 + $0x3f0] ss:$100 sps:$4 sm:$0xff]   ;;  %v10355_v33 = vld [vmem:[#allocation10 + $0x420] ss:$100 sps:$4 sm:$0xff]   ;;  %v10385_v54 = vld [vmem:[#allocation10 + $0x808] ss:$100 sps:$4 sm:$0xff]  }
  0xb3   :  { %v10387_v52 = vld [vmem:[#allocation10 + $0x80c] ss:$100 sps:$4 sm:$0xff]   ;;  %v10390_v55 = vld [vmem:[#allocation10 + $0x8a4] ss:$100 sps:$4 sm:$0xff]   ;;  %v10393_v56 = vld [vmem:[#allocation10 + $0x8d4] ss:$100 sps:$4 sm:$0xff]  }
  0xb4   :  { %2603 = vmatpush1.bf16.msra.mxu0 %v10278_v34  ;;  %2808 = vmatpush1.bf16.msra.mxu1 %v10279_v35  ;;  %v10360_v34 = vld [vmem:[#allocation10 + $0x4bc] ss:$100 sps:$4 sm:$0xff]   ;;  %v10363_v35 = vld [vmem:[#allocation10 + $0x4ec] ss:$100 sps:$4 sm:$0xff]  }
  0xb5   :  { %2604 = vmatprep.subr.bf16.mxu0 %v10280_v36  ;;  %2809 = vmatprep.subr.bf16.mxu1 %v10282_v37  ;;  %v10358_v36 = vld [vmem:[#allocation10 + $0x4b8] ss:$100 sps:$4 sm:$0xff]   ;;  %v10361_v37 = vld [vmem:[#allocation10 + $0x4e8] ss:$100 sps:$4 sm:$0xff]  }
  0xb6   :  { %v10397_v62 = vld [vmem:[#allocation10 + $0x998] ss:$100 sps:$4 sm:$0xff]  }
  0xb8   :  { %2605 = vmatpush1.bf16.msra.mxu0 %v10284_v38  ;;  %2810 = vmatpush1.bf16.msra.mxu1 %v10285_v39  ;;  %v10366_v38 = vld [vmem:[#allocation10 + $0x584] ss:$100 sps:$4 sm:$0xff]   ;;  %v10369_v39 = vld [vmem:[#allocation10 + $0x5b4] ss:$100 sps:$4 sm:$0xff]  }
  0xb9   :  { %2606 = vmatprep.subr.bf16.mxu0 %v10286_v40  ;;  %2811 = vmatprep.subr.bf16.mxu1 %v10288_v41  ;;  %v10364_v40 = vld [vmem:[#allocation10 + $0x580] ss:$100 sps:$4 sm:$0xff]   ;;  %v10367_v41 = vld [vmem:[#allocation10 + $0x5b0] ss:$100 sps:$4 sm:$0xff]  }
  0xbc   :  { %2607 = vmatpush1.bf16.msra.mxu0 %v10290_v42  ;;  %2812 = vmatpush1.bf16.msra.mxu1 %v10291_v43  ;;  %v10372_v42 = vld [vmem:[#allocation10 + $0x64c] ss:$100 sps:$4 sm:$0xff]   ;;  %v10375_v43 = vld [vmem:[#allocation10 + $0x67c] ss:$100 sps:$4 sm:$0xff]  }
  0xbd   :  { %2608 = vmatprep.subr.bf16.mxu0 %v10292_v44  ;;  %2813 = vmatprep.subr.bf16.mxu1 %v10294_v45  ;;  %v10370_v44 = vld [vmem:[#allocation10 + $0x648] ss:$100 sps:$4 sm:$0xff]   ;;  %v10373_v45 = vld [vmem:[#allocation10 + $0x678] ss:$100 sps:$4 sm:$0xff]  }
  0xc0   :  { %2609 = vmatpush1.bf16.msra.mxu0 %v10296_v46  ;;  %2814 = vmatpush1.bf16.msra.mxu1 %v10297_v48  ;;  %v10378_v46 = vld [vmem:[#allocation10 + $0x714] ss:$100 sps:$4 sm:$0xff]  }
  0xc1   :  { %2610 = vmatprep.subr.bf16.mxu0 %v10298_v50  ;;  %2815 = vmatprep.subr.bf16.mxu1 %v10300_v53  ;;  %v10376_v48 = vld [vmem:[#allocation10 + $0x710] ss:$100 sps:$4 sm:$0xff]   ;;  %v10379_v50 = vld [vmem:[#allocation10 + $0x740] ss:$100 sps:$4 sm:$0xff]   ;;  %v10382_v53 = vld [vmem:[#allocation10 + $0x7d8] ss:$100 sps:$4 sm:$0xff]  }
  0xc4   :  { %2611 = vmatpush1.bf16.msra.mxu0 %v10302_v57  ;;  %2816 = vmatpush1.bf16.msra.mxu1 %v10303_v59  ;;  %v10388_v57 = vld [vmem:[#allocation10 + $0x8a0] ss:$100 sps:$4 sm:$0xff]   ;;  %v10396_v59 = vld [vmem:[#allocation10 + $0x96c] ss:$100 sps:$4 sm:$0xff]  }
  0xc5   :  { %2612 = vmatprep.subr.bf16.mxu0 %v10304_v60  ;;  %2817 = vmatprep.subr.bf16.mxu1 %v10306_v61  ;;  %v10399_v60 = vld [vmem:[#allocation10 + $0x99c] ss:$100 sps:$4 sm:$0xff]   ;;  %v10394_v61 = vld [vmem:[#allocation10 + $0x968] ss:$100 sps:$4 sm:$0xff]  }
  0xc8   :  { %2613 = vmatpush1.bf16.msra.mxu0 %v10308_v63  ;;  %2818 = vmatpush1.bf16.msra.mxu1 %v10309_v0  ;;  %v10402_v63 = vld [vmem:[#allocation10 + $0xa34] ss:$100 sps:$4 sm:$0xff]   ;;  %v10405_v0 = vld [vmem:[#allocation10 + $0xa64] ss:$100 sps:$4 sm:$0xff]  }
  0xc9   :  { %2614 = vmatprep.subr.bf16.mxu0 %v10310_v1  ;;  %2819 = vmatprep.subr.bf16.mxu1 %v10312_v2  ;;  %v10400_v1 = vld [vmem:[#allocation10 + $0xa30] ss:$100 sps:$4 sm:$0xff]   ;;  %v10403_v2 = vld [vmem:[#allocation10 + $0xa60] ss:$100 sps:$4 sm:$0xff]  }
  0xcc   :  { %2615 = vmatpush1.bf16.msra.mxu0 %v10314_v3  ;;  %2820 = vmatpush1.bf16.msra.mxu1 %v10315_v4  ;;  %v10408_v3 = vld [vmem:[#allocation10 + $0xafc] ss:$100 sps:$4 sm:$0xff]   ;;  %v10411_v4 = vld [vmem:[#allocation10 + $0xb2c] ss:$100 sps:$4 sm:$0xff]  }
  0xcd   :  { %2616 = vmatprep.subr.bf16.mxu0 %v10316_v5  ;;  %2821 = vmatprep.subr.bf16.mxu1 %v10318_v6  ;;  %v10406_v5 = vld [vmem:[#allocation10 + $0xaf8] ss:$100 sps:$4 sm:$0xff]   ;;  %v10409_v6 = vld [vmem:[#allocation10 + $0xb28] ss:$100 sps:$4 sm:$0xff]  }
  0xd0   :  { %2617 = vmatpush1.bf16.msra.mxu0 %v10320_v7  ;;  %2822 = vmatpush1.bf16.msra.mxu1 %v10321_v8  ;;  %v10414_v7 = vld [vmem:[#allocation10 + $0xbc4] ss:$100 sps:$4 sm:$0xff]   ;;  %v10417_v8 = vld [vmem:[#allocation10 + $0xbf4] ss:$100 sps:$4 sm:$0xff]  }
  0xd1   :  { %2627 = vmatprep.subr.bf16.mxu0 %v10324_v9  ;;  %2873 = vmatprep.subr.bf16.mxu1 %v10327_v10  ;;  %v10412_v9 = vld [vmem:[#allocation10 + $0xbc0] ss:$100 sps:$4 sm:$0xff]   ;;  %v10415_v10 = vld [vmem:[#allocation10 + $0xbf0] ss:$100 sps:$4 sm:$0xff]  }
  0xd3   :  { %2824 = vmatmul.mubr.bf16.vlgmr.msra.gmra.mrb[0].mxu1 %v12122_v12  ;;  %2619 = vmatmul.mubr.bf16.vlgmr.msra.gmra.mrb[0].mxu0 %v12122_v12 }
  0xd4   :  { %2628 = vmatpush1.bf16.msra.mxu0 %v10322_v11  ;;  %2874 = vmatpush1.bf16.msra.mxu1 %v10325_v13  ;;  %v10420_v11 = vld [vmem:[#allocation10 + $0x14] ss:$100 sps:$4 sm:$0xff]   ;;  %v10423_v13 = vld [vmem:[#allocation10 + $0x4c] ss:$100 sps:$4 sm:$0xff]  }
  0xd5   :  { %2629 = vmatprep.subr.bf16.mxu0 %v10330_v14  ;;  %2875 = vmatprep.subr.bf16.mxu1 %v10333_v15  ;;  %v10418_v14 = vld [vmem:[#allocation10 + $0x10] ss:$100 sps:$4 sm:$0xff]   ;;  %v10421_v15 = vld [vmem:[#allocation10 + $0x48] ss:$100 sps:$4 sm:$0xff]  }
  0xd6   :  { %2905 = vmatprep.mubr.bf16.mxu1 %v12118_v49  ;;  %2659 = vmatprep.mubr.bf16.mxu0 %v12118_v49 }
  0xd8   :  { %2630 = vmatpush1.bf16.msra.mxu0 %v10328_v16  ;;  %2876 = vmatpush1.bf16.msra.mxu1 %v10331_v17  ;;  %v10426_v16 = vld [vmem:[#allocation10 + $0xdc] ss:$100 sps:$4 sm:$0xff]   ;;  %v10429_v17 = vld [vmem:[#allocation10 + $0x114] ss:$100 sps:$4 sm:$0xff]  }
  0xd9   :  { %2631 = vmatprep.subr.bf16.mxu0 %v10336_v18  ;;  %2877 = vmatprep.subr.bf16.mxu1 %v10339_v19  ;;  %v10424_v18 = vld [vmem:[#allocation10 + $0xd8] ss:$100 sps:$4 sm:$0xff]   ;;  %v10427_v19 = vld [vmem:[#allocation10 + $0x110] ss:$100 sps:$4 sm:$0xff]  }
  0xdc   :  { %2632 = vmatpush1.bf16.msra.mxu0 %v10334_v20  ;;  %2878 = vmatpush1.bf16.msra.mxu1 %v10337_v21  ;;  %v10432_v20 = vld [vmem:[#allocation10 + $0x1a4] ss:$100 sps:$4 sm:$0xff]   ;;  %v10435_v21 = vld [vmem:[#allocation10 + $0x1dc] ss:$100 sps:$4 sm:$0xff]  }
  0xdd   :  { %2633 = vmatprep.subr.bf16.mxu0 %v10342_v22  ;;  %2879 = vmatprep.subr.bf16.mxu1 %v10345_v23  ;;  %v10430_v22 = vld [vmem:[#allocation10 + $0x1a0] ss:$100 sps:$4 sm:$0xff]   ;;  %v10433_v23 = vld [vmem:[#allocation10 + $0x1d8] ss:$100 sps:$4 sm:$0xff]  }
  0xe0   :  { %2634 = vmatpush1.bf16.msra.mxu0 %v10340_v24  ;;  %2880 = vmatpush1.bf16.msra.mxu1 %v10343_v25  ;;  %v10438_v24 = vld [vmem:[#allocation10 + $0x26c] ss:$100 sps:$4 sm:$0xff]   ;;  %v10441_v25 = vld [vmem:[#allocation10 + $0x2a4] ss:$100 sps:$4 sm:$0xff]  }
  0xe1   :  { %2635 = vmatprep.subr.bf16.mxu0 %v10348_v26  ;;  %2881 = vmatprep.subr.bf16.mxu1 %v10351_v27  ;;  %v10436_v26 = vld [vmem:[#allocation10 + $0x268] ss:$100 sps:$4 sm:$0xff]   ;;  %v10439_v27 = vld [vmem:[#allocation10 + $0x2a0] ss:$100 sps:$4 sm:$0xff]  }
  0xe4   :  { %2636 = vmatpush1.bf16.msra.mxu0 %v10346_v28  ;;  %2882 = vmatpush1.bf16.msra.mxu1 %v10349_v29  ;;  %v10444_v28 = vld [vmem:[#allocation10 + $0x334] ss:$100 sps:$4 sm:$0xff]   ;;  %v10447_v29 = vld [vmem:[#allocation10 + $0x36c] ss:$100 sps:$4 sm:$0xff]  }
  0xe5   :  { %2637 = vmatprep.subr.bf16.mxu0 %v10354_v30  ;;  %2883 = vmatprep.subr.bf16.mxu1 %v10357_v31  ;;  %v10442_v30 = vld [vmem:[#allocation10 + $0x330] ss:$100 sps:$4 sm:$0xff]   ;;  %v10445_v31 = vld [vmem:[#allocation10 + $0x368] ss:$100 sps:$4 sm:$0xff]  }
  0xe8   :  { %2638 = vmatpush1.bf16.msra.mxu0 %v10352_v32  ;;  %2884 = vmatpush1.bf16.msra.mxu1 %v10355_v33  ;;  %v10450_v32 = vld [vmem:[#allocation10 + $0x3fc] ss:$100 sps:$4 sm:$0xff]   ;;  %v10453_v33 = vld [vmem:[#allocation10 + $0x434] ss:$100 sps:$4 sm:$0xff]  }
  0xe9   :  { %2639 = vmatprep.subr.bf16.mxu0 %v10360_v34  ;;  %2885 = vmatprep.subr.bf16.mxu1 %v10363_v35  ;;  %v10448_v34 = vld [vmem:[#allocation10 + $0x3f8] ss:$100 sps:$4 sm:$0xff]   ;;  %v10451_v35 = vld [vmem:[#allocation10 + $0x430] ss:$100 sps:$4 sm:$0xff]  }
  0xec   :  { %2640 = vmatpush1.bf16.msra.mxu0 %v10358_v36  ;;  %2886 = vmatpush1.bf16.msra.mxu1 %v10361_v37  ;;  %v10456_v36 = vld [vmem:[#allocation10 + $0x4c4] ss:$100 sps:$4 sm:$0xff]   ;;  %v10459_v37 = vld [vmem:[#allocation10 + $0x4fc] ss:$100 sps:$4 sm:$0xff]  }
  0xed   :  { %2641 = vmatprep.subr.bf16.mxu0 %v10366_v38  ;;  %2887 = vmatprep.subr.bf16.mxu1 %v10369_v39  ;;  %v10454_v38 = vld [vmem:[#allocation10 + $0x4c0] ss:$100 sps:$4 sm:$0xff]   ;;  %v10457_v39 = vld [vmem:[#allocation10 + $0x4f8] ss:$100 sps:$4 sm:$0xff]  }
  0xf0   :  { %2642 = vmatpush1.bf16.msra.mxu0 %v10364_v40  ;;  %2888 = vmatpush1.bf16.msra.mxu1 %v10367_v41  ;;  %v10462_v40 = vld [vmem:[#allocation10 + $0x58c] ss:$100 sps:$4 sm:$0xff]   ;;  %v10465_v41 = vld [vmem:[#allocation10 + $0x5c4] ss:$100 sps:$4 sm:$0xff]  }
  0xf1   :  { %2643 = vmatprep.subr.bf16.mxu0 %v10372_v42  ;;  %2889 = vmatprep.subr.bf16.mxu1 %v10375_v43  ;;  %v10460_v42 = vld [vmem:[#allocation10 + $0x588] ss:$100 sps:$4 sm:$0xff]   ;;  %v10463_v43 = vld [vmem:[#allocation10 + $0x5c0] ss:$100 sps:$4 sm:$0xff]  }
  0xf4   :  { %2644 = vmatpush1.bf16.msra.mxu0 %v10370_v44  ;;  %2890 = vmatpush1.bf16.msra.mxu1 %v10373_v45  ;;  %v10468_v44 = vld [vmem:[#allocation10 + $0x654] ss:$100 sps:$4 sm:$0xff]   ;;  %v10471_v45 = vld [vmem:[#allocation10 + $0x68c] ss:$100 sps:$4 sm:$0xff]  }
  0xf5   :  { %2645 = vmatprep.subr.bf16.mxu0 %v10378_v46  ;;  %2891 = vmatprep.subr.bf16.mxu1 %v10381_v47  ;;  %v10466_v46 = vld [vmem:[#allocation10 + $0x650] ss:$100 sps:$4 sm:$0xff]   ;;  %v10469_v47 = vld [vmem:[#allocation10 + $0x688] ss:$100 sps:$4 sm:$0xff]  }
  0xf8   :  { %2646 = vmatpush1.bf16.msra.mxu0 %v10376_v48  ;;  %2892 = vmatpush1.bf16.msra.mxu1 %v10379_v50  ;;  %v10474_v48 = vld [vmem:[#allocation10 + $0x71c] ss:$100 sps:$4 sm:$0xff]   ;;  %v10477_v50 = vld [vmem:[#allocation10 + $0x754] ss:$100 sps:$4 sm:$0xff]  }
  0xf9   :  { %2647 = vmatprep.subr.bf16.mxu0 %v10384_v51  ;;  %2893 = vmatprep.subr.bf16.mxu1 %v10387_v52  ;;  %v10472_v51 = vld [vmem:[#allocation10 + $0x718] ss:$100 sps:$4 sm:$0xff]   ;;  %v10475_v52 = vld [vmem:[#allocation10 + $0x750] ss:$100 sps:$4 sm:$0xff]  }
  0xfc   :  { %2648 = vmatpush1.bf16.msra.mxu0 %v10382_v53  ;;  %2894 = vmatpush1.bf16.msra.mxu1 %v10385_v54  ;;  %v10480_v53 = vld [vmem:[#allocation10 + $0x7e4] ss:$100 sps:$4 sm:$0xff]   ;;  %v10483_v54 = vld [vmem:[#allocation10 + $0x81c] ss:$100 sps:$4 sm:$0xff]  }
  0xfd   :  { %2649 = vmatprep.subr.bf16.mxu0 %v10390_v55  ;;  %2895 = vmatprep.subr.bf16.mxu1 %v10393_v56  ;;  %v10478_v55 = vld [vmem:[#allocation10 + $0x7e0] ss:$100 sps:$4 sm:$0xff]   ;;  %v10481_v56 = vld [vmem:[#allocation10 + $0x818] ss:$100 sps:$4 sm:$0xff]  }
 0x100   :  { %2650 = vmatpush1.bf16.msra.mxu0 %v10388_v57  ;;  %2896 = vmatpush1.bf16.msra.mxu1 %v10391_v58  ;;  %v10486_v57 = vld [vmem:[#allocation10 + $0x8ac] ss:$100 sps:$4 sm:$0xff]   ;;  %v10489_v58 = vld [vmem:[#allocation10 + $0x8e4] ss:$100 sps:$4 sm:$0xff]  }
 0x101   :  { %2651 = vmatprep.subr.bf16.mxu0 %v10396_v59  ;;  %2897 = vmatprep.subr.bf16.mxu1 %v10399_v60  ;;  %v10484_v59 = vld [vmem:[#allocation10 + $0x8a8] ss:$100 sps:$4 sm:$0xff]   ;;  %v10487_v60 = vld [vmem:[#allocation10 + $0x8e0] ss:$100 sps:$4 sm:$0xff]  }
 0x104   :  { %2652 = vmatpush1.bf16.msra.mxu0 %v10394_v61  ;;  %2898 = vmatpush1.bf16.msra.mxu1 %v10397_v62  ;;  %v10492_v61 = vld [vmem:[#allocation10 + $0x974] ss:$100 sps:$4 sm:$0xff]   ;;  %v10495_v62 = vld [vmem:[#allocation10 + $0x9ac] ss:$100 sps:$4 sm:$0xff]  }
 0x105   :  { %2653 = vmatprep.subr.bf16.mxu0 %v10402_v63  ;;  %2899 = vmatprep.subr.bf16.mxu1 %v10405_v0  ;;  %v10490_v63 = vld [vmem:[#allocation10 + $0x970] ss:$100 sps:$4 sm:$0xff]   ;;  %v10493_v0 = vld [vmem:[#allocation10 + $0x9a8] ss:$100 sps:$4 sm:$0xff]  }
 0x108   :  { %2654 = vmatpush1.bf16.msra.mxu0 %v10400_v1  ;;  %2900 = vmatpush1.bf16.msra.mxu1 %v10403_v2  ;;  %v10498_v1 = vld [vmem:[#allocation10 + $0xa3c] ss:$100 sps:$4 sm:$0xff]   ;;  %v10501_v2 = vld [vmem:[#allocation10 + $0xa74] ss:$100 sps:$4 sm:$0xff]  }
 0x109   :  { %2655 = vmatprep.subr.bf16.mxu0 %v10408_v3  ;;  %2901 = vmatprep.subr.bf16.mxu1 %v10411_v4  ;;  %v10496_v3 = vld [vmem:[#allocation10 + $0xa38] ss:$100 sps:$4 sm:$0xff]   ;;  %v10499_v4 = vld [vmem:[#allocation10 + $0xa70] ss:$100 sps:$4 sm:$0xff]  }
 0x10c   :  { %2656 = vmatpush1.bf16.msra.mxu0 %v10406_v5  ;;  %2902 = vmatpush1.bf16.msra.mxu1 %v10409_v6  ;;  %v10504_v5 = vld [vmem:[#allocation10 + $0xb04] ss:$100 sps:$4 sm:$0xff]   ;;  %v10507_v6 = vld [vmem:[#allocation10 + $0xb3c] ss:$100 sps:$4 sm:$0xff]  }
 0x10d   :  { %2657 = vmatprep.subr.bf16.mxu0 %v10414_v7  ;;  %2903 = vmatprep.subr.bf16.mxu1 %v10417_v8  ;;  %v10502_v7 = vld [vmem:[#allocation10 + $0xb00] ss:$100 sps:$4 sm:$0xff]   ;;  %v10505_v8 = vld [vmem:[#allocation10 + $0xb38] ss:$100 sps:$4 sm:$0xff]  }
 0x110   :  { %2658 = vmatpush1.bf16.msra.mxu0 %v10412_v9  ;;  %2904 = vmatpush1.bf16.msra.mxu1 %v10415_v10  ;;  %v10510_v9 = vld [vmem:[#allocation10 + $0xbcc] ss:$100 sps:$4 sm:$0xff]   ;;  %v10513_v10 = vld [vmem:[#allocation10 + $0xc04] ss:$100 sps:$4 sm:$0xff]  }
 0x111   :  { %2668 = vmatprep.subr.bf16.mxu0 %v10420_v11  ;;  %2955 = vmatprep.subr.bf16.mxu1 %v10423_v13  ;;  %v10508_v11 = vld [vmem:[#allocation10 + $0xbc8] ss:$100 sps:$4 sm:$0xff]   ;;  %v10511_v13 = vld [vmem:[#allocation10 + $0xc00] ss:$100 sps:$4 sm:$0xff]  }
 0x113   :  { %2906 = vmatmul.mubr.bf16.vlgmr.msra.gmra.mrb[4].mxu1 %v12122_v12  ;;  %2660 = vmatmul.mubr.bf16.vlgmr.msra.gmra.mrb[4].mxu0 %v12122_v12 }
 0x114   :  { %2669 = vmatpush1.bf16.msra.mxu0 %v10418_v14  ;;  %2956 = vmatpush1.bf16.msra.mxu1 %v10421_v15  ;;  %v10516_v14 = vld [vmem:[#allocation10 + $0x1c] ss:$100 sps:$4 sm:$0xff]  }
 0x115   :  { %2670 = vmatprep.subr.bf16.mxu0 %v10426_v16  ;;  %2957 = vmatprep.subr.bf16.mxu1 %v10429_v17  ;;  %v10519_v15 = vld [vmem:[#allocation10 + $0x5c] ss:$100 sps:$4 sm:$0xff]  }
 0x116   :  { %2987 = vmatprep.mubr.bf16.mxu1 %v12118_v49  ;;  %2700 = vmatprep.mubr.bf16.mxu0 %v12118_v49  ;;  %v10514_v16 = vld [vmem:[#allocation10 + $0x18] ss:$100 sps:$4 sm:$0xff]  }
 0x117   :  { %v10517_v17 = vld [vmem:[#allocation10 + $0x58] ss:$100 sps:$4 sm:$0xff]  }
 0x118   :  { %2671 = vmatpush1.bf16.msra.mxu0 %v10424_v18  ;;  %2958 = vmatpush1.bf16.msra.mxu1 %v10427_v19  ;;  %v10522_v18 = vld [vmem:[#allocation10 + $0xe4] ss:$100 sps:$4 sm:$0xff]  }
 0x119   :  { %2672 = vmatprep.subr.bf16.mxu0 %v10432_v20  ;;  %2959 = vmatprep.subr.bf16.mxu1 %v10435_v21  ;;  %v10525_v19 = vld [vmem:[#allocation10 + $0x124] ss:$100 sps:$4 sm:$0xff]  }
 0x11a   :  { %v10520_v20 = vld [vmem:[#allocation10 + $0xe0] ss:$100 sps:$4 sm:$0xff]  }
 0x11b   :  { %v10523_v21 = vld [vmem:[#allocation10 + $0x120] ss:$100 sps:$4 sm:$0xff]  }
 0x11c   :  { %2673 = vmatpush1.bf16.msra.mxu0 %v10430_v22  ;;  %2960 = vmatpush1.bf16.msra.mxu1 %v10433_v23  ;;  %v10528_v22 = vld [vmem:[#allocation10 + $0x1ac] ss:$100 sps:$4 sm:$0xff]  }
 0x11d   :  { %2674 = vmatprep.subr.bf16.mxu0 %v10438_v24  ;;  %2961 = vmatprep.subr.bf16.mxu1 %v10441_v25  ;;  %v10531_v23 = vld [vmem:[#allocation10 + $0x1ec] ss:$100 sps:$4 sm:$0xff]  }
 0x11e   :  { %v10526_v24 = vld [vmem:[#allocation10 + $0x1a8] ss:$100 sps:$4 sm:$0xff]  }
 0x11f   :  { %v10529_v25 = vld [vmem:[#allocation10 + $0x1e8] ss:$100 sps:$4 sm:$0xff]  }
 0x120   :  { %2675 = vmatpush1.bf16.msra.mxu0 %v10436_v26  ;;  %2962 = vmatpush1.bf16.msra.mxu1 %v10439_v27  ;;  %v10534_v26 = vld [vmem:[#allocation10 + $0x274] ss:$100 sps:$4 sm:$0xff]  }
 0x121   :  { %2676 = vmatprep.subr.bf16.mxu0 %v10444_v28  ;;  %2963 = vmatprep.subr.bf16.mxu1 %v10447_v29  ;;  %v10537_v27 = vld [vmem:[#allocation10 + $0x2b4] ss:$100 sps:$4 sm:$0xff]  }
 0x122   :  { %v10532_v28 = vld [vmem:[#allocation10 + $0x270] ss:$100 sps:$4 sm:$0xff]  }
 0x123   :  { %v10535_v29 = vld [vmem:[#allocation10 + $0x2b0] ss:$100 sps:$4 sm:$0xff]  }
 0x124   :  { %2677 = vmatpush1.bf16.msra.mxu0 %v10442_v30  ;;  %2964 = vmatpush1.bf16.msra.mxu1 %v10445_v31  ;;  %v10540_v30 = vld [vmem:[#allocation10 + $0x33c] ss:$100 sps:$4 sm:$0xff]  }
 0x125   :  { %2678 = vmatprep.subr.bf16.mxu0 %v10450_v32  ;;  %2965 = vmatprep.subr.bf16.mxu1 %v10453_v33  ;;  %v10543_v31 = vld [vmem:[#allocation10 + $0x37c] ss:$100 sps:$4 sm:$0xff]  }
 0x126   :  { %v10538_v32 = vld [vmem:[#allocation10 + $0x338] ss:$100 sps:$4 sm:$0xff]  }
 0x127   :  { %v10541_v33 = vld [vmem:[#allocation10 + $0x378] ss:$100 sps:$4 sm:$0xff]  }
 0x128   :  { %2679 = vmatpush1.bf16.msra.mxu0 %v10448_v34  ;;  %2966 = vmatpush1.bf16.msra.mxu1 %v10451_v35  ;;  %v10546_v34 = vld [vmem:[#allocation10 + $0x404] ss:$100 sps:$4 sm:$0xff]  }
 0x129   :  { %2680 = vmatprep.subr.bf16.mxu0 %v10456_v36  ;;  %2967 = vmatprep.subr.bf16.mxu1 %v10459_v37  ;;  %v10549_v35 = vld [vmem:[#allocation10 + $0x444] ss:$100 sps:$4 sm:$0xff]  }
 0x12a   :  { %v10544_v36 = vld [vmem:[#allocation10 + $0x400] ss:$100 sps:$4 sm:$0xff]  }
 0x12b   :  { %v10547_v37 = vld [vmem:[#allocation10 + $0x440] ss:$100 sps:$4 sm:$0xff]  }
 0x12c   :  { %2681 = vmatpush1.bf16.msra.mxu0 %v10454_v38  ;;  %2968 = vmatpush1.bf16.msra.mxu1 %v10457_v39  ;;  %v10552_v38 = vld [vmem:[#allocation10 + $0x4cc] ss:$100 sps:$4 sm:$0xff]  }
 0x12d   :  { %2682 = vmatprep.subr.bf16.mxu0 %v10462_v40  ;;  %2969 = vmatprep.subr.bf16.mxu1 %v10465_v41  ;;  %v10555_v39 = vld [vmem:[#allocation10 + $0x50c] ss:$100 sps:$4 sm:$0xff]  }
 0x12e   :  { %v10550_v40 = vld [vmem:[#allocation10 + $0x4c8] ss:$100 sps:$4 sm:$0xff]  }
 0x12f   :  { %v10553_v41 = vld [vmem:[#allocation10 + $0x508] ss:$100 sps:$4 sm:$0xff]  }
 0x130   :  { %2683 = vmatpush1.bf16.msra.mxu0 %v10460_v42  ;;  %2970 = vmatpush1.bf16.msra.mxu1 %v10463_v43  ;;  %v10558_v42 = vld [vmem:[#allocation10 + $0x594] ss:$100 sps:$4 sm:$0xff]  }
 0x131   :  { %2684 = vmatprep.subr.bf16.mxu0 %v10468_v44  ;;  %2971 = vmatprep.subr.bf16.mxu1 %v10471_v45  ;;  %v10561_v43 = vld [vmem:[#allocation10 + $0x5d4] ss:$100 sps:$4 sm:$0xff]  }
 0x132   :  { %v10556_v44 = vld [vmem:[#allocation10 + $0x590] ss:$100 sps:$4 sm:$0xff]  }
 0x133   :  { %v10559_v45 = vld [vmem:[#allocation10 + $0x5d0] ss:$100 sps:$4 sm:$0xff]  }
 0x134   :  { %2685 = vmatpush1.bf16.msra.mxu0 %v10466_v46  ;;  %2972 = vmatpush1.bf16.msra.mxu1 %v10469_v47  ;;  %v10564_v46 = vld [vmem:[#allocation10 + $0x65c] ss:$100 sps:$4 sm:$0xff]  }
 0x135   :  { %2686 = vmatprep.subr.bf16.mxu0 %v10474_v48  ;;  %2973 = vmatprep.subr.bf16.mxu1 %v10477_v50  ;;  %v10567_v47 = vld [vmem:[#allocation10 + $0x69c] ss:$100 sps:$4 sm:$0xff]  }
 0x136   :  { %v10562_v48 = vld [vmem:[#allocation10 + $0x658] ss:$100 sps:$4 sm:$0xff]  }
 0x137   :  { %v10565_v50 = vld [vmem:[#allocation10 + $0x698] ss:$100 sps:$4 sm:$0xff]  }
 0x138   :  { %2687 = vmatpush1.bf16.msra.mxu0 %v10472_v51  ;;  %2974 = vmatpush1.bf16.msra.mxu1 %v10475_v52  ;;  %v10570_v51 = vld [vmem:[#allocation10 + $0x724] ss:$100 sps:$4 sm:$0xff]  }
 0x139   :  { %2688 = vmatprep.subr.bf16.mxu0 %v10480_v53  ;;  %2975 = vmatprep.subr.bf16.mxu1 %v10483_v54  ;;  %v10573_v52 = vld [vmem:[#allocation10 + $0x764] ss:$100 sps:$4 sm:$0xff]  }
 0x13a   :  { %v10568_v53 = vld [vmem:[#allocation10 + $0x720] ss:$100 sps:$4 sm:$0xff]  }
 0x13b   :  { %v10571_v54 = vld [vmem:[#allocation10 + $0x760] ss:$100 sps:$4 sm:$0xff]  }
 0x13c   :  { %2689 = vmatpush1.bf16.msra.mxu0 %v10478_v55  ;;  %2976 = vmatpush1.bf16.msra.mxu1 %v10481_v56  ;;  %v10576_v55 = vld [vmem:[#allocation10 + $0x7ec] ss:$100 sps:$4 sm:$0xff]  }
 0x13d   :  { %2690 = vmatprep.subr.bf16.mxu0 %v10486_v57  ;;  %2977 = vmatprep.subr.bf16.mxu1 %v10489_v58  ;;  %v10579_v56 = vld [vmem:[#allocation10 + $0x82c] ss:$100 sps:$4 sm:$0xff]  }
 0x13e   :  { %v10574_v57 = vld [vmem:[#allocation10 + $0x7e8] ss:$100 sps:$4 sm:$0xff]  }
 0x13f   :  { %v10577_v58 = vld [vmem:[#allocation10 + $0x828] ss:$100 sps:$4 sm:$0xff]  }
 0x140   :  { %2691 = vmatpush1.bf16.msra.mxu0 %v10484_v59  ;;  %2978 = vmatpush1.bf16.msra.mxu1 %v10487_v60  ;;  %v10582_v59 = vld [vmem:[#allocation10 + $0x8b4] ss:$100 sps:$4 sm:$0xff]  }
 0x141   :  { %2692 = vmatprep.subr.bf16.mxu0 %v10492_v61  ;;  %2979 = vmatprep.subr.bf16.mxu1 %v10495_v62  ;;  %v10585_v60 = vld [vmem:[#allocation10 + $0x8f4] ss:$100 sps:$4 sm:$0xff]  }
 0x142   :  { %v10580_v61 = vld [vmem:[#allocation10 + $0x8b0] ss:$100 sps:$4 sm:$0xff]  }
 0x143   :  { %v10583_v62 = vld [vmem:[#allocation10 + $0x8f0] ss:$100 sps:$4 sm:$0xff]  }
 0x144   :  { %2693 = vmatpush1.bf16.msra.mxu0 %v10490_v63  ;;  %2980 = vmatpush1.bf16.msra.mxu1 %v10493_v0  ;;  %v10588_v63 = vld [vmem:[#allocation10 + $0x97c] ss:$100 sps:$4 sm:$0xff]  }
 0x145   :  { %2694 = vmatprep.subr.bf16.mxu0 %v10498_v1  ;;  %2981 = vmatprep.subr.bf16.mxu1 %v10501_v2  ;;  %v10591_v0 = vld [vmem:[#allocation10 + $0x9bc] ss:$100 sps:$4 sm:$0xff]  }
 0x146   :  { %v10586_v1 = vld [vmem:[#allocation10 + $0x978] ss:$100 sps:$4 sm:$0xff]  }
 0x147   :  { %v10589_v2 = vld [vmem:[#allocation10 + $0x9b8] ss:$100 sps:$4 sm:$0xff]  }
 0x148   :  { %2695 = vmatpush1.bf16.msra.mxu0 %v10496_v3  ;;  %2982 = vmatpush1.bf16.msra.mxu1 %v10499_v4  ;;  %v10594_v3 = vld [vmem:[#allocation10 + $0xa44] ss:$100 sps:$4 sm:$0xff]  }
 0x149   :  { %2696 = vmatprep.subr.bf16.mxu0 %v10504_v5  ;;  %2983 = vmatprep.subr.bf16.mxu1 %v10507_v6  ;;  %v10597_v4 = vld [vmem:[#allocation10 + $0xa84] ss:$100 sps:$4 sm:$0xff]  }
 0x14a   :  { %v10592_v5 = vld [vmem:[#allocation10 + $0xa40] ss:$100 sps:$4 sm:$0xff]  }
 0x14b   :  { %v10595_v6 = vld [vmem:[#allocation10 + $0xa80] ss:$100 sps:$4 sm:$0xff]  }
 0x14c   :  { %2697 = vmatpush1.bf16.msra.mxu0 %v10502_v7  ;;  %2984 = vmatpush1.bf16.msra.mxu1 %v10505_v8  ;;  %v10600_v7 = vld [vmem:[#allocation10 + $0xb0c] ss:$100 sps:$4 sm:$0xff]  }
 0x14d   :  { %2698 = vmatprep.subr.bf16.mxu0 %v10510_v9  ;;  %2985 = vmatprep.subr.bf16.mxu1 %v10513_v10  ;;  %v10603_v8 = vld [vmem:[#allocation10 + $0xb4c] ss:$100 sps:$4 sm:$0xff]  }
 0x14e   :  { %v10598_v9 = vld [vmem:[#allocation10 + $0xb08] ss:$100 sps:$4 sm:$0xff]  }
 0x14f   :  { %v10601_v10 = vld [vmem:[#allocation10 + $0xb48] ss:$100 sps:$4 sm:$0xff]  }
 0x150   :  { %2699 = vmatpush1.bf16.msra.mxu0 %v10508_v11  ;;  %2986 = vmatpush1.bf16.msra.mxu1 %v10511_v13  ;;  %v10606_v11 = vld [vmem:[#allocation10 + $0xbd4] ss:$100 sps:$4 sm:$0xff]  }
 0x151   :  { %2709 = vmatprep.subr.bf16.mxu0 %v10516_v14  ;;  %3037 = vmatprep.subr.bf16.mxu1 %v10519_v15  ;;  %v10609_v13 = vld [vmem:[#allocation10 + $0xc14] ss:$100 sps:$4 sm:$0xff]  }
 0x152   :  { %v10604_v14 = vld [vmem:[#allocation10 + $0xbd0] ss:$100 sps:$4 sm:$0xff]  }
 0x153   :  { %2988 = vmatmul.mubr.bf16.vlgmr.msra.gmra.mrb[8].mxu1 %v12122_v12  ;;  %2701 = vmatmul.mubr.bf16.vlgmr.msra.gmra.mrb[8].mxu0 %v12122_v12  ;;  %v10607_v15 = vld [vmem:[#allocation10 + $0xc10] ss:$100 sps:$4 sm:$0xff]  }
 0x154   :  { %2710 = vmatpush1.bf16.msra.mxu0 %v10514_v16  ;;  %3038 = vmatpush1.bf16.msra.mxu1 %v10517_v17  ;;  %v10612_v16 = vld [vmem:[#allocation10 + $0x24] ss:$100 sps:$4 sm:$0xff]  }
 0x155   :  { %2711 = vmatprep.subr.bf16.mxu0 %v10522_v18  ;;  %3039 = vmatprep.subr.bf16.mxu1 %v10525_v19  ;;  %v10615_v17 = vld [vmem:[#allocation11 + $0x4] ss:$12 sps:$4 sm:$0xff]   ;;  %v10613_v19 = vld [vmem:[#allocation11] ss:$12 sps:$4 sm:$0xff]  }
 0x156   :  { %3069 = vmatprep.mubr.bf16.mxu1 %v12118_v49  ;;  %2741 = vmatprep.mubr.bf16.mxu0 %v12118_v49  ;;  %v10610_v18 = vld [vmem:[#allocation10 + $0x20] ss:$100 sps:$4 sm:$0xff]  }
 0x158   :  { %2712 = vmatpush1.bf16.msra.mxu0 %v10520_v20  ;;  %3040 = vmatpush1.bf16.msra.mxu1 %v10523_v21  ;;  %v10618_v20 = vld [vmem:[#allocation10 + $0xec] ss:$100 sps:$4 sm:$0xff]   ;;  %v10621_v21 = vld [vmem:[#allocation11 + $0x1c] ss:$12 sps:$4 sm:$0xff]  }
 0x159   :  { %2713 = vmatprep.subr.bf16.mxu0 %v10528_v22  ;;  %3041 = vmatprep.subr.bf16.mxu1 %v10531_v23  ;;  %v10616_v22 = vld [vmem:[#allocation10 + $0xe8] ss:$100 sps:$4 sm:$0xff]   ;;  %v10619_v23 = vld [vmem:[#allocation11 + $0x18] ss:$12 sps:$4 sm:$0xff]  }
 0x15c   :  { %2714 = vmatpush1.bf16.msra.mxu0 %v10526_v24  ;;  %3042 = vmatpush1.bf16.msra.mxu1 %v10529_v25  ;;  %v10624_v24 = vld [vmem:[#allocation10 + $0x1b4] ss:$100 sps:$4 sm:$0xff]  }
 0x15d   :  { %2715 = vmatprep.subr.bf16.mxu0 %v10534_v26  ;;  %3043 = vmatprep.subr.bf16.mxu1 %v10537_v27  ;;  %v10627_v25 = vld [vmem:[#allocation11 + $0x34] ss:$12 sps:$4 sm:$0xff]   ;;  %v10625_v27 = vld [vmem:[#allocation11 + $0x30] ss:$12 sps:$4 sm:$0xff]  }
 0x15e   :  { %v10622_v26 = vld [vmem:[#allocation10 + $0x1b0] ss:$100 sps:$4 sm:$0xff]  }
 0x160   :  { %2716 = vmatpush1.bf16.msra.mxu0 %v10532_v28  ;;  %3044 = vmatpush1.bf16.msra.mxu1 %v10535_v29  ;;  %v10630_v28 = vld [vmem:[#allocation10 + $0x27c] ss:$100 sps:$4 sm:$0xff]   ;;  %v10633_v29 = vld [vmem:[#allocation11 + $0x4c] ss:$12 sps:$4 sm:$0xff]  }
 0x161   :  { %2717 = vmatprep.subr.bf16.mxu0 %v10540_v30  ;;  %3045 = vmatprep.subr.bf16.mxu1 %v10543_v31  ;;  %v10628_v30 = vld [vmem:[#allocation10 + $0x278] ss:$100 sps:$4 sm:$0xff]   ;;  %v10631_v31 = vld [vmem:[#allocation11 + $0x48] ss:$12 sps:$4 sm:$0xff]  }
 0x164   :  { %2718 = vmatpush1.bf16.msra.mxu0 %v10538_v32  ;;  %3046 = vmatpush1.bf16.msra.mxu1 %v10541_v33  ;;  %v10636_v32 = vld [vmem:[#allocation10 + $0x344] ss:$100 sps:$4 sm:$0xff]  }
 0x165   :  { %2719 = vmatprep.subr.bf16.mxu0 %v10546_v34  ;;  %3047 = vmatprep.subr.bf16.mxu1 %v10549_v35  ;;  %v10639_v33 = vld [vmem:[#allocation11 + $0x64] ss:$12 sps:$4 sm:$0xff]   ;;  %v10637_v35 = vld [vmem:[#allocation11 + $0x60] ss:$12 sps:$4 sm:$0xff]  }
 0x166   :  { %v10634_v34 = vld [vmem:[#allocation10 + $0x340] ss:$100 sps:$4 sm:$0xff]  }
 0x168   :  { %2720 = vmatpush1.bf16.msra.mxu0 %v10544_v36  ;;  %3048 = vmatpush1.bf16.msra.mxu1 %v10547_v37  ;;  %v10642_v36 = vld [vmem:[#allocation10 + $0x40c] ss:$100 sps:$4 sm:$0xff]   ;;  %v10645_v37 = vld [vmem:[#allocation11 + $0x7c] ss:$12 sps:$4 sm:$0xff]  }
 0x169   :  { %2721 = vmatprep.subr.bf16.mxu0 %v10552_v38  ;;  %3049 = vmatprep.subr.bf16.mxu1 %v10555_v39  ;;  %v10640_v38 = vld [vmem:[#allocation10 + $0x408] ss:$100 sps:$4 sm:$0xff]   ;;  %v10643_v39 = vld [vmem:[#allocation11 + $0x78] ss:$12 sps:$4 sm:$0xff]  }
 0x16c   :  { %2722 = vmatpush1.bf16.msra.mxu0 %v10550_v40  ;;  %3050 = vmatpush1.bf16.msra.mxu1 %v10553_v41  ;;  %v10648_v40 = vld [vmem:[#allocation10 + $0x4d4] ss:$100 sps:$4 sm:$0xff]  }
 0x16d   :  { %2723 = vmatprep.subr.bf16.mxu0 %v10558_v42  ;;  %3051 = vmatprep.subr.bf16.mxu1 %v10561_v43  ;;  %v10651_v41 = vld [vmem:[#allocation11 + $0x94] ss:$12 sps:$4 sm:$0xff]  }
 0x170   :  { %2724 = vmatpush1.bf16.msra.mxu0 %v10556_v44  ;;  %3052 = vmatpush1.bf16.msra.mxu1 %v10559_v45  ;;  %v10646_v45 = vld [vmem:[#allocation10 + $0x4d0] ss:$100 sps:$4 sm:$0xff]  }
 0x171   :  { %2725 = vmatprep.subr.bf16.mxu0 %v10564_v46  ;;  %3053 = vmatprep.subr.bf16.mxu1 %v10567_v47  ;;  %v10649_v46 = vld [vmem:[#allocation11 + $0x90] ss:$12 sps:$4 sm:$0xff]  }
 0x174   :  { %2726 = vmatpush1.bf16.msra.mxu0 %v10562_v48  ;;  %3054 = vmatpush1.bf16.msra.mxu1 %v10565_v50  ;;  %v10654_v50 = vld [vmem:[#allocation10 + $0x59c] ss:$100 sps:$4 sm:$0xff]  }
 0x175   :  { %2727 = vmatprep.subr.bf16.mxu0 %v10570_v51  ;;  %3055 = vmatprep.subr.bf16.mxu1 %v10573_v52  ;;  %v10657_v51 = vld [vmem:[#allocation11 + $0xac] ss:$12 sps:$4 sm:$0xff]  }
 0x178   :  { %2728 = vmatpush1.bf16.msra.mxu0 %v10568_v53  ;;  %3056 = vmatpush1.bf16.msra.mxu1 %v10571_v54 }
 0x179   :  { %2729 = vmatprep.subr.bf16.mxu0 %v10576_v55  ;;  %3057 = vmatprep.subr.bf16.mxu1 %v10579_v56 }
 0x17c   :  { %2730 = vmatpush1.bf16.msra.mxu0 %v10574_v57  ;;  %3058 = vmatpush1.bf16.msra.mxu1 %v10577_v58  ;;  %v10652_v57 = vld [vmem:[#allocation10 + $0x598] ss:$100 sps:$4 sm:$0xff]   ;;  %v10655_v58 = vld [vmem:[#allocation11 + $0xa8] ss:$12 sps:$4 sm:$0xff]  }
 0x17d   :  { %2731 = vmatprep.subr.bf16.mxu0 %v10582_v59  ;;  %3059 = vmatprep.subr.bf16.mxu1 %v10585_v60  ;;  %v10660_v60 = vld [vmem:[#allocation10 + $0x664] ss:$100 sps:$4 sm:$0xff]  }
 0x180   :  { %2732 = vmatpush1.bf16.msra.mxu0 %v10580_v61  ;;  %3060 = vmatpush1.bf16.msra.mxu1 %v10583_v62  ;;  %v10663_v61 = vld [vmem:[#allocation11 + $0xc4] ss:$12 sps:$4 sm:$0xff]  }
 0x181   :  { %2733 = vmatprep.subr.bf16.mxu0 %v10588_v63  ;;  %3061 = vmatprep.subr.bf16.mxu1 %v10591_v0  ;;  %v10658_v62 = vld [vmem:[#allocation10 + $0x660] ss:$100 sps:$4 sm:$0xff]   ;;  %v10666_v0 = vld [vmem:[#allocation10 + $0x72c] ss:$100 sps:$4 sm:$0xff]  }
 0x182   :  { %v10661_v63 = vld [vmem:[#allocation11 + $0xc0] ss:$12 sps:$4 sm:$0xff]  }
 0x184   :  { %2734 = vmatpush1.bf16.msra.mxu0 %v10586_v1  ;;  %3062 = vmatpush1.bf16.msra.mxu1 %v10589_v2  ;;  %v10669_v1 = vld [vmem:[#allocation11 + $0xdc] ss:$12 sps:$4 sm:$0xff]  }
 0x185   :  { %2735 = vmatprep.subr.bf16.mxu0 %v10594_v3  ;;  %3063 = vmatprep.subr.bf16.mxu1 %v10597_v4  ;;  %v10664_v2 = vld [vmem:[#allocation10 + $0x728] ss:$100 sps:$4 sm:$0xff]   ;;  %v10667_v3 = vld [vmem:[#allocation11 + $0xd8] ss:$12 sps:$4 sm:$0xff]  }
 0x186   :  { %v10672_v4 = vld [vmem:[#allocation10 + $0x7f4] ss:$100 sps:$4 sm:$0xff]  }
 0x188   :  { %2736 = vmatpush1.bf16.msra.mxu0 %v10592_v5  ;;  %3064 = vmatpush1.bf16.msra.mxu1 %v10595_v6  ;;  %v10675_v5 = vld [vmem:[#allocation11 + $0xf4] ss:$12 sps:$4 sm:$0xff]  }
 0x189   :  { %2737 = vmatprep.subr.bf16.mxu0 %v10600_v7  ;;  %3065 = vmatprep.subr.bf16.mxu1 %v10603_v8  ;;  %v10670_v6 = vld [vmem:[#allocation10 + $0x7f0] ss:$100 sps:$4 sm:$0xff]   ;;  %v10678_v8 = vld [vmem:[#allocation10 + $0x8bc] ss:$100 sps:$4 sm:$0xff]  }
 0x18a   :  { %v10673_v7 = vld [vmem:[#allocation11 + $0xf0] ss:$12 sps:$4 sm:$0xff]  }
 0x18c   :  { %2738 = vmatpush1.bf16.msra.mxu0 %v10598_v9  ;;  %3066 = vmatpush1.bf16.msra.mxu1 %v10601_v10  ;;  %v10681_v9 = vld [vmem:[#allocation11 + $0x10c] ss:$12 sps:$4 sm:$0xff]  }
 0x18d   :  { %2739 = vmatprep.subr.bf16.mxu0 %v10606_v11  ;;  %3067 = vmatprep.subr.bf16.mxu1 %v10609_v13  ;;  %v10676_v10 = vld [vmem:[#allocation10 + $0x8b8] ss:$100 sps:$4 sm:$0xff]   ;;  %v10679_v11 = vld [vmem:[#allocation11 + $0x108] ss:$12 sps:$4 sm:$0xff]  }
 0x18e   :  { %v10684_v13 = vld [vmem:[#allocation10 + $0x984] ss:$100 sps:$4 sm:$0xff]  }
 0x190   :  { %2740 = vmatpush1.bf16.msra.mxu0 %v10604_v14  ;;  %3068 = vmatpush1.bf16.msra.mxu1 %v10607_v15  ;;  %v10687_v14 = vld [vmem:[#allocation11 + $0x124] ss:$12 sps:$4 sm:$0xff]  }
 0x191   :  { %2750 = vmatprep.subr.bf16.mxu0 %v10612_v16  ;;  %7235 = vmatprep.subr.bf16.mxu1 %v10615_v17  ;;  %v10682_v15 = vld [vmem:[#allocation10 + $0x980] ss:$100 sps:$4 sm:$0xff]   ;;  %v10690_v17 = vld [vmem:[#allocation10 + $0xa4c] ss:$100 sps:$4 sm:$0xff]  }
 0x192   :  { %v10685_v16 = vld [vmem:[#allocation11 + $0x120] ss:$12 sps:$4 sm:$0xff]  }
 0x193   :  { %3070 = vmatmul.mubr.bf16.vlgmr.msra.gmra.mrb[12].mxu1 %v12122_v12  ;;  %2742 = vmatmul.mubr.bf16.vlgmr.msra.gmra.mrb[12].mxu0 %v12122_v12 }
 0x194   :  { %2751 = vmatpush1.bf16.msra.mxu0 %v10610_v18  ;;  %7236 = vmatpush1.bf16.msra.mxu1 %v10613_v19  ;;  %v10693_v18 = vld [vmem:[#allocation11 + $0x13c] ss:$12 sps:$4 sm:$0xff]  }
 0x195   :  { %2752 = vmatprep.subr.bf16.mxu0 %v10618_v20  ;;  %7237 = vmatprep.subr.bf16.mxu1 %v10621_v21  ;;  %v10688_v19 = vld [vmem:[#allocation10 + $0xa48] ss:$100 sps:$4 sm:$0xff]   ;;  %v10691_v20 = vld [vmem:[#allocation11 + $0x138] ss:$12 sps:$4 sm:$0xff]  }
 0x196   :  { %2782 = vmatprep.mubr.bf16.mxu0 %v12118_v49  ;;  %v10696_v21 = vld [vmem:[#allocation10 + $0xb14] ss:$100 sps:$4 sm:$0xff]  }
 0x198   :  { %2753 = vmatpush1.bf16.msra.mxu0 %v10616_v22  ;;  %7238 = vmatpush1.bf16.msra.mxu1 %v10619_v23  ;;  %v10699_v22 = vld [vmem:[#allocation11 + $0x154] ss:$12 sps:$4 sm:$0xff]  }
 0x199   :  { %2754 = vmatprep.subr.bf16.mxu0 %v10624_v24  ;;  %7239 = vmatprep.subr.bf16.mxu1 %v10627_v25  ;;  %v10694_v23 = vld [vmem:[#allocation10 + $0xb10] ss:$100 sps:$4 sm:$0xff]   ;;  %v10702_v25 = vld [vmem:[#allocation10 + $0xbdc] ss:$100 sps:$4 sm:$0xff]  }
 0x19a   :  { %v10697_v24 = vld [vmem:[#allocation11 + $0x150] ss:$12 sps:$4 sm:$0xff]  }
 0x19c   :  { %2755 = vmatpush1.bf16.msra.mxu0 %v10622_v26  ;;  %7240 = vmatpush1.bf16.msra.mxu1 %v10625_v27  ;;  %v10705_v26 = vld [vmem:[#allocation11 + $0x16c] ss:$12 sps:$4 sm:$0xff]  }
 0x19d   :  { %2756 = vmatprep.subr.bf16.mxu0 %v10630_v28  ;;  %7241 = vmatprep.subr.bf16.mxu1 %v10633_v29  ;;  %v10700_v28 = vld [vmem:[#allocation10 + $0xbd8] ss:$100 sps:$4 sm:$0xff]   ;;  %v10703_v29 = vld [vmem:[#allocation11 + $0x168] ss:$12 sps:$4 sm:$0xff]  }
 0x1a0   :  { %2757 = vmatpush1.bf16.msra.mxu0 %v10628_v30  ;;  %7242 = vmatpush1.bf16.msra.mxu1 %v10631_v31  ;;  %v10708_v30 = vld [vmem:[#allocation10 + $0x34] ss:$100 sps:$4 sm:$0xff]   ;;  %v10711_v31 = vld [vmem:[#allocation11 + $0x184] ss:$12 sps:$4 sm:$0xff]  }
 0x1a1   :  { %2758 = vmatprep.subr.bf16.mxu0 %v10636_v32  ;;  %7243 = vmatprep.subr.bf16.mxu1 %v10639_v33  ;;  %v10706_v33 = vld [vmem:[#allocation10 + $0x30] ss:$100 sps:$4 sm:$0xff]  }
 0x1a4   :  { %2759 = vmatpush1.bf16.msra.mxu0 %v10634_v34  ;;  %7244 = vmatpush1.bf16.msra.mxu1 %v10637_v35  ;;  %v10709_v34 = vld [vmem:[#allocation11 + $0x180] ss:$12 sps:$4 sm:$0xff]  }
 0x1a5   :  { %2760 = vmatprep.subr.bf16.mxu0 %v10642_v36  ;;  %7245 = vmatprep.subr.bf16.mxu1 %v10645_v37  ;;  %v10714_v35 = vld [vmem:[#allocation10 + $0xfc] ss:$100 sps:$4 sm:$0xff]  }
 0x1a6   :  { %v12139_v42 = vpop.f32.mrb[0].mxu1  ;;  %v12141_v43 = vpop.f32.mrb[0].mxu0  ;;  %v10717_v37 = vld [vmem:[#allocation11 + $0x19c] ss:$12 sps:$4 sm:$0xff]  }
 0x1a7   :  { %v12143_v44 = vpop.f32.mrb[1].mxu1  ;;  %v2622_v47 = vpop.f32.mrb[1].mxu0  ;;  %v3143_v27 = vmul.f32 0.2, %v12141_v43  ;;  %vm3118_vm1 = vcmp.ge.f32.partialorder %v12141_v43, 0.0  ;;  %vm3128_vm11 = vcmp.ge.f32.partialorder %v12139_v42, 0.0 }
 0x1a8   :  { %2761 = vmatpush1.bf16.msra.mxu0 %v10640_v38  ;;  %v2829_v48 = vpop.f32.mrb[2].mxu1  ;;  %7246 = vmatpush1.bf16.msra.mxu1 %v10643_v39  ;;  %vm3119_vm0 = vcmp.ge.f32.partialorder %v2622_v47, 0.0  ;;  %v3144_v53 = vmul.f32 0.2, %v2622_v47  ;;  %v2624_v54 = vpop.f32.mrb[2].mxu0  ;;  %vm3129_vm9 = vcmp.ge.f32.partialorder %v12143_v44, 0.0 }
 0x1a9   :  { %v2830_v52 = vpop.f32.mrb[3].mxu1  ;;  %2762 = vmatprep.subr.bf16.mxu0 %v10648_v40  ;;  %7247 = vmatprep.subr.bf16.mxu1 %v10651_v41  ;;  %v2625_v55 = vpop.f32.mrb[3].mxu0  ;;  %v3168_v32 = vsel %vm3118_vm1, %v12141_v43, %v3143_v27  ;;  %v10712_v38 = vld [vmem:[#allocation10 + $0xf8] ss:$100 sps:$4 sm:$0xff]   ;;  %v10720_v40 = vld [vmem:[#allocation10 + $0x1c4] ss:$100 sps:$4 sm:$0xff]  }
 0x1aa   :  { %v3169_v56 = vsel %vm3119_vm0, %v2622_v47, %v3144_v53  ;;  %v12151_v36 = vpack.c.bf16 %v3168_v32, %v3168_v32  ;;  %v10715_v39 = vld [vmem:[#allocation11 + $0x198] ss:$12 sps:$4 sm:$0xff]   ;;  %v10723_v41 = vld [vmem:[#allocation11 + $0x1b4] ss:$12 sps:$4 sm:$0xff]   ;;  %v10724_v48 = vld [vmem:[#allocation10 + $0x288] ss:$100 sps:$4 sm:$0xff]  }
 0x1ab   :  { %v12145_v59 = vpack.c.bf16 %v3169_v56, %v3169_v56  ;;  %v10718_v43 = vld [vmem:[#allocation10 + $0x1c0] ss:$100 sps:$4 sm:$0xff]   ;;  %v10729_v47 = vld [vmem:[#allocation11 + $0x1cc] ss:$12 sps:$4 sm:$0xff]   ;;  %v10730_v53 = vld [vmem:[#allocation10 + $0x350] ss:$100 sps:$4 sm:$0xff]  }
 0x1ac   :  { %2763 = vmatpush1.bf16.msra.mxu0 %v10646_v45  ;;  %7248 = vmatpush1.bf16.msra.mxu1 %v10649_v46  ;;  %v10721_v45 = vld [vmem:[#allocation11 + $0x1b0] ss:$12 sps:$4 sm:$0xff]   ;;  %v10733_v54 = vld [vmem:[#allocation11 + $0x1e0] ss:$12 sps:$4 sm:$0xff]   ;;  %v10780_v32 = vld [vmem:[#allocation10 + $0x994] ss:$100 sps:$4 sm:$0xff]  }
 0x1ad   :  { %2764 = vmatprep.subr.bf16.mxu0 %v10654_v50  ;;  %7249 = vmatprep.subr.bf16.mxu1 %v10657_v51  ;;  %v10726_v46 = vld [vmem:[#allocation10 + $0x28c] ss:$100 sps:$4 sm:$0xff]   ;;  %v10727_v50 = vld [vmem:[#allocation11 + $0x1c8] ss:$12 sps:$4 sm:$0xff]   ;;  %v10738_v55 = vld [vmem:[#allocation10 + $0x41c] ss:$100 sps:$4 sm:$0xff]  }
 0x1ae   :  { %7267 = vmatprep.mubr.bf16.mxu1 %v12145_v59  ;;  %v10732_v51 = vld [vmem:[#allocation10 + $0x354] ss:$100 sps:$4 sm:$0xff]   ;;  %v10735_v52 = vld [vmem:[#allocation11 + $0x1e4] ss:$12 sps:$4 sm:$0xff]   ;;  %v10741_v56 = vld [vmem:[#allocation11 + $0x1fc] ss:$12 sps:$4 sm:$0xff]  }
 0x1af   :  { %v10769_v27 = vld [vmem:[#allocation11 + $0x270] ss:$12 sps:$4 sm:$0xff]  }
 0x1b0   :  { %2765 = vmatpush1.bf16.msra.mxu0 %v10652_v57  ;;  %7250 = vmatpush1.bf16.msra.mxu1 %v10655_v58  ;;  %v10736_v57 = vld [vmem:[#allocation10 + $0x418] ss:$100 sps:$4 sm:$0xff]  }
 0x1b1   :  { %2766 = vmatprep.subr.bf16.mxu0 %v10660_v60  ;;  %7251 = vmatprep.subr.bf16.mxu1 %v10663_v61  ;;  %v10739_v58 = vld [vmem:[#allocation11 + $0x1f8] ss:$12 sps:$4 sm:$0xff]   ;;  %v10747_v61 = vld [vmem:[#allocation11 + $0x214] ss:$12 sps:$4 sm:$0xff]  }
 0x1b2   :  { %v10744_v60 = vld [vmem:[#allocation10 + $0x4e4] ss:$100 sps:$4 sm:$0xff]  }
 0x1b4   :  { %2767 = vmatpush1.bf16.msra.mxu0 %v10658_v62  ;;  %7252 = vmatpush1.bf16.msra.mxu1 %v10661_v63 }
 0x1b5   :  { %2768 = vmatprep.subr.bf16.mxu0 %v10666_v0  ;;  %7253 = vmatprep.subr.bf16.mxu1 %v10669_v1  ;;  %v10742_v1 = vld [vmem:[#allocation10 + $0x4e0] ss:$100 sps:$4 sm:$0xff]  }
 0x1b8   :  { %2769 = vmatpush1.bf16.msra.mxu0 %v10664_v2  ;;  %7254 = vmatpush1.bf16.msra.mxu1 %v10667_v3  ;;  %v10745_v2 = vld [vmem:[#allocation11 + $0x210] ss:$12 sps:$4 sm:$0xff]  }
 0x1b9   :  { %2770 = vmatprep.subr.bf16.mxu0 %v10672_v4  ;;  %7255 = vmatprep.subr.bf16.mxu1 %v10675_v5  ;;  %v10750_v5 = vld [vmem:[#allocation10 + $0x5ac] ss:$100 sps:$4 sm:$0xff]  }
 0x1bc   :  { %2771 = vmatpush1.bf16.msra.mxu0 %v10670_v6  ;;  %7256 = vmatpush1.bf16.msra.mxu1 %v10673_v7  ;;  %v10753_v6 = vld [vmem:[#allocation11 + $0x22c] ss:$12 sps:$4 sm:$0xff]  }
 0x1bd   :  { %2772 = vmatprep.subr.bf16.mxu0 %v10678_v8  ;;  %7257 = vmatprep.subr.bf16.mxu1 %v10681_v9 }
 0x1c0   :  { %2773 = vmatpush1.bf16.msra.mxu0 %v10676_v10  ;;  %7258 = vmatpush1.bf16.msra.mxu1 %v10679_v11 }
 0x1c1   :  { %2774 = vmatprep.subr.bf16.mxu0 %v10684_v13  ;;  %7259 = vmatprep.subr.bf16.mxu1 %v10687_v14  ;;  %v10748_v13 = vld [vmem:[#allocation10 + $0x5a8] ss:$100 sps:$4 sm:$0xff]  }
 0x1c2   :  { %v10751_v14 = vld [vmem:[#allocation11 + $0x228] ss:$12 sps:$4 sm:$0xff]  }
 0x1c4   :  { %2775 = vmatpush1.bf16.msra.mxu0 %v10682_v15  ;;  %7260 = vmatpush1.bf16.msra.mxu1 %v10685_v16  ;;  %v10756_v16 = vld [vmem:[#allocation10 + $0x674] ss:$100 sps:$4 sm:$0xff]  }
 0x1c5   :  { %2776 = vmatprep.subr.bf16.mxu0 %v10690_v17  ;;  %7261 = vmatprep.subr.bf16.mxu1 %v10693_v18  ;;  %v10759_v17 = vld [vmem:[#allocation11 + $0x244] ss:$12 sps:$4 sm:$0xff]  }
 0x1c6   :  { %v10754_v18 = vld [vmem:[#allocation10 + $0x670] ss:$100 sps:$4 sm:$0xff]  }
 0x1c8   :  { %2777 = vmatpush1.bf16.msra.mxu0 %v10688_v19  ;;  %7262 = vmatpush1.bf16.msra.mxu1 %v10691_v20  ;;  %v10757_v19 = vld [vmem:[#allocation11 + $0x240] ss:$12 sps:$4 sm:$0xff]  }
 0x1c9   :  { %2778 = vmatprep.subr.bf16.mxu0 %v10696_v21  ;;  %7263 = vmatprep.subr.bf16.mxu1 %v10699_v22  ;;  %v10762_v20 = vld [vmem:[#allocation10 + $0x73c] ss:$100 sps:$4 sm:$0xff]  }
 0x1ca   :  { %v10765_v21 = vld [vmem:[#allocation11 + $0x25c] ss:$12 sps:$4 sm:$0xff]  }
 0x1cb   :  { %v10760_v22 = vld [vmem:[#allocation10 + $0x738] ss:$100 sps:$4 sm:$0xff]  }
 0x1cc   :  { %2779 = vmatpush1.bf16.msra.mxu0 %v10694_v23  ;;  %7264 = vmatpush1.bf16.msra.mxu1 %v10697_v24  ;;  %v10763_v23 = vld [vmem:[#allocation11 + $0x258] ss:$12 sps:$4 sm:$0xff]  }
 0x1cd   :  { %2780 = vmatprep.subr.bf16.mxu0 %v10702_v25  ;;  %7265 = vmatprep.subr.bf16.mxu1 %v10705_v26  ;;  %v10768_v24 = vld [vmem:[#allocation10 + $0x804] ss:$100 sps:$4 sm:$0xff]   ;;  %v10771_v25 = vld [vmem:[#allocation11 + $0x274] ss:$12 sps:$4 sm:$0xff]  }
 0x1ce   :  { %v10766_v26 = vld [vmem:[#allocation10 + $0x800] ss:$100 sps:$4 sm:$0xff]  }
 0x1d0   :  { %2781 = vmatpush1.bf16.msra.mxu0 %v10700_v28  ;;  %7266 = vmatpush1.bf16.msra.mxu1 %v10703_v29  ;;  %v10774_v28 = vld [vmem:[#allocation10 + $0x8cc] ss:$100 sps:$4 sm:$0xff]  }
 0x1d1   :  { %2832 = vmatprep.subr.bf16.mxu0 %v10708_v30  ;;  %7276 = vmatprep.subr.bf16.mxu1 %v10711_v31  ;;  %v10777_v29 = vld [vmem:[#allocation11 + $0x28c] ss:$12 sps:$4 sm:$0xff]   ;;  %v10775_v31 = vld [vmem:[#allocation11 + $0x288] ss:$12 sps:$4 sm:$0xff]  }
 0x1d2   :  { %v10772_v30 = vld [vmem:[#allocation10 + $0x8c8] ss:$100 sps:$4 sm:$0xff]  }
 0x1d3   :  { %7268 = vmatmul.mubr.bf16.vlgmr.msra.gmra.mrb[16].mxu1 %v12151_v36  ;;  %2783 = vmatmul.mubr.bf16.vlgmr.msra.gmra.mrb[16].mxu0 %v12122_v12 }
 0x1d4   :  { %2833 = vmatpush1.bf16.msra.mxu0 %v10706_v33  ;;  %7277 = vmatpush1.bf16.msra.mxu1 %v10709_v34  ;;  %v10783_v33 = vld [vmem:[#allocation11 + $0x2a4] ss:$12 sps:$4 sm:$0xff]  }
 0x1d5   :  { %2834 = vmatprep.subr.bf16.mxu0 %v10714_v35  ;;  %7278 = vmatprep.subr.bf16.mxu1 %v10717_v37  ;;  %v10778_v34 = vld [vmem:[#allocation10 + $0x990] ss:$100 sps:$4 sm:$0xff]   ;;  %v10781_v35 = vld [vmem:[#allocation11 + $0x2a0] ss:$12 sps:$4 sm:$0xff]  }
 0x1d6   :  { %2864 = vmatprep.mubr.bf16.mxu0 %v12118_v49  ;;  %v10786_v37 = vld [vmem:[#allocation10 + $0xa5c] ss:$100 sps:$4 sm:$0xff]  }
 0x1d8   :  { %2835 = vmatpush1.bf16.msra.mxu0 %v10712_v38  ;;  %7279 = vmatpush1.bf16.msra.mxu1 %v10715_v39  ;;  %v10789_v38 = vld [vmem:[#allocation11 + $0x2bc] ss:$12 sps:$4 sm:$0xff]  }
 0x1d9   :  { %2836 = vmatprep.subr.bf16.mxu0 %v10720_v40  ;;  %7280 = vmatprep.subr.bf16.mxu1 %v10723_v41  ;;  %v10784_v39 = vld [vmem:[#allocation10 + $0xa58] ss:$100 sps:$4 sm:$0xff]   ;;  %v10792_v41 = vld [vmem:[#allocation10 + $0xb24] ss:$100 sps:$4 sm:$0xff]  }
 0x1da   :  { %v10787_v40 = vld [vmem:[#allocation11 + $0x2b8] ss:$12 sps:$4 sm:$0xff]  }
 0x1dc   :  { %2837 = vmatpush1.bf16.msra.mxu0 %v10718_v43  ;;  %7281 = vmatpush1.bf16.msra.mxu1 %v10721_v45  ;;  %v10795_v43 = vld [vmem:[#allocation11 + $0x2d4] ss:$12 sps:$4 sm:$0xff]  }
 0x1dd   :  { %2838 = vmatprep.subr.bf16.mxu0 %v10726_v46  ;;  %7282 = vmatprep.subr.bf16.mxu1 %v10729_v47  ;;  %v10790_v45 = vld [vmem:[#allocation10 + $0xb20] ss:$100 sps:$4 sm:$0xff]   ;;  %v10793_v46 = vld [vmem:[#allocation11 + $0x2d0] ss:$12 sps:$4 sm:$0xff]  }
 0x1de   :  { %v10798_v47 = vld [vmem:[#allocation10 + $0xbec] ss:$100 sps:$4 sm:$0xff]  }
 0x1e0   :  { %2839 = vmatpush1.bf16.msra.mxu0 %v10724_v48  ;;  %7283 = vmatpush1.bf16.msra.mxu1 %v10727_v50  ;;  %v10801_v50 = vld [vmem:[#allocation11 + $0x2ec] ss:$12 sps:$4 sm:$0xff]  }
 0x1e1   :  { %2840 = vmatprep.subr.bf16.mxu0 %v10732_v51  ;;  %7284 = vmatprep.subr.bf16.mxu1 %v10735_v52  ;;  %v10796_v51 = vld [vmem:[#allocation10 + $0xbe8] ss:$100 sps:$4 sm:$0xff]  }
 0x1e2   :  { %v10799_v52 = vld [vmem:[#allocation11 + $0x2e8] ss:$12 sps:$4 sm:$0xff]  }
 0x1e4   :  { %2841 = vmatpush1.bf16.msra.mxu0 %v10730_v53  ;;  %7285 = vmatpush1.bf16.msra.mxu1 %v10733_v54  ;;  %v10804_v53 = vld [vmem:[#allocation10 + $0x44] ss:$100 sps:$4 sm:$0xff]  }
 0x1e5   :  { %2842 = vmatprep.subr.bf16.mxu0 %v10738_v55  ;;  %7286 = vmatprep.subr.bf16.mxu1 %v10741_v56  ;;  %v10807_v54 = vld [vmem:[#allocation11 + $0x304] ss:$12 sps:$4 sm:$0xff]  }
 0x1e6   :  { %v12156_v62 = vpop.f32.mrb[4].mxu1  ;;  %v12158_v63 = vpop.f32.mrb[4].mxu0  ;;  %v10802_v56 = vld [vmem:[#allocation10 + $0x40] ss:$100 sps:$4 sm:$0xff]  }
 0x1e7   :  { %v12160_v0 = vpop.f32.mrb[5].mxu1  ;;  %v2663_v3 = vpop.f32.mrb[5].mxu0  ;;  %v3145_v48 = vmul.f32 0.2, %v12158_v63  ;;  %vm3120_vm3 = vcmp.ge.f32.partialorder %v12158_v63, 0.0  ;;  %vm3132_vm15 = vcmp.ge.f32.partialorder %v12156_v62, 0.0 }
 0x1e8   :  { %2843 = vmatpush1.bf16.msra.mxu0 %v10736_v57  ;;  %v2911_v4 = vpop.f32.mrb[6].mxu1  ;;  %7287 = vmatpush1.bf16.msra.mxu1 %v10739_v58  ;;  %vm3121_vm2 = vcmp.ge.f32.partialorder %v2663_v3, 0.0  ;;  %v3146_v8 = vmul.f32 0.2, %v2663_v3  ;;  %v2665_v9 = vpop.f32.mrb[6].mxu0  ;;  %vm3133_vm13 = vcmp.ge.f32.partialorder %v12160_v0, 0.0 }
 0x1e9   :  { %v2912_v7 = vpop.f32.mrb[7].mxu1  ;;  %2844 = vmatprep.subr.bf16.mxu0 %v10744_v60  ;;  %7288 = vmatprep.subr.bf16.mxu1 %v10747_v61  ;;  %v2666_v10 = vpop.f32.mrb[7].mxu0  ;;  %v3170_v55 = vsel %vm3120_vm3, %v12158_v63, %v3145_v48  ;;  %v10805_v57 = vld [vmem:[#allocation11 + $0x300] ss:$12 sps:$4 sm:$0xff]   ;;  %v10813_v61 = vld [vmem:[#allocation11 + $0x31c] ss:$12 sps:$4 sm:$0xff]  }
 0x1ea   :  { %v3171_v11 = vsel %vm3121_vm2, %v2663_v3, %v3146_v8  ;;  %v10810_v58 = vld [vmem:[#allocation10 + $0x10c] ss:$100 sps:$4 sm:$0xff]   ;;  %v12168_v60 = vpack.c.bf16 %v3170_v55, %v3170_v55  ;;  %v10816_v63 = vld [vmem:[#allocation10 + $0x1d4] ss:$100 sps:$4 sm:$0xff]   ;;  %v10828_v10 = vld [vmem:[#allocation10 + $0x364] ss:$100 sps:$4 sm:$0xff]  }
 0x1eb   :  { %v12162_v15 = vpack.c.bf16 %v3171_v11, %v3171_v11  ;;  %v10819_v3 = vld [vmem:[#allocation11 + $0x334] ss:$12 sps:$4 sm:$0xff]   ;;  %v10825_v7 = vld [vmem:[#allocation11 + $0x34c] ss:$12 sps:$4 sm:$0xff]   ;;  %v10831_v11 = vld [vmem:[#allocation11 + $0x364] ss:$12 sps:$4 sm:$0xff]  }
 0x1ec   :  { %2845 = vmatpush1.bf16.msra.mxu0 %v10742_v1  ;;  %7289 = vmatpush1.bf16.msra.mxu1 %v10745_v2  ;;  %v10808_v1 = vld [vmem:[#allocation10 + $0x108] ss:$100 sps:$4 sm:$0xff]   ;;  %v10811_v2 = vld [vmem:[#allocation11 + $0x318] ss:$12 sps:$4 sm:$0xff]   ;;  %v10814_v4 = vld [vmem:[#allocation10 + $0x1d0] ss:$100 sps:$4 sm:$0xff]  }
 0x1ed   :  { %2846 = vmatprep.subr.bf16.mxu0 %v10750_v5  ;;  %7290 = vmatprep.subr.bf16.mxu1 %v10753_v6  ;;  %v10817_v5 = vld [vmem:[#allocation11 + $0x330] ss:$12 sps:$4 sm:$0xff]   ;;  %v10823_v9 = vld [vmem:[#allocation11 + $0x348] ss:$12 sps:$4 sm:$0xff]  }
 0x1ee   :  { %7308 = vmatprep.mubr.bf16.mxu1 %v12162_v15  ;;  %v10822_v6 = vld [vmem:[#allocation10 + $0x29c] ss:$100 sps:$4 sm:$0xff]   ;;  %v10856_v48 = vld [vmem:[#allocation10 + $0x748] ss:$100 sps:$4 sm:$0xff]  }
 0x1ef   :  { %v10820_v8 = vld [vmem:[#allocation10 + $0x298] ss:$100 sps:$4 sm:$0xff]  }
 0x1f0   :  { %2847 = vmatpush1.bf16.msra.mxu0 %v10748_v13  ;;  %7291 = vmatpush1.bf16.msra.mxu1 %v10751_v14  ;;  %v10826_v13 = vld [vmem:[#allocation10 + $0x360] ss:$100 sps:$4 sm:$0xff]  }
 0x1f1   :  { %2848 = vmatprep.subr.bf16.mxu0 %v10756_v16  ;;  %7292 = vmatprep.subr.bf16.mxu1 %v10759_v17  ;;  %v10829_v14 = vld [vmem:[#allocation11 + $0x360] ss:$12 sps:$4 sm:$0xff]   ;;  %v10837_v17 = vld [vmem:[#allocation11 + $0x37c] ss:$12 sps:$4 sm:$0xff]  }
 0x1f2   :  { %v10834_v16 = vld [vmem:[#allocation10 + $0x42c] ss:$100 sps:$4 sm:$0xff]   ;;  %v10870_v55 = vld [vmem:[#allocation10 + $0x8dc] ss:$100 sps:$4 sm:$0xff]  }
 0x1f4   :  { %2849 = vmatpush1.bf16.msra.mxu0 %v10754_v18  ;;  %7293 = vmatpush1.bf16.msra.mxu1 %v10757_v19  ;;  %v10832_v18 = vld [vmem:[#allocation10 + $0x428] ss:$100 sps:$4 sm:$0xff]   ;;  %v10835_v19 = vld [vmem:[#allocation11 + $0x378] ss:$12 sps:$4 sm:$0xff]  }
 0x1f5   :  { %2850 = vmatprep.subr.bf16.mxu0 %v10762_v20  ;;  %7294 = vmatprep.subr.bf16.mxu1 %v10765_v21  ;;  %v10840_v20 = vld [vmem:[#allocation10 + $0x4f4] ss:$100 sps:$4 sm:$0xff]  }
 0x1f6   :  { %v10843_v21 = vld [vmem:[#allocation11 + $0x394] ss:$12 sps:$4 sm:$0xff]  }
 0x1f8   :  { %2851 = vmatpush1.bf16.msra.mxu0 %v10760_v22  ;;  %7295 = vmatpush1.bf16.msra.mxu1 %v10763_v23 }
 0x1f9   :  { %2852 = vmatprep.subr.bf16.mxu0 %v10768_v24  ;;  %7296 = vmatprep.subr.bf16.mxu1 %v10771_v25  ;;  %v10838_v25 = vld [vmem:[#allocation10 + $0x4f0] ss:$100 sps:$4 sm:$0xff]  }
 0x1fc   :  { %2853 = vmatpush1.bf16.msra.mxu0 %v10766_v26  ;;  %7297 = vmatpush1.bf16.msra.mxu1 %v10769_v27  ;;  %v10841_v26 = vld [vmem:[#allocation11 + $0x390] ss:$12 sps:$4 sm:$0xff]  }
 0x1fd   :  { %2854 = vmatprep.subr.bf16.mxu0 %v10774_v28  ;;  %7298 = vmatprep.subr.bf16.mxu1 %v10777_v29  ;;  %v10846_v29 = vld [vmem:[#allocation10 + $0x5bc] ss:$100 sps:$4 sm:$0xff]  }
 0x200   :  { %2855 = vmatpush1.bf16.msra.mxu0 %v10772_v30  ;;  %7299 = vmatpush1.bf16.msra.mxu1 %v10775_v31  ;;  %v10849_v30 = vld [vmem:[#allocation11 + $0x3ac] ss:$12 sps:$4 sm:$0xff]  }
 0x201   :  { %2856 = vmatprep.subr.bf16.mxu0 %v10780_v32  ;;  %7300 = vmatprep.subr.bf16.mxu1 %v10783_v33 }
 0x204   :  { %2857 = vmatpush1.bf16.msra.mxu0 %v10778_v34  ;;  %7301 = vmatpush1.bf16.msra.mxu1 %v10781_v35  ;;  %v10844_v35 = vld [vmem:[#allocation10 + $0x5b8] ss:$100 sps:$4 sm:$0xff]  }
 0x205   :  { %2858 = vmatprep.subr.bf16.mxu0 %v10786_v37  ;;  %7302 = vmatprep.subr.bf16.mxu1 %v10789_v38  ;;  %v10847_v38 = vld [vmem:[#allocation11 + $0x3a8] ss:$12 sps:$4 sm:$0xff]  }
 0x208   :  { %2859 = vmatpush1.bf16.msra.mxu0 %v10784_v39  ;;  %7303 = vmatpush1.bf16.msra.mxu1 %v10787_v40  ;;  %v10852_v40 = vld [vmem:[#allocation10 + $0x684] ss:$100 sps:$4 sm:$0xff]  }
 0x209   :  { %2860 = vmatprep.subr.bf16.mxu0 %v10792_v41  ;;  %7304 = vmatprep.subr.bf16.mxu1 %v10795_v43  ;;  %v10855_v41 = vld [vmem:[#allocation11 + $0x3c4] ss:$12 sps:$4 sm:$0xff]  }
 0x20a   :  { %v10850_v43 = vld [vmem:[#allocation10 + $0x680] ss:$100 sps:$4 sm:$0xff]  }
 0x20c   :  { %2861 = vmatpush1.bf16.msra.mxu0 %v10790_v45  ;;  %7305 = vmatpush1.bf16.msra.mxu1 %v10793_v46  ;;  %v10853_v45 = vld [vmem:[#allocation11 + $0x3c0] ss:$12 sps:$4 sm:$0xff]  }
 0x20d   :  { %2862 = vmatprep.subr.bf16.mxu0 %v10798_v47  ;;  %7306 = vmatprep.subr.bf16.mxu1 %v10801_v50  ;;  %v10858_v46 = vld [vmem:[#allocation10 + $0x74c] ss:$100 sps:$4 sm:$0xff]   ;;  %v10861_v47 = vld [vmem:[#allocation11 + $0x3dc] ss:$12 sps:$4 sm:$0xff]   ;;  %v10859_v50 = vld [vmem:[#allocation11 + $0x3d8] ss:$12 sps:$4 sm:$0xff]  }
 0x210   :  { %2863 = vmatpush1.bf16.msra.mxu0 %v10796_v51  ;;  %7307 = vmatpush1.bf16.msra.mxu1 %v10799_v52  ;;  %v10864_v51 = vld [vmem:[#allocation10 + $0x814] ss:$100 sps:$4 sm:$0xff]  }
 0x211   :  { %2914 = vmatprep.subr.bf16.mxu0 %v10804_v53  ;;  %7317 = vmatprep.subr.bf16.mxu1 %v10807_v54  ;;  %v10867_v52 = vld [vmem:[#allocation11 + $0x3f4] ss:$12 sps:$4 sm:$0xff]   ;;  %v10865_v54 = vld [vmem:[#allocation11 + $0x3f0] ss:$12 sps:$4 sm:$0xff]  }
 0x212   :  { %v10862_v53 = vld [vmem:[#allocation10 + $0x810] ss:$100 sps:$4 sm:$0xff]  }
 0x213   :  { %7309 = vmatmul.mubr.bf16.vlgmr.msra.gmra.mrb[16].mxu1 %v12168_v60  ;;  %2865 = vmatmul.mubr.bf16.vlgmr.msra.gmra.mrb[20].mxu0 %v12122_v12 }
 0x214   :  { %2915 = vmatpush1.bf16.msra.mxu0 %v10802_v56  ;;  %7318 = vmatpush1.bf16.msra.mxu1 %v10805_v57  ;;  %v10873_v56 = vld [vmem:[#allocation11 + $0x40c] ss:$12 sps:$4 sm:$0xff]  }
 0x215   :  { %2916 = vmatprep.subr.bf16.mxu0 %v10810_v58  ;;  %7319 = vmatprep.subr.bf16.mxu1 %v10813_v61  ;;  %v10868_v57 = vld [vmem:[#allocation10 + $0x8d8] ss:$100 sps:$4 sm:$0xff]   ;;  %v10871_v58 = vld [vmem:[#allocation11 + $0x408] ss:$12 sps:$4 sm:$0xff]  }
 0x216   :  { %2946 = vmatprep.mubr.bf16.mxu0 %v12118_v49  ;;  %v10876_v61 = vld [vmem:[#allocation10 + $0x9a4] ss:$100 sps:$4 sm:$0xff]  }
 0x218   :  { %2917 = vmatpush1.bf16.msra.mxu0 %v10808_v1  ;;  %7320 = vmatpush1.bf16.msra.mxu1 %v10811_v2  ;;  %v10879_v1 = vld [vmem:[#allocation11 + $0x424] ss:$12 sps:$4 sm:$0xff]  }
 0x219   :  { %2918 = vmatprep.subr.bf16.mxu0 %v10816_v63  ;;  %7321 = vmatprep.subr.bf16.mxu1 %v10819_v3  ;;  %v10874_v2 = vld [vmem:[#allocation10 + $0x9a0] ss:$100 sps:$4 sm:$0xff]   ;;  %v10882_v3 = vld [vmem:[#allocation10 + $0xa6c] ss:$100 sps:$4 sm:$0xff]  }
 0x21a   :  { %v10877_v63 = vld [vmem:[#allocation11 + $0x420] ss:$12 sps:$4 sm:$0xff]  }
 0x21c   :  { %2919 = vmatpush1.bf16.msra.mxu0 %v10814_v4  ;;  %7322 = vmatpush1.bf16.msra.mxu1 %v10817_v5  ;;  %v10885_v4 = vld [vmem:[#allocation11 + $0x43c] ss:$12 sps:$4 sm:$0xff]  }
 0x21d   :  { %2920 = vmatprep.subr.bf16.mxu0 %v10822_v6  ;;  %7323 = vmatprep.subr.bf16.mxu1 %v10825_v7  ;;  %v10880_v5 = vld [vmem:[#allocation10 + $0xa68] ss:$100 sps:$4 sm:$0xff]   ;;  %v10883_v6 = vld [vmem:[#allocation11 + $0x438] ss:$12 sps:$4 sm:$0xff]  }
 0x21e   :  { %v10888_v7 = vld [vmem:[#allocation10 + $0xb34] ss:$100 sps:$4 sm:$0xff]  }
 0x220   :  { %2921 = vmatpush1.bf16.msra.mxu0 %v10820_v8  ;;  %7324 = vmatpush1.bf16.msra.mxu1 %v10823_v9  ;;  %v10891_v8 = vld [vmem:[#allocation11 + $0x454] ss:$12 sps:$4 sm:$0xff]  }
 0x221   :  { %2922 = vmatprep.subr.bf16.mxu0 %v10828_v10  ;;  %7325 = vmatprep.subr.bf16.mxu1 %v10831_v11  ;;  %v10886_v9 = vld [vmem:[#allocation10 + $0xb30] ss:$100 sps:$4 sm:$0xff]   ;;  %v10894_v11 = vld [vmem:[#allocation10 + $0xbfc] ss:$100 sps:$4 sm:$0xff]  }
 0x222   :  { %v10889_v10 = vld [vmem:[#allocation11 + $0x450] ss:$12 sps:$4 sm:$0xff]  }
 0x224   :  { %2923 = vmatpush1.bf16.msra.mxu0 %v10826_v13  ;;  %7326 = vmatpush1.bf16.msra.mxu1 %v10829_v14  ;;  %v10897_v13 = vld [vmem:[#allocation11 + $0x46c] ss:$12 sps:$4 sm:$0xff]  }
 0x225   :  { %2924 = vmatprep.subr.bf16.mxu0 %v10834_v16  ;;  %7327 = vmatprep.subr.bf16.mxu1 %v10837_v17  ;;  %v10892_v16 = vld [vmem:[#allocation10 + $0xbf8] ss:$100 sps:$4 sm:$0xff]   ;;  %v10895_v17 = vld [vmem:[#allocation11 + $0x468] ss:$12 sps:$4 sm:$0xff]  }
 0x226   :  { %v12173_v22 = vpop.f32.mrb[8].mxu1  ;;  %v12175_v23 = vpop.f32.mrb[8].mxu0 }
 0x227   :  { %v12177_v24 = vpop.f32.mrb[9].mxu1  ;;  %v2704_v27 = vpop.f32.mrb[9].mxu0  ;;  %v3147_v14 = vmul.f32 0.2, %v12175_v23  ;;  %vm3122_vm5 = vcmp.ge.f32.partialorder %v12175_v23, 0.0  ;;  %vm3136_vm3 = vcmp.ge.f32.partialorder %v12173_v22, 0.0 }
 0x228   :  { %2925 = vmatpush1.bf16.msra.mxu0 %v10832_v18  ;;  %v2993_v28 = vpop.f32.mrb[10].mxu1  ;;  %7328 = vmatpush1.bf16.msra.mxu1 %v10835_v19  ;;  %vm3123_vm4 = vcmp.ge.f32.partialorder %v2704_v27, 0.0  ;;  %v3148_v32 = vmul.f32 0.2, %v2704_v27  ;;  %v2706_v33 = vpop.f32.mrb[10].mxu0  ;;  %vm3137_vm2 = vcmp.ge.f32.partialorder %v12177_v24, 0.0 }
 0x229   :  { %v2994_v31 = vpop.f32.mrb[11].mxu1  ;;  %2926 = vmatprep.subr.bf16.mxu0 %v10840_v20  ;;  %7329 = vmatprep.subr.bf16.mxu1 %v10843_v21  ;;  %v2707_v34 = vpop.f32.mrb[11].mxu0  ;;  %v10900_v18 = vld [vmem:[#allocation10 + $0x54] ss:$100 sps:$4 sm:$0xff]   ;;  %v10903_v19 = vld [vmem:[#allocation11 + $0x484] ss:$12 sps:$4 sm:$0xff]   ;;  %v3172_v20 = vsel %vm3122_vm5, %v12175_v23, %v3147_v14 }
 0x22a   :  { %v3173_v37 = vsel %vm3123_vm4, %v2704_v27, %v3148_v32  ;;  %v10898_v21 = vld [vmem:[#allocation10 + $0x50] ss:$100 sps:$4 sm:$0xff]   ;;  %v10909_v27 = vld [vmem:[#allocation11 + $0x49c] ss:$12 sps:$4 sm:$0xff]   ;;  %v12185_v28 = vpack.c.bf16 %v3172_v20, %v3172_v20  ;;  %v10910_v32 = vld [vmem:[#allocation10 + $0x1e0] ss:$100 sps:$4 sm:$0xff]  }
 0x22b   :  { %v12179_v39 = vpack.c.bf16 %v3173_v37, %v3173_v37  ;;  %v10912_v23 = vld [vmem:[#allocation10 + $0x1e4] ss:$100 sps:$4 sm:$0xff]   ;;  %v10915_v31 = vld [vmem:[#allocation11 + $0x4b4] ss:$12 sps:$4 sm:$0xff]   ;;  %v10913_v33 = vld [vmem:[#allocation11 + $0x4b0] ss:$12 sps:$4 sm:$0xff]  }
 0x22c   :  { %2927 = vmatpush1.bf16.msra.mxu0 %v10838_v25  ;;  %7330 = vmatpush1.bf16.msra.mxu1 %v10841_v26  ;;  %v10901_v25 = vld [vmem:[#allocation11 + $0x480] ss:$12 sps:$4 sm:$0xff]   ;;  %v10960_v20 = vld [vmem:[#allocation10 + $0x824] ss:$100 sps:$4 sm:$0xff]  }
 0x22d   :  { %2928 = vmatprep.subr.bf16.mxu0 %v10846_v29  ;;  %7331 = vmatprep.subr.bf16.mxu1 %v10849_v30  ;;  %v10906_v26 = vld [vmem:[#allocation10 + $0x11c] ss:$100 sps:$4 sm:$0xff]   ;;  %v10907_v30 = vld [vmem:[#allocation11 + $0x498] ss:$12 sps:$4 sm:$0xff]   ;;  %v10918_v34 = vld [vmem:[#allocation10 + $0x2ac] ss:$100 sps:$4 sm:$0xff]  }
 0x22e   :  { %7349 = vmatprep.mubr.bf16.mxu1 %v12179_v39  ;;  %v10904_v29 = vld [vmem:[#allocation10 + $0x118] ss:$100 sps:$4 sm:$0xff]   ;;  %v10916_v37 = vld [vmem:[#allocation10 + $0x2a8] ss:$100 sps:$4 sm:$0xff]  }
 0x22f   :  { %v10949_v14 = vld [vmem:[#allocation11 + $0x540] ss:$12 sps:$4 sm:$0xff]  }
 0x230   :  { %2929 = vmatpush1.bf16.msra.mxu0 %v10844_v35  ;;  %7332 = vmatpush1.bf16.msra.mxu1 %v10847_v38  ;;  %v10921_v35 = vld [vmem:[#allocation11 + $0x4cc] ss:$12 sps:$4 sm:$0xff]   ;;  %v10919_v38 = vld [vmem:[#allocation11 + $0x4c8] ss:$12 sps:$4 sm:$0xff]  }
 0x231   :  { %2930 = vmatprep.subr.bf16.mxu0 %v10852_v40  ;;  %7333 = vmatprep.subr.bf16.mxu1 %v10855_v41  ;;  %v10924_v40 = vld [vmem:[#allocation10 + $0x374] ss:$100 sps:$4 sm:$0xff]   ;;  %v10927_v41 = vld [vmem:[#allocation11 + $0x4e4] ss:$12 sps:$4 sm:$0xff]  }
 0x234   :  { %2931 = vmatpush1.bf16.msra.mxu0 %v10850_v43  ;;  %7334 = vmatpush1.bf16.msra.mxu1 %v10853_v45  ;;  %v10922_v43 = vld [vmem:[#allocation10 + $0x370] ss:$100 sps:$4 sm:$0xff]   ;;  %v10925_v45 = vld [vmem:[#allocation11 + $0x4e0] ss:$12 sps:$4 sm:$0xff]  }
 0x235   :  { %2932 = vmatprep.subr.bf16.mxu0 %v10858_v46  ;;  %7335 = vmatprep.subr.bf16.mxu1 %v10861_v47  ;;  %v10930_v46 = vld [vmem:[#allocation10 + $0x43c] ss:$100 sps:$4 sm:$0xff]  }
 0x236   :  { %v10933_v47 = vld [vmem:[#allocation11 + $0x4fc] ss:$12 sps:$4 sm:$0xff]  }
 0x238   :  { %2933 = vmatpush1.bf16.msra.mxu0 %v10856_v48  ;;  %7336 = vmatpush1.bf16.msra.mxu1 %v10859_v50  ;;  %v10928_v48 = vld [vmem:[#allocation10 + $0x438] ss:$100 sps:$4 sm:$0xff]  }
 0x239   :  { %2934 = vmatprep.subr.bf16.mxu0 %v10864_v51  ;;  %7337 = vmatprep.subr.bf16.mxu1 %v10867_v52  ;;  %v10931_v50 = vld [vmem:[#allocation11 + $0x4f8] ss:$12 sps:$4 sm:$0xff]   ;;  %v10939_v52 = vld [vmem:[#allocation11 + $0x514] ss:$12 sps:$4 sm:$0xff]  }
 0x23a   :  { %v10936_v51 = vld [vmem:[#allocation10 + $0x504] ss:$100 sps:$4 sm:$0xff]  }
 0x23c   :  { %2935 = vmatpush1.bf16.msra.mxu0 %v10862_v53  ;;  %7338 = vmatpush1.bf16.msra.mxu1 %v10865_v54 }
 0x23d   :  { %2936 = vmatprep.subr.bf16.mxu0 %v10870_v55  ;;  %7339 = vmatprep.subr.bf16.mxu1 %v10873_v56  ;;  %v10934_v56 = vld [vmem:[#allocation10 + $0x500] ss:$100 sps:$4 sm:$0xff]  }
 0x240   :  { %2937 = vmatpush1.bf16.msra.mxu0 %v10868_v57  ;;  %7340 = vmatpush1.bf16.msra.mxu1 %v10871_v58  ;;  %v10937_v57 = vld [vmem:[#allocation11 + $0x510] ss:$12 sps:$4 sm:$0xff]  }
 0x241   :  { %2938 = vmatprep.subr.bf16.mxu0 %v10876_v61  ;;  %7341 = vmatprep.subr.bf16.mxu1 %v10879_v1  ;;  %v10942_v1 = vld [vmem:[#allocation10 + $0x5cc] ss:$100 sps:$4 sm:$0xff]  }
 0x244   :  { %2939 = vmatpush1.bf16.msra.mxu0 %v10874_v2  ;;  %7342 = vmatpush1.bf16.msra.mxu1 %v10877_v63  ;;  %v10945_v2 = vld [vmem:[#allocation11 + $0x52c] ss:$12 sps:$4 sm:$0xff]  }
 0x245   :  { %2940 = vmatprep.subr.bf16.mxu0 %v10882_v3  ;;  %7343 = vmatprep.subr.bf16.mxu1 %v10885_v4 }
 0x248   :  { %2941 = vmatpush1.bf16.msra.mxu0 %v10880_v5  ;;  %7344 = vmatpush1.bf16.msra.mxu1 %v10883_v6  ;;  %v10940_v6 = vld [vmem:[#allocation10 + $0x5c8] ss:$100 sps:$4 sm:$0xff]  }
 0x249   :  { %2942 = vmatprep.subr.bf16.mxu0 %v10888_v7  ;;  %7345 = vmatprep.subr.bf16.mxu1 %v10891_v8  ;;  %v10943_v7 = vld [vmem:[#allocation11 + $0x528] ss:$12 sps:$4 sm:$0xff]  }
 0x24c   :  { %2943 = vmatpush1.bf16.msra.mxu0 %v10886_v9  ;;  %7346 = vmatpush1.bf16.msra.mxu1 %v10889_v10  ;;  %v10948_v10 = vld [vmem:[#allocation10 + $0x694] ss:$100 sps:$4 sm:$0xff]  }
 0x24d   :  { %2944 = vmatprep.subr.bf16.mxu0 %v10894_v11  ;;  %7347 = vmatprep.subr.bf16.mxu1 %v10897_v13  ;;  %v10951_v11 = vld [vmem:[#allocation11 + $0x544] ss:$12 sps:$4 sm:$0xff]  }
 0x24e   :  { %v10946_v13 = vld [vmem:[#allocation10 + $0x690] ss:$100 sps:$4 sm:$0xff]  }
 0x250   :  { %2945 = vmatpush1.bf16.msra.mxu0 %v10892_v16  ;;  %7348 = vmatpush1.bf16.msra.mxu1 %v10895_v17  ;;  %v10954_v16 = vld [vmem:[#allocation10 + $0x75c] ss:$100 sps:$4 sm:$0xff]  }
 0x251   :  { %2996 = vmatprep.subr.bf16.mxu0 %v10900_v18  ;;  %7358 = vmatprep.subr.bf16.mxu1 %v10903_v19  ;;  %v10957_v17 = vld [vmem:[#allocation11 + $0x55c] ss:$12 sps:$4 sm:$0xff]   ;;  %v10955_v19 = vld [vmem:[#allocation11 + $0x558] ss:$12 sps:$4 sm:$0xff]  }
 0x252   :  { %v10952_v18 = vld [vmem:[#allocation10 + $0x758] ss:$100 sps:$4 sm:$0xff]  }
 0x253   :  { %7350 = vmatmul.mubr.bf16.vlgmr.msra.gmra.mrb[16].mxu1 %v12185_v28  ;;  %2947 = vmatmul.mubr.bf16.vlgmr.msra.gmra.mrb[24].mxu0 %v12122_v12 }
 0x254   :  { %2997 = vmatpush1.bf16.msra.mxu0 %v10898_v21  ;;  %7359 = vmatpush1.bf16.msra.mxu1 %v10901_v25  ;;  %v10963_v21 = vld [vmem:[#allocation11 + $0x574] ss:$12 sps:$4 sm:$0xff]  }
 0x255   :  { %2998 = vmatprep.subr.bf16.mxu0 %v10906_v26  ;;  %7360 = vmatprep.subr.bf16.mxu1 %v10909_v27  ;;  %v10958_v25 = vld [vmem:[#allocation10 + $0x820] ss:$100 sps:$4 sm:$0xff]   ;;  %v10961_v26 = vld [vmem:[#allocation11 + $0x570] ss:$12 sps:$4 sm:$0xff]  }
 0x256   :  { %3028 = vmatprep.mubr.bf16.mxu0 %v12118_v49  ;;  %v10966_v27 = vld [vmem:[#allocation10 + $0x8ec] ss:$100 sps:$4 sm:$0xff]  }
 0x258   :  { %2999 = vmatpush1.bf16.msra.mxu0 %v10904_v29  ;;  %7361 = vmatpush1.bf16.msra.mxu1 %v10907_v30  ;;  %v10969_v29 = vld [vmem:[#allocation11 + $0x58c] ss:$12 sps:$4 sm:$0xff]  }
 0x259   :  { %3000 = vmatprep.subr.bf16.mxu0 %v10912_v23  ;;  %7362 = vmatprep.subr.bf16.mxu1 %v10915_v31  ;;  %v10964_v30 = vld [vmem:[#allocation10 + $0x8e8] ss:$100 sps:$4 sm:$0xff]   ;;  %v10972_v31 = vld [vmem:[#allocation10 + $0x9b4] ss:$100 sps:$4 sm:$0xff]  }
 0x25a   :  { %v10967_v23 = vld [vmem:[#allocation11 + $0x588] ss:$12 sps:$4 sm:$0xff]  }
 0x25c   :  { %3001 = vmatpush1.bf16.msra.mxu0 %v10910_v32  ;;  %7363 = vmatpush1.bf16.msra.mxu1 %v10913_v33  ;;  %v10975_v32 = vld [vmem:[#allocation11 + $0x5a4] ss:$12 sps:$4 sm:$0xff]  }
 0x25d   :  { %3002 = vmatprep.subr.bf16.mxu0 %v10918_v34  ;;  %7364 = vmatprep.subr.bf16.mxu1 %v10921_v35  ;;  %v10970_v33 = vld [vmem:[#allocation10 + $0x9b0] ss:$100 sps:$4 sm:$0xff]   ;;  %v10973_v34 = vld [vmem:[#allocation11 + $0x5a0] ss:$12 sps:$4 sm:$0xff]  }
 0x25e   :  { %v10978_v35 = vld [vmem:[#allocation10 + $0xa7c] ss:$100 sps:$4 sm:$0xff]  }
 0x260   :  { %3003 = vmatpush1.bf16.msra.mxu0 %v10916_v37  ;;  %7365 = vmatpush1.bf16.msra.mxu1 %v10919_v38  ;;  %v10981_v37 = vld [vmem:[#allocation11 + $0x5bc] ss:$12 sps:$4 sm:$0xff]  }
 0x261   :  { %3004 = vmatprep.subr.bf16.mxu0 %v10924_v40  ;;  %7366 = vmatprep.subr.bf16.mxu1 %v10927_v41  ;;  %v10976_v38 = vld [vmem:[#allocation10 + $0xa78] ss:$100 sps:$4 sm:$0xff]   ;;  %v10984_v41 = vld [vmem:[#allocation10 + $0xb44] ss:$100 sps:$4 sm:$0xff]  }
 0x262   :  { %v10979_v40 = vld [vmem:[#allocation11 + $0x5b8] ss:$12 sps:$4 sm:$0xff]  }
 0x264   :  { %3005 = vmatpush1.bf16.msra.mxu0 %v10922_v43  ;;  %7367 = vmatpush1.bf16.msra.mxu1 %v10925_v45  ;;  %v10987_v43 = vld [vmem:[#allocation11 + $0x5d4] ss:$12 sps:$4 sm:$0xff]  }
 0x265   :  { %3006 = vmatprep.subr.bf16.mxu0 %v10930_v46  ;;  %7368 = vmatprep.subr.bf16.mxu1 %v10933_v47  ;;  %v10982_v45 = vld [vmem:[#allocation10 + $0xb40] ss:$100 sps:$4 sm:$0xff]   ;;  %v10985_v46 = vld [vmem:[#allocation11 + $0x5d0] ss:$12 sps:$4 sm:$0xff]  }
 0x266   :  { %v12190_v53 = vpop.f32.mrb[12].mxu1  ;;  %v12192_v54 = vpop.f32.mrb[12].mxu0  ;;  %v10990_v47 = vld [vmem:[#allocation10 + $0xc0c] ss:$100 sps:$4 sm:$0xff]  }
 0x267   :  { %v12194_v55 = vpop.f32.mrb[13].mxu1  ;;  %v2745_v58 = vpop.f32.mrb[13].mxu0  ;;  %vm3124_vm7 = vcmp.ge.f32.partialorder %v12192_v54, 0.0 }
 0x268   :  { %3007 = vmatpush1.bf16.msra.mxu0 %v10928_v48  ;;  %v3075_v61 = vpop.f32.mrb[14].mxu1  ;;  %7369 = vmatpush1.bf16.msra.mxu1 %v10931_v50  ;;  %vm3125_vm6 = vcmp.ge.f32.partialorder %v2745_v58, 0.0  ;;  %v3150_v3 = vmul.f32 0.2, %v2745_v58  ;;  %v2747_v4 = vpop.f32.mrb[14].mxu0 }
 0x269   :  { %v3076_v63 = vpop.f32.mrb[15].mxu1  ;;  %3008 = vmatprep.subr.bf16.mxu0 %v10936_v51  ;;  %7370 = vmatprep.subr.bf16.mxu1 %v10939_v52  ;;  %v2748_v5 = vpop.f32.mrb[15].mxu0  ;;  %v10993_v48 = vld [vmem:[#allocation11 + $0x5ec] ss:$12 sps:$4 sm:$0xff]   ;;  %v3149_v50 = vmul.f32 0.2, %v12192_v54 }
 0x26a   :  { %v3175_v8 = vsel %vm3125_vm6, %v2745_v58, %v3150_v3  ;;  %v10988_v51 = vld [vmem:[#allocation10 + $0xc08] ss:$100 sps:$4 sm:$0xff]   ;;  %v11000_v4 = vld [vmem:[#allocation11 + $0x618] ss:$12 sps:$4 sm:$0xff]   ;;  %vm3141_vm6 = vcmp.ge.f32.partialorder %v12194_v55, 0.0 }
 0x26b   :  { %v12196_v9 = vpack.c.bf16 %v3175_v8, %v3175_v8  ;;  %v10991_v52 = vld [vmem:[#allocation11 + $0x5e8] ss:$12 sps:$4 sm:$0xff]   ;;  %v3174_v58 = vsel %vm3124_vm7, %v12192_v54, %v3149_v50  ;;  %v10995_v61 = vld [vmem:[#allocation11 + $0x600] ss:$12 sps:$4 sm:$0xff]   ;;  %vm3140_vm7 = vcmp.ge.f32.partialorder %v12190_v53, 0.0 }
 0x26c   :  { %3009 = vmatpush1.bf16.msra.mxu0 %v10934_v56  ;;  %7371 = vmatpush1.bf16.msra.mxu1 %v10937_v57  ;;  %v10994_v56 = vld [vmem:[#allocation10 + $0x6a0] ss:$100 sps:$4 sm:$0xff]   ;;  %v11002_v63 = vld [vmem:[#allocation11 + $0x61c] ss:$12 sps:$4 sm:$0xff]   ;;  %v12202_v3 = vpack.c.bf16 %v3174_v58, %v3174_v58  ;;  %v11004_v54 = vld [vmem:[#allocation10 + $0x830] ss:$100 sps:$4 sm:$0xff]  }
 0x26d   :  { %3010 = vmatprep.subr.bf16.mxu0 %v10942_v1  ;;  %7372 = vmatprep.subr.bf16.mxu1 %v10945_v2  ;;  %v10997_v57 = vld [vmem:[#allocation11 + $0x604] ss:$12 sps:$4 sm:$0xff]   ;;  %v10999_v2 = vld [vmem:[#allocation10 + $0x768] ss:$100 sps:$4 sm:$0xff]  }
 0x26e   :  { %7390 = vmatprep.mubr.bf16.mxu1 %v12196_v9  ;;  %v10998_v1 = vld [vmem:[#allocation10 + $0x60] ss:$100 sps:$4 sm:$0xff]   ;;  %v11003_v5 = vld [vmem:[#allocation10 + $0x128] ss:$100 sps:$4 sm:$0xff]   ;;  %v11008_v8 = vld [vmem:[#allocation10 + $0x1f0] ss:$100 sps:$4 sm:$0xff]  }
 0x26f   :  { %v11041_v50 = vld [vmem:[#allocation11 + $0x6dc] ss:$12 sps:$4 sm:$0xff]   ;;  %v11047_v58 = vld [vmem:[#allocation11 + $0xf8] ss:$12 sps:$4 sm:$0xff]  }
 0x270   :  { %3011 = vmatpush1.bf16.msra.mxu0 %v10940_v6  ;;  %7373 = vmatpush1.bf16.msra.mxu1 %v10943_v7  ;;  %v11007_v6 = vld [vmem:[#allocation11 + $0x634] ss:$12 sps:$4 sm:$0xff]   ;;  %v11005_v7 = vld [vmem:[#allocation11 + $0x630] ss:$12 sps:$4 sm:$0xff]  }
 0x271   :  { %3012 = vmatprep.subr.bf16.mxu0 %v10948_v10  ;;  %7374 = vmatprep.subr.bf16.mxu1 %v10951_v11  ;;  %v11009_v10 = vld [vmem:[#allocation10 + $0x8f8] ss:$100 sps:$4 sm:$0xff]  }
 0x272   :  { %v11012_v11 = vld [vmem:[#allocation11 + $0x64c] ss:$12 sps:$4 sm:$0xff]  }
 0x274   :  { %3013 = vmatpush1.bf16.msra.mxu0 %v10946_v13  ;;  %7375 = vmatpush1.bf16.msra.mxu1 %v10949_v14  ;;  %v11010_v13 = vld [vmem:[#allocation11 + $0x648] ss:$12 sps:$4 sm:$0xff]   ;;  %v11013_v14 = vld [vmem:[#allocation10 + $0x2b8] ss:$100 sps:$4 sm:$0xff]  }
 0x275   :  { %3014 = vmatprep.subr.bf16.mxu0 %v10954_v16  ;;  %7376 = vmatprep.subr.bf16.mxu1 %v10957_v17  ;;  %v11014_v16 = vld [vmem:[#allocation10 + $0x9c0] ss:$100 sps:$4 sm:$0xff]  }
 0x276   :  { %v11017_v17 = vld [vmem:[#allocation11 + $0x664] ss:$12 sps:$4 sm:$0xff]  }
 0x278   :  { %3015 = vmatpush1.bf16.msra.mxu0 %v10952_v18  ;;  %7377 = vmatpush1.bf16.msra.mxu1 %v10955_v19  ;;  %v11015_v18 = vld [vmem:[#allocation11 + $0x660] ss:$12 sps:$4 sm:$0xff]  }
 0x279   :  { %3016 = vmatprep.subr.bf16.mxu0 %v10960_v20  ;;  %7378 = vmatprep.subr.bf16.mxu1 %v10963_v21  ;;  %v11018_v19 = vld [vmem:[#allocation10 + $0x380] ss:$100 sps:$4 sm:$0xff]   ;;  %v11022_v20 = vld [vmem:[#allocation11 + $0x67c] ss:$12 sps:$4 sm:$0xff]  }
 0x27a   :  { %v11020_v21 = vld [vmem:[#allocation11 + $0x678] ss:$12 sps:$4 sm:$0xff]  }
 0x27c   :  { %3017 = vmatpush1.bf16.msra.mxu0 %v10958_v25  ;;  %7379 = vmatpush1.bf16.msra.mxu1 %v10961_v26  ;;  %v11023_v25 = vld [vmem:[#allocation10 + $0x448] ss:$100 sps:$4 sm:$0xff]   ;;  %v11024_v26 = vld [vmem:[#allocation10 + $0xb50] ss:$100 sps:$4 sm:$0xff]  }
 0x27d   :  { %3018 = vmatprep.subr.bf16.mxu0 %v10966_v27  ;;  %7380 = vmatprep.subr.bf16.mxu1 %v10969_v29  ;;  %v11027_v27 = vld [vmem:[#allocation11 + $0x694] ss:$12 sps:$4 sm:$0xff]  }
 0x280   :  { %3019 = vmatpush1.bf16.msra.mxu0 %v10964_v30  ;;  %7381 = vmatpush1.bf16.msra.mxu1 %v10967_v23  ;;  %v11025_v30 = vld [vmem:[#allocation11 + $0x690] ss:$12 sps:$4 sm:$0xff]  }
 0x281   :  { %3020 = vmatprep.subr.bf16.mxu0 %v10972_v31  ;;  %7382 = vmatprep.subr.bf16.mxu1 %v10975_v32  ;;  %v11028_v23 = vld [vmem:[#allocation10 + $0x510] ss:$100 sps:$4 sm:$0xff]  }
 0x284   :  { %3021 = vmatpush1.bf16.msra.mxu0 %v10970_v33  ;;  %7383 = vmatpush1.bf16.msra.mxu1 %v10973_v34  ;;  %v11029_v34 = vld [vmem:[#allocation10 + $0xc18] ss:$100 sps:$4 sm:$0xff]  }
 0x285   :  { %3022 = vmatprep.subr.bf16.mxu0 %v10978_v35  ;;  %7384 = vmatprep.subr.bf16.mxu1 %v10981_v37  ;;  %v11032_v35 = vld [vmem:[#allocation11 + $0x6ac] ss:$12 sps:$4 sm:$0xff]  }
 0x288   :  { %3023 = vmatpush1.bf16.msra.mxu0 %v10976_v38  ;;  %7385 = vmatpush1.bf16.msra.mxu1 %v10979_v40  ;;  %v11030_v38 = vld [vmem:[#allocation11 + $0x6a8] ss:$12 sps:$4 sm:$0xff]  }
 0x289   :  { %3024 = vmatprep.subr.bf16.mxu0 %v10984_v41  ;;  %7386 = vmatprep.subr.bf16.mxu1 %v10987_v43  ;;  %v11033_v41 = vld [vmem:[#allocation10 + $0x5d8] ss:$100 sps:$4 sm:$0xff]  }
 0x28c   :  { %3025 = vmatpush1.bf16.msra.mxu0 %v10982_v45  ;;  %7387 = vmatpush1.bf16.msra.mxu1 %v10985_v46  ;;  %v11036_v45 = vld [vmem:[#allocation11 + $0x6c4] ss:$12 sps:$4 sm:$0xff]   ;;  %v11037_v46 = vld [vmem:[#allocation11 + $0xc8] ss:$12 sps:$4 sm:$0xff]  }
 0x28d   :  { %3026 = vmatprep.subr.bf16.mxu0 %v10990_v47  ;;  %7388 = vmatprep.subr.bf16.mxu1 %v10993_v48  ;;  %v11034_v47 = vld [vmem:[#allocation11 + $0x6c0] ss:$12 sps:$4 sm:$0xff]   ;;  %v11038_v48 = vld [vmem:[#allocation11 + $0x8] ss:$12 sps:$4 sm:$0xff]  }
 0x290   :  { %3027 = vmatpush1.bf16.msra.mxu0 %v10988_v51  ;;  %7389 = vmatpush1.bf16.msra.mxu1 %v10991_v52  ;;  %v11039_v51 = vld [vmem:[#allocation11 + $0x6d8] ss:$12 sps:$4 sm:$0xff]   ;;  %v11042_v52 = vld [vmem:[#allocation11 + $0xe0] ss:$12 sps:$4 sm:$0xff]  }
 0x291   :  { %9835 = vmatprep.subr.bf16.mxu0 %v10994_v56  ;;  %7399 = vmatprep.subr.bf16.mxu1 %v10997_v57  ;;  %v11043_v56 = vld [vmem:[#allocation11 + $0x20] ss:$12 sps:$4 sm:$0xff]  }
 0x292   :  { %v11046_v57 = vld [vmem:[#allocation11 + $0x6f4] ss:$12 sps:$4 sm:$0xff]  }
 0x293   :  { %7391 = vmatmul.mubr.bf16.vlgmr.msra.gmra.mrb[16].mxu1 %v12202_v3  ;;  %3029 = vmatmul.mubr.bf16.vlgmr.msra.gmra.mrb[28].mxu0 %v12122_v12 }
 0x294   :  { %9836 = vmatpush3.bf16.msra.mxu0 %v10998_v1  ;;  %7400 = vmatpush1.bf16.msra.mxu1 %v10995_v61  ;;  %v11044_v61 = vld [vmem:[#allocation11 + $0x6f0] ss:$12 sps:$4 sm:$0xff]   ;;  %v11048_v1 = vld [vmem:[#allocation11 + $0x38] ss:$12 sps:$4 sm:$0xff]  }
 0x295   :  { %9837 = vmatprep.subr.bf16.mxu0 %v10999_v2  ;;  %7401 = vmatprep.subr.bf16.mxu1 %v11002_v63  ;;  %v11051_v2 = vld [vmem:[#allocation11 + $0x70c] ss:$12 sps:$4 sm:$0xff]   ;;  %v11052_v63 = vld [vmem:[#allocation11 + $0x110] ss:$12 sps:$4 sm:$0xff]  }
 0x296   :  { %3110 = vmatprep.mubr.bf16.mxu0 %v12118_v49  ;;  %v11019_v49 = vld [vmem:[#allocation10 + $0xa88] ss:$100 sps:$4 sm:$0xff]  }
 0x298   :  { %9838 = vmatpush3.bf16.msra.mxu0 %v11003_v5  ;;  %7402 = vmatpush1.bf16.msra.mxu1 %v11000_v4  ;;  %v11049_v4 = vld [vmem:[#allocation11 + $0x708] ss:$12 sps:$4 sm:$0xff]   ;;  %v11053_v5 = vld [vmem:[#allocation11 + $0x50] ss:$12 sps:$4 sm:$0xff]  }
 0x299   :  { %9839 = vmatprep.subr.bf16.mxu0 %v11004_v54  ;;  %7403 = vmatprep.subr.bf16.mxu1 %v11007_v6  ;;  %v11054_v54 = vld [vmem:[#allocation11 + $0x720] ss:$12 sps:$4 sm:$0xff]   ;;  %v11058_v6 = vld [vmem:[#allocation11 + $0x68] ss:$12 sps:$4 sm:$0xff]  }
 0x29c   :  { %9840 = vmatpush3.bf16.msra.mxu0 %v11008_v8  ;;  %7404 = vmatpush1.bf16.msra.mxu1 %v11005_v7  ;;  %v11061_v7 = vld [vmem:[#allocation11 + $0x73c] ss:$12 sps:$4 sm:$0xff]   ;;  %v11062_v8 = vld [vmem:[#allocation11 + $0x140] ss:$12 sps:$4 sm:$0xff]  }
 0x29d   :  { %9841 = vmatprep.subr.bf16.mxu0 %v11009_v10  ;;  %7405 = vmatprep.subr.bf16.mxu1 %v11012_v11  ;;  %v11059_v10 = vld [vmem:[#allocation11 + $0x738] ss:$12 sps:$4 sm:$0xff]   ;;  %v11063_v11 = vld [vmem:[#allocation11 + $0x80] ss:$12 sps:$4 sm:$0xff]  }
 0x2a0   :  { %9842 = vmatpush3.bf16.msra.mxu0 %v11013_v14  ;;  %7406 = vmatpush1.bf16.msra.mxu1 %v11010_v13  ;;  %v3154_v13 = vmul.f32 0.2, %v12143_v44  ;;  %v11066_v14 = vld [vmem:[#allocation11 + $0x754] ss:$12 sps:$4 sm:$0xff]  }
 0x2a1   :  { %9843 = vmatprep.subr.bf16.mxu0 %v11014_v16  ;;  %7407 = vmatprep.subr.bf16.mxu1 %v11017_v17  ;;  %v11067_v16 = vld [vmem:[#allocation11 + $0x158] ss:$12 sps:$4 sm:$0xff]   ;;  %v11064_v17 = vld [vmem:[#allocation11 + $0x750] ss:$12 sps:$4 sm:$0xff]  }
 0x2a4   :  { %9844 = vmatpush3.bf16.msra.mxu0 %v11018_v19  ;;  %7408 = vmatpush1.bf16.msra.mxu1 %v11015_v18  ;;  %v11068_v18 = vld [vmem:[#allocation11 + $0x98] ss:$12 sps:$4 sm:$0xff]  }
 0x2a5   :  { %9845 = vmatprep.subr.bf16.mxu0 %v11019_v49  ;;  %7409 = vmatprep.subr.bf16.mxu1 %v11022_v20  ;;  %v11071_v49 = vld [vmem:[#allocation11 + $0x76c] ss:$12 sps:$4 sm:$0xff]   ;;  %v11072_v20 = vld [vmem:[#allocation11 + $0x170] ss:$12 sps:$4 sm:$0xff]  }
 0x2a6   :  { %v12207_v29 = vpop.f32.mrb[16].mxu0 }
 0x2a7   :  { %v2786_v31 = vpop.f32.mrb[17].mxu0  ;;  %v3151_v19 = vmul.f32 0.2, %v12207_v29  ;;  %vm3126_vm10 = vcmp.ge.f32.partialorder %v12207_v29, 0.0 }
 0x2a8   :  { %9846 = vmatpush3.bf16.msra.mxu0 %v11023_v25  ;;  %7410 = vmatpush1.bf16.msra.mxu1 %v11020_v21  ;;  %vm3127_vm8 = vcmp.ge.f32.partialorder %v2786_v31, 0.0  ;;  %v3152_v32 = vmul.f32 0.2, %v2786_v31  ;;  %v2788_v33 = vpop.f32.mrb[18].mxu0  ;;  %v11069_v21 = vld [vmem:[#allocation11 + $0x768] ss:$12 sps:$4 sm:$0xff]  }
 0x2a9   :  { %9847 = vmatprep.subr.bf16.mxu0 %v11024_v26  ;;  %7411 = vmatprep.subr.bf16.mxu1 %v11027_v27  ;;  %v2789_v37 = vpop.f32.mrb[19].mxu0  ;;  %v11073_v25 = vld [vmem:[#allocation11 + $0xb0] ss:$12 sps:$4 sm:$0xff]   ;;  %v11077_v27 = vld [vmem:[#allocation11 + $0x248] ss:$12 sps:$4 sm:$0xff]  }
 0x2aa   :  { %v3177_v40 = vsel %vm3127_vm8, %v2786_v31, %v3152_v32  ;;  %v11076_v26 = vld [vmem:[#allocation11 + $0x784] ss:$12 sps:$4 sm:$0xff]   ;;  %v3179_v31 = vsel %vm3129_vm9, %v12143_v44, %v3154_v13  ;;  %v11078_v32 = vld [vmem:[#allocation11 + $0x188] ss:$12 sps:$4 sm:$0xff]   ;;  %vm11962_vm8 = vmmov 0  }
 0x2ab   :  { %v12209_v43 = vpack.c.bf16 %v3177_v40, %v3177_v40  ;;  %v11081_v37 = vld [vmem:[#allocation11 + $0x79c] ss:$12 sps:$4 sm:$0xff]   ;;  %v11086_v40 = vld [vmem:[#allocation11 + $0x7b4] ss:$12 sps:$4 sm:$0xff]   ;;  %v11087_v44 = vld [vmem:[#allocation11 + $0x278] ss:$12 sps:$4 sm:$0xff]  }
 0x2ac   :  { %9848 = vmatpush3.bf16.msra.mxu0 %v11028_v23  ;;  %7412 = vmatpush1.bf16.msra.mxu1 %v11025_v30  ;;  %v3176_v30 = vsel %vm3126_vm10, %v12207_v29, %v3151_v19  ;;  %v11074_v23 = vld [vmem:[#allocation11 + $0x780] ss:$12 sps:$4 sm:$0xff]   ;;  %v11117_v13 = vld [vmem:[#allocation11 + $0x3c8] ss:$12 sps:$4 sm:$0xff]   ;;  %v11119_v19 = vld [vmem:[#allocation11 + $0x858] ss:$12 sps:$4 sm:$0xff]  }
 0x2ad   :  { %9849 = vmatprep.subr.bf16.mxu0 %v11029_v34  ;;  %7413 = vmatprep.subr.bf16.mxu1 %v11032_v35  ;;  %v12220_v33 = vpack.c.bf16 %v3176_v30, %v3176_v30  ;;  %v12222_v34 = vpack.c.bf16 %v3179_v31, %v3179_v31  ;;  %v11079_v35 = vld [vmem:[#allocation11 + $0x798] ss:$12 sps:$4 sm:$0xff]   ;;  %v11083_v29 = vld [vmem:[#allocation11 + $0x1a0] ss:$12 sps:$4 sm:$0xff]   ;;  %v11132_v30 = vld [vmem:[#allocation11 + $0x410] ss:$12 sps:$4 sm:$0xff]  }
 0x2ae   :  { %7431 = vmatprep.mubr.bf16.mxu1 %v12209_v43  ;;  %v11136_v31 = vld [vmem:[#allocation11 + $0x8a4] ss:$12 sps:$4 sm:$0xff]  }
 0x2b0   :  { %9850 = vmatpush3.bf16.msra.mxu0 %v11033_v41  ;;  %7414 = vmatpush1.bf16.msra.mxu1 %v11030_v38  ;;  %v11082_v38 = vld [vmem:[#allocation11 + $0x260] ss:$12 sps:$4 sm:$0xff]   ;;  %v11084_v41 = vld [vmem:[#allocation11 + $0x7b0] ss:$12 sps:$4 sm:$0xff]  }
 0x2b1   :  { %7415 = vmatprep.subr.bf16.mxu1 %v11036_v45  ;;  %9857 = vmatprep.subr.bf16.mxu0 %v11037_v46  ;;  %v11088_v45 = vld [vmem:[#allocation11 + $0x1b8] ss:$12 sps:$4 sm:$0xff]  }
 0x2b2   :  { %v11091_v46 = vld [vmem:[#allocation11 + $0x7cc] ss:$12 sps:$4 sm:$0xff]  }
 0x2b3   :  { %3111 = vmatmul.mubr.bf16.vlgmr.msra.gmra.mrb[32].mxu0 %v12122_v12  ;;  %v11056_v12 = vld [vmem:[#allocation11 + $0x724] ss:$12 sps:$4 sm:$0xff]  }
 0x2b4   :  { %7416 = vmatpush1.bf16.msra.mxu1 %v11034_v47  ;;  %9858 = vmatpush3.bf16.msra.mxu0 %v11038_v48  ;;  %v11092_v47 = vld [vmem:[#allocation11 + $0x290] ss:$12 sps:$4 sm:$0xff]  }
 0x2b5   :  { %7800 = vmatprep.mubr.bf16.mxu0 %v12145_v59  ;;  %7417 = vmatprep.subr.bf16.mxu1 %v11041_v50  ;;  %v11057_v59 = vld [vmem:[#allocation11 + $0x128] ss:$12 sps:$4 sm:$0xff]   ;;  %v11093_v48 = vld [vmem:[#allocation11 + $0x1d0] ss:$12 sps:$4 sm:$0xff]  }
 0x2b6   :  { %9859 = vmatprep.subr.bf16.mxu0 %v11042_v52  ;;  %v11096_v50 = vld [vmem:[#allocation11 + $0x7e4] ss:$12 sps:$4 sm:$0xff]   ;;  %v11098_v52 = vld [vmem:[#allocation11 + $0x1e8] ss:$12 sps:$4 sm:$0xff]  }
 0x2b8   :  { %7418 = vmatpush1.bf16.msra.mxu1 %v11039_v51  ;;  %9860 = vmatpush3.bf16.msra.mxu0 %v11043_v56  ;;  %v11097_v51 = vld [vmem:[#allocation11 + $0x2a8] ss:$12 sps:$4 sm:$0xff]  }
 0x2b9   :  { %7419 = vmatprep.subr.bf16.mxu1 %v11046_v57  ;;  %9861 = vmatprep.subr.bf16.mxu0 %v11047_v58  ;;  %v11101_v56 = vld [vmem:[#allocation11 + $0x7fc] ss:$12 sps:$4 sm:$0xff]   ;;  %v11102_v57 = vld [vmem:[#allocation11 + $0x2c0] ss:$12 sps:$4 sm:$0xff]   ;;  %v11099_v58 = vld [vmem:[#allocation11 + $0x7f8] ss:$12 sps:$4 sm:$0xff]  }
 0x2bc   :  { %7420 = vmatpush1.bf16.msra.mxu1 %v11044_v61  ;;  %9862 = vmatpush3.bf16.msra.mxu0 %v11048_v1  ;;  %v11103_v61 = vld [vmem:[#allocation11 + $0x200] ss:$12 sps:$4 sm:$0xff]  }
 0x2bd   :  { %7421 = vmatprep.subr.bf16.mxu1 %v11051_v2  ;;  %9863 = vmatprep.subr.bf16.mxu0 %v11052_v63  ;;  %v11106_v1 = vld [vmem:[#allocation11 + $0x814] ss:$12 sps:$4 sm:$0xff]   ;;  %v11107_v2 = vld [vmem:[#allocation11 + $0x2d8] ss:$12 sps:$4 sm:$0xff]  }
 0x2c0   :  { %7422 = vmatpush1.bf16.msra.mxu1 %v11049_v4  ;;  %9864 = vmatpush3.bf16.msra.mxu0 %v11053_v5  ;;  %v11104_v5 = vld [vmem:[#allocation11 + $0x810] ss:$12 sps:$4 sm:$0xff]  }
 0x2c1   :  { %7423 = vmatprep.subr.bf16.mxu1 %v11056_v12  ;;  %9865 = vmatprep.subr.bf16.mxu0 %v11057_v59  ;;  %v11108_v59 = vld [vmem:[#allocation11 + $0x218] ss:$12 sps:$4 sm:$0xff]  }
 0x2c4   :  { %7424 = vmatpush1.bf16.msra.mxu1 %v11054_v54  ;;  %9866 = vmatpush3.bf16.msra.mxu0 %v11058_v6  ;;  %v11111_v54 = vld [vmem:[#allocation11 + $0x82c] ss:$12 sps:$4 sm:$0xff]  }
 0x2c5   :  { %7425 = vmatprep.subr.bf16.mxu1 %v11061_v7  ;;  %9867 = vmatprep.subr.bf16.mxu0 %v11062_v8  ;;  %v11112_v7 = vld [vmem:[#allocation11 + $0x2f0] ss:$12 sps:$4 sm:$0xff]   ;;  %v11109_v8 = vld [vmem:[#allocation11 + $0x828] ss:$12 sps:$4 sm:$0xff]  }
 0x2c8   :  { %7426 = vmatpush1.bf16.msra.mxu1 %v11059_v10  ;;  %9868 = vmatpush3.bf16.msra.mxu0 %v11063_v11  ;;  %v11113_v10 = vld [vmem:[#allocation11 + $0x230] ss:$12 sps:$4 sm:$0xff]  }
 0x2c9   :  { %7427 = vmatprep.subr.bf16.mxu1 %v11066_v14  ;;  %9869 = vmatprep.subr.bf16.mxu0 %v11067_v16  ;;  %v11116_v11 = vld [vmem:[#allocation11 + $0x844] ss:$12 sps:$4 sm:$0xff]   ;;  %v11114_v14 = vld [vmem:[#allocation11 + $0x840] ss:$12 sps:$4 sm:$0xff]   ;;  %v11118_v16 = vld [vmem:[#allocation11 + $0x308] ss:$12 sps:$4 sm:$0xff]  }
 0x2cc   :  { %7428 = vmatpush1.bf16.msra.mxu1 %v11064_v17  ;;  %9870 = vmatpush3.bf16.msra.mxu0 %v11068_v18  ;;  %v11121_v17 = vld [vmem:[#allocation11 + $0x85c] ss:$12 sps:$4 sm:$0xff]   ;;  %v11122_v18 = vld [vmem:[#allocation11 + $0x3e0] ss:$12 sps:$4 sm:$0xff]  }
 0x2cd   :  { %7429 = vmatprep.subr.bf16.mxu1 %v11071_v49  ;;  %9871 = vmatprep.subr.bf16.mxu0 %v11072_v20  ;;  %v11123_v49 = vld [vmem:[#allocation11 + $0x320] ss:$12 sps:$4 sm:$0xff]  }
 0x2ce   :  { %v11126_v20 = vld [vmem:[#allocation11 + $0x874] ss:$12 sps:$4 sm:$0xff]  }
 0x2d0   :  { %7430 = vmatpush1.bf16.msra.mxu1 %v11069_v21  ;;  %9872 = vmatpush3.bf16.msra.mxu0 %v11073_v25  ;;  %v11127_v21 = vld [vmem:[#allocation11 + $0x3f8] ss:$12 sps:$4 sm:$0xff]   ;;  %v11124_v25 = vld [vmem:[#allocation11 + $0x870] ss:$12 sps:$4 sm:$0xff]  }
 0x2d1   :  { %7440 = vmatprep.subr.bf16.mxu1 %v11076_v26  ;;  %9879 = vmatprep.subr.bf16.mxu0 %v11077_v27  ;;  %v11128_v26 = vld [vmem:[#allocation11 + $0x338] ss:$12 sps:$4 sm:$0xff]  }
 0x2d2   :  { %v11131_v27 = vld [vmem:[#allocation11 + $0x88c] ss:$12 sps:$4 sm:$0xff]  }
 0x2d3   :  { %7432 = vmatmul.mubr.bf16.vlgmr.msra.gmra.mrb[16].mxu1 %v12220_v33  ;;  %7801 = vmatmul.mubr.bf16.vlgmr.msra.gmra.mrb[36].mxu0 %v12151_v36  ;;  %v11089_v36 = vld [vmem:[#allocation11 + $0x7c8] ss:$12 sps:$4 sm:$0xff]  }
 0x2d4   :  { %7441 = vmatpush1.bf16.msra.mxu1 %v11074_v23  ;;  %7472 = vmatprep.mubr.bf16.mxu1 %v12222_v34  ;;  %v11133_v23 = vld [vmem:[#allocation11 + $0x350] ss:$12 sps:$4 sm:$0xff]  }
 0x2d5   :  { %9880 = vmatpush3.bf16.msra.mxu0 %v11078_v32  ;;  %7840 = vmatprep.mubr.bf16.mxu0 %v12162_v15  ;;  %v11094_v15 = vld [vmem:[#allocation11 + $0x7e0] ss:$12 sps:$4 sm:$0xff]  }
 0x2d6   :  { %7442 = vmatprep.subr.bf16.mxu1 %v11081_v37  ;;  %9881 = vmatprep.subr.bf16.mxu0 %v11082_v38  ;;  %v11134_v32 = vld [vmem:[#allocation11 + $0x8a0] ss:$12 sps:$4 sm:$0xff]   ;;  %v11141_v37 = vld [vmem:[#allocation11 + $0x8bc] ss:$12 sps:$4 sm:$0xff]  }
 0x2d7   :  { %v11142_v38 = vld [vmem:[#allocation11 + $0x440] ss:$12 sps:$4 sm:$0xff]  }
 0x2d8   :  { %7443 = vmatpush1.bf16.msra.mxu1 %v11079_v35  ;;  %v11138_v35 = vld [vmem:[#allocation11 + $0x368] ss:$12 sps:$4 sm:$0xff]  }
 0x2d9   :  { %9882 = vmatpush3.bf16.msra.mxu0 %v11083_v29  ;;  %7444 = vmatprep.subr.bf16.mxu1 %v11086_v40  ;;  %v11139_v29 = vld [vmem:[#allocation11 + $0x8b8] ss:$12 sps:$4 sm:$0xff]   ;;  %v11143_v40 = vld [vmem:[#allocation11 + $0x380] ss:$12 sps:$4 sm:$0xff]  }
 0x2da   :  { %9883 = vmatprep.subr.bf16.mxu0 %v11087_v44  ;;  %v11146_v44 = vld [vmem:[#allocation11 + $0x8d4] ss:$12 sps:$4 sm:$0xff]  }
 0x2dc   :  { %7445 = vmatpush1.bf16.msra.mxu1 %v11084_v41  ;;  %v11147_v41 = vld [vmem:[#allocation11 + $0x458] ss:$12 sps:$4 sm:$0xff]  }
 0x2dd   :  { %9884 = vmatpush3.bf16.msra.mxu0 %v11088_v45  ;;  %7446 = vmatprep.subr.bf16.mxu1 %v11091_v46  ;;  %v3153_v45 = vmul.f32 0.2, %v12139_v42  ;;  %v11144_v46 = vld [vmem:[#allocation11 + $0x8d0] ss:$12 sps:$4 sm:$0xff]  }
 0x2de   :  { %9885 = vmatprep.subr.bf16.mxu0 %v11092_v47  ;;  %v11148_v47 = vld [vmem:[#allocation11 + $0x398] ss:$12 sps:$4 sm:$0xff]  }
 0x2e0   :  { %7447 = vmatpush1.bf16.msra.mxu1 %v11089_v36  ;;  %v11151_v36 = vld [vmem:[#allocation11 + $0x8ec] ss:$12 sps:$4 sm:$0xff]  }
 0x2e1   :  { %9886 = vmatpush3.bf16.msra.mxu0 %v11093_v48  ;;  %7448 = vmatprep.subr.bf16.mxu1 %v11096_v50  ;;  %v11152_v48 = vld [vmem:[#allocation11 + $0x470] ss:$12 sps:$4 sm:$0xff]   ;;  %v11149_v50 = vld [vmem:[#allocation11 + $0x8e8] ss:$12 sps:$4 sm:$0xff]  }
 0x2e2   :  { %9887 = vmatprep.subr.bf16.mxu0 %v11097_v51  ;;  %v11153_v51 = vld [vmem:[#allocation11 + $0x3b0] ss:$12 sps:$4 sm:$0xff]  }
 0x2e4   :  { %7449 = vmatpush1.bf16.msra.mxu1 %v11094_v15 }
 0x2e5   :  { %9888 = vmatpush3.bf16.msra.mxu0 %v11098_v52  ;;  %7450 = vmatprep.subr.bf16.mxu1 %v11101_v56  ;;  %v11156_v52 = vld [vmem:[#allocation11 + $0x904] ss:$12 sps:$4 sm:$0xff]   ;;  %v11157_v56 = vld [vmem:[#allocation11 + $0x548] ss:$12 sps:$4 sm:$0xff]  }
 0x2e6   :  { %9889 = vmatprep.subr.bf16.mxu0 %v11102_v57  ;;  %v12228_v63 = vpop.f32.mrb[20].mxu0  ;;  %v3178_v57 = vsel %vm3128_vm11, %v12139_v42, %v3153_v45  ;;  %v11159_v42 = vld [vmem:[#allocation11 + $0x918] ss:$12 sps:$4 sm:$0xff]   ;;  %v11202_v45 = vld [vmem:[#allocation11 + $0x6e0] ss:$12 sps:$4 sm:$0xff]  }
 0x2e7   :  { %v12230_v4 = vpop.f32.mrb[21].mxu0  ;;  %vm3130_vm14 = vcmp.ge.f32.partialorder %v12228_v63, 0.0 }
 0x2e8   :  { %7451 = vmatpush1.bf16.msra.mxu1 %v11099_v58  ;;  %v2870_v12 = vpop.f32.mrb[22].mxu0  ;;  %v3156_v15 = vmul.f32 0.2, %v12230_v4  ;;  %vm3131_vm12 = vcmp.ge.f32.partialorder %v12230_v4, 0.0  ;;  %v11154_v58 = vld [vmem:[#allocation11 + $0x900] ss:$12 sps:$4 sm:$0xff]  }
 0x2e9   :  { %9890 = vmatpush3.bf16.msra.mxu0 %v11103_v61  ;;  %7452 = vmatprep.subr.bf16.mxu1 %v11106_v1  ;;  %v2871_v6 = vpop.f32.mrb[23].mxu0  ;;  %v11158_v61 = vld [vmem:[#allocation11 + $0x488] ss:$12 sps:$4 sm:$0xff]   ;;  %v12240_v12 = vpack.c.bf16 %v3178_v57, %v3178_v57  ;;  %v11216_v57 = vld [vmem:[#allocation11 + $0xa24] ss:$12 sps:$4 sm:$0xff]  }
 0x2ea   :  { %9891 = vmatprep.subr.bf16.mxu0 %v11107_v2  ;;  %v11161_v1 = vld [vmem:[#allocation11 + $0x91c] ss:$12 sps:$4 sm:$0xff]   ;;  %v11162_v2 = vld [vmem:[#allocation11 + $0x560] ss:$12 sps:$4 sm:$0xff]  }
 0x2eb   :  { %v11166_v6 = vld [vmem:[#allocation11 + $0x934] ss:$12 sps:$4 sm:$0xff]  }
 0x2ec   :  { %7453 = vmatpush1.bf16.msra.mxu1 %v11104_v5  ;;  %v3181_v5 = vsel %vm3131_vm12, %v12230_v4, %v3156_v15  ;;  %v11167_v4 = vld [vmem:[#allocation11 + $0x578] ss:$12 sps:$4 sm:$0xff]  }
 0x2ed   :  { %9892 = vmatpush3.bf16.msra.mxu0 %v11108_v59  ;;  %7454 = vmatprep.subr.bf16.mxu1 %v11111_v54  ;;  %v12243_v59 = vpack.c.bf16 %v3181_v5, %v3181_v5  ;;  %v11163_v54 = vld [vmem:[#allocation11 + $0x4a0] ss:$12 sps:$4 sm:$0xff]   ;;  %v11219_v5 = vld [vmem:[#allocation11 + $0xa38] ss:$12 sps:$4 sm:$0xff]  }
 0x2ee   :  { %9893 = vmatprep.subr.bf16.mxu0 %v11112_v7  ;;  %v11164_v7 = vld [vmem:[#allocation11 + $0x930] ss:$12 sps:$4 sm:$0xff]   ;;  %v11211_v15 = vld [vmem:[#allocation11 + $0xa0c] ss:$12 sps:$4 sm:$0xff]  }
 0x2f0   :  { %7455 = vmatpush1.bf16.msra.mxu1 %v11109_v8  ;;  %v11168_v8 = vld [vmem:[#allocation11 + $0x4b8] ss:$12 sps:$4 sm:$0xff]  }
 0x2f1   :  { %9894 = vmatpush3.bf16.msra.mxu0 %v11113_v10  ;;  %7456 = vmatprep.subr.bf16.mxu1 %v11116_v11  ;;  %v11171_v10 = vld [vmem:[#allocation11 + $0x94c] ss:$12 sps:$4 sm:$0xff]   ;;  %v11172_v11 = vld [vmem:[#allocation11 + $0x590] ss:$12 sps:$4 sm:$0xff]  }
 0x2f2   :  { %9901 = vmatprep.subr.bf16.mxu0 %v11117_v13  ;;  %v11176_v13 = vld [vmem:[#allocation11 + $0x964] ss:$12 sps:$4 sm:$0xff]  }
 0x2f4   :  { %7841 = vmatmul.mubr.bf16.vlgmr.msra.gmra.mrb[40].mxu0 %v12168_v60  ;;  %7457 = vmatpush1.bf16.msra.mxu1 %v11114_v14  ;;  %v11129_v60 = vld [vmem:[#allocation11 + $0x888] ss:$12 sps:$4 sm:$0xff]  }
 0x2f5   :  { %9902 = vmatpush3.bf16.msra.mxu0 %v11118_v16  ;;  %7880 = vmatprep.mubr.bf16.mxu0 %v12179_v39  ;;  %v11137_v39 = vld [vmem:[#allocation11 + $0x428] ss:$12 sps:$4 sm:$0xff]   ;;  %v11174_v16 = vld [vmem:[#allocation11 + $0x960] ss:$12 sps:$4 sm:$0xff]  }
 0x2f6   :  { %7458 = vmatprep.subr.bf16.mxu1 %v11121_v17  ;;  %9903 = vmatprep.subr.bf16.mxu0 %v11122_v18  ;;  %v11177_v14 = vld [vmem:[#allocation11 + $0x5a8] ss:$12 sps:$4 sm:$0xff]  }
 0x2f7   :  { %v11178_v17 = vld [vmem:[#allocation11 + $0x4e8] ss:$12 sps:$4 sm:$0xff]  }
 0x2f8   :  { %7459 = vmatpush1.bf16.msra.mxu1 %v11119_v19  ;;  %v11181_v18 = vld [vmem:[#allocation11 + $0x97c] ss:$12 sps:$4 sm:$0xff]   ;;  %v11182_v19 = vld [vmem:[#allocation11 + $0x5c0] ss:$12 sps:$4 sm:$0xff]  }
 0x2f9   :  { %9904 = vmatpush3.bf16.msra.mxu0 %v11123_v49  ;;  %7460 = vmatprep.subr.bf16.mxu1 %v11126_v20  ;;  %v11179_v49 = vld [vmem:[#allocation11 + $0x978] ss:$12 sps:$4 sm:$0xff]   ;;  %v11183_v20 = vld [vmem:[#allocation11 + $0x500] ss:$12 sps:$4 sm:$0xff]  }
 0x2fa   :  { %9905 = vmatprep.subr.bf16.mxu0 %v11127_v21  ;;  %v11186_v21 = vld [vmem:[#allocation11 + $0x994] ss:$12 sps:$4 sm:$0xff]  }
 0x2fc   :  { %7461 = vmatpush1.bf16.msra.mxu1 %v11124_v25  ;;  %v11187_v25 = vld [vmem:[#allocation11 + $0x5d8] ss:$12 sps:$4 sm:$0xff]  }
 0x2fd   :  { %9906 = vmatpush3.bf16.msra.mxu0 %v11128_v26  ;;  %7462 = vmatprep.subr.bf16.mxu1 %v11131_v27 }
 0x2fe   :  { %9907 = vmatprep.subr.bf16.mxu0 %v11132_v30  ;;  %v11184_v30 = vld [vmem:[#allocation11 + $0x990] ss:$12 sps:$4 sm:$0xff]  }
 0x300   :  { %7463 = vmatpush1.bf16.msra.mxu1 %v11129_v60 }
 0x301   :  { %9908 = vmatpush3.bf16.msra.mxu0 %v11133_v23  ;;  %7464 = vmatprep.subr.bf16.mxu1 %v11136_v31  ;;  %v11188_v23 = vld [vmem:[#allocation11 + $0x518] ss:$12 sps:$4 sm:$0xff]  }
 0x302   :  { %9909 = vmatprep.subr.bf16.mxu0 %v11137_v39  ;;  %v11191_v31 = vld [vmem:[#allocation11 + $0x9ac] ss:$12 sps:$4 sm:$0xff]  }
 0x304   :  { %7465 = vmatpush1.bf16.msra.mxu1 %v11134_v32  ;;  %v11192_v32 = vld [vmem:[#allocation11 + $0x5f0] ss:$12 sps:$4 sm:$0xff]  }
 0x305   :  { %9910 = vmatpush3.bf16.msra.mxu0 %v11138_v35  ;;  %7466 = vmatprep.subr.bf16.mxu1 %v11141_v37  ;;  %v11189_v35 = vld [vmem:[#allocation11 + $0x9a8] ss:$12 sps:$4 sm:$0xff]   ;;  %v11193_v37 = vld [vmem:[#allocation11 + $0x530] ss:$12 sps:$4 sm:$0xff]  }
 0x306   :  { %9911 = vmatprep.subr.bf16.mxu0 %v11142_v38  ;;  %v11196_v38 = vld [vmem:[#allocation11 + $0x9c4] ss:$12 sps:$4 sm:$0xff]  }
 0x308   :  { %7467 = vmatpush1.bf16.msra.mxu1 %v11139_v29  ;;  %v11197_v29 = vld [vmem:[#allocation11 + $0x6c8] ss:$12 sps:$4 sm:$0xff]  }
 0x309   :  { %9912 = vmatpush3.bf16.msra.mxu0 %v11143_v40  ;;  %7468 = vmatprep.subr.bf16.mxu1 %v11146_v44  ;;  %v11194_v40 = vld [vmem:[#allocation11 + $0x9c0] ss:$12 sps:$4 sm:$0xff]   ;;  %v11198_v44 = vld [vmem:[#allocation11 + $0x608] ss:$12 sps:$4 sm:$0xff]  }
 0x30a   :  { %9913 = vmatprep.subr.bf16.mxu0 %v11147_v41  ;;  %v11201_v41 = vld [vmem:[#allocation11 + $0x9dc] ss:$12 sps:$4 sm:$0xff]  }
 0x30c   :  { %7469 = vmatpush1.bf16.msra.mxu1 %v11144_v46  ;;  %v11199_v46 = vld [vmem:[#allocation11 + $0x9d8] ss:$12 sps:$4 sm:$0xff]  }
 0x30d   :  { %9914 = vmatpush3.bf16.msra.mxu0 %v11148_v47  ;;  %7470 = vmatprep.subr.bf16.mxu1 %v11151_v36  ;;  %v11203_v47 = vld [vmem:[#allocation11 + $0x620] ss:$12 sps:$4 sm:$0xff]  }
 0x30e   :  { %9915 = vmatprep.subr.bf16.mxu0 %v11152_v48  ;;  %v11206_v36 = vld [vmem:[#allocation11 + $0x9f4] ss:$12 sps:$4 sm:$0xff]   ;;  %v11207_v48 = vld [vmem:[#allocation11 + $0x6f8] ss:$12 sps:$4 sm:$0xff]  }
 0x310   :  { %7471 = vmatpush1.bf16.msra.mxu1 %v11149_v50  ;;  %v11204_v50 = vld [vmem:[#allocation11 + $0x9f0] ss:$12 sps:$4 sm:$0xff]  }
 0x311   :  { %9916 = vmatpush3.bf16.msra.mxu0 %v11153_v51  ;;  %7481 = vmatprep.subr.bf16.mxu1 %v11156_v52  ;;  %v11208_v51 = vld [vmem:[#allocation11 + $0x638] ss:$12 sps:$4 sm:$0xff]   ;;  %v11212_v52 = vld [vmem:[#allocation11 + $0x710] ss:$12 sps:$4 sm:$0xff]  }
 0x312   :  { %9923 = vmatprep.subr.bf16.mxu0 %v11157_v56  ;;  %v11213_v56 = vld [vmem:[#allocation11 + $0x650] ss:$12 sps:$4 sm:$0xff]  }
 0x313   :  { %7473 = vmatmul.mubr.bf16.vlgmr.msra.gmra.mrb[16].mxu1 %v12240_v12 }
 0x314   :  { %7881 = vmatmul.mubr.bf16.vlgmr.msra.gmra.mrb[44].mxu0 %v12185_v28  ;;  %7482 = vmatpush1.bf16.msra.mxu1 %v11154_v58  ;;  %v11169_v28 = vld [vmem:[#allocation11 + $0x948] ss:$12 sps:$4 sm:$0xff]   ;;  %v11214_v58 = vld [vmem:[#allocation11 + $0xa20] ss:$12 sps:$4 sm:$0xff]  }
 0x315   :  { %9924 = vmatpush3.bf16.msra.mxu0 %v11158_v61  ;;  %7920 = vmatprep.mubr.bf16.mxu0 %v12196_v9  ;;  %v11173_v9 = vld [vmem:[#allocation11 + $0x4d0] ss:$12 sps:$4 sm:$0xff]   ;;  %v11218_v61 = vld [vmem:[#allocation11 + $0x668] ss:$12 sps:$4 sm:$0xff]  }
 0x316   :  { %7483 = vmatprep.subr.bf16.mxu1 %v11161_v1  ;;  %9925 = vmatprep.subr.bf16.mxu0 %v11162_v2  ;;  %v11221_v1 = vld [vmem:[#allocation11 + $0xa3c] ss:$12 sps:$4 sm:$0xff]   ;;  %v11222_v2 = vld [vmem:[#allocation11 + $0x740] ss:$12 sps:$4 sm:$0xff]  }
 0x317   :  { %7513 = vmatprep.mubr.bf16.mxu1 %v12243_v59 }
 0x318   :  { %7484 = vmatpush1.bf16.msra.mxu1 %v11159_v42  ;;  %v11223_v42 = vld [vmem:[#allocation11 + $0x680] ss:$12 sps:$4 sm:$0xff]  }
 0x319   :  { %9926 = vmatpush3.bf16.msra.mxu0 %v11163_v54  ;;  %7485 = vmatprep.subr.bf16.mxu1 %v11166_v6  ;;  %v11226_v54 = vld [vmem:[#allocation11 + $0xa54] ss:$12 sps:$4 sm:$0xff]   ;;  %v11227_v6 = vld [vmem:[#allocation11 + $0x758] ss:$12 sps:$4 sm:$0xff]  }
 0x31a   :  { %9927 = vmatprep.subr.bf16.mxu0 %v11167_v4  ;;  %v11224_v4 = vld [vmem:[#allocation11 + $0xa50] ss:$12 sps:$4 sm:$0xff]  }
 0x31c   :  { %7486 = vmatpush1.bf16.msra.mxu1 %v11164_v7  ;;  %v11228_v7 = vld [vmem:[#allocation11 + $0x698] ss:$12 sps:$4 sm:$0xff]  }
 0x31d   :  { %9928 = vmatpush3.bf16.msra.mxu0 %v11168_v8  ;;  %7487 = vmatprep.subr.bf16.mxu1 %v11171_v10  ;;  %v11231_v8 = vld [vmem:[#allocation11 + $0xa6c] ss:$12 sps:$4 sm:$0xff]   ;;  %v11232_v10 = vld [vmem:[#allocation11 + $0x770] ss:$12 sps:$4 sm:$0xff]  }
 0x31e   :  { %9929 = vmatprep.subr.bf16.mxu0 %v11172_v11  ;;  %v3155_v11 = vmul.f32 0.2, %v12228_v63 }
 0x320   :  { %7488 = vmatpush1.bf16.msra.mxu1 %v11169_v28  ;;  %v3158_v28 = vmul.f32 0.2, %v12160_v0 }
 0x321   :  { %9930 = vmatpush3.bf16.msra.mxu0 %v11173_v9  ;;  %7489 = vmatprep.subr.bf16.mxu1 %v11176_v13  ;;  %v11229_v9 = vld [vmem:[#allocation11 + $0xa68] ss:$12 sps:$4 sm:$0xff]   ;;  %v11233_v13 = vld [vmem:[#allocation11 + $0x6b0] ss:$12 sps:$4 sm:$0xff]  }
 0x322   :  { %9931 = vmatprep.subr.bf16.mxu0 %v11177_v14  ;;  %v11236_v14 = vld [vmem:[#allocation11 + $0xa84] ss:$12 sps:$4 sm:$0xff]  }
 0x324   :  { %7490 = vmatpush1.bf16.msra.mxu1 %v11174_v16  ;;  %v11237_v16 = vld [vmem:[#allocation11 + $0x848] ss:$12 sps:$4 sm:$0xff]  }
 0x325   :  { %9932 = vmatpush3.bf16.msra.mxu0 %v11178_v17  ;;  %7491 = vmatprep.subr.bf16.mxu1 %v11181_v18  ;;  %v3180_v17 = vsel %vm3130_vm14, %v12228_v63, %v3155_v11  ;;  %v11234_v18 = vld [vmem:[#allocation11 + $0xa80] ss:$12 sps:$4 sm:$0xff]   ;;  %v11288_v11 = vld [vmem:[#allocation11 + $0x938] ss:$12 sps:$4 sm:$0xff]  }
 0x326   :  { %9933 = vmatprep.subr.bf16.mxu0 %v11182_v19  ;;  %v12248_v26 = vpop.f32.mrb[24].mxu0  ;;  %v11238_v19 = vld [vmem:[#allocation11 + $0x788] ss:$12 sps:$4 sm:$0xff]  }
 0x327   :  { %v12250_v27 = vpop.f32.mrb[25].mxu0  ;;  %v11246_v63 = vld [vmem:[#allocation11 + $0xab4] ss:$12 sps:$4 sm:$0xff]   ;;  %vm3134_vm1 = vcmp.ge.f32.partialorder %v12248_v26, 0.0 }
 0x328   :  { %7492 = vmatpush1.bf16.msra.mxu1 %v11179_v49  ;;  %v2952_v60 = vpop.f32.mrb[26].mxu0  ;;  %v3183_v49 = vsel %vm3133_vm13, %v12160_v0, %v3158_v28  ;;  %v11247_v0 = vld [vmem:[#allocation11 + $0x878] ss:$12 sps:$4 sm:$0xff]   ;;  %vm3135_vm0 = vcmp.ge.f32.partialorder %v12250_v27, 0.0 }
 0x329   :  { %9934 = vmatpush3.bf16.msra.mxu0 %v11183_v20  ;;  %7493 = vmatprep.subr.bf16.mxu1 %v11186_v21  ;;  %v2953_v39 = vpop.f32.mrb[27].mxu0  ;;  %v11241_v20 = vld [vmem:[#allocation11 + $0xa9c] ss:$12 sps:$4 sm:$0xff]   ;;  %v12260_v21 = vpack.c.bf16 %v3180_v17, %v3180_v17  ;;  %v11242_v60 = vld [vmem:[#allocation11 + $0x860] ss:$12 sps:$4 sm:$0xff]  }
 0x32a   :  { %9935 = vmatprep.subr.bf16.mxu0 %v11187_v25  ;;  %v12262_v25 = vpack.c.bf16 %v3183_v49, %v3183_v49  ;;  %v11248_v39 = vld [vmem:[#allocation11 + $0x7b8] ss:$12 sps:$4 sm:$0xff]   ;;  %v11298_v17 = vld [vmem:[#allocation11 + $0x968] ss:$12 sps:$4 sm:$0xff]  }
 0x32b   :  { %v11291_v28 = vld [vmem:[#allocation11 + $0xb8c] ss:$12 sps:$4 sm:$0xff]  }
 0x32c   :  { %7494 = vmatpush1.bf16.msra.mxu1 %v11184_v30  ;;  %v11239_v30 = vld [vmem:[#allocation11 + $0xa98] ss:$12 sps:$4 sm:$0xff]  }
 0x32d   :  { %9936 = vmatpush3.bf16.msra.mxu0 %v11188_v23  ;;  %7495 = vmatprep.subr.bf16.mxu1 %v11191_v31  ;;  %v11243_v23 = vld [vmem:[#allocation11 + $0x7a0] ss:$12 sps:$4 sm:$0xff]   ;;  %v11244_v31 = vld [vmem:[#allocation11 + $0xab0] ss:$12 sps:$4 sm:$0xff]   ;;  %v11299_v49 = vld [vmem:[#allocation11 + $0xbb8] ss:$12 sps:$4 sm:$0xff]  }
 0x32e   :  { %9937 = vmatprep.subr.bf16.mxu0 %v11192_v32  ;;  %v11251_v32 = vld [vmem:[#allocation11 + $0xacc] ss:$12 sps:$4 sm:$0xff]  }
 0x330   :  { %7496 = vmatpush1.bf16.msra.mxu1 %v11189_v35  ;;  %v11252_v35 = vld [vmem:[#allocation11 + $0x890] ss:$12 sps:$4 sm:$0xff]  }
 0x331   :  { %9938 = vmatpush3.bf16.msra.mxu0 %v11193_v37  ;;  %7497 = vmatprep.subr.bf16.mxu1 %v11196_v38  ;;  %v11253_v37 = vld [vmem:[#allocation11 + $0x7d0] ss:$12 sps:$4 sm:$0xff]  }
 0x332   :  { %9945 = vmatprep.subr.bf16.mxu0 %v11197_v29  ;;  %v11256_v38 = vld [vmem:[#allocation11 + $0xae4] ss:$12 sps:$4 sm:$0xff]   ;;  %v11257_v29 = vld [vmem:[#allocation11 + $0x8a8] ss:$12 sps:$4 sm:$0xff]  }
 0x334   :  { %7921 = vmatmul.mubr.bf16.vlgmr.msra.gmra.mrb[48].mxu0 %v12202_v3  ;;  %7498 = vmatpush1.bf16.msra.mxu1 %v11194_v40  ;;  %v11209_v3 = vld [vmem:[#allocation11 + $0xa08] ss:$12 sps:$4 sm:$0xff]  }
 0x335   :  { %9946 = vmatpush3.bf16.msra.mxu0 %v11198_v44  ;;  %7960 = vmatprep.mubr.bf16.mxu0 %v12209_v43  ;;  %v11217_v43 = vld [vmem:[#allocation11 + $0x728] ss:$12 sps:$4 sm:$0xff]  }
 0x336   :  { %7499 = vmatprep.subr.bf16.mxu1 %v11201_v41  ;;  %9947 = vmatprep.subr.bf16.mxu0 %v11202_v45  ;;  %v11258_v40 = vld [vmem:[#allocation11 + $0x7e8] ss:$12 sps:$4 sm:$0xff]   ;;  %v11262_v41 = vld [vmem:[#allocation11 + $0x8c0] ss:$12 sps:$4 sm:$0xff]   ;;  %v11259_v45 = vld [vmem:[#allocation11 + $0xaf8] ss:$12 sps:$4 sm:$0xff]  }
 0x337   :  { %v11261_v44 = vld [vmem:[#allocation11 + $0xafc] ss:$12 sps:$4 sm:$0xff]  }
 0x338   :  { %7500 = vmatpush1.bf16.msra.mxu1 %v11199_v46  ;;  %v11263_v46 = vld [vmem:[#allocation11 + $0x800] ss:$12 sps:$4 sm:$0xff]  }
 0x339   :  { %9948 = vmatpush3.bf16.msra.mxu0 %v11203_v47  ;;  %7501 = vmatprep.subr.bf16.mxu1 %v11206_v36  ;;  %v11266_v47 = vld [vmem:[#allocation11 + $0xb14] ss:$12 sps:$4 sm:$0xff]   ;;  %v11267_v36 = vld [vmem:[#allocation11 + $0x8d8] ss:$12 sps:$4 sm:$0xff]  }
 0x33a   :  { %9949 = vmatprep.subr.bf16.mxu0 %v11207_v48 }
 0x33c   :  { %7502 = vmatpush1.bf16.msra.mxu1 %v11204_v50 }
 0x33d   :  { %9950 = vmatpush3.bf16.msra.mxu0 %v11208_v51  ;;  %7503 = vmatprep.subr.bf16.mxu1 %v11211_v15  ;;  %v11264_v51 = vld [vmem:[#allocation11 + $0xb10] ss:$12 sps:$4 sm:$0xff]  }
 0x33e   :  { %9951 = vmatprep.subr.bf16.mxu0 %v11212_v52  ;;  %v11268_v52 = vld [vmem:[#allocation11 + $0x818] ss:$12 sps:$4 sm:$0xff]  }
 0x340   :  { %7504 = vmatpush1.bf16.msra.mxu1 %v11209_v3  ;;  %v11271_v3 = vld [vmem:[#allocation11 + $0xb2c] ss:$12 sps:$4 sm:$0xff]  }
 0x341   :  { %9952 = vmatpush3.bf16.msra.mxu0 %v11213_v56  ;;  %7505 = vmatprep.subr.bf16.mxu1 %v11216_v57  ;;  %v11272_v57 = vld [vmem:[#allocation11 + $0x8f0] ss:$12 sps:$4 sm:$0xff]  }
 0x342   :  { %9953 = vmatprep.subr.bf16.mxu0 %v11217_v43  ;;  %v11269_v43 = vld [vmem:[#allocation11 + $0xb28] ss:$12 sps:$4 sm:$0xff]  }
 0x344   :  { %7506 = vmatpush1.bf16.msra.mxu1 %v11214_v58  ;;  %v11273_v58 = vld [vmem:[#allocation11 + $0x830] ss:$12 sps:$4 sm:$0xff]  }
 0x345   :  { %9954 = vmatpush3.bf16.msra.mxu0 %v11218_v61  ;;  %7507 = vmatprep.subr.bf16.mxu1 %v11221_v1  ;;  %v11276_v61 = vld [vmem:[#allocation11 + $0xb44] ss:$12 sps:$4 sm:$0xff]   ;;  %v11277_v1 = vld [vmem:[#allocation11 + $0x9c8] ss:$12 sps:$4 sm:$0xff]  }
 0x346   :  { %9955 = vmatprep.subr.bf16.mxu0 %v11222_v2  ;;  %v11274_v2 = vld [vmem:[#allocation11 + $0xb40] ss:$12 sps:$4 sm:$0xff]  }
 0x348   :  { %7508 = vmatpush1.bf16.msra.mxu1 %v11219_v5  ;;  %v11278_v5 = vld [vmem:[#allocation11 + $0x908] ss:$12 sps:$4 sm:$0xff]  }
 0x349   :  { %9956 = vmatpush3.bf16.msra.mxu0 %v11223_v42  ;;  %7509 = vmatprep.subr.bf16.mxu1 %v11226_v54  ;;  %v11281_v42 = vld [vmem:[#allocation11 + $0xb5c] ss:$12 sps:$4 sm:$0xff]   ;;  %v11282_v54 = vld [vmem:[#allocation11 + $0x9e0] ss:$12 sps:$4 sm:$0xff]  }
 0x34a   :  { %9957 = vmatprep.subr.bf16.mxu0 %v11227_v6  ;;  %v11279_v6 = vld [vmem:[#allocation11 + $0xb58] ss:$12 sps:$4 sm:$0xff]  }
 0x34c   :  { %7510 = vmatpush1.bf16.msra.mxu1 %v11224_v4  ;;  %v11283_v4 = vld [vmem:[#allocation11 + $0x920] ss:$12 sps:$4 sm:$0xff]  }
 0x34d   :  { %9958 = vmatpush3.bf16.msra.mxu0 %v11228_v7  ;;  %7511 = vmatprep.subr.bf16.mxu1 %v11231_v8  ;;  %v11286_v7 = vld [vmem:[#allocation11 + $0xb74] ss:$12 sps:$4 sm:$0xff]   ;;  %v11287_v8 = vld [vmem:[#allocation11 + $0x9f8] ss:$12 sps:$4 sm:$0xff]  }
 0x34e   :  { %9959 = vmatprep.subr.bf16.mxu0 %v11232_v10  ;;  %v11284_v10 = vld [vmem:[#allocation11 + $0xb70] ss:$12 sps:$4 sm:$0xff]  }
 0x350   :  { %7512 = vmatpush1.bf16.msra.mxu1 %v11229_v9  ;;  %v11292_v9 = vld [vmem:[#allocation11 + $0xa10] ss:$12 sps:$4 sm:$0xff]  }
 0x351   :  { %9960 = vmatpush3.bf16.msra.mxu0 %v11233_v13  ;;  %7522 = vmatprep.subr.bf16.mxu1 %v11236_v14  ;;  %v11293_v13 = vld [vmem:[#allocation11 + $0x950] ss:$12 sps:$4 sm:$0xff]  }
 0x352   :  { %9967 = vmatprep.subr.bf16.mxu0 %v11237_v16  ;;  %v11296_v14 = vld [vmem:[#allocation11 + $0xba4] ss:$12 sps:$4 sm:$0xff]   ;;  %v11294_v16 = vld [vmem:[#allocation11 + $0xba0] ss:$12 sps:$4 sm:$0xff]  }
 0x353   :  { %7514 = vmatmul.mubr.bf16.vlgmr.msra.gmra.mrb[16].mxu1 %v12260_v21 }
 0x354   :  { %7961 = vmatmul.mubr.bf16.vlgmr.msra.gmra.mrb[52].mxu0 %v12220_v33  ;;  %7523 = vmatpush1.bf16.msra.mxu1 %v11234_v18  ;;  %v11249_v33 = vld [vmem:[#allocation11 + $0xac8] ss:$12 sps:$4 sm:$0xff]  }
 0x355   :  { %7554 = vmatprep.mubr.bf16.mxu1 %v12262_v25  ;;  %9968 = vmatpush3.bf16.msra.mxu0 %v11238_v19  ;;  %v11301_v18 = vld [vmem:[#allocation11 + $0xbbc] ss:$12 sps:$4 sm:$0xff]   ;;  %v11302_v19 = vld [vmem:[#allocation11 + $0xa40] ss:$12 sps:$4 sm:$0xff]  }
 0x356   :  { %8000 = vmatprep.mubr.bf16.mxu0 %v12222_v34  ;;  %7524 = vmatprep.subr.bf16.mxu1 %v11241_v20  ;;  %v11254_v34 = vld [vmem:[#allocation11 + $0xae0] ss:$12 sps:$4 sm:$0xff]  }
 0x357   :  { %9969 = vmatprep.subr.bf16.mxu0 %v11242_v60  ;;  %v11303_v20 = vld [vmem:[#allocation11 + $0x980] ss:$12 sps:$4 sm:$0xff]   ;;  %v11307_v60 = vld [vmem:[#allocation11 + $0xa58] ss:$12 sps:$4 sm:$0xff]  }
 0x358   :  { %7525 = vmatpush1.bf16.msra.mxu1 %v11239_v30  ;;  %v11306_v30 = vld [vmem:[#allocation11 + $0xbd4] ss:$12 sps:$4 sm:$0xff]  }
 0x359   :  { %9970 = vmatpush3.bf16.msra.mxu0 %v11243_v23  ;;  %7526 = vmatprep.subr.bf16.mxu1 %v11246_v63 }
 0x35a   :  { %9971 = vmatprep.subr.bf16.mxu0 %v11247_v0  ;;  %v11304_v0 = vld [vmem:[#allocation11 + $0xbd0] ss:$12 sps:$4 sm:$0xff]  }
 0x35c   :  { %7527 = vmatpush1.bf16.msra.mxu1 %v11244_v31 }
 0x35d   :  { %9972 = vmatpush3.bf16.msra.mxu0 %v11248_v39  ;;  %7528 = vmatprep.subr.bf16.mxu1 %v11251_v32  ;;  %v11308_v32 = vld [vmem:[#allocation11 + $0x998] ss:$12 sps:$4 sm:$0xff]  }
 0x35e   :  { %9973 = vmatprep.subr.bf16.mxu0 %v11252_v35  ;;  %v11311_v35 = vld [vmem:[#allocation11 + $0xbec] ss:$12 sps:$4 sm:$0xff]  }
 0x360   :  { %7529 = vmatpush1.bf16.msra.mxu1 %v11249_v33 }
 0x361   :  { %9974 = vmatpush3.bf16.msra.mxu0 %v11253_v37  ;;  %7530 = vmatprep.subr.bf16.mxu1 %v11256_v38  ;;  %v3157_v37 = vmul.f32 0.2, %v12156_v62  ;;  %v11312_v38 = vld [vmem:[#allocation11 + $0xa70] ss:$12 sps:$4 sm:$0xff]  }
 0x362   :  { %9975 = vmatprep.subr.bf16.mxu0 %v11257_v29  ;;  %v11309_v29 = vld [vmem:[#allocation11 + $0xbe8] ss:$12 sps:$4 sm:$0xff]  }
 0x364   :  { %7531 = vmatpush1.bf16.msra.mxu1 %v11254_v34  ;;  %v3160_v34 = vmul.f32 0.2, %v12250_v27 }
 0x365   :  { %9976 = vmatpush3.bf16.msra.mxu0 %v11258_v40  ;;  %7532 = vmatprep.subr.bf16.mxu1 %v11261_v44  ;;  %v11313_v40 = vld [vmem:[#allocation11 + $0x9b0] ss:$12 sps:$4 sm:$0xff]  }
 0x366   :  { %9977 = vmatprep.subr.bf16.mxu0 %v11262_v41  ;;  %v12268_v48 = vpop.f32.mrb[28].mxu0  ;;  %v11316_v44 = vld [vmem:[#allocation11 + $0xc04] ss:$12 sps:$4 sm:$0xff]   ;;  %v3182_v41 = vsel %vm3132_vm15, %v12156_v62, %v3157_v37 }
 0x367   :  { %v12270_v50 = vpop.f32.mrb[29].mxu0  ;;  %v11319_v62 = vld [vmem:[#allocation11 + $0xc18] ss:$12 sps:$4 sm:$0xff]   ;;  %v11364_v37 = vld [vmem:[#allocation11 + $0xcf0] ss:$12 sps:$4 sm:$0xff]   ;;  %vm3138_vm5 = vcmp.ge.f32.partialorder %v12268_v48, 0.0 }
 0x368   :  { %7533 = vmatpush1.bf16.msra.mxu1 %v11259_v45  ;;  %v3034_v15 = vpop.f32.mrb[30].mxu0  ;;  %v11317_v45 = vld [vmem:[#allocation11 + $0xb48] ss:$12 sps:$4 sm:$0xff]   ;;  %vm3139_vm4 = vcmp.ge.f32.partialorder %v12270_v50, 0.0 }
 0x369   :  { %9978 = vmatpush3.bf16.msra.mxu0 %v11263_v46  ;;  %7534 = vmatprep.subr.bf16.mxu1 %v11266_v47  ;;  %v3035_v56 = vpop.f32.mrb[31].mxu0  ;;  %v11314_v46 = vld [vmem:[#allocation11 + $0xc00] ss:$12 sps:$4 sm:$0xff]   ;;  %v3185_v47 = vsel %vm3135_vm0, %v12250_v27, %v3160_v34  ;;  %v11321_v15 = vld [vmem:[#allocation11 + $0xc1c] ss:$12 sps:$4 sm:$0xff]  }
 0x36a   :  { %9979 = vmatprep.subr.bf16.mxu0 %v11267_v36  ;;  %v12282_v36 = vpack.c.bf16 %v3182_v41, %v3182_v41  ;;  %v11323_v27 = vld [vmem:[#allocation11 + $0xaa0] ss:$12 sps:$4 sm:$0xff]  }
 0x36b   :  { %v11326_v56 = vld [vmem:[#allocation11 + $0xc34] ss:$12 sps:$4 sm:$0xff]   ;;  %v11371_v34 = vld [vmem:[#allocation11 + $0xd0c] ss:$12 sps:$4 sm:$0xff]  }
 0x36c   :  { %7535 = vmatpush1.bf16.msra.mxu1 %v11264_v51  ;;  %v11318_v51 = vld [vmem:[#allocation11 + $0xa88] ss:$12 sps:$4 sm:$0xff]  }
 0x36d   :  { %9980 = vmatpush3.bf16.msra.mxu0 %v11268_v52  ;;  %7536 = vmatprep.subr.bf16.mxu1 %v11271_v3  ;;  %v11322_v52 = vld [vmem:[#allocation11 + $0xb60] ss:$12 sps:$4 sm:$0xff]   ;;  %v12285_v3 = vpack.c.bf16 %v3185_v47, %v3185_v47  ;;  %v11377_v47 = vld [vmem:[#allocation11 + $0xd28] ss:$12 sps:$4 sm:$0xff]  }
 0x36e   :  { %9981 = vmatprep.subr.bf16.mxu0 %v11272_v57  ;;  %v11327_v57 = vld [vmem:[#allocation11 + $0xb78] ss:$12 sps:$4 sm:$0xff]  }
 0x370   :  { %7537 = vmatpush1.bf16.msra.mxu1 %v11269_v43  ;;  %v11324_v43 = vld [vmem:[#allocation11 + $0xc30] ss:$12 sps:$4 sm:$0xff]  }
 0x371   :  { %9982 = vmatpush3.bf16.msra.mxu0 %v11273_v58  ;;  %7538 = vmatprep.subr.bf16.mxu1 %v11276_v61  ;;  %v11328_v58 = vld [vmem:[#allocation11 + $0xab8] ss:$12 sps:$4 sm:$0xff]  }
 0x372   :  { %9989 = vmatprep.subr.bf16.mxu0 %v11277_v1  ;;  %v11331_v61 = vld [vmem:[#allocation11 + $0xc4c] ss:$12 sps:$4 sm:$0xff]   ;;  %v11329_v1 = vld [vmem:[#allocation11 + $0xc48] ss:$12 sps:$4 sm:$0xff]  }
 0x374   :  { %8001 = vmatmul.mubr.bf16.vlgmr.msra.gmra.mrb[56].mxu0 %v12240_v12  ;;  %7539 = vmatpush1.bf16.msra.mxu1 %v11274_v2  ;;  %v11289_v12 = vld [vmem:[#allocation11 + $0xb88] ss:$12 sps:$4 sm:$0xff]   ;;  %v11336_v2 = vld [vmem:[#allocation11 + $0xc64] ss:$12 sps:$4 sm:$0xff]  }
 0x375   :  { %9990 = vmatpush3.bf16.msra.mxu0 %v11278_v5  ;;  %8040 = vmatprep.mubr.bf16.mxu0 %v12243_v59  ;;  %v11297_v59 = vld [vmem:[#allocation11 + $0xa28] ss:$12 sps:$4 sm:$0xff]  }
 0x376   :  { %7540 = vmatprep.subr.bf16.mxu1 %v11281_v42  ;;  %9991 = vmatprep.subr.bf16.mxu0 %v11282_v54  ;;  %v11337_v5 = vld [vmem:[#allocation11 + $0xba8] ss:$12 sps:$4 sm:$0xff]   ;;  %v11334_v42 = vld [vmem:[#allocation11 + $0xc60] ss:$12 sps:$4 sm:$0xff]  }
 0x377   :  { %v11338_v54 = vld [vmem:[#allocation11 + $0xae8] ss:$12 sps:$4 sm:$0xff]  }
 0x378   :  { %7541 = vmatpush1.bf16.msra.mxu1 %v11279_v6  ;;  %v11341_v6 = vld [vmem:[#allocation11 + $0xc7c] ss:$12 sps:$4 sm:$0xff]  }
 0x379   :  { %9992 = vmatpush3.bf16.msra.mxu0 %v11283_v4  ;;  %7542 = vmatprep.subr.bf16.mxu1 %v11286_v7  ;;  %v11342_v4 = vld [vmem:[#allocation11 + $0xbc0] ss:$12 sps:$4 sm:$0xff]   ;;  %v11339_v7 = vld [vmem:[#allocation11 + $0xc78] ss:$12 sps:$4 sm:$0xff]  }
 0x37a   :  { %9993 = vmatprep.subr.bf16.mxu0 %v11287_v8  ;;  %v11343_v8 = vld [vmem:[#allocation11 + $0xb00] ss:$12 sps:$4 sm:$0xff]  }
 0x37c   :  { %7543 = vmatpush1.bf16.msra.mxu1 %v11284_v10  ;;  %v11346_v10 = vld [vmem:[#allocation11 + $0xc94] ss:$12 sps:$4 sm:$0xff]  }
 0x37d   :  { %9994 = vmatpush3.bf16.msra.mxu0 %v11288_v11  ;;  %7544 = vmatprep.subr.bf16.mxu1 %v11291_v28  ;;  %v11347_v28 = vld [vmem:[#allocation11 + $0xbd8] ss:$12 sps:$4 sm:$0xff]  }
 0x37e   :  { %9995 = vmatprep.subr.bf16.mxu0 %v11292_v9 }
 0x380   :  { %7545 = vmatpush1.bf16.msra.mxu1 %v11289_v12 }
 0x381   :  { %9996 = vmatpush3.bf16.msra.mxu0 %v11293_v13  ;;  %7546 = vmatprep.subr.bf16.mxu1 %v11296_v14  ;;  %v11344_v14 = vld [vmem:[#allocation11 + $0xc90] ss:$12 sps:$4 sm:$0xff]  }
 0x382   :  { %9997 = vmatprep.subr.bf16.mxu0 %v11297_v59 }
 0x384   :  { %7547 = vmatpush1.bf16.msra.mxu1 %v11294_v16  ;;  %v11348_v16 = vld [vmem:[#allocation11 + $0xb18] ss:$12 sps:$4 sm:$0xff]  }
 0x385   :  { %9998 = vmatpush3.bf16.msra.mxu0 %v11298_v17  ;;  %7548 = vmatprep.subr.bf16.mxu1 %v11301_v18  ;;  %v11351_v17 = vld [vmem:[#allocation11 + $0xcac] ss:$12 sps:$4 sm:$0xff]   ;;  %v11352_v18 = vld [vmem:[#allocation11 + $0xbf0] ss:$12 sps:$4 sm:$0xff]  }
 0x386   :  { %9999 = vmatprep.subr.bf16.mxu0 %v11302_v19  ;;  %v9851_v23 = vpop.f32.mrb[32].mxu0  ;;  %v11349_v19 = vld [vmem:[#allocation11 + $0xca8] ss:$12 sps:$4 sm:$0xff]  }
 0x387   :  { %v9852_v63 = vpop.f32.mrb[33].mxu0 }
 0x388   :  { %7549 = vmatpush1.bf16.msra.mxu1 %v11299_v49  ;;  %v12274_v31 = vadd.f32 %v9852_v63, %v9851_v23  ;;  %v9854_v39 = vpop.f32.mrb[34].mxu0  ;;  %v11353_v49 = vld [vmem:[#allocation11 + $0xb30] ss:$12 sps:$4 sm:$0xff]   ;;  %v11358_v23 = vld [vmem:[#allocation11 + $0xc08] ss:$12 sps:$4 sm:$0xff]  }
 0x389   :  { %10000 = vmatpush3.bf16.msra.mxu0 %v11303_v20  ;;  %7550 = vmatprep.subr.bf16.mxu1 %v11306_v30  ;;  %v9855_v33 = vpop.f32.mrb[35].mxu0  ;;  %v11356_v20 = vld [vmem:[#allocation11 + $0xcc4] ss:$12 sps:$4 sm:$0xff]   ;;  %v11357_v30 = vld [vmem:[#allocation11 + $0xcc8] ss:$12 sps:$4 sm:$0xff]  }
 0x38a   :  { %10001 = vmatprep.subr.bf16.mxu0 %v11307_v60  ;;  %v11354_v60 = vld [vmem:[#allocation11 + $0xcc0] ss:$12 sps:$4 sm:$0xff]   ;;  %v11361_v63 = vld [vmem:[#allocation11 + $0xcdc] ss:$12 sps:$4 sm:$0xff]   ;;  %v11359_v39 = vld [vmem:[#allocation11 + $0xcd8] ss:$12 sps:$4 sm:$0xff]  }
 0x38b   :  { %v11367_v33 = vld [vmem:[#allocation11 + $0xcf8] ss:$12 sps:$4 sm:$0xff]   ;;  %vm3142_vm9 = vcmp.ge.f32.partialorder %v12274_v31, 0.0 }
 0x38c   :  { %7551 = vmatpush1.bf16.msra.mxu1 %v11304_v0  ;;  %v11362_v0 = vld [vmem:[#allocation11 + $0xce0] ss:$12 sps:$4 sm:$0xff]  }
 0x38d   :  { %10002 = vmatpush3.bf16.msra.mxu0 %v11308_v32  ;;  %7552 = vmatprep.subr.bf16.mxu1 %v11311_v35  ;;  %v11363_v32 = vld [vmem:[#allocation11 + $0xc20] ss:$12 sps:$4 sm:$0xff]  }
 0x38e   :  { %10003 = vmatprep.subr.bf16.mxu0 %v11312_v38  ;;  %v11366_v35 = vld [vmem:[#allocation11 + $0xcf4] ss:$12 sps:$4 sm:$0xff]   ;;  %v4020_v38 = vlaneseq }
 0x390   :  { %7553 = vmatpush1.bf16.msra.mxu1 %v11309_v29  ;;  %v11368_v29 = vld [vmem:[#allocation11 + $0xc38] ss:$12 sps:$4 sm:$0xff]   ;;  %v12294_v41 = vshrl.u32 %v4020_v38, 7  ;;  %v11418_v38 = vld [vmem:[#allocation11 + $0xde8] ss:$12 sps:$4 sm:$0xff]  }
 0x391   :  { %10004 = vmatpush3.bf16.msra.mxu0 %v11313_v40  ;;  %7563 = vmatprep.subr.bf16.mxu1 %v11316_v44  ;;  %v11372_v40 = vld [vmem:[#allocation11 + $0xd10] ss:$12 sps:$4 sm:$0xff]   ;;  %v11369_v44 = vld [vmem:[#allocation11 + $0xd08] ss:$12 sps:$4 sm:$0xff]  }
 0x392   :  { %10011 = vmatprep.subr.bf16.mxu0 %v11317_v45  ;;  %v11373_v45 = vld [vmem:[#allocation11 + $0xc50] ss:$12 sps:$4 sm:$0xff]  }
 0x393   :  { %7555 = vmatmul.mubr.bf16.vlgmr.msra.gmra.mrb[16].mxu1 %v12282_v36 }
 0x394   :  { %8041 = vmatmul.mubr.bf16.vlgmr.msra.gmra.mrb[60].mxu0 %v12260_v21  ;;  %7564 = vmatpush1.bf16.msra.mxu1 %v11314_v46  ;;  %v11332_v21 = vld [vmem:[#allocation11 + $0xb90] ss:$12 sps:$4 sm:$0xff]  }
 0x395   :  { %10012 = vmatpush3.bf16.msra.mxu0 %v11318_v51  ;;  %8080 = vmatprep.mubr.bf16.mxu0 %v12262_v25  ;;  %v11333_v25 = vld [vmem:[#allocation11 + $0xad0] ss:$12 sps:$4 sm:$0xff]   ;;  %v4030_v51 = vsub.s32 2, %v12294_v41 }
 0x396   :  { %7565 = vmatprep.subr.bf16.mxu1 %v11321_v15  ;;  %10013 = vmatprep.subr.bf16.mxu0 %v11322_v52  ;;  %v11376_v46 = vld [vmem:[#allocation11 + $0xd24] ss:$12 sps:$4 sm:$0xff]   ;;  %v11378_v15 = vld [vmem:[#allocation11 + $0xc68] ss:$12 sps:$4 sm:$0xff]  }
 0x397   :  { %7595 = vmatprep.mubr.bf16.mxu1 %v12285_v3  ;;  %v11381_v52 = vld [vmem:[#allocation11 + $0xd3c] ss:$12 sps:$4 sm:$0xff]  }
 0x398   :  { %7566 = vmatpush1.bf16.msra.mxu1 %v11319_v62  ;;  %v11382_v62 = vld [vmem:[#allocation11 + $0xd40] ss:$12 sps:$4 sm:$0xff]  }
 0x399   :  { %10014 = vmatpush3.bf16.msra.mxu0 %v11323_v27  ;;  %7567 = vmatprep.subr.bf16.mxu1 %v11326_v56  ;;  %v11379_v27 = vld [vmem:[#allocation11 + $0xd38] ss:$12 sps:$4 sm:$0xff]  }
 0x39a   :  { %10015 = vmatprep.subr.bf16.mxu0 %v11327_v57  ;;  %v11383_v57 = vld [vmem:[#allocation11 + $0xc80] ss:$12 sps:$4 sm:$0xff]  }
 0x39c   :  { %7568 = vmatpush1.bf16.msra.mxu1 %v11324_v43  ;;  %v11386_v43 = vld [vmem:[#allocation11 + $0xd54] ss:$12 sps:$4 sm:$0xff]  }
 0x39d   :  { %10016 = vmatpush3.bf16.msra.mxu0 %v11328_v58  ;;  %7569 = vmatprep.subr.bf16.mxu1 %v11331_v61  ;;  %v11387_v58 = vld [vmem:[#allocation11 + $0xd58] ss:$12 sps:$4 sm:$0xff]  }
 0x39e   :  { %10017 = vmatprep.subr.bf16.mxu0 %v11332_v21 }
 0x3a0   :  { %7570 = vmatpush1.bf16.msra.mxu1 %v11329_v1  ;;  %v11384_v1 = vld [vmem:[#allocation11 + $0xd50] ss:$12 sps:$4 sm:$0xff]  }
 0x3a1   :  { %10018 = vmatpush3.bf16.msra.mxu0 %v11333_v25  ;;  %7571 = vmatprep.subr.bf16.mxu1 %v11336_v2 }
 0x3a2   :  { %10019 = vmatprep.subr.bf16.mxu0 %v11337_v5 }
 0x3a4   :  { %7572 = vmatpush1.bf16.msra.mxu1 %v11334_v42  ;;  %v11388_v42 = vld [vmem:[#allocation11 + $0xc98] ss:$12 sps:$4 sm:$0xff]  }
 0x3a5   :  { %10020 = vmatpush3.bf16.msra.mxu0 %v11338_v54  ;;  %7573 = vmatprep.subr.bf16.mxu1 %v11341_v6  ;;  %v11391_v54 = vld [vmem:[#allocation11 + $0xd6c] ss:$12 sps:$4 sm:$0xff]   ;;  %v3159_v6 = vmul.f32 0.2, %v12248_v26 }
 0x3a6   :  { %v9873_v11 = vpop.f32.mrb[36].mxu0  ;;  %10021 = vmatprep.subr.bf16.mxu0 %v11342_v4 }
 0x3a7   :  { %v9874_v9 = vpop.f32.mrb[37].mxu0 }
 0x3a8   :  { %v12290_v12 = vadd.f32 %v9874_v9, %v9873_v11  ;;  %7574 = vmatpush1.bf16.msra.mxu1 %v11339_v7  ;;  %v9876_v13 = vpop.f32.mrb[38].mxu0  ;;  %v11392_v7 = vld [vmem:[#allocation11 + $0xd70] ss:$12 sps:$4 sm:$0xff]   ;;  %v11389_v11 = vld [vmem:[#allocation11 + $0xd68] ss:$12 sps:$4 sm:$0xff]  }
 0x3a9   :  { %10022 = vmatpush3.bf16.msra.mxu0 %v11343_v8  ;;  %v9877_v59 = vpop.f32.mrb[39].mxu0  ;;  %7575 = vmatprep.subr.bf16.mxu1 %v11346_v10  ;;  %v3162_v10 = vmul.f32 0.2, %v12177_v24  ;;  %v11396_v9 = vld [vmem:[#allocation11 + $0xd84] ss:$12 sps:$4 sm:$0xff]  }
 0x3aa   :  { %10023 = vmatprep.subr.bf16.mxu0 %v11347_v28  ;;  %v11393_v28 = vld [vmem:[#allocation11 + $0xcb0] ss:$12 sps:$4 sm:$0xff]   ;;  %v11397_v13 = vld [vmem:[#allocation11 + $0xe48] ss:$12 sps:$4 sm:$0xff]   ;;  %v11394_v59 = vld [vmem:[#allocation11 + $0xd80] ss:$12 sps:$4 sm:$0xff]  }
 0x3ac   :  { %7576 = vmatpush1.bf16.msra.mxu1 %v11344_v14  ;;  %v3187_v14 = vsel %vm3137_vm2, %v12177_v24, %v3162_v10  ;;  %v11407_v24 = vld [vmem:[#allocation11 + $0xe78] ss:$12 sps:$4 sm:$0xff]  }
 0x3ad   :  { %10024 = vmatpush3.bf16.msra.mxu0 %v11348_v16  ;;  %7577 = vmatprep.subr.bf16.mxu1 %v11351_v17  ;;  %v11398_v17 = vld [vmem:[#allocation11 + $0xd88] ss:$12 sps:$4 sm:$0xff]   ;;  %v11439_v10 = vld [vmem:[#allocation11 + $0xe58] ss:$12 sps:$4 sm:$0xff]  }
 0x3ae   :  { %10025 = vmatprep.subr.bf16.mxu0 %v11352_v18  ;;  %v11401_v18 = vld [vmem:[#allocation11 + $0xd9c] ss:$12 sps:$4 sm:$0xff]  }
 0x3b0   :  { %7578 = vmatpush1.bf16.msra.mxu1 %v11349_v19  ;;  %v3212_v19 = vpack.c.bf16 %v3187_v14, %v3187_v14  ;;  %v11449_v14 = vld [vmem:[#allocation11 + $0xe88] ss:$12 sps:$4 sm:$0xff]  }
 0x3b1   :  { %10026 = vmatpush3.bf16.msra.mxu0 %v11353_v49  ;;  %7579 = vmatprep.subr.bf16.mxu1 %v11356_v20  ;;  %v11402_v49 = vld [vmem:[#allocation11 + $0xe60] ss:$12 sps:$4 sm:$0xff]   ;;  %v11399_v20 = vld [vmem:[#allocation11 + $0xd98] ss:$12 sps:$4 sm:$0xff]  }
 0x3b2   :  { %10033 = vmatprep.subr.bf16.mxu0 %v11357_v30  ;;  %v11406_v30 = vld [vmem:[#allocation11 + $0xdb4] ss:$12 sps:$4 sm:$0xff]  }
 0x3b4   :  { %8081 = vmatmul.mubr.bf16.vlgmr.msra.gmra.mrb[64].mxu0 %v12282_v36  ;;  %7580 = vmatpush1.bf16.msra.mxu1 %v11354_v60  ;;  %v11374_v36 = vld [vmem:[#allocation11 + $0xd20] ss:$12 sps:$4 sm:$0xff]   ;;  %v11404_v60 = vld [vmem:[#allocation11 + $0xdb0] ss:$12 sps:$4 sm:$0xff]  }
 0x3b5   :  { %10034 = vmatpush3.bf16.msra.mxu0 %v11358_v23  ;;  %8120 = vmatprep.mubr.bf16.mxu0 %v12285_v3  ;;  %v4018_v3 = vld [vmem:[#allocation14] ss:$2 sm:$0x7] }
 0x3b6   :  { %7581 = vmatprep.subr.bf16.mxu1 %v11361_v63  ;;  %10035 = vmatprep.subr.bf16.mxu0 %v11362_v0  ;;  %v4031_v56 = vrot.slane %v4018_v3, %v4030_v51  ;;  %v11408_v23 = vld [vmem:[#allocation11 + $0xdb8] ss:$12 sps:$4 sm:$0xff]   ;;  %v11412_v0 = vld [vmem:[#allocation11 + $0xe90] ss:$12 sps:$4 sm:$0xff]  }
 0x3b7   :  { %v11411_v63 = vld [vmem:[#allocation11 + $0xdcc] ss:$12 sps:$4 sm:$0xff]   ;;  %v11424_v51 = vld [vmem:[#allocation11 + $0xe10] ss:$12 sps:$4 sm:$0xff]  }
 0x3b8   :  { %7582 = vmatpush1.bf16.msra.mxu1 %v11359_v39  ;;  %v7803_v25 = vadd.f32 %v12290_v12, %v4031_v56  ;;  %v3184_v12 = vsel %vm3134_vm1, %v12248_v26, %v3159_v6  ;;  %v11403_v26 = vld [vmem:[#allocation11 + $0xda0] ss:$12 sps:$4 sm:$0xff]   ;;  %v11409_v39 = vld [vmem:[#allocation11 + $0xdc8] ss:$12 sps:$4 sm:$0xff]   ;;  %v11428_v3 = vld [vmem:[#allocation11 + $0xe18] ss:$12 sps:$4 sm:$0xff]  }
 0x3b9   :  { %10036 = vmatpush3.bf16.msra.mxu0 %v11363_v32  ;;  %7583 = vmatprep.subr.bf16.mxu1 %v11366_v35  ;;  %v3209_v16 = vpack.c.bf16 %v3184_v12, %v3184_v12  ;;  %v11413_v32 = vld [vmem:[#allocation11 + $0xdd0] ss:$12 sps:$4 sm:$0xff]   ;;  %v11451_v12 = vld [vmem:[#allocation11 + $0xe8c] ss:$12 sps:$4 sm:$0xff]  }
 0x3ba   :  { %10037 = vmatprep.subr.bf16.mxu0 %v11367_v33  ;;  %v11416_v35 = vld [vmem:[#allocation11 + $0xde4] ss:$12 sps:$4 sm:$0xff]   ;;  %v11417_v33 = vld [vmem:[#allocation11 + $0xea8] ss:$12 sps:$4 sm:$0xff]  }
 0x3bb   :  { %v11432_v56 = vld [vmem:[#allocation11 + $0xef0] ss:$12 sps:$4 sm:$0xff]  }
 0x3bc   :  { %7584 = vmatpush1.bf16.msra.mxu1 %v11364_v37  ;;  %v11414_v37 = vld [vmem:[#allocation11 + $0xde0] ss:$12 sps:$4 sm:$0xff]  }
 0x3bd   :  { %10038 = vmatpush3.bf16.msra.mxu0 %v11368_v29  ;;  %7585 = vmatprep.subr.bf16.mxu1 %v11371_v34  ;;  %v11421_v29 = vld [vmem:[#allocation11 + $0xdfc] ss:$12 sps:$4 sm:$0xff]   ;;  %v11422_v34 = vld [vmem:[#allocation11 + $0xec0] ss:$12 sps:$4 sm:$0xff]  }
 0x3be   :  { %10039 = vmatprep.subr.bf16.mxu0 %v11372_v40  ;;  %v11419_v40 = vld [vmem:[#allocation11 + $0xdf8] ss:$12 sps:$4 sm:$0xff]  }
 0x3c0   :  { %7586 = vmatpush1.bf16.msra.mxu1 %v11369_v44  ;;  %v11423_v44 = vld [vmem:[#allocation11 + $0xe00] ss:$12 sps:$4 sm:$0xff]  }
 0x3c1   :  { %10040 = vmatpush3.bf16.msra.mxu0 %v11373_v45  ;;  %7587 = vmatprep.subr.bf16.mxu1 %v11376_v46  ;;  %v11426_v45 = vld [vmem:[#allocation11 + $0xe14] ss:$12 sps:$4 sm:$0xff]   ;;  %v11427_v46 = vld [vmem:[#allocation11 + $0xed8] ss:$12 sps:$4 sm:$0xff]  }
 0x3c2   :  { %10041 = vmatprep.subr.bf16.mxu0 %v11377_v47 }
 0x3c4   :  { %7588 = vmatpush1.bf16.msra.mxu1 %v11374_v36 }
 0x3c5   :  { %10042 = vmatpush3.bf16.msra.mxu0 %v11378_v15  ;;  %7589 = vmatprep.subr.bf16.mxu1 %v11381_v52 }
 0x3c6   :  { %10043 = vmatprep.subr.bf16.mxu0 %v11382_v62  ;;  %v11431_v62 = vld [vmem:[#allocation11 + $0xe2c] ss:$12 sps:$4 sm:$0xff]  }
 0x3c7   :  { %v9895_v61 = vpop.f32.mrb[40].mxu0 }
 0x3c8   :  { %v9896_v21 = vpop.f32.mrb[41].mxu0  ;;  %7590 = vmatpush1.bf16.msra.mxu1 %v11379_v27 }
 0x3c9   :  { %v9897_v2 = vadd.f32 %v9896_v21, %v9895_v61  ;;  %v9898_v5 = vpop.f32.mrb[42].mxu0  ;;  %10044 = vmatpush3.bf16.msra.mxu0 %v11383_v57  ;;  %7591 = vmatprep.subr.bf16.mxu1 %v11386_v43  ;;  %v3161_v57 = vmul.f32 0.2, %v12173_v22  ;;  %v11429_v61 = vld [vmem:[#allocation11 + $0xe28] ss:$12 sps:$4 sm:$0xff]  }
 0x3ca   :  { %v9899_v4 = vpop.f32.mrb[43].mxu0  ;;  %10045 = vmatprep.subr.bf16.mxu0 %v11387_v58  ;;  %v3164_v58 = vmul.f32 0.2, %v12270_v50  ;;  %v11433_v21 = vld [vmem:[#allocation11 + $0xe30] ss:$12 sps:$4 sm:$0xff]  }
 0x3cb   :  { %v12300_v8 = vadd.f32 %v9897_v2, %v7803_v25  ;;  %v11437_v25 = vld [vmem:[#allocation11 + $0xfc8] ss:$12 sps:$4 sm:$0xff]   ;;  %v3186_v2 = vsel %vm3136_vm3, %v12173_v22, %v3161_v57  ;;  %v11443_v22 = vld [vmem:[#allocation11 + $0xf20] ss:$12 sps:$4 sm:$0xff]  }
 0x3cc   :  { %7592 = vmatpush1.bf16.msra.mxu1 %v11384_v1  ;;  %v11436_v1 = vld [vmem:[#allocation11 + $0xe44] ss:$12 sps:$4 sm:$0xff]   ;;  %v3189_v5 = vsel %vm3139_vm4, %v12270_v50, %v3164_v58  ;;  %v12315_v6 = vpack.c.bf16 %v3186_v2, %v3186_v2  ;;  %v11441_v4 = vld [vmem:[#allocation11 + $0xe5c] ss:$12 sps:$4 sm:$0xff]   ;;  %v11446_v50 = vld [vmem:[#allocation11 + $0xe74] ss:$12 sps:$4 sm:$0xff]  }
 0x3cd   :  { %10046 = vmatpush3.bf16.msra.mxu0 %v11388_v42  ;;  %7593 = vmatprep.subr.bf16.mxu1 %v11391_v54  ;;  %v11434_v42 = vld [vmem:[#allocation11 + $0xe40] ss:$12 sps:$4 sm:$0xff]   ;;  %v11438_v54 = vld [vmem:[#allocation11 + $0xf08] ss:$12 sps:$4 sm:$0xff]   ;;  %v11484_v58 = vld [vmem:[#allocation11 + $0xf30] ss:$12 sps:$4 sm:$0xff]  }
 0x3ce   :  { %10047 = vmatprep.subr.bf16.mxu0 %v11392_v7  ;;  %v11442_v7 = vld [vmem:[#allocation11 + $0xfe0] ss:$12 sps:$4 sm:$0xff]   ;;  %v11493_v2 = vld [vmem:[#allocation11 + $0x10d0] ss:$12 sps:$4 sm:$0xff]  }
 0x3cf   :  { %v11486_v57 = vld [vmem:[#allocation11 + $0xf34] ss:$12 sps:$4 sm:$0xff]  }
 0x3d0   :  { %7594 = vmatpush1.bf16.msra.mxu1 %v11389_v11  ;;  %v11447_v11 = vld [vmem:[#allocation11 + $0xff8] ss:$12 sps:$4 sm:$0xff]  }
 0x3d1   :  { %10048 = vmatpush3.bf16.msra.mxu0 %v11393_v28  ;;  %7604 = vmatprep.subr.bf16.mxu1 %v11396_v9  ;;  %v11444_v28 = vld [vmem:[#allocation11 + $0xe70] ss:$12 sps:$4 sm:$0xff]   ;;  %v11448_v9 = vld [vmem:[#allocation11 + $0xf38] ss:$12 sps:$4 sm:$0xff]  }
 0x3d2   :  { %10055 = vmatprep.subr.bf16.mxu0 %v11397_v13  ;;  %v11452_v13 = vld [vmem:[#allocation11 + $0x1010] ss:$12 sps:$4 sm:$0xff]  }
 0x3d3   :  { %7596 = vmatmul.mubr.bf16.vlgmr.msra.gmra.mrb[16].mxu1 %v3209_v16 }
 0x3d4   :  { %8121 = vmatmul.mubr.bf16.vlgmr.msra.gmra.mrb[68].mxu0 %v3209_v16  ;;  %7605 = vmatpush1.bf16.msra.mxu1 %v11394_v59  ;;  %v11453_v59 = vld [vmem:[#allocation11 + $0xf50] ss:$12 sps:$4 sm:$0xff]  }
 0x3d5   :  { %7636 = vmatprep.mubr.bf16.mxu1 %v3212_v19  ;;  %10056 = vmatpush3.bf16.msra.mxu0 %v11398_v17  ;;  %v11456_v16 = vld [vmem:[#allocation11 + $0xea4] ss:$12 sps:$4 sm:$0xff]   ;;  %v11457_v17 = vld [vmem:[#allocation11 + $0x1028] ss:$12 sps:$4 sm:$0xff]  }
 0x3d6   :  { %8160 = vmatprep.mubr.bf16.mxu0 %v3212_v19  ;;  %7606 = vmatprep.subr.bf16.mxu1 %v11401_v18  ;;  %v11454_v18 = vld [vmem:[#allocation11 + $0xea0] ss:$12 sps:$4 sm:$0xff]   ;;  %v11458_v19 = vld [vmem:[#allocation11 + $0xf68] ss:$12 sps:$4 sm:$0xff]  }
 0x3d7   :  { %10057 = vmatprep.subr.bf16.mxu0 %v11402_v49  ;;  %v11461_v49 = vld [vmem:[#allocation11 + $0xebc] ss:$12 sps:$4 sm:$0xff]  }
 0x3d8   :  { %7607 = vmatpush1.bf16.msra.mxu1 %v11399_v20  ;;  %v11462_v20 = vld [vmem:[#allocation11 + $0x1040] ss:$12 sps:$4 sm:$0xff]  }
 0x3d9   :  { %10058 = vmatpush3.bf16.msra.mxu0 %v11403_v26  ;;  %7608 = vmatprep.subr.bf16.mxu1 %v11406_v30  ;;  %v11459_v26 = vld [vmem:[#allocation11 + $0xeb8] ss:$12 sps:$4 sm:$0xff]   ;;  %v11463_v30 = vld [vmem:[#allocation11 + $0xf80] ss:$12 sps:$4 sm:$0xff]  }
 0x3da   :  { %10059 = vmatprep.subr.bf16.mxu0 %v11407_v24  ;;  %v11466_v24 = vld [vmem:[#allocation11 + $0xed4] ss:$12 sps:$4 sm:$0xff]  }
 0x3dc   :  { %7609 = vmatpush1.bf16.msra.mxu1 %v11404_v60  ;;  %v11467_v60 = vld [vmem:[#allocation11 + $0x1058] ss:$12 sps:$4 sm:$0xff]  }
 0x3dd   :  { %10060 = vmatpush3.bf16.msra.mxu0 %v11408_v23  ;;  %7610 = vmatprep.subr.bf16.mxu1 %v11411_v63 }
 0x3de   :  { %10061 = vmatprep.subr.bf16.mxu0 %v11412_v0  ;;  %v11464_v0 = vld [vmem:[#allocation11 + $0xed0] ss:$12 sps:$4 sm:$0xff]  }
 0x3e0   :  { %7611 = vmatpush1.bf16.msra.mxu1 %v11409_v39 }
 0x3e1   :  { %10062 = vmatpush3.bf16.msra.mxu0 %v11413_v32  ;;  %7612 = vmatprep.subr.bf16.mxu1 %v11416_v35  ;;  %v11468_v35 = vld [vmem:[#allocation11 + $0xf98] ss:$12 sps:$4 sm:$0xff]  }
 0x3e2   :  { %10063 = vmatprep.subr.bf16.mxu0 %v11417_v33  ;;  %v11471_v33 = vld [vmem:[#allocation11 + $0xeec] ss:$12 sps:$4 sm:$0xff]  }
 0x3e4   :  { %7613 = vmatpush1.bf16.msra.mxu1 %v11414_v37 }
 0x3e5   :  { %10064 = vmatpush3.bf16.msra.mxu0 %v11418_v38  ;;  %7614 = vmatprep.subr.bf16.mxu1 %v11421_v29  ;;  %v11472_v38 = vld [vmem:[#allocation11 + $0x1070] ss:$12 sps:$4 sm:$0xff]   ;;  %v3163_v29 = vmul.f32 0.2, %v12268_v48 }
 0x3e6   :  { %10065 = vmatprep.subr.bf16.mxu0 %v11422_v34 }
 0x3e7   :  { %v9917_v47 = vpop.f32.mrb[44].mxu0 }
 0x3e8   :  { %v9918_v36 = vpop.f32.mrb[45].mxu0  ;;  %7615 = vmatpush1.bf16.msra.mxu1 %v11419_v40  ;;  %v11469_v40 = vld [vmem:[#allocation11 + $0xee8] ss:$12 sps:$4 sm:$0xff]  }
 0x3e9   :  { %v9919_v15 = vadd.f32 %v9918_v36, %v9917_v47  ;;  %v9920_v52 = vpop.f32.mrb[46].mxu0  ;;  %10066 = vmatpush3.bf16.msra.mxu0 %v11423_v44  ;;  %7616 = vmatprep.subr.bf16.mxu1 %v11426_v45  ;;  %v3166_v44 = vmul.f32 0.2, %v12194_v55  ;;  %v11473_v45 = vld [vmem:[#allocation11 + $0xfb0] ss:$12 sps:$4 sm:$0xff]   ;;  %v3188_v36 = vsel %vm3138_vm5, %v12268_v48, %v3163_v29 }
 0x3ea   :  { %v9921_v27 = vpop.f32.mrb[47].mxu0  ;;  %10067 = vmatprep.subr.bf16.mxu0 %v11427_v46  ;;  %v11476_v46 = vld [vmem:[#allocation11 + $0xf04] ss:$12 sps:$4 sm:$0xff]   ;;  %v11477_v47 = vld [vmem:[#allocation11 + $0x1148] ss:$12 sps:$4 sm:$0xff]  }
 0x3eb   :  { %v12308_v43 = vadd.f32 %v9919_v15, %v12300_v8  ;;  %v12317_v8 = vpack.c.bf16 %v3189_v5, %v3189_v5  ;;  %v3191_v15 = vsel %vm3141_vm6, %v12194_v55, %v3166_v44  ;;  %v11478_v52 = vld [vmem:[#allocation11 + $0x1088] ss:$12 sps:$4 sm:$0xff]   ;;  %v11482_v27 = vld [vmem:[#allocation11 + $0x1160] ss:$12 sps:$4 sm:$0xff]   ;;  %v11479_v48 = vld [vmem:[#allocation11 + $0xf18] ss:$12 sps:$4 sm:$0xff]  }
 0x3ec   :  { %7617 = vmatpush1.bf16.msra.mxu1 %v11424_v51  ;;  %v11474_v51 = vld [vmem:[#allocation11 + $0xf00] ss:$12 sps:$4 sm:$0xff]   ;;  %v11496_v5 = vld [vmem:[#allocation11 + $0xf64] ss:$12 sps:$4 sm:$0xff]   ;;  %v11533_v44 = vld [vmem:[#allocation11 + $0x1268] ss:$12 sps:$4 sm:$0xff]  }
 0x3ed   :  { %10068 = vmatpush3.bf16.msra.mxu0 %v11428_v3  ;;  %7618 = vmatprep.subr.bf16.mxu1 %v11431_v62  ;;  %v12330_v3 = vpack.c.bf16 %v3188_v36, %v3188_v36  ;;  %v11481_v62 = vld [vmem:[#allocation11 + $0xf1c] ss:$12 sps:$4 sm:$0xff]   ;;  %v11483_v55 = vld [vmem:[#allocation11 + $0x10a0] ss:$12 sps:$4 sm:$0xff]  }
 0x3ee   :  { %10069 = vmatprep.subr.bf16.mxu0 %v11432_v56  ;;  %v12333_v56 = vpack.c.bf16 %v3191_v15, %v3191_v15  ;;  %v11529_v29 = vld [vmem:[#allocation11 + $0x1250] ss:$12 sps:$4 sm:$0xff]   ;;  %v11540_v36 = vld [vmem:[#allocation11 + $0x1054] ss:$12 sps:$4 sm:$0xff]  }
 0x3f0   :  { %7619 = vmatpush1.bf16.msra.mxu1 %v11429_v61  ;;  %v11488_v61 = vld [vmem:[#allocation11 + $0x10b8] ss:$12 sps:$4 sm:$0xff]  }
 0x3f1   :  { %10070 = vmatpush3.bf16.msra.mxu0 %v11433_v21  ;;  %7620 = vmatprep.subr.bf16.mxu1 %v11436_v1  ;;  %v11491_v21 = vld [vmem:[#allocation11 + $0xf4c] ss:$12 sps:$4 sm:$0xff]   ;;  %v11492_v1 = vld [vmem:[#allocation11 + $0x1190] ss:$12 sps:$4 sm:$0xff]  }
 0x3f2   :  { %10077 = vmatprep.subr.bf16.mxu0 %v11437_v25  ;;  %v11489_v25 = vld [vmem:[#allocation11 + $0xf48] ss:$12 sps:$4 sm:$0xff]  }
 0x3f4   :  { %8161 = vmatmul.mubr.bf16.vlgmr.msra.gmra.mrb[72].mxu0 %v12315_v6  ;;  %7621 = vmatpush1.bf16.msra.mxu1 %v11434_v42  ;;  %v11497_v42 = vld [vmem:[#allocation11 + $0x11a8] ss:$12 sps:$4 sm:$0xff]  }
 0x3f5   :  { %10078 = vmatpush3.bf16.msra.mxu0 %v11438_v54  ;;  %8200 = vmatprep.mubr.bf16.mxu0 %v12317_v8  ;;  %v11494_v54 = vld [vmem:[#allocation11 + $0xf60] ss:$12 sps:$4 sm:$0xff]  }
 0x3f6   :  { %7622 = vmatprep.subr.bf16.mxu1 %v11441_v4  ;;  %10079 = vmatprep.subr.bf16.mxu0 %v11442_v7  ;;  %v11501_v4 = vld [vmem:[#allocation11 + $0xf7c] ss:$12 sps:$4 sm:$0xff]   ;;  %v11502_v7 = vld [vmem:[#allocation11 + $0x11c0] ss:$12 sps:$4 sm:$0xff]  }
 0x3f8   :  { %7623 = vmatpush1.bf16.msra.mxu1 %v11439_v10  ;;  %v11503_v10 = vld [vmem:[#allocation11 + $0x1100] ss:$12 sps:$4 sm:$0xff]  }
 0x3f9   :  { %10080 = vmatpush3.bf16.msra.mxu0 %v11443_v22  ;;  %7624 = vmatprep.subr.bf16.mxu1 %v11446_v50  ;;  %v11506_v22 = vld [vmem:[#allocation11 + $0xf94] ss:$12 sps:$4 sm:$0xff]   ;;  %v11507_v50 = vld [vmem:[#allocation11 + $0x11d8] ss:$12 sps:$4 sm:$0xff]  }
 0x3fa   :  { %10081 = vmatprep.subr.bf16.mxu0 %v11447_v11 }
 0x3fc   :  { %7625 = vmatpush1.bf16.msra.mxu1 %v11444_v28 }
 0x3fd   :  { %10082 = vmatpush3.bf16.msra.mxu0 %v11448_v9  ;;  %7626 = vmatprep.subr.bf16.mxu1 %v11451_v12  ;;  %v11504_v9 = vld [vmem:[#allocation11 + $0xf90] ss:$12 sps:$4 sm:$0xff]  }
 0x3fe   :  { %10083 = vmatprep.subr.bf16.mxu0 %v11452_v13 }
 0x400   :  { %7627 = vmatpush1.bf16.msra.mxu1 %v11449_v14  ;;  %v11508_v14 = vld [vmem:[#allocation11 + $0x1118] ss:$12 sps:$4 sm:$0xff]  }
 0x401   :  { %10084 = vmatpush3.bf16.msra.mxu0 %v11453_v59  ;;  %7628 = vmatprep.subr.bf16.mxu1 %v11456_v16  ;;  %v11511_v59 = vld [vmem:[#allocation11 + $0xfac] ss:$12 sps:$4 sm:$0xff]  }
 0x402   :  { %10085 = vmatprep.subr.bf16.mxu0 %v11457_v17  ;;  %v11512_v17 = vld [vmem:[#allocation11 + $0x11f0] ss:$12 sps:$4 sm:$0xff]  }
 0x404   :  { %7629 = vmatpush1.bf16.msra.mxu1 %v11454_v18  ;;  %v3165_v18 = vmul.f32 0.2, %v12190_v53 }
 0x405   :  { %10086 = vmatpush3.bf16.msra.mxu0 %v11458_v19  ;;  %7630 = vmatprep.subr.bf16.mxu1 %v11461_v49  ;;  %v11509_v49 = vld [vmem:[#allocation11 + $0xfa8] ss:$12 sps:$4 sm:$0xff]  }
 0x406   :  { %10087 = vmatprep.subr.bf16.mxu0 %v11462_v20  ;;  %v11513_v20 = vld [vmem:[#allocation11 + $0x1130] ss:$12 sps:$4 sm:$0xff]  }
 0x407   :  { %v9939_v23 = vpop.f32.mrb[48].mxu0 }
 0x408   :  { %v9940_v63 = vpop.f32.mrb[49].mxu0  ;;  %7631 = vmatpush1.bf16.msra.mxu1 %v11459_v26  ;;  %v11516_v26 = vld [vmem:[#allocation11 + $0xfc4] ss:$12 sps:$4 sm:$0xff]  }
 0x409   :  { %v9941_v39 = vadd.f32 %v9940_v63, %v9939_v23  ;;  %v9942_v32 = vpop.f32.mrb[50].mxu0  ;;  %10088 = vmatpush3.bf16.msra.mxu0 %v11463_v30  ;;  %7632 = vmatprep.subr.bf16.mxu1 %v11466_v24  ;;  %v3190_v30 = vsel %vm3140_vm7, %v12190_v53, %v3165_v18  ;;  %v11514_v24 = vld [vmem:[#allocation11 + $0xfc0] ss:$12 sps:$4 sm:$0xff]   ;;  %v11520_v23 = vld [vmem:[#allocation11 + $0xfdc] ss:$12 sps:$4 sm:$0xff]  }
 0x40a   :  { %v9943_v37 = vpop.f32.mrb[51].mxu0  ;;  %10089 = vmatprep.subr.bf16.mxu0 %v11467_v60  ;;  %v11517_v60 = vld [vmem:[#allocation11 + $0x1208] ss:$12 sps:$4 sm:$0xff]   ;;  %v12344_v63 = vpack.c.bf16 %v3190_v30, %v3190_v30  ;;  %v11521_v32 = vld [vmem:[#allocation11 + $0x1220] ss:$12 sps:$4 sm:$0xff]  }
 0x40b   :  { %v12323_v34 = vadd.f32 %v9941_v39, %v12308_v43  ;;  %v11487_v43 = vld [vmem:[#allocation11 + $0x1178] ss:$12 sps:$4 sm:$0xff]   ;;  %v11522_v53 = vld [vmem:[#allocation11 + $0xff0] ss:$12 sps:$4 sm:$0xff]   ;;  %v11570_v18 = vld [vmem:[#allocation11 + $0x1140] ss:$12 sps:$4 sm:$0xff]  }
 0x40c   :  { %7633 = vmatpush1.bf16.msra.mxu1 %v11464_v0  ;;  %v11961_v0 = vmov 0.0   ;;  %v11518_v39 = vld [vmem:[#allocation11 + $0xfd8] ss:$12 sps:$4 sm:$0xff]  }
 0x40d   :  { %10090 = vmatpush3.bf16.msra.mxu0 %v11468_v35  ;;  %7634 = vmatprep.subr.bf16.mxu1 %v11471_v33  ;;  %v11524_v35 = vld [vmem:[#allocation11 + $0xff4] ss:$12 sps:$4 sm:$0xff]   ;;  %v11525_v33 = vld [vmem:[#allocation11 + $0x1238] ss:$12 sps:$4 sm:$0xff]  }
 0x40e   :  { %10091 = vmatprep.subr.bf16.mxu0 %v11472_v38  ;;  %v11528_v37 = vld [vmem:[#allocation11 + $0x100c] ss:$12 sps:$4 sm:$0xff]   ;;  %v11526_v38 = vld [vmem:[#allocation11 + $0x1008] ss:$12 sps:$4 sm:$0xff]  }
 0x40f   :  { %v11581_v30 = vld [vmem:[#allocation11 + $0x118c] ss:$12 sps:$4 sm:$0xff]  }
 0x410   :  { %7635 = vmatpush1.bf16.msra.mxu1 %v11469_v40  ;;  %v11530_v40 = vld [vmem:[#allocation11 + $0x1020] ss:$12 sps:$4 sm:$0xff]  }
 0x411   :  { %10092 = vmatpush3.bf16.msra.mxu0 %v11473_v45  ;;  %7645 = vmatprep.subr.bf16.mxu1 %v11476_v46  ;;  %v11536_v45 = vld [vmem:[#allocation11 + $0x103c] ss:$12 sps:$4 sm:$0xff]   ;;  %v11534_v46 = vld [vmem:[#allocation11 + $0x1038] ss:$12 sps:$4 sm:$0xff]  }
 0x412   :  { %10099 = vmatprep.subr.bf16.mxu0 %v11477_v47  ;;  %v11537_v47 = vld [vmem:[#allocation11 + $0x1280] ss:$12 sps:$4 sm:$0xff]  }
 0x413   :  { %7637 = vmatmul.mubr.bf16.vlgmr.msra.gmra.mrb[16].mxu1 %v12315_v6  ;;  %v11498_v6 = vld [vmem:[#allocation11 + $0x10e8] ss:$12 sps:$4 sm:$0xff]  }
 0x414   :  { %8201 = vmatmul.mubr.bf16.vlgmr.msra.gmra.mrb[76].mxu0 %v12330_v3  ;;  %7646 = vmatpush1.bf16.msra.mxu1 %v11474_v51 }
 0x415   :  { %7677 = vmatprep.mubr.bf16.mxu1 %v12317_v8  ;;  %10100 = vmatpush3.bf16.msra.mxu0 %v11478_v52  ;;  %v11499_v8 = vld [vmem:[#allocation11 + $0xf78] ss:$12 sps:$4 sm:$0xff]   ;;  %v11538_v52 = vld [vmem:[#allocation11 + $0x1050] ss:$12 sps:$4 sm:$0xff]  }
 0x416   :  { %8240 = vmatprep.mubr.bf16.mxu0 %v12333_v56  ;;  %7647 = vmatprep.subr.bf16.mxu1 %v11481_v62 }
 0x417   :  { %10101 = vmatprep.subr.bf16.mxu0 %v11482_v27 }
 0x418   :  { %7648 = vmatpush1.bf16.msra.mxu1 %v11479_v48  ;;  %v11541_v48 = vld [vmem:[#allocation11 + $0x1298] ss:$12 sps:$4 sm:$0xff]  }
 0x419   :  { %10102 = vmatpush3.bf16.msra.mxu0 %v11483_v55  ;;  %7649 = vmatprep.subr.bf16.mxu1 %v11486_v57  ;;  %v11544_v55 = vld [vmem:[#allocation11 + $0x106c] ss:$12 sps:$4 sm:$0xff]  }
 0x41a   :  { %10103 = vmatprep.subr.bf16.mxu0 %v11487_v43  ;;  %v3167_v43 = vmul.f32 0.2, %v12274_v31 }
 0x41c   :  { %7650 = vmatpush1.bf16.msra.mxu1 %v11484_v58 }
 0x41d   :  { %10104 = vmatpush3.bf16.msra.mxu0 %v11488_v61  ;;  %7651 = vmatprep.subr.bf16.mxu1 %v11491_v21  ;;  %v11542_v61 = vld [vmem:[#allocation11 + $0x1068] ss:$12 sps:$4 sm:$0xff]   ;;  %v11545_v21 = vld [vmem:[#allocation11 + $0x12b0] ss:$12 sps:$4 sm:$0xff]  }
 0x41e   :  { %10105 = vmatprep.subr.bf16.mxu0 %v11492_v1  ;;  %v11548_v1 = vld [vmem:[#allocation11 + $0x1084] ss:$12 sps:$4 sm:$0xff]  }
 0x420   :  { %7652 = vmatpush1.bf16.msra.mxu1 %v11489_v25  ;;  %v3192_v25 = vsel %vm3142_vm9, %v12274_v31, %v3167_v43  ;;  %v11557_v31 = vld [vmem:[#allocation11 + $0x10cc] ss:$12 sps:$4 sm:$0xff]   ;;  %v11614_v43 = vld [vmem:[#allocation11 + $0x1294] ss:$12 sps:$4 sm:$0xff]  }
 0x421   :  { %10106 = vmatpush3.bf16.msra.mxu0 %v11493_v2  ;;  %7653 = vmatprep.subr.bf16.mxu1 %v11496_v5  ;;  %v11546_v2 = vld [vmem:[#allocation11 + $0x1080] ss:$12 sps:$4 sm:$0xff]   ;;  %v11551_v5 = vld [vmem:[#allocation11 + $0x109c] ss:$12 sps:$4 sm:$0xff]  }
 0x422   :  { %10107 = vmatprep.subr.bf16.mxu0 %v11497_v42  ;;  %v12351_v42 = vpack.c.bf16 %v3192_v25, %v3192_v25 }
 0x424   :  { %7654 = vmatpush1.bf16.msra.mxu1 %v11494_v54  ;;  %v11549_v54 = vld [vmem:[#allocation11 + $0x1098] ss:$12 sps:$4 sm:$0xff]  }
 0x425   :  { %10108 = vmatpush3.bf16.msra.mxu0 %v11498_v6  ;;  %7655 = vmatprep.subr.bf16.mxu1 %v11501_v4  ;;  %v11554_v6 = vld [vmem:[#allocation11 + $0x10b4] ss:$12 sps:$4 sm:$0xff]   ;;  %v11552_v4 = vld [vmem:[#allocation11 + $0x10b0] ss:$12 sps:$4 sm:$0xff]  }
 0x426   :  { %10109 = vmatprep.subr.bf16.mxu0 %v11502_v7  ;;  %v11555_v7 = vld [vmem:[#allocation11 + $0x10c8] ss:$12 sps:$4 sm:$0xff]  }
 0x427   :  { %v9961_v11 = vpop.f32.mrb[52].mxu0 }
 0x428   :  { %v9962_v28 = vpop.f32.mrb[53].mxu0  ;;  %7656 = vmatpush1.bf16.msra.mxu1 %v11499_v8  ;;  %v11560_v8 = vld [vmem:[#allocation11 + $0x10e4] ss:$12 sps:$4 sm:$0xff]  }
 0x429   :  { %v9963_v12 = vadd.f32 %v9962_v28, %v9961_v11  ;;  %v9964_v13 = vpop.f32.mrb[54].mxu0  ;;  %10110 = vmatpush3.bf16.msra.mxu0 %v11503_v10  ;;  %7657 = vmatprep.subr.bf16.mxu1 %v11506_v22  ;;  %v11558_v10 = vld [vmem:[#allocation11 + $0x10e0] ss:$12 sps:$4 sm:$0xff]   ;;  %v11561_v22 = vld [vmem:[#allocation11 + $0x10f8] ss:$12 sps:$4 sm:$0xff]  }
 0x42a   :  { %v9965_v16 = vpop.f32.mrb[55].mxu0  ;;  %10111 = vmatprep.subr.bf16.mxu0 %v11507_v50  ;;  %v11566_v50 = vld [vmem:[#allocation11 + $0x1114] ss:$12 sps:$4 sm:$0xff]   ;;  %v11564_v28 = vld [vmem:[#allocation11 + $0x1110] ss:$12 sps:$4 sm:$0xff]  }
 0x42b   :  { %v12340_v19 = vadd.f32 %v9963_v12, %v12323_v34  ;;  %v11532_v34 = vld [vmem:[#allocation11 + $0x1024] ss:$12 sps:$4 sm:$0xff]   ;;  %v11569_v13 = vld [vmem:[#allocation11 + $0x112c] ss:$12 sps:$4 sm:$0xff]   ;;  %v11567_v16 = vld [vmem:[#allocation11 + $0x1128] ss:$12 sps:$4 sm:$0xff]  }
 0x42c   :  { %7658 = vmatpush1.bf16.msra.mxu1 %v11504_v9 }
 0x42d   :  { %10112 = vmatpush3.bf16.msra.mxu0 %v11508_v14  ;;  %7659 = vmatprep.subr.bf16.mxu1 %v11511_v59 }
 0x42e   :  { %10113 = vmatprep.subr.bf16.mxu0 %v11512_v17  ;;  %v11572_v17 = vld [vmem:[#allocation11 + $0x1144] ss:$12 sps:$4 sm:$0xff]  }
 0x430   :  { %7660 = vmatpush1.bf16.msra.mxu1 %v11509_v49  ;;  %v11573_v49 = vld [vmem:[#allocation11 + $0x1158] ss:$12 sps:$4 sm:$0xff]  }
 0x431   :  { %10114 = vmatpush3.bf16.msra.mxu0 %v11513_v20  ;;  %7661 = vmatprep.subr.bf16.mxu1 %v11516_v26  ;;  %v11578_v20 = vld [vmem:[#allocation11 + $0x1174] ss:$12 sps:$4 sm:$0xff]   ;;  %v11576_v26 = vld [vmem:[#allocation11 + $0x1170] ss:$12 sps:$4 sm:$0xff]  }
 0x432   :  { %10130 = vmatprep.subr.bf16.mxu0 %v11961_v0 }
 0x434   :  { %8241 = vmatmul.mubr.bf16.vlgmr.msra.gmra.mrb[80].mxu0 %v12344_v63  ;;  %7662 = vmatpush1.bf16.msra.mxu1 %v11514_v24  ;;  %v11579_v24 = vld [vmem:[#allocation11 + $0x1188] ss:$12 sps:$4 sm:$0xff]  }
 0x435   :  { %10131 = vmatpush3.bf16.msra.mxu0 %v11517_v60  ;;  %7663 = vmatprep.subr.bf16.mxu1 %v11520_v23  ;;  %v11584_v60 = vld [vmem:[#allocation11 + $0x11a4] ss:$12 sps:$4 sm:$0xff]   ;;  %v11582_v23 = vld [vmem:[#allocation11 + $0x11a0] ss:$12 sps:$4 sm:$0xff]  }
 0x436   :  { %10132 = vmatprep.subr.bf16.mxu0 %v11961_v0  ;;  %10146 = vmatprep.mubr.msk.bf16.mxu0 %vm11962_vm8, %v11961_v0 }
 0x438   :  { %7664 = vmatpush1.bf16.msra.mxu1 %v11518_v39  ;;  %v11585_v39 = vld [vmem:[#allocation11 + $0x11b8] ss:$12 sps:$4 sm:$0xff]  }
 0x439   :  { %10133 = vmatpush3.bf16.msra.mxu0 %v11521_v32  ;;  %7665 = vmatprep.subr.bf16.mxu1 %v11524_v35  ;;  %v11590_v32 = vld [vmem:[#allocation11 + $0x11d4] ss:$12 sps:$4 sm:$0xff]  }
 0x43a   :  { %10134 = vmatprep.subr.bf16.mxu0 %v11961_v0 }
 0x43c   :  { %7666 = vmatpush1.bf16.msra.mxu1 %v11522_v53 }
 0x43d   :  { %10135 = vmatpush3.bf16.msra.mxu0 %v11525_v33  ;;  %7667 = vmatprep.subr.bf16.mxu1 %v11528_v37  ;;  %v11588_v33 = vld [vmem:[#allocation11 + $0x11d0] ss:$12 sps:$4 sm:$0xff]  }
 0x43e   :  { %10136 = vmatprep.subr.bf16.mxu0 %v11961_v0 }
 0x440   :  { %7668 = vmatpush1.bf16.msra.mxu1 %v11526_v38 }
 0x441   :  { %10137 = vmatpush3.bf16.msra.mxu0 %v11529_v29  ;;  %7669 = vmatprep.subr.bf16.mxu1 %v11532_v34  ;;  %v11593_v29 = vld [vmem:[#allocation11 + $0x11ec] ss:$12 sps:$4 sm:$0xff]  }
 0x442   :  { %10138 = vmatprep.subr.bf16.mxu0 %v11961_v0 }
 0x444   :  { %7670 = vmatpush1.bf16.msra.mxu1 %v11530_v40 }
 0x445   :  { %10139 = vmatpush3.bf16.msra.mxu0 %v11533_v44  ;;  %7671 = vmatprep.subr.bf16.mxu1 %v11536_v45  ;;  %v11591_v44 = vld [vmem:[#allocation11 + $0x11e8] ss:$12 sps:$4 sm:$0xff]   ;;  %v11596_v45 = vld [vmem:[#allocation11 + $0x1204] ss:$12 sps:$4 sm:$0xff]  }
 0x446   :  { %10140 = vmatprep.subr.bf16.mxu0 %v11961_v0 }
 0x447   :  { %v9983_v51 = vpop.f32.mrb[56].mxu0 }
 0x448   :  { %v9984_v15 = vpop.f32.mrb[57].mxu0  ;;  %7672 = vmatpush1.bf16.msra.mxu1 %v11534_v46  ;;  %v11594_v46 = vld [vmem:[#allocation11 + $0x1200] ss:$12 sps:$4 sm:$0xff]  }
 0x449   :  { %v9985_v62 = vadd.f32 %v9984_v15, %v9983_v51  ;;  %v9986_v27 = vpop.f32.mrb[58].mxu0  ;;  %10141 = vmatpush3.bf16.msra.mxu0 %v11537_v47  ;;  %7673 = vmatprep.subr.bf16.mxu1 %v11540_v36  ;;  %v11599_v47 = vld [vmem:[#allocation11 + $0x121c] ss:$12 sps:$4 sm:$0xff]   ;;  %v11597_v36 = vld [vmem:[#allocation11 + $0x1218] ss:$12 sps:$4 sm:$0xff]   ;;  %v11963_v51 = vmov 0  }
 0x44a   :  { %v9987_v57 = vpop.f32.mrb[59].mxu0  ;;  %10142 = vmatprep.subr.bf16.mxu0 %v11961_v0  ;;  %v11602_v15 = vld [vmem:[#allocation11 + $0x1234] ss:$12 sps:$4 sm:$0xff]  }
 0x44b   :  { %v8003_v58 = vadd.f32 %v9985_v62, %v12340_v19  ;;  %v11575_v19 = vld [vmem:[#allocation11 + $0x115c] ss:$12 sps:$4 sm:$0xff]   ;;  %v11605_v62 = vld [vmem:[#allocation11 + $0x124c] ss:$12 sps:$4 sm:$0xff]  }
 0x44c   :  { %7674 = vmatpush1.bf16.msra.mxu1 %v11538_v52  ;;  %v11600_v52 = vld [vmem:[#allocation11 + $0x1230] ss:$12 sps:$4 sm:$0xff]   ;;  %v11603_v27 = vld [vmem:[#allocation11 + $0x1248] ss:$12 sps:$4 sm:$0xff]  }
 0x44d   :  { %10143 = vmatpush3.bf16.msra.mxu0 %v11541_v48  ;;  %7675 = vmatprep.subr.bf16.mxu1 %v11544_v55  ;;  %v11608_v48 = vld [vmem:[#allocation11 + $0x1264] ss:$12 sps:$4 sm:$0xff]   ;;  %v11606_v55 = vld [vmem:[#allocation11 + $0x1260] ss:$12 sps:$4 sm:$0xff]   ;;  %v11611_v57 = vld [vmem:[#allocation11 + $0x127c] ss:$12 sps:$4 sm:$0xff]  }
 0x44e   :  { %10144 = vmatprep.subr.bf16.mxu0 %v11961_v0  ;;  %v11587_v0 = vld [vmem:[#allocation11 + $0x11bc] ss:$12 sps:$4 sm:$0xff]  }
 0x450   :  { %7676 = vmatpush1.bf16.msra.mxu1 %v11542_v61 }
 0x451   :  { %10145 = vmatpush3.bf16.msra.mxu0 %v11545_v21  ;;  %7686 = vmatprep.subr.bf16.mxu1 %v11548_v1  ;;  %v11612_v21 = vld [vmem:[#allocation11 + $0x1290] ss:$12 sps:$4 sm:$0xff]  }
 0x453   :  { %7678 = vmatmul.mubr.bf16.vlgmr.msra.gmra.mrb[16].mxu1 %v12330_v3  ;;  %v11563_v3 = vld [vmem:[#allocation11 + $0x10fc] ss:$12 sps:$4 sm:$0xff]  }
 0x454   :  { %10147 = vmatmul.mubr.bf16.vlgmr.msra.gmra.mrb[84].mxu0 %v12351_v42  ;;  %7687 = vmatpush1.bf16.msra.mxu1 %v11546_v2  ;;  %v11617_v2 = vld [vmem:[#allocation11 + $0x12ac] ss:$12 sps:$4 sm:$0xff]  }
 0x455   :  { %7718 = vmatprep.mubr.bf16.mxu1 %v12333_v56  ;;  %7688 = vmatprep.subr.bf16.mxu1 %v11551_v5 }
 0x458   :  { %7689 = vmatpush1.bf16.msra.mxu1 %v11549_v54 }
 0x459   :  { %7690 = vmatprep.subr.bf16.mxu1 %v11554_v6  ;;  %v11615_v6 = vld [vmem:[#allocation11 + $0x12a8] ss:$12 sps:$4 sm:$0xff]  }
 0x45c   :  { %7691 = vmatpush1.bf16.msra.mxu1 %v11552_v4  ;;  %v11618_v4 = vld [vmem:[#allocation13] ss:$8 sps:$4 sm:$0xff]  }
 0x45d   :  { %7692 = vmatprep.subr.bf16.mxu1 %v11557_v31  ;;  %v11620_v31 = vld [vmem:[#allocation13 + $0x4] ss:$8 sps:$4 sm:$0xff]  }
 0x45e   :  { %8601 = vmatprep.subr.bf16.mxu0 %v11620_v31 }
 0x45f   :  { %8602 = vmatpush1.bf16.msra.mxu0 %v11618_v4 }
 0x460   :  { %7693 = vmatpush1.bf16.msra.mxu1 %v11555_v7  ;;  %v11623_v7 = vld [vmem:[#allocation13 + $0x14] ss:$8 sps:$4 sm:$0xff]  }
 0x461   :  { %7694 = vmatprep.subr.bf16.mxu1 %v11560_v8  ;;  %v11621_v8 = vld [vmem:[#allocation13 + $0x10] ss:$8 sps:$4 sm:$0xff]   ;;  %8603 = vmatprep.subr.bf16.mxu0 %v11623_v7 }
 0x463   :  { %8604 = vmatpush1.bf16.msra.mxu0 %v11621_v8 }
 0x464   :  { %7695 = vmatpush1.bf16.msra.mxu1 %v11558_v10  ;;  %v11626_v10 = vld [vmem:[#allocation13 + $0x24] ss:$8 sps:$4 sm:$0xff]  }
 0x465   :  { %7696 = vmatprep.subr.bf16.mxu1 %v11563_v3  ;;  %v11624_v3 = vld [vmem:[#allocation13 + $0x20] ss:$8 sps:$4 sm:$0xff]   ;;  %8605 = vmatprep.subr.bf16.mxu0 %v11626_v10 }
 0x467   :  { %v10005_v11 = vpop.f32.mrb[60].mxu0  ;;  %8606 = vmatpush1.bf16.msra.mxu0 %v11624_v3 }
 0x468   :  { %v10006_v56 = vpop.f32.mrb[61].mxu0  ;;  %7697 = vmatpush1.bf16.msra.mxu1 %v11561_v22  ;;  %v11629_v22 = vld [vmem:[#allocation13 + $0x34] ss:$8 sps:$4 sm:$0xff]  }
 0x469   :  { %v10007_v9 = vadd.f32 %v10006_v56, %v10005_v11  ;;  %v10008_v12 = vpop.f32.mrb[62].mxu0  ;;  %7698 = vmatprep.subr.bf16.mxu1 %v11566_v50  ;;  %v11627_v50 = vld [vmem:[#allocation13 + $0x30] ss:$8 sps:$4 sm:$0xff]   ;;  %8607 = vmatprep.subr.bf16.mxu0 %v11629_v22  ;;  %v11632_v11 = vld [vmem:[#allocation13 + $0x44] ss:$8 sps:$4 sm:$0xff]  }
 0x46a   :  { %v10009_v14 = vpop.f32.mrb[63].mxu0  ;;  %v11630_v56 = vld [vmem:[#allocation13 + $0x40] ss:$8 sps:$4 sm:$0xff]   ;;  %v11638_v12 = vld [vmem:[#allocation13 + $0x64] ss:$8 sps:$4 sm:$0xff]  }
 0x46b   :  { %v8043_v59 = vadd.f32 %v10007_v9, %v8003_v58  ;;  %8608 = vmatpush1.bf16.msra.mxu0 %v11627_v50  ;;  %v11633_v9 = vld [vmem:[#allocation13 + $0x50] ss:$8 sps:$4 sm:$0xff]  }
 0x46c   :  { %7699 = vmatpush1.bf16.msra.mxu1 %v11564_v28  ;;  %8609 = vmatprep.subr.bf16.mxu0 %v11632_v11  ;;  %v11635_v28 = vld [vmem:[#allocation13 + $0x54] ss:$8 sps:$4 sm:$0xff]  }
 0x46d   :  { %7700 = vmatprep.subr.bf16.mxu1 %v11569_v13  ;;  %v11636_v13 = vld [vmem:[#allocation13 + $0x60] ss:$8 sps:$4 sm:$0xff]  }
 0x46f   :  { %8610 = vmatpush1.bf16.msra.mxu0 %v11630_v56 }
 0x470   :  { %7701 = vmatpush1.bf16.msra.mxu1 %v11567_v16  ;;  %8611 = vmatprep.subr.bf16.mxu0 %v11635_v28  ;;  %v11639_v16 = vld [vmem:[#allocation13 + $0x70] ss:$8 sps:$4 sm:$0xff]   ;;  %v11666_v28 = vld [vmem:[#allocation13 + $0x100] ss:$8 sps:$4 sm:$0xff]  }
 0x471   :  { %7702 = vmatprep.subr.bf16.mxu1 %v11572_v17 }
 0x473   :  { %8612 = vmatpush1.bf16.msra.mxu0 %v11633_v9 }
 0x474   :  { %7703 = vmatpush1.bf16.msra.mxu1 %v11570_v18  ;;  %8613 = vmatprep.subr.bf16.mxu0 %v11638_v12  ;;  %v11671_v12 = vld [vmem:[#allocation13 + $0x114] ss:$8 sps:$4 sm:$0xff]  }
 0x475   :  { %7704 = vmatprep.subr.bf16.mxu1 %v11575_v19  ;;  %v11644_v19 = vld [vmem:[#allocation13 + $0x84] ss:$8 sps:$4 sm:$0xff]  }
 0x477   :  { %8614 = vmatpush1.bf16.msra.mxu0 %v11636_v13  ;;  %v11669_v13 = vld [vmem:[#allocation13 + $0x110] ss:$8 sps:$4 sm:$0xff]  }
 0x478   :  { %7705 = vmatpush1.bf16.msra.mxu1 %v11573_v49 }
 0x479   :  { %7706 = vmatprep.subr.bf16.mxu1 %v11578_v20 }
 0x47c   :  { %7707 = vmatpush1.bf16.msra.mxu1 %v11576_v26  ;;  %v11642_v26 = vld [vmem:[#allocation13 + $0x80] ss:$8 sps:$4 sm:$0xff]  }
 0x47d   :  { %7708 = vmatprep.subr.bf16.mxu1 %v11581_v30  ;;  %v11647_v30 = vld [vmem:[#allocation13 + $0x94] ss:$8 sps:$4 sm:$0xff]  }
 0x480   :  { %7709 = vmatpush1.bf16.msra.mxu1 %v11579_v24  ;;  %v11645_v24 = vld [vmem:[#allocation13 + $0x90] ss:$8 sps:$4 sm:$0xff]  }
 0x481   :  { %7710 = vmatprep.subr.bf16.mxu1 %v11584_v60  ;;  %v11650_v60 = vld [vmem:[#allocation13 + $0xa4] ss:$8 sps:$4 sm:$0xff]  }
 0x484   :  { %7711 = vmatpush1.bf16.msra.mxu1 %v11582_v23  ;;  %v11648_v23 = vld [vmem:[#allocation13 + $0xa0] ss:$8 sps:$4 sm:$0xff]  }
 0x485   :  { %7712 = vmatprep.subr.bf16.mxu1 %v11587_v0  ;;  %v11653_v0 = vld [vmem:[#allocation13 + $0xb4] ss:$8 sps:$4 sm:$0xff]  }
 0x487   :  { %v10027_v35 = vpop.f32.mrb[64].mxu0 }
 0x488   :  { %v10028_v53 = vpop.f32.mrb[65].mxu0  ;;  %7713 = vmatpush1.bf16.msra.mxu1 %v11585_v39  ;;  %v11651_v39 = vld [vmem:[#allocation13 + $0xb0] ss:$8 sps:$4 sm:$0xff]  }
 0x489   :  { %v10029_v37 = vadd.f32 %v10028_v53, %v10027_v35  ;;  %v10030_v38 = vpop.f32.mrb[66].mxu0  ;;  %7714 = vmatprep.subr.bf16.mxu1 %v11590_v32  ;;  %v11656_v32 = vld [vmem:[#allocation13 + $0xc4] ss:$8 sps:$4 sm:$0xff]   ;;  %v11654_v35 = vld [vmem:[#allocation13 + $0xc0] ss:$8 sps:$4 sm:$0xff]  }
 0x48a   :  { %v10031_v34 = vpop.f32.mrb[67].mxu0  ;;  %v11659_v53 = vld [vmem:[#allocation13 + $0xd4] ss:$8 sps:$4 sm:$0xff]  }
 0x48b   :  { %v8083_v40 = vadd.f32 %v10029_v37, %v8043_v59 }
 0x48c   :  { %7715 = vmatpush1.bf16.msra.mxu1 %v11588_v33  ;;  %v11657_v33 = vld [vmem:[#allocation13 + $0xd0] ss:$8 sps:$4 sm:$0xff]  }
 0x48d   :  { %7716 = vmatprep.subr.bf16.mxu1 %v11593_v29 }
 0x490   :  { %7717 = vmatpush1.bf16.msra.mxu1 %v11591_v44 }
 0x491   :  { %7727 = vmatprep.subr.bf16.mxu1 %v11596_v45 }
 0x493   :  { %7719 = vmatmul.mubr.bf16.vlgmr.msra.gmra.mrb[16].mxu1 %v12344_v63  ;;  %v11609_v63 = vld [vmem:[#allocation11 + $0x1278] ss:$12 sps:$4 sm:$0xff]  }
 0x494   :  { %7728 = vmatpush1.bf16.msra.mxu1 %v11594_v46  ;;  %7759 = vmatprep.mubr.bf16.mxu1 %v11963_v51  ;;  %v11662_v46 = vld [vmem:[#allocation13 + $0xe4] ss:$8 sps:$4 sm:$0xff]  }
 0x495   :  { %7729 = vmatprep.subr.bf16.mxu1 %v11599_v47 }
 0x498   :  { %7730 = vmatpush1.bf16.msra.mxu1 %v11597_v36  ;;  %v11660_v36 = vld [vmem:[#allocation13 + $0xe0] ss:$8 sps:$4 sm:$0xff]  }
 0x499   :  { %7731 = vmatprep.subr.bf16.mxu1 %v11602_v15 }
 0x49c   :  { %7732 = vmatpush1.bf16.msra.mxu1 %v11600_v52 }
 0x49d   :  { %7733 = vmatprep.subr.bf16.mxu1 %v11605_v62 }
 0x4a0   :  { %7734 = vmatpush1.bf16.msra.mxu1 %v11603_v27 }
 0x4a1   :  { %7735 = vmatprep.subr.bf16.mxu1 %v11608_v48  ;;  %v11665_v48 = vld [vmem:[#allocation13 + $0xf4] ss:$8 sps:$4 sm:$0xff]  }
 0x4a4   :  { %7736 = vmatpush1.bf16.msra.mxu1 %v11606_v55  ;;  %v11663_v55 = vld [vmem:[#allocation13 + $0xf0] ss:$8 sps:$4 sm:$0xff]  }
 0x4a5   :  { %7737 = vmatprep.subr.bf16.mxu1 %v11611_v57  ;;  %v11668_v57 = vld [vmem:[#allocation13 + $0x104] ss:$8 sps:$4 sm:$0xff]  }
 0x4a7   :  { %v10049_v58 = vpop.f32.mrb[68].mxu0 }
 0x4a8   :  { %v10050_v61 = vpop.f32.mrb[69].mxu0  ;;  %7738 = vmatpush1.bf16.msra.mxu1 %v11609_v63 }
 0x4a9   :  { %v10051_v1 = vadd.f32 %v10050_v61, %v10049_v58  ;;  %v10052_v25 = vpop.f32.mrb[70].mxu0  ;;  %7739 = vmatprep.subr.bf16.mxu1 %v11614_v43 }
 0x4aa   :  { %v10053_v5 = vpop.f32.mrb[71].mxu0  ;;  %v4026_v25 = vsub.s32 1, %v12294_v41 }
 0x4ab   :  { %v8123_v54 = vadd.f32 %v10051_v1, %v8083_v40  ;;  %v4022_v1 = vsub.s32 0, %v12294_v41 }
 0x4ac   :  { %7740 = vmatpush1.bf16.msra.mxu1 %v11612_v21 }
 0x4ad   :  { %7741 = vmatprep.subr.bf16.mxu1 %v11617_v2  ;;  %v11690_v2 = vld [vmem:[#allocation14] ss:$2 sm:$0x7] }
 0x4ae   :  { %v4023_v5 = vrot.slane %v11690_v2, %v4022_v1 }
 0x4b0   :  { %7742 = vmatpush1.bf16.msra.mxu1 %v11615_v6 }
 0x4b3   :  { %7760 = vmatmul.mubr.bf16.vlgmr.msra.gmra.mrb[16].mxu1 %v12351_v42  ;;  %v11641_v42 = vld [vmem:[#allocation13 + $0x74] ss:$8 sps:$4 sm:$0xff]  }
 0x4b4   :  { %8615 = vmatprep.subr.bf16.mxu0 %v11641_v42  ;;  %v11674_v42 = vld [vmem:[#allocation13 + $0x124] ss:$8 sps:$4 sm:$0xff]  }
 0x4b5   :  { %8616 = vmatpush1.bf16.msra.mxu0 %v11639_v16  ;;  %v11675_v16 = vld [vmem:[#allocation13 + $0x130] ss:$8 sps:$4 sm:$0xff]  }
 0x4b6   :  { %8617 = vmatprep.subr.bf16.mxu0 %v11644_v19  ;;  %v11683_v19 = vld [vmem:[#allocation13 + $0x154] ss:$8 sps:$4 sm:$0xff]  }
 0x4b9   :  { %8618 = vmatpush1.bf16.msra.mxu0 %v11642_v26  ;;  %v11689_v26 = vld [vmem:[#allocation13 + $0x174] ss:$8 sps:$4 sm:$0xff]  }
 0x4ba   :  { %8619 = vmatprep.subr.bf16.mxu0 %v11647_v30 }
 0x4bd   :  { %8620 = vmatpush1.bf16.msra.mxu0 %v11645_v24  ;;  %v11687_v24 = vld [vmem:[#allocation13 + $0x170] ss:$8 sps:$4 sm:$0xff]  }
 0x4be   :  { %8621 = vmatprep.subr.bf16.mxu0 %v11650_v60 }
 0x4c1   :  { %8622 = vmatpush1.bf16.msra.mxu0 %v11648_v23 }
 0x4c2   :  { %8623 = vmatprep.subr.bf16.mxu0 %v11653_v0 }
 0x4c5   :  { %8624 = vmatpush1.bf16.msra.mxu0 %v11651_v39 }
 0x4c6   :  { %8625 = vmatprep.subr.bf16.mxu0 %v11656_v32 }
 0x4c7   :  { %v10071_v14 = vpop.f32.mrb[72].mxu0 }
 0x4c8   :  { %v10072_v59 = vpop.f32.mrb[73].mxu0 }
 0x4c9   :  { %v10073_v17 = vadd.f32 %v10072_v59, %v10071_v14  ;;  %v10074_v18 = vpop.f32.mrb[74].mxu0  ;;  %8626 = vmatpush1.bf16.msra.mxu0 %v11654_v35  ;;  %v11672_v14 = vld [vmem:[#allocation13 + $0x120] ss:$8 sps:$4 sm:$0xff]   ;;  %v11677_v59 = vld [vmem:[#allocation13 + $0x134] ss:$8 sps:$4 sm:$0xff]  }
 0x4ca   :  { %v10075_v49 = vpop.f32.mrb[75].mxu0  ;;  %8627 = vmatprep.subr.bf16.mxu0 %v11659_v53  ;;  %v11678_v18 = vld [vmem:[#allocation13 + $0x140] ss:$8 sps:$4 sm:$0xff]  }
 0x4cb   :  { %v8163_v20 = vadd.f32 %v10073_v17, %v8123_v54  ;;  %v4027_v54 = vrot.slane %v11690_v2, %v4026_v25  ;;  %v11680_v17 = vld [vmem:[#allocation13 + $0x144] ss:$8 sps:$4 sm:$0xff]   ;;  %v11681_v49 = vld [vmem:[#allocation13 + $0x150] ss:$8 sps:$4 sm:$0xff]  }
 0x4cd   :  { %8628 = vmatpush1.bf16.msra.mxu0 %v11657_v33 }
 0x4ce   :  { %8629 = vmatprep.subr.bf16.mxu0 %v11662_v46 }
 0x4d1   :  { %8630 = vmatpush1.bf16.msra.mxu0 %v11660_v36 }
 0x4d2   :  { %8631 = vmatprep.subr.bf16.mxu0 %v11665_v48 }
 0x4d5   :  { %8632 = vmatpush1.bf16.msra.mxu0 %v11663_v55 }
 0x4d6   :  { %8642 = vmatprep.subr.bf16.mxu0 %v11668_v57 }
 0x4e7   :  { %v10093_v37 = vpop.f32.mrb[76].mxu0 }
 0x4e8   :  { %v10094_v38 = vpop.f32.mrb[77].mxu0 }
 0x4e9   :  { %v10095_v29 = vadd.f32 %v10094_v38, %v10093_v37  ;;  %v10096_v34 = vpop.f32.mrb[78].mxu0 }
 0x4ea   :  { %v10097_v40 = vpop.f32.mrb[79].mxu0 }
 0x4eb   :  { %v8203_v44 = vadd.f32 %v10095_v29, %v8163_v20  ;;  %v11686_v20 = vld [vmem:[#allocation13 + $0x164] ss:$8 sps:$4 sm:$0xff]  }
 0x507   :  { %v10115_v45 = vpop.f32.mrb[80].mxu0 }
 0x508   :  { %v10116_v47 = vpop.f32.mrb[81].mxu0 }
 0x509   :  { %v10117_v15 = vadd.f32 %v10116_v47, %v10115_v45  ;;  %v10118_v52 = vpop.f32.mrb[82].mxu0 }
 0x50a   :  { %v10119_v62 = vpop.f32.mrb[83].mxu0 }
 0x50b   :  { %v8243_v27 = vadd.f32 %v10117_v15, %v8203_v44 }
 0x527   :  { %v8282_v63 = vpop.f32.mrb[84].mxu0 }
 0x528   :  { %v8283_v43 = vadd.f32 %v8282_v63, %v8243_v27  ;;  %v10148_v58 = vpop.f32.mrb[85].mxu0 }
 0x529   :  { %v8285_v61 = vpop.f32.mrb[86].mxu0 }
 0x52a   :  { %v10149_v21 = vpop.f32.mrb[87].mxu0  ;;  %v8293_v30 = vmul.f32 0.2, %v8283_v43  ;;  %vm8290_vm12 = vcmp.ge.f32.partialorder %v8283_v43, 0.0 }
 0x52c   :  { %v8296_v60 = vsel %vm8290_vm12, %v8283_v43, %v8293_v30 }
 0x52d   :  { %v8299_v23 = vpack.c.bf16 %v8296_v60, %v8296_v60 }
 0x586   :  { %v7761_v6 = vpop.f32.mrb[16].mxu1 }
 0x587   :  { %v10150_v4 = vadd.f32 %v7761_v6, %v4023_v5  ;;  %v7763_v31 = vpop.f32.mrb[17].mxu1 }
 0x588   :  { %v10151_v7 = vadd.f32 %v7763_v31, %v4027_v54  ;;  %v7765_v8 = vpop.f32.mrb[18].mxu1 }
 0x589   :  { %vm8288_vm10 = vcmp.ge.f32.partialorder %v10150_v4, 0.0  ;;  %v8291_v10 = vmul.f32 0.2, %v10150_v4  ;;  %v7766_v3 = vpop.f32.mrb[19].mxu1 }
 0x58a   :  { %vm8289_vm11 = vcmp.ge.f32.partialorder %v10151_v7, 0.0  ;;  %v8292_v22 = vmul.f32 0.2, %v10151_v7 }
 0x58b   :  { %v8294_v50 = vsel %vm8288_vm10, %v10150_v4, %v8291_v10 }
 0x58c   :  { %v8295_v11 = vsel %vm8289_vm11, %v10151_v7, %v8292_v22  ;;  %v8297_v9 = vpack.c.bf16 %v8294_v50, %v8294_v50 }
 0x58d   :  { %v8298_v56 = vpack.c.bf16 %v8295_v11, %v8295_v11 }
 0x58f   :  { %8633 = vmatprep.mubr.bf16.mxu0 %v8298_v56 }
 0x590   :  { %8634 = vmatmul.mubr.bf16.vlgmr.msra.gmra.mrb[88].mxu0 %v8297_v9 }
 0x591   :  { %8643 = vmatpush1.bf16.msra.mxu0 %v11666_v28  ;;  %8674 = vmatprep.mubr.bf16.mxu0 %v11963_v51  ;;  %v11684_v51 = vld [vmem:[#allocation13 + $0x160] ss:$8 sps:$4 sm:$0xff]  }
 0x592   :  { %8644 = vmatprep.subr.bf16.mxu0 %v11671_v12 }
 0x595   :  { %8645 = vmatpush1.bf16.msra.mxu0 %v11669_v13 }
 0x596   :  { %8646 = vmatprep.subr.bf16.mxu0 %v11674_v42 }
 0x599   :  { %8647 = vmatpush1.bf16.msra.mxu0 %v11672_v14 }
 0x59a   :  { %8648 = vmatprep.subr.bf16.mxu0 %v11677_v59 }
 0x59d   :  { %8649 = vmatpush1.bf16.msra.mxu0 %v11675_v16 }
 0x59e   :  { %8650 = vmatprep.subr.bf16.mxu0 %v11680_v17 }
 0x5a1   :  { %8651 = vmatpush1.bf16.msra.mxu0 %v11678_v18 }
 0x5a2   :  { %8652 = vmatprep.subr.bf16.mxu0 %v11683_v19 }
 0x5a5   :  { %8653 = vmatpush1.bf16.msra.mxu0 %v11681_v49 }
 0x5a6   :  { %8654 = vmatprep.subr.bf16.mxu0 %v11686_v20 }
 0x5a9   :  { %8655 = vmatpush1.bf16.msra.mxu0 %v11684_v51 }
 0x5aa   :  { %8656 = vmatprep.subr.bf16.mxu0 %v11689_v26 }
 0x5ad   :  { %8657 = vmatpush1.bf16.msra.mxu0 %v11687_v24 }
 0x5b0   :  { %8675 = vmatmul.mubr.bf16.vlgmr.msra.gmra.mrb[88].mxu0 %v8299_v23 }
 0x5b1   :  { %11878 = shalt.err (!%p11875_p12)
}
 0x5b2   :  { %s11879_s24 = scalar_lea.hbm %s12416_s8, 256 }
 0x5b3   :  { %p11880_p13 = scmp.ne.s32.totalorder %s12416_s8, %s11879_s24  ;;  %p11883_p0 = scmp.lt.u32.totalorder %s11879_s24, %s12416_s8 }
 0x5b5   :  { %p11885_p1 = pnand %p11883_p0, %p11880_p13 }
 0x5b7   :  { %11888 = shalt.err (!%p11885_p1)
}
 0x5b8   :  { %8748 = dma.vmem_to_hbm [thread:$0]  %s8746_s18, 256, %s12416_s8, [#allocation4]   ;;  %v8349_v0 = vld [vmem:[#allocation14 + $0x1] ss:$2 sm:$0x3] }
 0x5b9   :  { %v8354_v39 = vrot.slane %v8349_v0, %v4022_v1  ;;  %v8358_v32 = vrot.slane %v8349_v0, %v4026_v25  ;;  %s11965_s4 = smov [#allocation17]  }
 0x5ba   :  { %s8755_s28 = sshll.u32 %s11965_s4, 4  ;;  %s8756_s28 = int_to_ptr.vmem [resolvable:$true] %s8755_s28 }
 0x5bb   :  { %s11889_s8 = scalar_lea.vmem %s8756_s28, 256  ;;  %p11894_p3 = scmp.lt.s32.totalorder %s8756_s28, %s8756_s28 }
 0x5bc   :  { %p11890_p2 = scmp.ne.s32.totalorder %s8756_s28, %s11889_s8  ;;  %p11895_p4 = scmp.lt.s32.totalorder %s11889_s8, %s11889_s8 }
 0x5be   :  { %p11896_p5 = por %p11895_p4, %p11894_p3 }
 0x5c0   :  { %p11897_p6 = pnand %p11896_p5, %p11890_p2 }
 0x683   :  { %v8676_v35 = vpop.f32.mrb[88].mxu0 }
 0x684   :  { %v10152_v53 = vadd.f32 %v8676_v35, %v8354_v39  ;;  %v8678_v33 = vpop.f32.mrb[89].mxu0 }
 0x685   :  { %v10153_v37 = vadd.f32 %v8678_v33, %v8358_v32  ;;  %v8680_v38 = vpop.f32.mrb[90].mxu0 }
 0x686   :  { %vm8683_vm13 = vcmp.ge.f32.partialorder %v10152_v53, 0.0  ;;  %v8685_v29 = vmul.f32 0.02, %v10152_v53  ;;  %v8681_v34 = vpop.f32.mrb[91].mxu0 }
 0x687   :  { %vm8684_vm14 = vcmp.ge.f32.partialorder %v10153_v37, 0.0  ;;  %v8686_v40 = vmul.f32 0.02, %v10153_v37 }
 0x688   :  { %v8687_v44 = vsel %vm8683_vm13, %v10152_v53, %v8685_v29 }
 0x689   :  { %v8701_v45 = vrot.slane %v8687_v44, 4  ;;  %v8713_v46 = vmul.f32 %v8687_v44, %v8687_v44  ;;  %8689 = vst [vmem:[#allocation17] sm:$0xff] %v8687_v44  ;;  %v8688_v47 = vsel %vm8684_vm14, %v10153_v37, %v8686_v40 }
 0x68a   :  { %v8707_v36 = vrot.slane %v8688_v47, 4  ;;  %v8714_v15 = vmul.f32 %v8688_v47, %v8688_v47  ;;  %8690 = vst [vmem:[#allocation17 + $0x8] sm:$0xff] %v8688_v47 }
 0x68b   :  { %v8702_v52 = vadd.f32 %v8701_v45, %v8687_v44  ;;  %v8715_v62 = vrot.slane %v8713_v46, 4 }
 0x68c   :  { %11900 = shalt.err (!%p11897_p6)
}
 0x68d   :  { %s11901_s11 = scalar_lea.hbm %s12417_s9, 256 }
 0x68e   :  { %p11902_p7 = scmp.ne.s32.totalorder %s12417_s9, %s11901_s11  ;;  %p11905_p8 = scmp.lt.u32.totalorder %s11901_s11, %s12417_s9 }
 0x690   :  { %p11907_p9 = pnand %p11905_p8, %p11902_p7 }
 0x692   :  { %11910 = shalt.err (!%p11907_p9)
}
 0x693   :  { %8758 = dma.vmem_to_hbm [thread:$0]  %s8756_s28, 256, %s12417_s9, [#allocation18]   ;;  %v8708_v27 = vadd.f32 %v8707_v36, %v8688_v47  ;;  %v8721_v48 = vrot.slane %v8714_v15, 4  ;;  %v8703_v55 = vrot.slane %v8702_v52, 2  ;;  %v8716_v57 = vadd.f32 %v8715_v62, %v8713_v46 }
 0x694   :  { %vm8728_vm15 = vcmp.eq.s32.totalorder %v12294_v41, 1  ;;  %vm8727_vm0 = vcmp.eq.s32.totalorder %v12294_v41, 0  ;;  %s11966_s9 = smov [#allocation19]  }
 0x695   :  { %v8709_v63 = vrot.slane %v8708_v27, 2  ;;  %v8722_v43 = vadd.f32 %v8721_v48, %v8714_v15  ;;  %v8704_v58 = vadd.f32 %v8703_v55, %v8702_v52  ;;  %v8717_v61 = vrot.slane %v8716_v57, 2  ;;  %s8765_s20 = sshll.u32 %s11966_s9, 4  ;;  %s8766_s20 = int_to_ptr.vmem [resolvable:$true] %s8765_s20 }
 0x696   :  { %s11911_s2 = scalar_lea.vmem %s8766_s20, 256  ;;  %p11916_p11 = scmp.lt.s32.totalorder %s8766_s20, %s8766_s20 }
 0x697   :  { %v8710_v21 = vadd.f32 %v8709_v63, %v8708_v27  ;;  %v8723_v1 = vrot.slane %v8722_v43, 2  ;;  %v8718_v25 = vadd.f32 %v8717_v61, %v8716_v57  ;;  %v8705_v2 = vrot.slane %v8704_v58, 1  ;;  %p11912_p10 = scmp.ne.s32.totalorder %s8766_s20, %s11911_s2  ;;  %p11917_p12 = scmp.lt.s32.totalorder %s11911_s2, %s11911_s2 }
 0x699   :  { %v8724_v5 = vadd.f32 %v8723_v1, %v8722_v43  ;;  %v8711_v54 = vrot.slane %v8710_v21, 1  ;;  %v8719_v6 = vrot.slane %v8718_v25, 1  ;;  %v8706_v7 = vadd.f32 %v8705_v2, %v8704_v58  ;;  %p11918_p13 = por %p11917_p12, %p11916_p11 }
 0x69b   :  { %v8725_v4 = vrot.slane %v8724_v5, 1  ;;  %v8720_v31 = vadd.f32 %v8719_v6, %v8718_v25  ;;  %v8712_v10 = vadd.f32 %v8711_v54, %v8710_v21  ;;  %p11919_p0 = pnand %p11918_p13, %p11912_p10 }
 0x69d   :  { %v8726_v8 = vadd.f32 %v8725_v4, %v8724_v5  ;;  %v8731_v3 = vsel %vm8728_vm15, %v8720_v31, 0.0 }
 0x69e   :  { %v8735_v50 = vsel %vm8727_vm0, %v8706_v7, %v8731_v3 }
 0x69f   :  { %v8732_v22 = vsel %vm8728_vm15, %v8726_v8, 0.0  ;;  %8737 = vst [vmem:[#allocation19] sm:$0xff] %v8735_v50 }
 0x6a0   :  { %v8736_v11 = vsel %vm8727_vm0, %v8712_v10, %v8732_v22 }
 0x6a1   :  { %8738 = vst [vmem:[#allocation19 + $0x8] sm:$0xff] %v8736_v11 }
 0x6a2   :  { %11922 = shalt.err (!%p11919_p0)
}
 0x6a3   :  { %s11923_s5 = scalar_lea.hbm %s12418_s10, 256 }
 0x6a4   :  { %p11924_p1 = scmp.ne.s32.totalorder %s12418_s10, %s11923_s5  ;;  %p11927_p2 = scmp.lt.u32.totalorder %s11923_s5, %s12418_s10 }
 0x6a6   :  { %p11929_p3 = pnand %p11927_p2, %p11924_p1 }
 0x6a8   :  { %11932 = shalt.err (!%p11929_p3)
}
 0x6a9   :  { %8768 = dma.vmem_to_hbm [thread:$0]  %s8766_s20, 256, %s12418_s10, [#allocation18]  }
 0x6aa   :  { %11943 = dma.done.wait [#allocation4], 256  }
 0x6ab   :  { %11944 = vsyncadd [#allocation4], 4294967040 }
 0x6ac   :  { %11945 = dma.done.wait [#allocation18], 512  }
 0x6ad   :  { %11946 = vsyncadd [#allocation18], 4294966784 }
 0x6ae   :  { %8778 = vsyncpa [#allocation3], 1 }
 0x6af   :  { %8779 = vsyncpa [#allocation6], 1 }
 0x6b0   :  { %8780 = vsyncpa [#allocation9], 1 }
 0x6b1   :  { %8781 = vsyncpa [#allocation12], 1 }
 0x6b2   :  { %8782 = vsyncpa [#allocation15], 1 }
 0x6b3   :  { %8783 = vsyncpa [#allocation4], 1 }
 0x6b4   :  { %8784 = vsyncpa [#allocation18], 1 }

</bundles_post_ra>
